<compile_context>
chip_gen: v6e
topology: v6e:2x2x1
jax: 0.10.0
libtpu: 0.0.40
codegen_flags: <defaults>
</compile_context>

<pallas_src>
import math
from functools import partial

import jax
import jax.numpy as jnp
from jax.experimental import pallas as pl
from jax.experimental.pallas import tpu as pltpu


# ----------------------------------------------------------------------------
# Fused kernel: all encoder layers + mean-pool + fc_indices
# ----------------------------------------------------------------------------
def fused_forward_kernel(num_heads,
                         x_ref,       # (S, B, E)    f32   activations (S-leading layout)
                         wqkv_ref,    # (L, E, 3E)   bf16  in_proj weight, pre-T, Wq pre-scaled
                         wo_ref,      # (L, E, E)    bf16  out_proj weight, pre-transposed
                         w1_ref,      # (L, E, F)    bf16  linear1 weight, pre-transposed
                         w2_ref,      # (L, F, E)    bf16  linear2 weight, pre-transposed
                         vec_ref,     # (L, 8, Kpad) f32   lane-aligned packed biases / LN params
                         fcw_ref,     # (E, O)       bf16  fc_indices weight, pre-transposed
                         fcb_ref,     # (1, O)       f32
                         o_ref):      # (B, O)       f32
    S, B, E = x_ref.shape
    L = wqkv_ref.shape[0]
    F = w1_ref.shape[2]
    H = num_heads
    d = E // H
    BS = S * B
    eps = 1e-5
    bf16 = jnp.bfloat16
    f32 = jnp.float32

    # Rows ordered s-major: row (s*B + b).
    x = x_ref[...].reshape(BS, E)

    for layer in range(L):
        # Packed-vector layout: one vector per sublane row, every row starts
        # at lane 0 (lane-aligned unpack, no XLU lane-rotates).
        vec = vec_ref[layer]                                    # (8, Kpad) f32
        bqkv = vec[0:1, :3 * E]   # Wq bias already scaled by 1/sqrt(d)
        bo   = vec[1:2, :E]
        n1w  = vec[2:3, :E]
        n1b  = vec[3:4, :E]
        b1   = vec[4:5, :F]
        b2   = vec[5:6, :E]
        n2w  = vec[6:7, :E]
        n2b  = vec[7:8, :E]

        wqkv = wqkv_ref[layer]                                  # (E, 3E) bf16
        wo_l = wo_ref[layer]                                    # (E, E)  bf16
        w1 = w1_ref[layer]                                      # (E, F)  bf16
        w2 = w2_ref[layer]                                      # (F, E)  bf16

        # ---- fused QKV projection (1/sqrt(d) folded into Wq / bq) ----------
        qkv = jnp.dot(x.astype(bf16), wqkv,
                      preferred_element_type=f32) + bqkv        # (BS, 3E) f32

        # ---- head-batched self-attention (mixes over B, batched over S*H) --
        def heads(t):                     # (BS, E) -> (S*H, B, d)
            t = t.reshape(S, B, H, d)
            t = jnp.transpose(t, (0, 2, 1, 3))                  # (S, H, B, d)
            return t.reshape(S * H, B, d)

        q = heads(qkv[:, :E]).astype(bf16)
        k = heads(qkv[:, E:2 * E]).astype(bf16)
        v = heads(qkv[:, 2 * E:]).astype(bf16)

        s = jnp.einsum('gqd,gkd->gqk', q, k,
                       preferred_element_type=f32)              # (S*H, B, B)

        if B == 2:
            # softmax over 2 keys == sigmoid(s0 - s1); exp saturation degrades
            # gracefully (inf -> reciprocal ~0), fine for inference.
            diff = s[:, :, 0:1] - s[:, :, 1:2]                  # (S*H, B, 1)
            p0 = pl.reciprocal(1.0 + jnp.exp(-diff), approx=True)
            p = jnp.concatenate([p0, 1.0 - p0], axis=-1)        # (S*H, B, 2)
        else:
            s = s - jnp.max(s, axis=-1, keepdims=True)
            e = jnp.exp(s)
            p = e * pl.reciprocal(jnp.sum(e, axis=-1, keepdims=True), approx=True)

        ctx = jnp.einsum('gqk,gkd->gqd', p.astype(bf16), v,
                         preferred_element_type=f32)            # (S*H, B, d)
        ctx = jnp.transpose(ctx.reshape(S, H, B, d), (0, 2, 1, 3)).reshape(BS, E)

        # Single output-projection GEMM over all heads.
        attn = jnp.dot(ctx.astype(bf16), wo_l,
                       preferred_element_type=f32) + bo         # (BS, E)

        # ---- residual + LayerNorm1 (post-norm, f32) -------------------------
        y = x + attn
        mu = jnp.mean(y, axis=-1, keepdims=True)
        var = jnp.mean(jnp.square(y - mu), axis=-1, keepdims=True)
        y = (y - mu) * jax.lax.rsqrt(var + eps) * n1w + n1b

        # ---- feed-forward (ReLU) --------------------------------------------
        hid = jnp.maximum(
            jnp.dot(y.astype(bf16), w1, preferred_element_type=f32) + b1, 0.0)
        f = jnp.dot(hid.astype(bf16), w2, preferred_element_type=f32) + b2

        # ---- residual + LayerNorm2 -------------------------------------------
        z = y + f
        mu2 = jnp.mean(z, axis=-1, keepdims=True)
        var2 = jnp.mean(jnp.square(z - mu2), axis=-1, keepdims=True)
        x = (z - mu2) * jax.lax.rsqrt(var2 + eps) * n2w + n2b

    # ---- mean over S (PyTorch mean(dim=1)) + fc_indices ----------------------
    pooled = jnp.mean(x.reshape(S, B, E), axis=0)               # (B, E)
    o_ref[...] = (jnp.dot(pooled.astype(bf16), fcw_ref[...],
                          preferred_element_type=f32)
                  + fcb_ref[...]).astype(o_ref.dtype)


# ----------------------------------------------------------------------------
# Wrapper: weight repacking + single pallas_call
# ----------------------------------------------------------------------------
def artikel_transformer_forward(tokens, params, num_heads):
    B, S = tokens.shape
    E = params['embedding'].shape[1]
    H = num_heads
    d = E // H
    inv_sqrt_d = 1.0 / math.sqrt(d)

    # Embedding gather with the (B,S)->(S,B) transpose folded into the gather
    # (only int32 token ids are transposed), plus positional-embedding add.
    x = jnp.take(params['embedding'], tokens.T, axis=0)                  # (S, B, E)
    x = (x + params['pos_embedding'][0, :S][:, None, :]).astype(jnp.float32)

    layers = params['layers']
    F = layers[0]['w1'].shape[0]

    # Matmul weights: pre-transposed to (in, out), bf16 operands (f32 accumulate
    # in kernel), stacked over layers; Wq columns pre-scaled by 1/sqrt(d).
    def qkv_weight(p):
        w = p['wqkv'].T                                                  # (E, 3E)
        return w.at[:, :E].multiply(inv_sqrt_d)

    wqkv = jnp.stack([qkv_weight(p) for p in layers]).astype(jnp.bfloat16)   # (L,E,3E)
    wo = jnp.stack([p['wo'].T for p in layers]).astype(jnp.bfloat16)         # (L,E,E)
    w1 = jnp.stack([p['w1'].T for p in layers]).astype(jnp.bfloat16)         # (L,E,F)
    w2 = jnp.stack([p['w2'].T for p in layers]).astype(jnp.bfloat16)         # (L,F,E)

    # Lane-aligned packing: one (1, .) vector per sublane row, padded to Kpad.
    kpad = ((max(3 * E, F) + 127) // 128) * 128

    def pack_vec(p):
        bqkv = p['bqkv'].at[:, :E].multiply(inv_sqrt_d)        # q bias pre-scaled
        segs = [bqkv, p['bo'], p['n1w'], p['n1b'], p['b1'], p['b2'], p['n2w'], p['n2b']]
        rows = [jnp.pad(seg, ((0, 0), (0, kpad - seg.shape[1]))) for seg in segs]
        return jnp.concatenate(rows, axis=0)                   # (8, Kpad)

    vec = jnp.stack([pack_vec(p) for p in layers]).astype(jnp.float32)       # (L,8,Kpad)

    fcw = params['fc_w'].T.astype(jnp.bfloat16)                              # (E, O)
    fcb = params['fc_b'].astype(jnp.float32)                                 # (1, O)
    O = fcw.shape[1]

    def full(arr):
        nd = arr.ndim
        return pl.BlockSpec(arr.shape, lambda i, _nd=nd: (0,) * _nd)

    return pl.pallas_call(
        partial(fused_forward_kernel, num_heads),
        out_shape=jax.ShapeDtypeStruct((B, O), jnp.float32),
        grid=(1,),
        in_specs=[full(x), full(wqkv), full(wo), full(w1), full(w2),
                  full(vec), full(fcw), full(fcb)],
        out_specs=pl.BlockSpec((B, O), lambda i: (0, 0)),
        compiler_params=pltpu.CompilerParams(
            dimension_semantics=("arbitrary",),
            vmem_limit_bytes=32 * 1024 * 1024),
    )(x, wqkv, wo, w1, w2, vec, fcw, fcb)


# ----------------------------------------------------------------------------
# Deterministic synthetic parameter init (shapes from the module's __init__)
# ----------------------------------------------------------------------------
def init_params(key, vocab_size, embedding_dim, num_heads, hidden_dim, num_layers):
    E, F = embedding_dim, hidden_dim
    keys = jax.random.split(key, 4)
    emb = 0.1 * jax.random.normal(keys[0], (vocab_size, E), jnp.float32)
    emb = emb.at[0].set(0.0)                         # padding_idx=0 row is zero
    pos = 0.02 * jax.random.normal(keys[1], (1, 100, E), jnp.float32)
    fc_w = 0.1 * jax.random.normal(keys[2], (4, E), jnp.float32)
    fc_b = 0.01 * jax.random.normal(keys[3], (1, 4), jnp.float32)
    layers = []
    for l in range(num_layers):
        lk = jax.random.split(jax.random.fold_in(keys[3], l + 1), 8)
        layers.append(dict(
            wqkv=0.1 * jax.random.normal(lk[0], (3 * E, E), jnp.float32),
            bqkv=0.01 * jax.random.normal(lk[1], (1, 3 * E), jnp.float32),
            wo=0.1 * jax.random.normal(lk[2], (E, E), jnp.float32),
            bo=0.01 * jax.random.normal(lk[3], (1, E), jnp.float32),
            n1w=jnp.ones((1, E), jnp.float32),
            n1b=jnp.zeros((1, E), jnp.float32),
            w1=0.1 * jax.random.normal(lk[4], (F, E), jnp.float32),
            b1=0.01 * jax.random.normal(lk[5], (1, F), jnp.float32),
            w2=0.1 * jax.random.normal(lk[6], (E, F), jnp.float32),
            b2=0.01 * jax.random.normal(lk[7], (1, E), jnp.float32),
            n2w=jnp.ones((1, E), jnp.float32),
            n2b=jnp.zeros((1, E), jnp.float32),
        ))
    return dict(embedding=emb, pos_embedding=pos, fc_w=fc_w, fc_b=fc_b, layers=layers)


if __name__ == "__main__":
    vocab_size, embedding_dim, num_heads, hidden_dim, num_layers = 50, 32, 4, 64, 2
    B, S = 2, 8

    key = jax.random.PRNGKey(0)
    pkey, xkey = jax.random.split(key)
    params = init_params(pkey, vocab_size, embedding_dim, num_heads,
                         hidden_dim, num_layers)
    tokens = jax.random.randint(xkey, (B, S), 0, vocab_size, dtype=jnp.int32)

    out = artikel_transformer_forward(tokens, params, num_heads)
    out = jax.block_until_ready(out)
    assert out.shape == (B, 4) and out.dtype == jnp.float32
    assert bool(jnp.all(jnp.isfinite(out)))
    print("KERNEL_OK")
</pallas_src>

<mosaic_0001>
module attributes {stable_mosaic.version = 11 : i64} {
  func.func @fused_forward_kernel(%arg0: i32, %arg1: memref<8x2x32xf32, #tpu.memory_space<vmem>>, %arg2: memref<2x32x96xbf16, #tpu.memory_space<vmem>>, %arg3: memref<2x32x32xbf16, #tpu.memory_space<vmem>>, %arg4: memref<2x32x64xbf16, #tpu.memory_space<vmem>>, %arg5: memref<2x64x32xbf16, #tpu.memory_space<vmem>>, %arg6: memref<2x8x128xf32, #tpu.memory_space<vmem>>, %arg7: memref<32x4xbf16, #tpu.memory_space<vmem>>, %arg8: memref<1x4xf32, #tpu.memory_space<vmem>>, %arg9: memref<2x4xf32, #tpu.memory_space<vmem>>) attributes {dimension_semantics = [#tpu.dimension_semantics<arbitrary>], iteration_bounds = array<i64: 1>, scalar_prefetch = 0 : i64, scratch_operands = 0 : i64, tpu.core_type = #tpu.core_type<tc>, window_params = [{pipeline_mode = #tpu.pipeline_mode<synchronous>, transform_indices = @transform_0, window_bounds = array<i64: 8, 2, 32>}, {pipeline_mode = #tpu.pipeline_mode<synchronous>, transform_indices = @transform_1, window_bounds = array<i64: 2, 32, 96>}, {pipeline_mode = #tpu.pipeline_mode<synchronous>, transform_indices = @transform_2, window_bounds = array<i64: 2, 32, 32>}, {pipeline_mode = #tpu.pipeline_mode<synchronous>, transform_indices = @transform_3, window_bounds = array<i64: 2, 32, 64>}, {pipeline_mode = #tpu.pipeline_mode<synchronous>, transform_indices = @transform_4, window_bounds = array<i64: 2, 64, 32>}, {pipeline_mode = #tpu.pipeline_mode<synchronous>, transform_indices = @transform_5, window_bounds = array<i64: 2, 8, 128>}, {pipeline_mode = #tpu.pipeline_mode<synchronous>, transform_indices = @transform_6, window_bounds = array<i64: 32, 4>}, {pipeline_mode = #tpu.pipeline_mode<synchronous>, transform_indices = @transform_7, window_bounds = array<i64: 1, 4>}, {pipeline_mode = #tpu.pipeline_mode<synchronous>, transform_indices = @transform_8, window_bounds = array<i64: 2, 4>}]} {
    %c0 = arith.constant 0 : index
    %c0_0 = arith.constant 0 : index
    %c0_1 = arith.constant 0 : index
    %0 = vector.load %arg1[%c0, %c0_0, %c0_1] : memref<8x2x32xf32, #tpu.memory_space<vmem>>, vector<8x2x32xf32>
    %1 = vector.shape_cast %0 : vector<8x2x32xf32> to vector<16x32xf32>
    %c0_2 = arith.constant 0 : index
    %c0_3 = arith.constant 0 : index
    %c0_4 = arith.constant 0 : index
    %2 = vector.load %arg6[%c0_2, %c0_3, %c0_4] : memref<2x8x128xf32, #tpu.memory_space<vmem>>, vector<1x8x128xf32>
    %3 = vector.shape_cast %2 : vector<1x8x128xf32> to vector<8x128xf32>
    %4 = vector.extract_strided_slice %3 {offsets = [0, 0], sizes = [1, 96], strides = [1, 1]} : vector<8x128xf32> to vector<1x96xf32>
    %5 = vector.extract_strided_slice %3 {offsets = [1, 0], sizes = [1, 32], strides = [1, 1]} : vector<8x128xf32> to vector<1x32xf32>
    %6 = vector.extract_strided_slice %3 {offsets = [2, 0], sizes = [1, 32], strides = [1, 1]} : vector<8x128xf32> to vector<1x32xf32>
    %7 = vector.extract_strided_slice %3 {offsets = [3, 0], sizes = [1, 32], strides = [1, 1]} : vector<8x128xf32> to vector<1x32xf32>
    %8 = vector.extract_strided_slice %3 {offsets = [4, 0], sizes = [1, 64], strides = [1, 1]} : vector<8x128xf32> to vector<1x64xf32>
    %9 = vector.extract_strided_slice %3 {offsets = [5, 0], sizes = [1, 32], strides = [1, 1]} : vector<8x128xf32> to vector<1x32xf32>
    %10 = vector.extract_strided_slice %3 {offsets = [6, 0], sizes = [1, 32], strides = [1, 1]} : vector<8x128xf32> to vector<1x32xf32>
    %11 = vector.extract_strided_slice %3 {offsets = [7, 0], sizes = [1, 32], strides = [1, 1]} : vector<8x128xf32> to vector<1x32xf32>
    %c0_5 = arith.constant 0 : index
    %c0_6 = arith.constant 0 : index
    %c0_7 = arith.constant 0 : index
    %12 = vector.load %arg2[%c0_5, %c0_6, %c0_7] : memref<2x32x96xbf16, #tpu.memory_space<vmem>>, vector<1x32x96xbf16>
    %13 = vector.shape_cast %12 : vector<1x32x96xbf16> to vector<32x96xbf16>
    %c0_8 = arith.constant 0 : index
    %c0_9 = arith.constant 0 : index
    %c0_10 = arith.constant 0 : index
    %14 = vector.load %arg3[%c0_8, %c0_9, %c0_10] : memref<2x32x32xbf16, #tpu.memory_space<vmem>>, vector<1x32x32xbf16>
    %15 = vector.shape_cast %14 : vector<1x32x32xbf16> to vector<32x32xbf16>
    %c0_11 = arith.constant 0 : index
    %c0_12 = arith.constant 0 : index
    %c0_13 = arith.constant 0 : index
    %16 = vector.load %arg4[%c0_11, %c0_12, %c0_13] : memref<2x32x64xbf16, #tpu.memory_space<vmem>>, vector<1x32x64xbf16>
    %17 = vector.shape_cast %16 : vector<1x32x64xbf16> to vector<32x64xbf16>
    %c0_14 = arith.constant 0 : index
    %c0_15 = arith.constant 0 : index
    %c0_16 = arith.constant 0 : index
    %18 = vector.load %arg5[%c0_14, %c0_15, %c0_16] : memref<2x64x32xbf16, #tpu.memory_space<vmem>>, vector<1x64x32xbf16>
    %19 = vector.shape_cast %18 : vector<1x64x32xbf16> to vector<64x32xbf16>
    %20 = arith.truncf %1 : vector<16x32xf32> to vector<16x32xbf16>
    %cst = arith.constant dense<0.000000e+00> : vector<16x96xf32>
    %21 = tpu.matmul %20, %13, %cst {dimension_numbers = #tpu.dot_dimension_numbers<[1], [0], [0], [1], [0, 0, 1, 1], [], []>} : vector<16x32xbf16>, vector<32x96xbf16>, vector<16x96xf32> -> vector<16x96xf32>
    %22 = vector.broadcast %4 : vector<1x96xf32> to vector<16x96xf32>
    %23 = arith.addf %21, %22 : vector<16x96xf32>
    %24 = vector.extract_strided_slice %23 {offsets = [0, 0], sizes = [16, 32], strides = [1, 1]} : vector<16x96xf32> to vector<16x32xf32>
    %25 = vector.shape_cast %24 : vector<16x32xf32> to vector<8x2x4x8xf32>
    %26 = tpu.transpose %25, [0, 2, 1, 3] : vector<8x2x4x8xf32> -> vector<8x4x2x8xf32>
    %27 = vector.shape_cast %26 : vector<8x4x2x8xf32> to vector<32x2x8xf32>
    %28 = arith.truncf %27 : vector<32x2x8xf32> to vector<32x2x8xbf16>
    %29 = vector.extract_strided_slice %23 {offsets = [0, 32], sizes = [16, 32], strides = [1, 1]} : vector<16x96xf32> to vector<16x32xf32>
    %30 = vector.shape_cast %29 : vector<16x32xf32> to vector<8x2x4x8xf32>
    %31 = tpu.transpose %30, [0, 2, 1, 3] : vector<8x2x4x8xf32> -> vector<8x4x2x8xf32>
    %32 = vector.shape_cast %31 : vector<8x4x2x8xf32> to vector<32x2x8xf32>
    %33 = arith.truncf %32 : vector<32x2x8xf32> to vector<32x2x8xbf16>
    %34 = vector.extract_strided_slice %23 {offsets = [0, 64], sizes = [16, 32], strides = [1, 1]} : vector<16x96xf32> to vector<16x32xf32>
    %35 = vector.shape_cast %34 : vector<16x32xf32> to vector<8x2x4x8xf32>
    %36 = tpu.transpose %35, [0, 2, 1, 3] : vector<8x2x4x8xf32> -> vector<8x4x2x8xf32>
    %37 = vector.shape_cast %36 : vector<8x4x2x8xf32> to vector<32x2x8xf32>
    %38 = arith.truncf %37 : vector<32x2x8xf32> to vector<32x2x8xbf16>
    "tpu.trace_start"() <{level = 10 : i32, message = "gqd,gkd->gqk"}> : () -> ()
    %cst_17 = arith.constant dense<0.000000e+00> : vector<32x2x2xf32>
    %39 = tpu.matmul %28, %33, %cst_17 {dimension_numbers = #tpu.dot_dimension_numbers<[2], [2], [1], [1], [0, 0, 0, 1, 1, 1], [0], [0]>} : vector<32x2x8xbf16>, vector<32x2x8xbf16>, vector<32x2x2xf32> -> vector<32x2x2xf32>
    "tpu.trace_stop"() : () -> ()
    %40 = vector.extract_strided_slice %39 {offsets = [0, 0, 0], sizes = [32, 2, 1], strides = [1, 1, 1]} : vector<32x2x2xf32> to vector<32x2x1xf32>
    %41 = vector.extract_strided_slice %39 {offsets = [0, 0, 1], sizes = [32, 2, 1], strides = [1, 1, 1]} : vector<32x2x2xf32> to vector<32x2x1xf32>
    %42 = arith.subf %40, %41 : vector<32x2x1xf32>
    %cst_18 = arith.constant 0.000000e+00 : f32
    %43 = vector.broadcast %cst_18 : f32 to vector<32x2x1xf32>
    %44 = arith.subf %43, %42 : vector<32x2x1xf32>
    %45 = math.exp %44 : vector<32x2x1xf32>
    %cst_19 = arith.constant 1.000000e+00 : f32
    %46 = vector.broadcast %cst_19 : f32 to vector<32x2x1xf32>
    %47 = arith.addf %46, %45 : vector<32x2x1xf32>
    %48 = tpu.reciprocal %47 {approx = true} : vector<32x2x1xf32> -> vector<32x2x1xf32>
    %cst_20 = arith.constant 1.000000e+00 : f32
    %49 = vector.broadcast %cst_20 : f32 to vector<32x2x1xf32>
    %50 = arith.subf %49, %48 : vector<32x2x1xf32>
    %51 = tpu.concatenate %48, %50 in 2 : vector<32x2x1xf32>, vector<32x2x1xf32> -> vector<32x2x2xf32>
    %52 = arith.truncf %51 : vector<32x2x2xf32> to vector<32x2x2xbf16>
    "tpu.trace_start"() <{level = 10 : i32, message = "gqk,gkd->gqd"}> : () -> ()
    %cst_21 = arith.constant dense<0.000000e+00> : vector<32x2x8xf32>
    %53 = tpu.matmul %52, %38, %cst_21 {dimension_numbers = #tpu.dot_dimension_numbers<[2], [1], [1], [2], [0, 0, 0, 1, 1, 2], [0], [0]>} : vector<32x2x2xbf16>, vector<32x2x8xbf16>, vector<32x2x8xf32> -> vector<32x2x8xf32>
    "tpu.trace_stop"() : () -> ()
    %54 = vector.shape_cast %53 : vector<32x2x8xf32> to vector<8x4x2x8xf32>
    %55 = tpu.transpose %54, [0, 2, 1, 3] : vector<8x4x2x8xf32> -> vector<8x2x4x8xf32>
    %56 = vector.shape_cast %55 : vector<8x2x4x8xf32> to vector<16x32xf32>
    %57 = arith.truncf %56 : vector<16x32xf32> to vector<16x32xbf16>
    %cst_22 = arith.constant dense<0.000000e+00> : vector<16x32xf32>
    %58 = tpu.matmul %57, %15, %cst_22 {dimension_numbers = #tpu.dot_dimension_numbers<[1], [0], [0], [1], [0, 0, 1, 1], [], []>} : vector<16x32xbf16>, vector<32x32xbf16>, vector<16x32xf32> -> vector<16x32xf32>
    %59 = vector.broadcast %5 : vector<1x32xf32> to vector<16x32xf32>
    %60 = arith.addf %58, %59 : vector<16x32xf32>
    %61 = arith.addf %1, %60 : vector<16x32xf32>
    %cst_23 = arith.constant dense<0.000000e+00> : vector<16xf32>
    %62 = vector.multi_reduction <add>, %61, %cst_23 [1] : vector<16x32xf32> to vector<16xf32>
    %63 = vector.shape_cast %62 : vector<16xf32> to vector<16x1xf32>
    %cst_24 = arith.constant 3.200000e+01 : f32
    %64 = vector.broadcast %cst_24 : f32 to vector<16x1xf32>
    %65 = arith.divf %63, %64 : vector<16x1xf32>
    %66 = vector.broadcast %65 : vector<16x1xf32> to vector<16x32xf32>
    %67 = arith.subf %61, %66 : vector<16x32xf32>
    %68 = arith.mulf %67, %67 : vector<16x32xf32>
    %cst_25 = arith.constant dense<0.000000e+00> : vector<16xf32>
    %69 = vector.multi_reduction <add>, %68, %cst_25 [1] : vector<16x32xf32> to vector<16xf32>
    %70 = vector.shape_cast %69 : vector<16xf32> to vector<16x1xf32>
    %cst_26 = arith.constant 3.200000e+01 : f32
    %71 = vector.broadcast %cst_26 : f32 to vector<16x1xf32>
    %72 = arith.divf %70, %71 : vector<16x1xf32>
    %73 = vector.broadcast %65 : vector<16x1xf32> to vector<16x32xf32>
    %74 = arith.subf %61, %73 : vector<16x32xf32>
    %cst_27 = arith.constant 9.99999974E-6 : f32
    %75 = vector.broadcast %cst_27 : f32 to vector<16x1xf32>
    %76 = arith.addf %72, %75 : vector<16x1xf32>
    %77 = math.rsqrt %76 : vector<16x1xf32>
    %78 = vector.broadcast %77 : vector<16x1xf32> to vector<16x32xf32>
    %79 = arith.mulf %74, %78 : vector<16x32xf32>
    %80 = vector.broadcast %6 : vector<1x32xf32> to vector<16x32xf32>
    %81 = arith.mulf %79, %80 : vector<16x32xf32>
    %82 = vector.broadcast %7 : vector<1x32xf32> to vector<16x32xf32>
    %83 = arith.addf %81, %82 : vector<16x32xf32>
    %84 = arith.truncf %83 : vector<16x32xf32> to vector<16x32xbf16>
    %cst_28 = arith.constant dense<0.000000e+00> : vector<16x64xf32>
    %85 = tpu.matmul %84, %17, %cst_28 {dimension_numbers = #tpu.dot_dimension_numbers<[1], [0], [0], [1], [0, 0, 1, 1], [], []>} : vector<16x32xbf16>, vector<32x64xbf16>, vector<16x64xf32> -> vector<16x64xf32>
    %86 = vector.broadcast %8 : vector<1x64xf32> to vector<16x64xf32>
    %87 = arith.addf %85, %86 : vector<16x64xf32>
    %cst_29 = arith.constant 0.000000e+00 : f32
    %88 = vector.broadcast %cst_29 : f32 to vector<16x64xf32>
    %89 = arith.maximumf %87, %88 : vector<16x64xf32>
    %90 = arith.truncf %89 : vector<16x64xf32> to vector<16x64xbf16>
    %cst_30 = arith.constant dense<0.000000e+00> : vector<16x32xf32>
    %91 = tpu.matmul %90, %19, %cst_30 {dimension_numbers = #tpu.dot_dimension_numbers<[1], [0], [0], [1], [0, 0, 1, 1], [], []>} : vector<16x64xbf16>, vector<64x32xbf16>, vector<16x32xf32> -> vector<16x32xf32>
    %92 = vector.broadcast %9 : vector<1x32xf32> to vector<16x32xf32>
    %93 = arith.addf %91, %92 : vector<16x32xf32>
    %94 = arith.addf %83, %93 : vector<16x32xf32>
    %cst_31 = arith.constant dense<0.000000e+00> : vector<16xf32>
    %95 = vector.multi_reduction <add>, %94, %cst_31 [1] : vector<16x32xf32> to vector<16xf32>
    %96 = vector.shape_cast %95 : vector<16xf32> to vector<16x1xf32>
    %cst_32 = arith.constant 3.200000e+01 : f32
    %97 = vector.broadcast %cst_32 : f32 to vector<16x1xf32>
    %98 = arith.divf %96, %97 : vector<16x1xf32>
    %99 = vector.broadcast %98 : vector<16x1xf32> to vector<16x32xf32>
    %100 = arith.subf %94, %99 : vector<16x32xf32>
    %101 = arith.mulf %100, %100 : vector<16x32xf32>
    %cst_33 = arith.constant dense<0.000000e+00> : vector<16xf32>
    %102 = vector.multi_reduction <add>, %101, %cst_33 [1] : vector<16x32xf32> to vector<16xf32>
    %103 = vector.shape_cast %102 : vector<16xf32> to vector<16x1xf32>
    %cst_34 = arith.constant 3.200000e+01 : f32
    %104 = vector.broadcast %cst_34 : f32 to vector<16x1xf32>
    %105 = arith.divf %103, %104 : vector<16x1xf32>
    %106 = vector.broadcast %98 : vector<16x1xf32> to vector<16x32xf32>
    %107 = arith.subf %94, %106 : vector<16x32xf32>
    %cst_35 = arith.constant 9.99999974E-6 : f32
    %108 = vector.broadcast %cst_35 : f32 to vector<16x1xf32>
    %109 = arith.addf %105, %108 : vector<16x1xf32>
    %110 = math.rsqrt %109 : vector<16x1xf32>
    %111 = vector.broadcast %110 : vector<16x1xf32> to vector<16x32xf32>
    %112 = arith.mulf %107, %111 : vector<16x32xf32>
    %113 = vector.broadcast %10 : vector<1x32xf32> to vector<16x32xf32>
    %114 = arith.mulf %112, %113 : vector<16x32xf32>
    %115 = vector.broadcast %11 : vector<1x32xf32> to vector<16x32xf32>
    %116 = arith.addf %114, %115 : vector<16x32xf32>
    %c1 = arith.constant 1 : index
    %c0_36 = arith.constant 0 : index
    %c0_37 = arith.constant 0 : index
    %117 = vector.load %arg6[%c1, %c0_36, %c0_37] : memref<2x8x128xf32, #tpu.memory_space<vmem>>, vector<1x8x128xf32>
    %118 = vector.shape_cast %117 : vector<1x8x128xf32> to vector<8x128xf32>
    %119 = vector.extract_strided_slice %118 {offsets = [0, 0], sizes = [1, 96], strides = [1, 1]} : vector<8x128xf32> to vector<1x96xf32>
    %120 = vector.extract_strided_slice %118 {offsets = [1, 0], sizes = [1, 32], strides = [1, 1]} : vector<8x128xf32> to vector<1x32xf32>
    %121 = vector.extract_strided_slice %118 {offsets = [2, 0], sizes = [1, 32], strides = [1, 1]} : vector<8x128xf32> to vector<1x32xf32>
    %122 = vector.extract_strided_slice %118 {offsets = [3, 0], sizes = [1, 32], strides = [1, 1]} : vector<8x128xf32> to vector<1x32xf32>
    %123 = vector.extract_strided_slice %118 {offsets = [4, 0], sizes = [1, 64], strides = [1, 1]} : vector<8x128xf32> to vector<1x64xf32>
    %124 = vector.extract_strided_slice %118 {offsets = [5, 0], sizes = [1, 32], strides = [1, 1]} : vector<8x128xf32> to vector<1x32xf32>
    %125 = vector.extract_strided_slice %118 {offsets = [6, 0], sizes = [1, 32], strides = [1, 1]} : vector<8x128xf32> to vector<1x32xf32>
    %126 = vector.extract_strided_slice %118 {offsets = [7, 0], sizes = [1, 32], strides = [1, 1]} : vector<8x128xf32> to vector<1x32xf32>
    %c1_38 = arith.constant 1 : index
    %c0_39 = arith.constant 0 : index
    %c0_40 = arith.constant 0 : index
    %127 = vector.load %arg2[%c1_38, %c0_39, %c0_40] : memref<2x32x96xbf16, #tpu.memory_space<vmem>>, vector<1x32x96xbf16>
    %128 = vector.shape_cast %127 : vector<1x32x96xbf16> to vector<32x96xbf16>
    %c1_41 = arith.constant 1 : index
    %c0_42 = arith.constant 0 : index
    %c0_43 = arith.constant 0 : index
    %129 = vector.load %arg3[%c1_41, %c0_42, %c0_43] : memref<2x32x32xbf16, #tpu.memory_space<vmem>>, vector<1x32x32xbf16>
    %130 = vector.shape_cast %129 : vector<1x32x32xbf16> to vector<32x32xbf16>
    %c1_44 = arith.constant 1 : index
    %c0_45 = arith.constant 0 : index
    %c0_46 = arith.constant 0 : index
    %131 = vector.load %arg4[%c1_44, %c0_45, %c0_46] : memref<2x32x64xbf16, #tpu.memory_space<vmem>>, vector<1x32x64xbf16>
    %132 = vector.shape_cast %131 : vector<1x32x64xbf16> to vector<32x64xbf16>
    %c1_47 = arith.constant 1 : index
    %c0_48 = arith.constant 0 : index
    %c0_49 = arith.constant 0 : index
    %133 = vector.load %arg5[%c1_47, %c0_48, %c0_49] : memref<2x64x32xbf16, #tpu.memory_space<vmem>>, vector<1x64x32xbf16>
    %134 = vector.shape_cast %133 : vector<1x64x32xbf16> to vector<64x32xbf16>
    %135 = arith.truncf %116 : vector<16x32xf32> to vector<16x32xbf16>
    %cst_50 = arith.constant dense<0.000000e+00> : vector<16x96xf32>
    %136 = tpu.matmul %135, %128, %cst_50 {dimension_numbers = #tpu.dot_dimension_numbers<[1], [0], [0], [1], [0, 0, 1, 1], [], []>} : vector<16x32xbf16>, vector<32x96xbf16>, vector<16x96xf32> -> vector<16x96xf32>
    %137 = vector.broadcast %119 : vector<1x96xf32> to vector<16x96xf32>
    %138 = arith.addf %136, %137 : vector<16x96xf32>
    %139 = vector.extract_strided_slice %138 {offsets = [0, 0], sizes = [16, 32], strides = [1, 1]} : vector<16x96xf32> to vector<16x32xf32>
    %140 = vector.shape_cast %139 : vector<16x32xf32> to vector<8x2x4x8xf32>
    %141 = tpu.transpose %140, [0, 2, 1, 3] : vector<8x2x4x8xf32> -> vector<8x4x2x8xf32>
    %142 = vector.shape_cast %141 : vector<8x4x2x8xf32> to vector<32x2x8xf32>
    %143 = arith.truncf %142 : vector<32x2x8xf32> to vector<32x2x8xbf16>
    %144 = vector.extract_strided_slice %138 {offsets = [0, 32], sizes = [16, 32], strides = [1, 1]} : vector<16x96xf32> to vector<16x32xf32>
    %145 = vector.shape_cast %144 : vector<16x32xf32> to vector<8x2x4x8xf32>
    %146 = tpu.transpose %145, [0, 2, 1, 3] : vector<8x2x4x8xf32> -> vector<8x4x2x8xf32>
    %147 = vector.shape_cast %146 : vector<8x4x2x8xf32> to vector<32x2x8xf32>
    %148 = arith.truncf %147 : vector<32x2x8xf32> to vector<32x2x8xbf16>
    %149 = vector.extract_strided_slice %138 {offsets = [0, 64], sizes = [16, 32], strides = [1, 1]} : vector<16x96xf32> to vector<16x32xf32>
    %150 = vector.shape_cast %149 : vector<16x32xf32> to vector<8x2x4x8xf32>
    %151 = tpu.transpose %150, [0, 2, 1, 3] : vector<8x2x4x8xf32> -> vector<8x4x2x8xf32>
    %152 = vector.shape_cast %151 : vector<8x4x2x8xf32> to vector<32x2x8xf32>
    %153 = arith.truncf %152 : vector<32x2x8xf32> to vector<32x2x8xbf16>
    "tpu.trace_start"() <{level = 10 : i32, message = "gqd,gkd->gqk"}> : () -> ()
    %cst_51 = arith.constant dense<0.000000e+00> : vector<32x2x2xf32>
    %154 = tpu.matmul %143, %148, %cst_51 {dimension_numbers = #tpu.dot_dimension_numbers<[2], [2], [1], [1], [0, 0, 0, 1, 1, 1], [0], [0]>} : vector<32x2x8xbf16>, vector<32x2x8xbf16>, vector<32x2x2xf32> -> vector<32x2x2xf32>
    "tpu.trace_stop"() : () -> ()
    %155 = vector.extract_strided_slice %154 {offsets = [0, 0, 0], sizes = [32, 2, 1], strides = [1, 1, 1]} : vector<32x2x2xf32> to vector<32x2x1xf32>
    %156 = vector.extract_strided_slice %154 {offsets = [0, 0, 1], sizes = [32, 2, 1], strides = [1, 1, 1]} : vector<32x2x2xf32> to vector<32x2x1xf32>
    %157 = arith.subf %155, %156 : vector<32x2x1xf32>
    %cst_52 = arith.constant 0.000000e+00 : f32
    %158 = vector.broadcast %cst_52 : f32 to vector<32x2x1xf32>
    %159 = arith.subf %158, %157 : vector<32x2x1xf32>
    %160 = math.exp %159 : vector<32x2x1xf32>
    %cst_53 = arith.constant 1.000000e+00 : f32
    %161 = vector.broadcast %cst_53 : f32 to vector<32x2x1xf32>
    %162 = arith.addf %161, %160 : vector<32x2x1xf32>
    %163 = tpu.reciprocal %162 {approx = true} : vector<32x2x1xf32> -> vector<32x2x1xf32>
    %cst_54 = arith.constant 1.000000e+00 : f32
    %164 = vector.broadcast %cst_54 : f32 to vector<32x2x1xf32>
    %165 = arith.subf %164, %163 : vector<32x2x1xf32>
    %166 = tpu.concatenate %163, %165 in 2 : vector<32x2x1xf32>, vector<32x2x1xf32> -> vector<32x2x2xf32>
    %167 = arith.truncf %166 : vector<32x2x2xf32> to vector<32x2x2xbf16>
    "tpu.trace_start"() <{level = 10 : i32, message = "gqk,gkd->gqd"}> : () -> ()
    %cst_55 = arith.constant dense<0.000000e+00> : vector<32x2x8xf32>
    %168 = tpu.matmul %167, %153, %cst_55 {dimension_numbers = #tpu.dot_dimension_numbers<[2], [1], [1], [2], [0, 0, 0, 1, 1, 2], [0], [0]>} : vector<32x2x2xbf16>, vector<32x2x8xbf16>, vector<32x2x8xf32> -> vector<32x2x8xf32>
    "tpu.trace_stop"() : () -> ()
    %169 = vector.shape_cast %168 : vector<32x2x8xf32> to vector<8x4x2x8xf32>
    %170 = tpu.transpose %169, [0, 2, 1, 3] : vector<8x4x2x8xf32> -> vector<8x2x4x8xf32>
    %171 = vector.shape_cast %170 : vector<8x2x4x8xf32> to vector<16x32xf32>
    %172 = arith.truncf %171 : vector<16x32xf32> to vector<16x32xbf16>
    %cst_56 = arith.constant dense<0.000000e+00> : vector<16x32xf32>
    %173 = tpu.matmul %172, %130, %cst_56 {dimension_numbers = #tpu.dot_dimension_numbers<[1], [0], [0], [1], [0, 0, 1, 1], [], []>} : vector<16x32xbf16>, vector<32x32xbf16>, vector<16x32xf32> -> vector<16x32xf32>
    %174 = vector.broadcast %120 : vector<1x32xf32> to vector<16x32xf32>
    %175 = arith.addf %173, %174 : vector<16x32xf32>
    %176 = arith.addf %116, %175 : vector<16x32xf32>
    %cst_57 = arith.constant dense<0.000000e+00> : vector<16xf32>
    %177 = vector.multi_reduction <add>, %176, %cst_57 [1] : vector<16x32xf32> to vector<16xf32>
    %178 = vector.shape_cast %177 : vector<16xf32> to vector<16x1xf32>
    %cst_58 = arith.constant 3.200000e+01 : f32
    %179 = vector.broadcast %cst_58 : f32 to vector<16x1xf32>
    %180 = arith.divf %178, %179 : vector<16x1xf32>
    %181 = vector.broadcast %180 : vector<16x1xf32> to vector<16x32xf32>
    %182 = arith.subf %176, %181 : vector<16x32xf32>
    %183 = arith.mulf %182, %182 : vector<16x32xf32>
    %cst_59 = arith.constant dense<0.000000e+00> : vector<16xf32>
    %184 = vector.multi_reduction <add>, %183, %cst_59 [1] : vector<16x32xf32> to vector<16xf32>
    %185 = vector.shape_cast %184 : vector<16xf32> to vector<16x1xf32>
    %cst_60 = arith.constant 3.200000e+01 : f32
    %186 = vector.broadcast %cst_60 : f32 to vector<16x1xf32>
    %187 = arith.divf %185, %186 : vector<16x1xf32>
    %188 = vector.broadcast %180 : vector<16x1xf32> to vector<16x32xf32>
    %189 = arith.subf %176, %188 : vector<16x32xf32>
    %cst_61 = arith.constant 9.99999974E-6 : f32
    %190 = vector.broadcast %cst_61 : f32 to vector<16x1xf32>
    %191 = arith.addf %187, %190 : vector<16x1xf32>
    %192 = math.rsqrt %191 : vector<16x1xf32>
    %193 = vector.broadcast %192 : vector<16x1xf32> to vector<16x32xf32>
    %194 = arith.mulf %189, %193 : vector<16x32xf32>
    %195 = vector.broadcast %121 : vector<1x32xf32> to vector<16x32xf32>
    %196 = arith.mulf %194, %195 : vector<16x32xf32>
    %197 = vector.broadcast %122 : vector<1x32xf32> to vector<16x32xf32>
    %198 = arith.addf %196, %197 : vector<16x32xf32>
    %199 = arith.truncf %198 : vector<16x32xf32> to vector<16x32xbf16>
    %cst_62 = arith.constant dense<0.000000e+00> : vector<16x64xf32>
    %200 = tpu.matmul %199, %132, %cst_62 {dimension_numbers = #tpu.dot_dimension_numbers<[1], [0], [0], [1], [0, 0, 1, 1], [], []>} : vector<16x32xbf16>, vector<32x64xbf16>, vector<16x64xf32> -> vector<16x64xf32>
    %201 = vector.broadcast %123 : vector<1x64xf32> to vector<16x64xf32>
    %202 = arith.addf %200, %201 : vector<16x64xf32>
    %cst_63 = arith.constant 0.000000e+00 : f32
    %203 = vector.broadcast %cst_63 : f32 to vector<16x64xf32>
    %204 = arith.maximumf %202, %203 : vector<16x64xf32>
    %205 = arith.truncf %204 : vector<16x64xf32> to vector<16x64xbf16>
    %cst_64 = arith.constant dense<0.000000e+00> : vector<16x32xf32>
    %206 = tpu.matmul %205, %134, %cst_64 {dimension_numbers = #tpu.dot_dimension_numbers<[1], [0], [0], [1], [0, 0, 1, 1], [], []>} : vector<16x64xbf16>, vector<64x32xbf16>, vector<16x32xf32> -> vector<16x32xf32>
    %207 = vector.broadcast %124 : vector<1x32xf32> to vector<16x32xf32>
    %208 = arith.addf %206, %207 : vector<16x32xf32>
    %209 = arith.addf %198, %208 : vector<16x32xf32>
    %cst_65 = arith.constant dense<0.000000e+00> : vector<16xf32>
    %210 = vector.multi_reduction <add>, %209, %cst_65 [1] : vector<16x32xf32> to vector<16xf32>
    %211 = vector.shape_cast %210 : vector<16xf32> to vector<16x1xf32>
    %cst_66 = arith.constant 3.200000e+01 : f32
    %212 = vector.broadcast %cst_66 : f32 to vector<16x1xf32>
    %213 = arith.divf %211, %212 : vector<16x1xf32>
    %214 = vector.broadcast %213 : vector<16x1xf32> to vector<16x32xf32>
    %215 = arith.subf %209, %214 : vector<16x32xf32>
    %216 = arith.mulf %215, %215 : vector<16x32xf32>
    %cst_67 = arith.constant dense<0.000000e+00> : vector<16xf32>
    %217 = vector.multi_reduction <add>, %216, %cst_67 [1] : vector<16x32xf32> to vector<16xf32>
    %218 = vector.shape_cast %217 : vector<16xf32> to vector<16x1xf32>
    %cst_68 = arith.constant 3.200000e+01 : f32
    %219 = vector.broadcast %cst_68 : f32 to vector<16x1xf32>
    %220 = arith.divf %218, %219 : vector<16x1xf32>
    %221 = vector.broadcast %213 : vector<16x1xf32> to vector<16x32xf32>
    %222 = arith.subf %209, %221 : vector<16x32xf32>
    %cst_69 = arith.constant 9.99999974E-6 : f32
    %223 = vector.broadcast %cst_69 : f32 to vector<16x1xf32>
    %224 = arith.addf %220, %223 : vector<16x1xf32>
    %225 = math.rsqrt %224 : vector<16x1xf32>
    %226 = vector.broadcast %225 : vector<16x1xf32> to vector<16x32xf32>
    %227 = arith.mulf %222, %226 : vector<16x32xf32>
    %228 = vector.broadcast %125 : vector<1x32xf32> to vector<16x32xf32>
    %229 = arith.mulf %227, %228 : vector<16x32xf32>
    %230 = vector.broadcast %126 : vector<1x32xf32> to vector<16x32xf32>
    %231 = arith.addf %229, %230 : vector<16x32xf32>
    %232 = vector.shape_cast %231 : vector<16x32xf32> to vector<8x2x32xf32>
    %cst_70 = arith.constant dense<0.000000e+00> : vector<2x32xf32>
    %233 = vector.multi_reduction <add>, %232, %cst_70 [0] : vector<8x2x32xf32> to vector<2x32xf32>
    %cst_71 = arith.constant 8.000000e+00 : f32
    %234 = vector.broadcast %cst_71 : f32 to vector<2x32xf32>
    %235 = arith.divf %233, %234 : vector<2x32xf32>
    %236 = arith.truncf %235 : vector<2x32xf32> to vector<2x32xbf16>
    %c0_72 = arith.constant 0 : index
    %c0_73 = arith.constant 0 : index
    %237 = vector.load %arg7[%c0_72, %c0_73] : memref<32x4xbf16, #tpu.memory_space<vmem>>, vector<32x4xbf16>
    %cst_74 = arith.constant dense<0.000000e+00> : vector<2x4xf32>
    %238 = tpu.matmul %236, %237, %cst_74 {dimension_numbers = #tpu.dot_dimension_numbers<[1], [0], [0], [1], [0, 0, 1, 1], [], []>} : vector<2x32xbf16>, vector<32x4xbf16>, vector<2x4xf32> -> vector<2x4xf32>
    %c0_75 = arith.constant 0 : index
    %c0_76 = arith.constant 0 : index
    %239 = vector.load %arg8[%c0_75, %c0_76] : memref<1x4xf32, #tpu.memory_space<vmem>>, vector<1x4xf32>
    %240 = vector.broadcast %239 : vector<1x4xf32> to vector<2x4xf32>
    %241 = arith.addf %238, %240 : vector<2x4xf32>
    %c0_77 = arith.constant 0 : index
    %c0_78 = arith.constant 0 : index
    %242 = vector.load %arg9[%c0_77, %c0_78] : memref<2x4xf32, #tpu.memory_space<vmem>>, vector<2x4xf32>
    tpu.vector_store %arg9[%c0_77, %c0_78], %241 {strides = array<i32>} : memref<2x4xf32, #tpu.memory_space<vmem>>, vector<2x4xf32>,
    return
  }
  func.func @transform_0(%arg0: i32) -> (i32, i32, i32) {
    %c0_i32 = arith.constant 0 : i32
    %c0_i32_0 = arith.constant 0 : i32
    %c0_i32_1 = arith.constant 0 : i32
    %c0_i32_2 = arith.constant 0 : i32
    return %c0_i32, %c0_i32_0, %c0_i32_1 : i32, i32, i32
  }
  func.func @transform_1(%arg0: i32) -> (i32, i32, i32) {
    %c0_i32 = arith.constant 0 : i32
    %c0_i32_0 = arith.constant 0 : i32
    %c0_i32_1 = arith.constant 0 : i32
    %c0_i32_2 = arith.constant 0 : i32
    return %c0_i32, %c0_i32_0, %c0_i32_1 : i32, i32, i32
  }
  func.func @transform_2(%arg0: i32) -> (i32, i32, i32) {
    %c0_i32 = arith.constant 0 : i32
    %c0_i32_0 = arith.constant 0 : i32
    %c0_i32_1 = arith.constant 0 : i32
    %c0_i32_2 = arith.constant 0 : i32
    return %c0_i32, %c0_i32_0, %c0_i32_1 : i32, i32, i32
  }
  func.func @transform_3(%arg0: i32) -> (i32, i32, i32) {
    %c0_i32 = arith.constant 0 : i32
    %c0_i32_0 = arith.constant 0 : i32
    %c0_i32_1 = arith.constant 0 : i32
    %c0_i32_2 = arith.constant 0 : i32
    return %c0_i32, %c0_i32_0, %c0_i32_1 : i32, i32, i32
  }
  func.func @transform_4(%arg0: i32) -> (i32, i32, i32) {
    %c0_i32 = arith.constant 0 : i32
    %c0_i32_0 = arith.constant 0 : i32
    %c0_i32_1 = arith.constant 0 : i32
    %c0_i32_2 = arith.constant 0 : i32
    return %c0_i32, %c0_i32_0, %c0_i32_1 : i32, i32, i32
  }
  func.func @transform_5(%arg0: i32) -> (i32, i32, i32) {
    %c0_i32 = arith.constant 0 : i32
    %c0_i32_0 = arith.constant 0 : i32
    %c0_i32_1 = arith.constant 0 : i32
    %c0_i32_2 = arith.constant 0 : i32
    return %c0_i32, %c0_i32_0, %c0_i32_1 : i32, i32, i32
  }
  func.func @transform_6(%arg0: i32) -> (i32, i32) {
    %c0_i32 = arith.constant 0 : i32
    %c0_i32_0 = arith.constant 0 : i32
    %c0_i32_1 = arith.constant 0 : i32
    return %c0_i32, %c0_i32_0 : i32, i32
  }
  func.func @transform_7(%arg0: i32) -> (i32, i32) {
    %c0_i32 = arith.constant 0 : i32
    %c0_i32_0 = arith.constant 0 : i32
    %c0_i32_1 = arith.constant 0 : i32
    return %c0_i32, %c0_i32_0 : i32, i32
  }
  func.func @transform_8(%arg0: i32) -> (i32, i32) {
    %c0_i32 = arith.constant 0 : i32
    %c0_i32_0 = arith.constant 0 : i32
    %c0_i32_1 = arith.constant 0 : i32
    return %c0_i32, %c0_i32_0 : i32, i32
  }
}

</mosaic_0001>

<bundles_post_ra>
// kernel: tpu_custom_call.1
= control target key start
LH: loop header
LB: loop body
LE: loop exit
PB: predicated region body
PF: predicated region fallthrough
CT: control target
= control target key end

     0   :  { %13 = vsyncpa [#allocation3], 0  ;;  %s17653_s0 = inlined_call_operand.vmem [shape: f32[8,2,32], index: 0, kind: input, shape index: {}]   ;;  %s17654_s1 = inlined_call_operand.vmem [shape: bf16[2,32,96], index: 1, kind: input, shape index: {}]   ;;  %s17655_s2 = inlined_call_operand.vmem [shape: bf16[2,32,32], index: 2, kind: input, shape index: {}]   ;;  %s17656_s3 = inlined_call_operand.vmem [shape: bf16[2,32,64], index: 3, kind: input, shape index: {}]   ;;  %s17657_s4 = inlined_call_operand.vmem [shape: bf16[2,64,32], index: 4, kind: input, shape index: {}]   ;;  %s17658_s5 = inlined_call_operand.hbm [shape: f32[2,8,128], index: 5, kind: input, shape index: {}]   ;;  %s17659_s6 = inlined_call_operand.vmem [shape: bf16[32,4], index: 6, kind: input, shape index: {}]   ;;  %s17660_s7 = inlined_call_operand.vmem [shape: f32[1,4], index: 7, kind: input, shape index: {}]   ;;  %s17661_s8 = inlined_call_operand.hbm [shape: f32[2,4], index: 8, kind: output, shape index: {}]  }
   0x1   :  { %14 = vsyncpa [#allocation4], 0  ;;  %s14709_s27 = smov [#allocation2]  }
   0x2   :  { %s30_s28 = sshll.u32 %s14709_s27, 4  ;;  %s31_s28 = int_to_ptr.vmem [resolvable:$true] %s30_s28 }
   0x3   :  { %s14673_s29 = scalar_lea.vmem %s31_s28, 256  ;;  %p14678_p1 = scmp.lt.s32.totalorder %s31_s28, %s31_s28 }
   0x4   :  { %p14674_p0 = scmp.ne.s32.totalorder %s31_s28, %s14673_s29  ;;  %p14679_p2 = scmp.lt.s32.totalorder %s14673_s29, %s14673_s29 }
   0x6   :  { %p14680_p3 = por %p14679_p2, %p14678_p1 }
   0x8   :  { %p14681_p4 = pnand %p14680_p3, %p14674_p0 }
   0xa   :  { %14684 = shalt.err (!%p14681_p4)
}
   0xb   :  { %s14710_s30 = smov 128   ;;  %s14711_s9 = smov 8  }
   0xc   :  { %36 = dma.hbm_to_vmem [thread:$0]  %s17658_s5, 256, %s31_s28, [#allocation3], %s14710_s30, %s14710_s30, %s14711_s9  }
   0xd   :  { %14705 = dma.done.wait [#allocation3], 256  }
   0xe   :  { %14706 = vsyncadd [#allocation3], 4294967040  ;;  %v87_v0 = vlaneseq  ;;  %v17669_v1 = vmov 0.0   ;;  %vm14713_vm0 = vmmov 0   ;;  %v14714_v2 = vmov 1983009808  }
   0xf   :  { %13302 = vmatprep.subr.bf16.mxu0 %v17669_v1  ;;  %13306 = vmatprep.mubr.msk.bf16.mxu0 %vm14713_vm0, %v17669_v1  ;;  %v85_v3 = vunpack.c.l.s4 %v14714_v2  ;;  %v14361_v6 = vld [vmem:[%s17654_s1 + $0x8] sm:$0xff]   ;;  %v14362_v7 = vld [vmem:[%s17654_s1] sm:$0xff]   ;;  %vm135_vm1 = vcmask 261120   ;;  %s14715_s10 = smov 104   ;;  %s14716_s11 = smov 120   ;;  %vm1520_vm2 = vcmask 64512  }
  0x10   :  { %13310 = vmatprep.subr.bf16.mxu1 %v17669_v1  ;;  %13312 = vmatprep.mubr.msk.bf16.mxu1 %vm14713_vm0, %v17669_v1  ;;  %v14785_v5 = vshrl.u32 %v87_v0, 7  ;;  %v45_v9 = vld [vmem:[%s17653_s0] sm:$0x3]  ;;  %v46_v10 = vld [vmem:[%s17653_s0 + $0x2] sm:$0x3]  ;;  %s14717_s5 = smov 96  }
  0x11   :  { %v86_v4 = vunpack.c.0.s8 %v85_v3  ;;  %13303 = vmatpush3.bf16.msra.mxu0 %v14361_v6  ;;  %v47_v11 = vld [vmem:[%s17653_s0 + $0x4] sm:$0x3]  ;;  %v48_v12 = vld [vmem:[%s17653_s0 + $0x6] sm:$0x3]  ;;  %v49_v13 = vld [vmem:[%s17653_s0 + $0x8] sm:$0x3]  ;;  %v82_v15 = vcombine.low %v45_v9, %v46_v10 }
  0x12   :  { %13304 = vmatprep.subr.bf16.mxu0 %v17669_v1  ;;  %v50_v14 = vld [vmem:[%s17653_s0 + $0xa] sm:$0x3]  ;;  %v51_v16 = vld [vmem:[%s17653_s0 + $0xc] sm:$0x3]  ;;  %v52_v17 = vld [vmem:[%s17653_s0 + $0xe] sm:$0x3]  ;;  %v83_v18 = vcombine.low %v47_v11, %v48_v12 }
  0x13   :  { %v14794_v8 = vsub.s32 %v86_v4, %v14785_v5  ;;  %v99_v19 = vcombine.low %v49_v13, %v50_v14  ;;  %v100_v21 = vcombine.low %v51_v16, %v52_v17  ;;  %v121_v28 = vsub.s32 0, %v14785_v5  ;;  %v53_v29 = vld [vmem:[#allocation2] sm:$0xff]  ;;  %s14718_s12 = smov 112   ;;  %s14720_s13 = smov 127  }
  0x14   :  { %v14719_v40 = vmov 1934713408   ;;  %s14721_s14 = smov 64   ;;  %s14722_s15 = smov 1   ;;  %vm3542_vm3 = vcmask 1040384   ;;  %vm3473_vm4 = vcmask 7168  }
  0x15   :  { %v90_v20 = vrot.slane %v82_v15, %v14794_v8  ;;  %13305 = vmatpush3.bf16.msra.mxu0 %v14362_v7  ;;  %v97_v22 = vrot.slane %v83_v18, %v14794_v8  ;;  %v107_v23 = vrot.slane %v99_v19, %v14794_v8  ;;  %v114_v24 = vrot.slane %v100_v21, %v14794_v8  ;;  %s14723_s20 = smov 16   ;;  %s14724_s21 = smov 24  }
  0x16   :  { %13316 = vmatprep.subr.bf16.mxu0 %v17669_v1  ;;  %v122_v30 = vrot.slane %v53_v29, %v121_v28  ;;  %v235_v41 = vunpack.c.l.s4 %v14719_v40  ;;  %vm3538_vm5 = vcmask 15360   ;;  %vm5374_vm6 = vcmask 130048   ;;  %s14729_s18 = smov [#allocation5]  }
  0x17   :  { %v98_v25 = vcombine.low %v90_v20, %v97_v22  ;;  %v115_v26 = vcombine.low %v107_v23, %v114_v24  ;;  %vm5377_vm7 = vcmask 195584   ;;  %vm5962_vm8 = vcmask 523264   ;;  %s12818_s19 = sshll.u32 %s14729_s18, 4  ;;  %s12819_s19 = int_to_ptr.vmem [resolvable:$true] %s12818_s19 }
  0x18   :  { %v236_v46 = vunpack.c.0.s8 %v235_v41  ;;  %vm12725_vm9 = vcmask 254976   ;;  %vm12810_vm10 = vcmask 25600   ;;  %s14685_s22 = scalar_lea.vmem %s12819_s19, 32  ;;  %p14690_p6 = scmp.lt.s32.totalorder %s12819_s19, %s12819_s19 }
  0x19   :  { %v118_v27 = vpack.c.bf16 %v115_v26, %v98_v25  ;;  %p14686_p5 = scmp.ne.s32.totalorder %s12819_s19, %s14685_s22  ;;  %p14691_p7 = scmp.lt.s32.totalorder %s14685_s22, %s14685_s22 }
  0x1a   :  { %v14871_v53 = vsub.s32 %v236_v46, %v14785_v5 }
  0x1b   :  { %13307 = vmatmul.mubr.msk.bf16.vlgmr.msra.gmra.mxu0 %vm135_vm1, %v118_v27  ;;  %p14692_p8 = por %p14691_p7, %p14690_p6 }
  0x1c   :  { %13318 = vmatprep.mubr.msk.bf16.mxu0 %vm14713_vm0, %v17669_v1 }
  0x1d   :  { %p14693_p9 = pnand %p14692_p8, %p14686_p5 }
  0xdb   :  { %v173_v31 = vpop.f32.mrf.mxu0 }
  0xdc   :  { %v14832_v32 = vadd.f32 %v173_v31, %v122_v30 }
  0xdd   :  { %v13308_v33 = vpop.f32.mrf.mxu0 }
  0xde   :  { %194 = vrot.lane.b32.xlu1 %v14832_v32, %s14715_s10  ;;  %182 = vrot.lane.b32.xlu0 %v14832_v32, %s14716_s11 }
  0xdf   :  { %v176_v34 = vpop.f32.mrf.mxu0 }
  0xe0   :  { %v14838_v35 = vadd.f32 %v176_v34, %v122_v30 }
  0xe1   :  { %v13309_v36 = vpop.f32.mrf.mxu0 }
  0xe2   :  { %624 = vrot.lane.b32.xlu1 %v14832_v32, %s14717_s5  ;;  %188 = vrot.lane.b32.xlu0 %v14832_v32, %s14718_s12 }
 0x150   :  { %v14844_v37 = vpop.permute.xlu0 %182  ;;  %v14848_v38 = vpop.permute.xlu1 %194 }
 0x151   :  { %628 = vrot.lane.b32.xlu0 %v14844_v37, %s14717_s5  ;;  %v216_v43 = vcombine.low %v14844_v37, %v14848_v38 }
 0x153   :  { %v224_v48 = vrot.slane %v216_v43, %v14794_v8 }
 0x154   :  { %v14850_v39 = vpop.permute.xlu0 %188  ;;  %v625_v44 = vpop.permute.xlu1 %624 }
 0x155   :  { %636 = vrot.lane.b32.xlu0 %v14848_v38, %s14717_s5  ;;  %632 = vrot.lane.b32.xlu1 %v14850_v39, %s14717_s5  ;;  %v200_v42 = vcombine.low %v14832_v32, %v14850_v39  ;;  %v201_v36 = vcombine.high %v14832_v32, %v14850_v39 }
 0x157   :  { %v208_v47 = vrot.slane %v200_v42, %v14794_v8 }
 0x159   :  { %190 = vrot.lane.b32.xlu0 %v14838_v35, %s14718_s12  ;;  %184 = vrot.lane.b32.xlu1 %v14838_v35, %s14716_s11  ;;  %v232_v54 = vcombine.low %v208_v47, %v224_v48  ;;  %v233_v15 = vcombine.high %v208_v47, %v224_v48 }
 0x15b   :  { %v240_v60 = vrot.slane %v232_v54, %v14871_v53  ;;  %v247_v24 = vrot.slane %v233_v15, %v14871_v53 }
 0x15d   :  { %626 = vrot.lane.b32.xlu0 %v14838_v35, %s14717_s5  ;;  %196 = vrot.lane.b32.xlu1 %v14838_v35, %s14715_s10  ;;  %v335_v2 = vcombine.high %v240_v60, %v17669_v1  ;;  %v334_v13 = vrot.slane %v240_v60, %v14794_v8  ;;  %v368_v40 = vcombine.high %v247_v24, %v17669_v1 }
 0x15f   :  { %v342_v7 = vrot.slane %v335_v2, %v14794_v8  ;;  %v375_v54 = vrot.slane %v368_v40, %v14794_v8 }
 0x161   :  { %v343_v17 = vcombine.low %v334_v13, %v342_v7  ;;  %v344_v41 = vcombine.high %v334_v13, %v342_v7 }
 0x163   :  { %v351_v27 = vrot.slane %v343_v17, %v14871_v53 }
 0x165   :  { %v359_v42 = vcombine.high %v351_v27, %v17669_v1  ;;  %v592_v46 = vpack.c.bf16 %v351_v27, %v351_v27 }
 0x1c3   :  { %v629_v45 = vpop.permute.xlu0 %628 }
 0x1c7   :  { %v633_v49 = vpop.permute.xlu1 %632  ;;  %v637_v50 = vpop.permute.xlu0 %636 }
 0x1c8   :  { %v648_v51 = vcombine.low %v625_v44, %v633_v49  ;;  %v664_v52 = vcombine.low %v629_v45, %v637_v50  ;;  %v649_v9 = vcombine.high %v625_v44, %v633_v49  ;;  %v665_v10 = vcombine.high %v629_v45, %v637_v50 }
 0x1c9   :  { %v217_v44 = vcombine.high %v14844_v37, %v14848_v38  ;;  %v14926_v49 = vrot.slane %v201_v36, %v14794_v8 }
 0x1ca   :  { %v656_v55 = vrot.slane %v648_v51, %v14794_v8  ;;  %v672_v56 = vrot.slane %v664_v52, %v14794_v8  ;;  %v14899_v18 = vrot.slane %v649_v9, %v14794_v8  ;;  %v14902_v19 = vrot.slane %v665_v10, %v14794_v8 }
 0x1cb   :  { %v14875_v57 = vpop.permute.xlu0 %190  ;;  %v14877_v59 = vpop.permute.xlu1 %184  ;;  %v593_v51 = vpack.c.bf16 %v359_v42, %v359_v42  ;;  %v358_v52 = vrot.slane %v344_v41, %v14871_v53 }
 0x1cc   :  { %v680_v58 = vcombine.low %v656_v55, %v672_v56  ;;  %634 = vrot.lane.b32.xlu0 %v14875_v57, %s14717_s5  ;;  %630 = vrot.lane.b32.xlu1 %v14877_v59, %s14717_s5  ;;  %v681_v62 = vcombine.high %v656_v55, %v672_v56  ;;  %v696_v30 = vcombine.low %v14899_v18, %v14902_v19 }
 0x1cd   :  { %v14933_v55 = vrot.slane %v217_v44, %v14794_v8  ;;  %v367_v56 = vrot.slane %v247_v24, %v14794_v8 }
 0x1ce   :  { %v688_v61 = vrot.slane %v680_v58, %v14871_v53  ;;  %v695_v3 = vrot.slane %v681_v62, %v14871_v53  ;;  %v704_v45 = vrot.slane %v696_v30, %v14871_v53 }
 0x1cf   :  { %v14885_v63 = vpop.permute.xlu1 %196 }
 0x1d0   :  { %638 = vrot.lane.b32.xlu1 %v14885_v63, %s14717_s5  ;;  %v783_v0 = vcombine.high %v688_v61, %v17669_v1  ;;  %v782_v6 = vrot.slane %v688_v61, %v14794_v8  ;;  %v816_v12 = vcombine.high %v695_v3, %v17669_v1  ;;  %v815_v29 = vrot.slane %v695_v3, %v14794_v8 }
 0x1d1   :  { %v849_v58 = vcombine.high %v704_v45, %v17669_v1  ;;  %v360_v3 = vcombine.high %v358_v52, %v17669_v1  ;;  %v848_v15 = vrot.slane %v704_v45, %v14794_v8 }
 0x1d2   :  { %v790_v4 = vrot.slane %v783_v0, %v14794_v8  ;;  %v823_v23 = vrot.slane %v816_v12, %v14794_v8  ;;  %v248_v0 = vcombine.low %v14926_v49, %v14933_v55 }
 0x1d3   :  { %v856_v10 = vrot.slane %v849_v58, %v14794_v8  ;;  %v595_v13 = vpack.c.bf16 %v360_v3, %v360_v3 }
 0x1d4   :  { %v791_v11 = vcombine.low %v782_v6, %v790_v4  ;;  %v792_v14 = vcombine.high %v782_v6, %v790_v4  ;;  %v824_v34 = vcombine.low %v815_v29, %v823_v23  ;;  %v825_v62 = vcombine.high %v815_v29, %v823_v23 }
 0x1d5   :  { %v376_v4 = vcombine.low %v367_v56, %v375_v54  ;;  %v594_v6 = vpack.c.bf16 %v358_v52, %v358_v52  ;;  %v858_v42 = vcombine.high %v848_v15, %v856_v10 }
 0x1d6   :  { %v799_v16 = vrot.slane %v791_v11, %v14871_v53  ;;  %v806_v22 = vrot.slane %v792_v14, %v14871_v53  ;;  %v832_v48 = vrot.slane %v824_v34, %v14871_v53  ;;  %v839_v9 = vrot.slane %v825_v62, %v14871_v53 }
 0x1d7   :  { %v256_v11 = vrot.slane %v248_v0, %v14871_v53  ;;  %v384_v14 = vrot.slane %v376_v4, %v14871_v53 }
 0x1d8   :  { %v1040_v20 = vpack.c.bf16 %v799_v16, %v799_v16  ;;  %v807_v21 = vcombine.high %v799_v16, %v17669_v1  ;;  %v808_v33 = vcombine.high %v806_v22, %v17669_v1  ;;  %v1042_v43 = vpack.c.bf16 %v806_v22, %v806_v22 }
 0x1d9   :  { %v840_v61 = vcombine.high %v832_v48, %v17669_v1  ;;  %v1044_v2 = vpack.c.bf16 %v832_v48, %v832_v48  ;;  %v697_v16 = vcombine.high %v14899_v18, %v14902_v19  ;;  %v401_v22 = vcombine.high %v256_v11, %v17669_v1 }
 0x1da   :  { %v1525_v25 = vsel %vm1520_vm2, %v1040_v20, 0  ;;  %v1041_v26 = vpack.c.bf16 %v807_v21, %v807_v21  ;;  %v1043_v47 = vpack.c.bf16 %v808_v33, %v808_v33  ;;  %v1617_v50 = vsel %vm1520_vm2, %v1042_v43, 0 }
 0x1db   :  { %13311 = vmatpush3.bf16.xpose.msra.mxu1 %v1525_v25  ;;  %v1045_v7 = vpack.c.bf16 %v840_v61, %v840_v61  ;;  %v1709_v12 = vsel %vm1520_vm2, %v1044_v2, 0  ;;  %v841_v20 = vcombine.high %v839_v9, %v17669_v1  ;;  %v857_v21 = vcombine.low %v848_v15, %v856_v10 }
 0x1dc   :  { %v1571_v31 = vsel %vm1520_vm2, %v1041_v26, 0  ;;  %13322 = vmatprep.subr.bf16.mxu1 %v17669_v1  ;;  %v1663_v60 = vsel %vm1520_vm2, %v1043_v47, 0  ;;  %v1046_v23 = vpack.c.bf16 %v839_v9, %v839_v9  ;;  %v392_v24 = vcombine.high %v384_v14, %v17669_v1 }
 0x1dd   :  { %13317 = vmatpush3.bf16.xpose.msra.mxu0 %v1571_v31  ;;  %v1755_v17 = vsel %vm1520_vm2, %v1045_v7, 0  ;;  %v377_v18 = vcombine.high %v367_v56, %v375_v54  ;;  %v711_v19 = vrot.slane %v697_v16, %v14871_v53  ;;  %v596_v25 = vpack.c.bf16 %v384_v14, %v384_v14 }
 0x1de   :  { %13328 = vmatprep.subr.bf16.mxu0 %v17669_v1  ;;  %v1047_v26 = vpack.c.bf16 %v841_v20, %v841_v20  ;;  %v865_v27 = vrot.slane %v857_v21, %v14871_v53  ;;  %v1801_v29 = vsel %vm1520_vm2, %v1046_v23, 0  ;;  %v597_v30 = vpack.c.bf16 %v392_v24, %v392_v24 }
 0x1df   :  { %v391_v31 = vrot.slane %v377_v18, %v14871_v53  ;;  %v408_v33 = vrot.slane %v401_v22, %v14794_v8  ;;  %v400_v34 = vrot.slane %v256_v11, %v14794_v8  ;;  %v882_v36 = vcombine.high %v711_v19, %v17669_v1 }
 0x1e0   :  { %v1847_v40 = vsel %vm1520_vm2, %v1047_v26, 0  ;;  %v873_v41 = vcombine.high %v865_v27, %v17669_v1  ;;  %v249_v43 = vcombine.high %v14926_v49, %v14933_v55  ;;  %v1048_v44 = vpack.c.bf16 %v865_v27, %v865_v27 }
 0x1e1   :  { %v393_v45 = vcombine.high %v391_v31, %v17669_v1  ;;  %v598_v47 = vpack.c.bf16 %v391_v31, %v391_v31  ;;  %v881_v56 = vrot.slane %v711_v19, %v14794_v8  ;;  %v410_v3 = vcombine.high %v400_v34, %v408_v33 }
 0x1e2   :  { %13313 = vmatmul.mubr.msk.bf16.vlgmr.msra.gmra.mxu1 %vm1520_vm2, %v592_v46  ;;  %v409_v46 = vcombine.low %v400_v34, %v408_v33  ;;  %v1049_v48 = vpack.c.bf16 %v873_v41, %v873_v41  ;;  %v263_v52 = vrot.slane %v249_v43, %v14871_v53  ;;  %v1893_v49 = vsel %vm1520_vm2, %v1048_v44, 0 }
 0x1e3   :  { %13323 = vmatpush3.bf16.xpose.msra.mxu1 %v1617_v50  ;;  %13324 = vmatprep.mubr.msk.bf16.mxu1 %vm14713_vm0, %v17669_v1  ;;  %v872_v50 = vrot.slane %v858_v42, %v14871_v53  ;;  %v599_v54 = vpack.c.bf16 %v393_v45, %v393_v45  ;;  %v424_v11 = vrot.slane %v410_v3, %v14871_v53 }
 0x1e4   :  { %13319 = vmatmul.mubr.msk.bf16.vlgmr.msra.gmra.mxu0 %vm1520_vm2, %v593_v51  ;;  %13334 = vmatprep.subr.bf16.mxu1 %v17669_v1  ;;  %v889_v51 = vrot.slane %v882_v36, %v14794_v8  ;;  %v417_v55 = vrot.slane %v409_v46, %v14871_v53  ;;  %v1939_v58 = vsel %vm1520_vm2, %v1049_v48, 0  ;;  %v434_v62 = vcombine.high %v263_v52, %v17669_v1  ;;  %v627_v48 = vpop.permute.xlu0 %626 }
 0x1e5   :  { %13329 = vmatpush3.bf16.xpose.msra.mxu0 %v1663_v60  ;;  %13330 = vmatprep.mubr.msk.bf16.mxu0 %vm14713_vm0, %v17669_v1  ;;  %v874_v60 = vcombine.high %v872_v50, %v17669_v1  ;;  %v1050_v0 = vpack.c.bf16 %v872_v50, %v872_v50  ;;  %v426_v20 = vcombine.high %v424_v11, %v17669_v1 }
 0x1e6   :  { %13340 = vmatprep.subr.bf16.mxu0 %v17669_v1  ;;  %v890_v61 = vcombine.low %v881_v56, %v889_v51  ;;  %v425_v2 = vcombine.high %v417_v55, %v17669_v1  ;;  %v600_v4 = vpack.c.bf16 %v417_v55, %v417_v55  ;;  %v891_v16 = vcombine.high %v881_v56, %v889_v51 }
 0x1e7   :  { %v1985_v9 = vsel %vm1520_vm2, %v1050_v0, 0  ;;  %v602_v22 = vpack.c.bf16 %v424_v11, %v424_v11  ;;  %v603_v19 = vpack.c.bf16 %v426_v20, %v426_v20  ;;  %v280_v46 = vcombine.low %v14877_v59, %v14885_v63 }
 0x1e8   :  { %v898_v7 = vrot.slane %v890_v61, %v14871_v53  ;;  %v601_v10 = vpack.c.bf16 %v425_v2, %v425_v2  ;;  %v905_v24 = vrot.slane %v891_v16, %v14871_v53 }
 0x1e9   :  { %v288_v50 = vrot.slane %v280_v46, %v14794_v8 }
 0x1ea   :  { %13325 = vmatmul.mubr.msk.bf16.vlgmr.msra.gmra.mxu1 %vm1520_vm2, %v594_v6  ;;  %v1051_v6 = vpack.c.bf16 %v874_v60, %v874_v60  ;;  %v906_v15 = vcombine.high %v898_v7, %v17669_v1  ;;  %v907_v27 = vcombine.high %v905_v24, %v17669_v1 }
 0x1eb   :  { %13335 = vmatpush3.bf16.xpose.msra.mxu1 %v1709_v12  ;;  %13336 = vmatprep.mubr.msk.bf16.mxu1 %vm14713_vm0, %v17669_v1  ;;  %v441_v12 = vrot.slane %v434_v62, %v14794_v8 }
 0x1ec   :  { %13331 = vmatmul.mubr.msk.bf16.vlgmr.msra.gmra.mxu0 %vm1520_vm2, %v595_v13  ;;  %13346 = vmatprep.subr.bf16.mxu1 %v17669_v1  ;;  %v433_v13 = vrot.slane %v263_v52, %v14794_v8  ;;  %v2031_v14 = vsel %vm1520_vm2, %v1051_v6, 0  ;;  %v1053_v23 = vpack.c.bf16 %v906_v15, %v906_v15  ;;  %v1055_v34 = vpack.c.bf16 %v907_v27, %v907_v27 }
 0x1ed   :  { %13341 = vmatpush3.bf16.xpose.msra.mxu0 %v1755_v17  ;;  %13342 = vmatprep.mubr.msk.bf16.mxu0 %vm14713_vm0, %v17669_v1  ;;  %v1052_v17 = vpack.c.bf16 %v898_v7, %v898_v7 }
 0x1ee   :  { %13352 = vmatprep.subr.bf16.mxu0 %v17669_v1  ;;  %v442_v21 = vcombine.low %v433_v13, %v441_v12  ;;  %v2123_v26 = vsel %vm1520_vm2, %v1053_v23, 0  ;;  %v443_v31 = vcombine.high %v433_v13, %v441_v12  ;;  %v2215_v42 = vsel %vm1520_vm2, %v1055_v34, 0 }
 0x1ef   :  { %v2077_v18 = vsel %vm1520_vm2, %v1052_v17, 0 }
 0x1f0   :  { %v457_v41 = vrot.slane %v443_v31, %v14871_v53 }
 0x1f2   :  { %13337 = vmatmul.mubr.msk.bf16.vlgmr.msra.gmra.mxu1 %vm1520_vm2, %v596_v25  ;;  %v450_v25 = vrot.slane %v442_v21, %v14871_v53  ;;  %v459_v43 = vcombine.high %v457_v41, %v17669_v1  ;;  %v606_v44 = vpack.c.bf16 %v457_v41, %v457_v41 }
 0x1f3   :  { %13347 = vmatpush3.bf16.xpose.msra.mxu1 %v1801_v29  ;;  %13348 = vmatprep.mubr.msk.bf16.mxu1 %vm14713_vm0, %v17669_v1  ;;  %v1054_v29 = vpack.c.bf16 %v905_v24, %v905_v24 }
 0x1f4   :  { %13343 = vmatmul.mubr.msk.bf16.vlgmr.msra.gmra.mxu0 %vm1520_vm2, %v597_v30  ;;  %13358 = vmatprep.subr.bf16.mxu1 %v17669_v1  ;;  %v458_v30 = vcombine.high %v450_v25, %v17669_v1  ;;  %v604_v33 = vpack.c.bf16 %v450_v25, %v450_v25  ;;  %v607_v45 = vpack.c.bf16 %v459_v43, %v459_v43 }
 0x1f5   :  { %13353 = vmatpush3.bf16.xpose.msra.mxu0 %v1847_v40  ;;  %13354 = vmatprep.mubr.msk.bf16.mxu0 %vm14713_vm0, %v17669_v1  ;;  %v2169_v36 = vsel %vm1520_vm2, %v1054_v29, 0 }
 0x1f6   :  { %13364 = vmatprep.subr.bf16.mxu0 %v17669_v1  ;;  %v605_v40 = vpack.c.bf16 %v458_v30, %v458_v30 }
 0x1fa   :  { %13349 = vmatmul.mubr.msk.bf16.vlgmr.msra.gmra.mxu1 %vm1520_vm2, %v598_v47  ;;  %v264_v47 = vcombine.low %v14838_v35, %v14875_v57 }
 0x1fb   :  { %13359 = vmatpush3.bf16.xpose.msra.mxu1 %v1893_v49  ;;  %13360 = vmatprep.mubr.msk.bf16.mxu1 %vm14713_vm0, %v17669_v1 }
 0x1fc   :  { %13355 = vmatmul.mubr.msk.bf16.vlgmr.msra.gmra.mxu0 %vm1520_vm2, %v599_v54  ;;  %13370 = vmatprep.subr.bf16.mxu1 %v17669_v1  ;;  %v272_v51 = vrot.slane %v264_v47, %v14794_v8  ;;  %v265_v47 = vcombine.high %v14838_v35, %v14875_v57 }
 0x1fd   :  { %13365 = vmatpush3.bf16.xpose.msra.mxu0 %v1939_v58  ;;  %13366 = vmatprep.mubr.msk.bf16.mxu0 %vm14713_vm0, %v17669_v1 }
 0x1fe   :  { %13376 = vmatprep.subr.bf16.mxu0 %v17669_v1  ;;  %v296_v54 = vcombine.low %v272_v51, %v288_v50  ;;  %v297_v17 = vcombine.high %v272_v51, %v288_v50 }
 0x200   :  { %v304_v60 = vrot.slane %v296_v54, %v14871_v53 }
 0x202   :  { %13361 = vmatmul.mubr.msk.bf16.vlgmr.msra.gmra.mxu1 %vm1520_vm2, %v600_v4  ;;  %v467_v3 = vcombine.high %v304_v60, %v17669_v1  ;;  %v466_v12 = vrot.slane %v304_v60, %v14794_v8  ;;  %v15109_v60 = vrot.slane %v265_v47, %v14794_v8 }
 0x203   :  { %13371 = vmatpush3.bf16.xpose.msra.mxu1 %v1985_v9  ;;  %13372 = vmatprep.mubr.msk.bf16.mxu1 %vm14713_vm0, %v17669_v1 }
 0x204   :  { %13367 = vmatmul.mubr.msk.bf16.vlgmr.msra.gmra.mxu0 %vm1520_vm2, %v601_v10  ;;  %13382 = vmatprep.subr.bf16.mxu1 %v17669_v1  ;;  %v474_v9 = vrot.slane %v467_v3, %v14794_v8 }
 0x205   :  { %13377 = vmatpush3.bf16.xpose.msra.mxu0 %v2031_v14  ;;  %13378 = vmatprep.mubr.msk.bf16.mxu0 %vm14713_vm0, %v17669_v1 }
 0x206   :  { %13388 = vmatprep.subr.bf16.mxu0 %v17669_v1  ;;  %v475_v20 = vcombine.low %v466_v12, %v474_v9  ;;  %v476_v46 = vcombine.high %v466_v12, %v474_v9 }
 0x208   :  { %v483_v27 = vrot.slane %v475_v20, %v14871_v53 }
 0x20a   :  { %13373 = vmatmul.mubr.msk.bf16.vlgmr.msra.gmra.mxu1 %vm1520_vm2, %v602_v22  ;;  %v608_v50 = vpack.c.bf16 %v483_v27, %v483_v27 }
 0x20b   :  { %13383 = vmatpush3.bf16.xpose.msra.mxu1 %v2077_v18  ;;  %13384 = vmatprep.mubr.msk.bf16.mxu1 %vm14713_vm0, %v17669_v1 }
 0x20c   :  { %13379 = vmatmul.mubr.msk.bf16.vlgmr.msra.gmra.mxu0 %vm1520_vm2, %v603_v19  ;;  %13394 = vmatprep.subr.bf16.mxu1 %v17669_v1 }
 0x20d   :  { %13389 = vmatpush3.bf16.xpose.msra.mxu0 %v2123_v26  ;;  %13390 = vmatprep.mubr.msk.bf16.mxu0 %vm14713_vm0, %v17669_v1  ;;  %v311_v26 = vrot.slane %v297_v17, %v14871_v53 }
 0x20e   :  { %13400 = vmatprep.subr.bf16.mxu0 %v17669_v1 }
 0x20f   :  { %v500_v43 = vcombine.high %v311_v26, %v17669_v1 }
 0x212   :  { %13385 = vmatmul.mubr.msk.bf16.vlgmr.msra.gmra.mxu1 %vm1520_vm2, %v604_v33 }
 0x213   :  { %13395 = vmatpush3.bf16.xpose.msra.mxu1 %v2169_v36  ;;  %13396 = vmatprep.mubr.msk.bf16.mxu1 %vm14713_vm0, %v17669_v1 }
 0x214   :  { %13391 = vmatmul.mubr.msk.bf16.vlgmr.msra.gmra.mxu0 %vm1520_vm2, %v605_v40  ;;  %13406 = vmatprep.subr.bf16.mxu1 %v17669_v1 }
 0x215   :  { %13401 = vmatpush3.bf16.xpose.msra.mxu0 %v2215_v42  ;;  %13402 = vmatprep.mubr.msk.bf16.mxu0 %vm14713_vm0, %v17669_v1  ;;  %v281_v42 = vcombine.high %v14877_v59, %v14885_v63 }
 0x216   :  { %13412 = vmatprep.subr.bf16.mxu0 %v17669_v1 }
 0x21a   :  { %13397 = vmatmul.mubr.msk.bf16.vlgmr.msra.gmra.mxu1 %vm1520_vm2, %v606_v44 }
 0x21b   :  { %13408 = vmatprep.mubr.msk.bf16.mxu1 %vm14713_vm0, %v17669_v1 }
 0x21c   :  { %13403 = vmatmul.mubr.msk.bf16.vlgmr.msra.gmra.mxu0 %vm1520_vm2, %v607_v45  ;;  %v491_v45 = vcombine.high %v483_v27, %v17669_v1 }
 0x21d   :  { %13414 = vmatprep.mubr.msk.bf16.mxu0 %vm14713_vm0, %v17669_v1 }
 0x23e   :  { %v635_v52 = vpop.permute.xlu0 %634  ;;  %v631_v49 = vpop.permute.xlu1 %630 }
 0x23f   :  { %v712_v55 = vcombine.low %v627_v48, %v635_v52  ;;  %v713_v21 = vcombine.high %v627_v48, %v635_v52 }
 0x241   :  { %v720_v61 = vrot.slane %v712_v55, %v14794_v8  ;;  %v15083_v29 = vrot.slane %v713_v21, %v14794_v8  ;;  %v609_v55 = vpack.c.bf16 %v491_v45, %v491_v45 }
 0x242   :  { %v639_v56 = vpop.permute.xlu1 %638 }
 0x243   :  { %v728_v58 = vcombine.low %v631_v49, %v639_v56  ;;  %v729_v13 = vcombine.high %v631_v49, %v639_v56  ;;  %v15102_v49 = vrot.slane %v281_v42, %v14794_v8  ;;  %v490_v56 = vrot.slane %v476_v46, %v14871_v53 }
 0x245   :  { %v736_v62 = vrot.slane %v728_v58, %v14794_v8  ;;  %v15075_v23 = vrot.slane %v729_v13, %v14794_v8  ;;  %v507_v58 = vrot.slane %v500_v43, %v14794_v8  ;;  %v313_v46 = vcombine.high %v15109_v60, %v15102_v49 }
 0x247   :  { %v744_v0 = vcombine.low %v720_v61, %v736_v62  ;;  %v745_v2 = vcombine.high %v720_v61, %v736_v62  ;;  %v760_v34 = vcombine.low %v15083_v29, %v15075_v23  ;;  %v499_v61 = vrot.slane %v311_v26, %v14794_v8 }
 0x248   :  { %v761_v21 = vcombine.high %v15083_v29, %v15075_v23 }
 0x249   :  { %v752_v4 = vrot.slane %v744_v0, %v14871_v53  ;;  %v759_v6 = vrot.slane %v745_v2, %v14871_v53  ;;  %v768_v48 = vrot.slane %v760_v34, %v14871_v53  ;;  %v508_v9 = vcombine.low %v499_v61, %v507_v58 }
 0x24a   :  { %v509_v23 = vcombine.high %v499_v61, %v507_v58  ;;  %v775_v27 = vrot.slane %v761_v21, %v14871_v53 }
 0x24b   :  { %v915_v7 = vcombine.high %v752_v4, %v17669_v1  ;;  %v914_v10 = vrot.slane %v752_v4, %v14794_v8  ;;  %v948_v14 = vcombine.high %v759_v6, %v17669_v1  ;;  %v947_v33 = vrot.slane %v759_v6, %v14794_v8 }
 0x24c   :  { %v981_v62 = vcombine.high %v768_v48, %v17669_v1  ;;  %v312_v4 = vcombine.low %v15109_v60, %v15102_v49  ;;  %v516_v17 = vrot.slane %v508_v9, %v14871_v53  ;;  %v980_v20 = vrot.slane %v768_v48, %v14794_v8 }
 0x24d   :  { %v922_v11 = vrot.slane %v915_v7, %v14794_v8  ;;  %v955_v25 = vrot.slane %v948_v14, %v14794_v8  ;;  %v492_v7 = vcombine.high %v490_v56, %v17669_v1  ;;  %v1014_v42 = vcombine.high %v775_v27, %v17669_v1 }
 0x24e   :  { %v988_v13 = vrot.slane %v981_v62, %v14794_v8  ;;  %v320_v14 = vrot.slane %v312_v4, %v14871_v53  ;;  %v524_v26 = vcombine.high %v516_v17, %v17669_v1  ;;  %v612_v29 = vpack.c.bf16 %v516_v17, %v516_v17 }
 0x24f   :  { %v923_v15 = vcombine.low %v914_v10, %v922_v11  ;;  %v924_v16 = vcombine.high %v914_v10, %v922_v11  ;;  %v956_v41 = vcombine.low %v947_v33, %v955_v25  ;;  %v957_v3 = vcombine.high %v947_v33, %v955_v25 }
 0x250   :  { %v610_v10 = vpack.c.bf16 %v490_v56, %v490_v56  ;;  %v613_v34 = vpack.c.bf16 %v524_v26, %v524_v26  ;;  %v990_v45 = vcombine.high %v980_v20, %v988_v13  ;;  %v327_v56 = vrot.slane %v313_v46, %v14871_v53 }
 0x251   :  { %v931_v22 = vrot.slane %v923_v15, %v14871_v53  ;;  %v938_v19 = vrot.slane %v924_v16, %v14871_v53  ;;  %v964_v52 = vrot.slane %v956_v41, %v14871_v53  ;;  %v971_v12 = vrot.slane %v957_v3, %v14871_v53 }
 0x252   :  { %v611_v16 = vpack.c.bf16 %v492_v7, %v492_v7  ;;  %v532_v41 = vrot.slane %v320_v14, %v14794_v8  ;;  %v1013_v61 = vrot.slane %v775_v27, %v14794_v8  ;;  %v566_v3 = vcombine.high %v327_v56, %v17669_v1 }
 0x253   :  { %v1056_v24 = vpack.c.bf16 %v931_v22, %v931_v22  ;;  %v939_v18 = vcombine.high %v931_v22, %v17669_v1  ;;  %v940_v40 = vcombine.high %v938_v19, %v17669_v1  ;;  %v1058_v44 = vpack.c.bf16 %v938_v19, %v938_v19 }
 0x254   :  { %v972_v2 = vcombine.high %v964_v52, %v17669_v1  ;;  %v1060_v6 = vpack.c.bf16 %v964_v52, %v964_v52  ;;  %v533_v19 = vcombine.high %v320_v14, %v17669_v1  ;;  %v1062_v25 = vpack.c.bf16 %v971_v12, %v971_v12 }
 0x255   :  { %v2261_v30 = vsel %vm1520_vm2, %v1056_v24, 0  ;;  %v1057_v31 = vpack.c.bf16 %v939_v18, %v939_v18  ;;  %v1059_v51 = vpack.c.bf16 %v940_v40, %v940_v40  ;;  %v2353_v54 = vsel %vm1520_vm2, %v1058_v44, 0 }
 0x256   :  { %13407 = vmatpush3.bf16.xpose.msra.mxu1 %v2261_v30  ;;  %v1061_v11 = vpack.c.bf16 %v972_v2, %v972_v2  ;;  %v2445_v15 = vsel %vm1520_vm2, %v1060_v6, 0  ;;  %v973_v24 = vcombine.high %v971_v12, %v17669_v1  ;;  %v989_v18 = vcombine.low %v980_v20, %v988_v13 }
 0x257   :  { %v2307_v36 = vsel %vm1520_vm2, %v1057_v31, 0  ;;  %13418 = vmatprep.subr.bf16.mxu1 %v17669_v1  ;;  %v2399_v0 = vsel %vm1520_vm2, %v1059_v51, 0  ;;  %v2537_v33 = vsel %vm1520_vm2, %v1062_v25, 0  ;;  %v540_v40 = vrot.slane %v533_v19, %v14794_v8 }
 0x258   :  { %13413 = vmatpush3.bf16.xpose.msra.mxu0 %v2307_v36  ;;  %v2491_v22 = vsel %vm1520_vm2, %v1061_v11, 0  ;;  %v1063_v30 = vpack.c.bf16 %v973_v24, %v973_v24  ;;  %v997_v31 = vrot.slane %v989_v18, %v14871_v53  ;;  %v523_v36 = vrot.slane %v509_v23, %v14871_v53 }
 0x259   :  { %13424 = vmatprep.subr.bf16.mxu0 %v17669_v1  ;;  %v542_v7 = vcombine.high %v532_v41, %v540_v40 }
 0x25a   :  { %v2583_v43 = vsel %vm1520_vm2, %v1063_v30, 0  ;;  %v1005_v44 = vcombine.high %v997_v31, %v17669_v1  ;;  %v1064_v47 = vpack.c.bf16 %v997_v31, %v997_v31  ;;  %v525_v48 = vcombine.high %v523_v36, %v17669_v1 }
 0x25b   :  { %v614_v51 = vpack.c.bf16 %v523_v36, %v523_v36  ;;  %v556_v14 = vrot.slane %v542_v7, %v14871_v53 }
 0x25c   :  { %v1065_v52 = vpack.c.bf16 %v1005_v44, %v1005_v44  ;;  %v2629_v49 = vsel %vm1520_vm2, %v1064_v47, 0  ;;  %v615_v58 = vpack.c.bf16 %v525_v48, %v525_v48 }
 0x25d   :  { %13409 = vmatmul.mubr.msk.bf16.vlgmr.msra.gmra.mxu1 %vm1520_vm2, %v608_v50  ;;  %v541_v50 = vcombine.low %v532_v41, %v540_v40  ;;  %v558_v24 = vcombine.high %v556_v14, %v17669_v1  ;;  %v618_v19 = vpack.c.bf16 %v556_v14, %v556_v14 }
 0x25e   :  { %13419 = vmatpush3.bf16.xpose.msra.mxu1 %v2353_v54  ;;  %13420 = vmatprep.mubr.msk.bf16.mxu1 %vm14713_vm0, %v17669_v1  ;;  %v1004_v54 = vrot.slane %v990_v45, %v14871_v53  ;;  %v2675_v62 = vsel %vm1520_vm2, %v1065_v52, 0 }
 0x25f   :  { %13415 = vmatmul.mubr.msk.bf16.vlgmr.msra.gmra.mxu0 %vm1520_vm2, %v609_v55  ;;  %13430 = vmatprep.subr.bf16.mxu1 %v17669_v1  ;;  %v1021_v55 = vrot.slane %v1014_v42, %v14794_v8  ;;  %v549_v60 = vrot.slane %v541_v50, %v14871_v53  ;;  %v619_v27 = vpack.c.bf16 %v558_v24, %v558_v24 }
 0x260   :  { %13425 = vmatpush3.bf16.xpose.msra.mxu0 %v2399_v0  ;;  %13426 = vmatprep.mubr.msk.bf16.mxu0 %vm14713_vm0, %v17669_v1  ;;  %v1006_v0 = vcombine.high %v1004_v54, %v17669_v1  ;;  %v1066_v4 = vpack.c.bf16 %v1004_v54, %v1004_v54 }
 0x261   :  { %13436 = vmatprep.subr.bf16.mxu0 %v17669_v1  ;;  %v1022_v2 = vcombine.low %v1013_v61, %v1021_v55  ;;  %v557_v6 = vcombine.high %v549_v60, %v17669_v1  ;;  %v616_v9 = vpack.c.bf16 %v549_v60, %v549_v60  ;;  %v1023_v21 = vcombine.high %v1013_v61, %v1021_v55 }
 0x262   :  { %v2721_v12 = vsel %vm1520_vm2, %v1066_v4, 0 }
 0x263   :  { %v1030_v11 = vrot.slane %v1022_v2, %v14871_v53  ;;  %v617_v13 = vpack.c.bf16 %v557_v6, %v557_v6  ;;  %v1037_v26 = vrot.slane %v1023_v21, %v14871_v53 }
 0x265   :  { %13421 = vmatmul.mubr.msk.bf16.vlgmr.msra.gmra.mxu1 %vm1520_vm2, %v610_v10  ;;  %v1067_v10 = vpack.c.bf16 %v1006_v0, %v1006_v0  ;;  %v1038_v20 = vcombine.high %v1030_v11, %v17669_v1  ;;  %v1039_v31 = vcombine.high %v1037_v26, %v17669_v1 }
 0x266   :  { %13431 = vmatpush3.bf16.xpose.msra.mxu1 %v2445_v15  ;;  %13432 = vmatprep.mubr.msk.bf16.mxu1 %vm14713_vm0, %v17669_v1  ;;  %v573_v15 = vrot.slane %v566_v3, %v14794_v8 }
 0x267   :  { %13427 = vmatmul.mubr.msk.bf16.vlgmr.msra.gmra.mxu0 %vm1520_vm2, %v611_v16  ;;  %13442 = vmatprep.subr.bf16.mxu1 %v17669_v1  ;;  %v565_v16 = vrot.slane %v327_v56, %v14794_v8  ;;  %v2767_v17 = vsel %vm1520_vm2, %v1067_v10, 0  ;;  %v1069_v25 = vpack.c.bf16 %v1038_v20, %v1038_v20  ;;  %v1071_v41 = vpack.c.bf16 %v1039_v31, %v1039_v31 }
 0x268   :  { %13437 = vmatpush3.bf16.xpose.msra.mxu0 %v2491_v22  ;;  %13438 = vmatprep.mubr.msk.bf16.mxu0 %vm14713_vm0, %v17669_v1  ;;  %v1068_v22 = vpack.c.bf16 %v1030_v11, %v1030_v11 }
 0x269   :  { %13448 = vmatprep.subr.bf16.mxu0 %v17669_v1  ;;  %v574_v18 = vcombine.low %v565_v16, %v573_v15  ;;  %v2859_v30 = vsel %vm1520_vm2, %v1069_v25, 0  ;;  %v575_v36 = vcombine.high %v565_v16, %v573_v15  ;;  %v2951_v45 = vsel %vm1520_vm2, %v1071_v41, 0 }
 0x26a   :  { %v2813_v23 = vsel %vm1520_vm2, %v1068_v22, 0 }
 0x26b   :  { %v589_v44 = vrot.slane %v575_v36, %v14871_v53 }
 0x26d   :  { %13433 = vmatmul.mubr.msk.bf16.vlgmr.msra.gmra.mxu1 %vm1520_vm2, %v612_v29  ;;  %v582_v29 = vrot.slane %v574_v18, %v14871_v53  ;;  %v591_v46 = vcombine.high %v589_v44, %v17669_v1  ;;  %v622_v47 = vpack.c.bf16 %v589_v44, %v589_v44 }
 0x26e   :  { %13443 = vmatpush3.bf16.xpose.msra.mxu1 %v2537_v33  ;;  %13444 = vmatprep.mubr.msk.bf16.mxu1 %vm14713_vm0, %v17669_v1  ;;  %v1070_v33 = vpack.c.bf16 %v1037_v26, %v1037_v26 }
 0x26f   :  { %13439 = vmatmul.mubr.msk.bf16.vlgmr.msra.gmra.mxu0 %vm1520_vm2, %v613_v34  ;;  %13454 = vmatprep.subr.bf16.mxu1 %v17669_v1  ;;  %v590_v34 = vcombine.high %v582_v29, %v17669_v1  ;;  %v620_v40 = vpack.c.bf16 %v582_v29, %v582_v29  ;;  %v623_v48 = vpack.c.bf16 %v591_v46, %v591_v46 }
 0x270   :  { %13449 = vmatpush3.bf16.xpose.msra.mxu0 %v2583_v43  ;;  %13450 = vmatprep.mubr.msk.bf16.mxu0 %vm14713_vm0, %v17669_v1  ;;  %v2905_v42 = vsel %vm1520_vm2, %v1070_v33, 0 }
 0x271   :  { %13460 = vmatprep.subr.bf16.mxu0 %v17669_v1  ;;  %v621_v43 = vpack.c.bf16 %v590_v34, %v590_v34 }
 0x275   :  { %13445 = vmatmul.mubr.msk.bf16.vlgmr.msra.gmra.mxu1 %vm1520_vm2, %v614_v51 }
 0x276   :  { %13455 = vmatpush3.bf16.xpose.msra.mxu1 %v2629_v49  ;;  %13456 = vmatprep.mubr.msk.bf16.mxu1 %vm14713_vm0, %v17669_v1 }
 0x277   :  { %13451 = vmatmul.mubr.msk.bf16.vlgmr.msra.gmra.mxu0 %vm1520_vm2, %v615_v58  ;;  %13466 = vmatprep.subr.bf16.mxu1 %v17669_v1 }
 0x278   :  { %13461 = vmatpush3.bf16.xpose.msra.mxu0 %v2675_v62  ;;  %13462 = vmatprep.mubr.msk.bf16.mxu0 %vm14713_vm0, %v17669_v1 }
 0x279   :  { %13472 = vmatprep.subr.bf16.mxu0 %v17669_v1 }
 0x27d   :  { %13457 = vmatmul.mubr.msk.bf16.vlgmr.msra.gmra.mxu1 %vm1520_vm2, %v616_v9 }
 0x27e   :  { %13467 = vmatpush3.bf16.xpose.msra.mxu1 %v2721_v12  ;;  %13468 = vmatprep.mubr.msk.bf16.mxu1 %vm14713_vm0, %v17669_v1 }
 0x27f   :  { %13463 = vmatmul.mubr.msk.bf16.vlgmr.msra.gmra.mxu0 %vm1520_vm2, %v617_v13  ;;  %13478 = vmatprep.subr.bf16.mxu1 %v17669_v1 }
 0x280   :  { %13473 = vmatpush3.bf16.xpose.msra.mxu0 %v2767_v17  ;;  %13474 = vmatprep.mubr.msk.bf16.mxu0 %vm14713_vm0, %v17669_v1 }
 0x281   :  { %13484 = vmatprep.subr.bf16.mxu0 %v17669_v1 }
 0x285   :  { %13469 = vmatmul.mubr.msk.bf16.vlgmr.msra.gmra.mxu1 %vm1520_vm2, %v618_v19 }
 0x286   :  { %13479 = vmatpush3.bf16.xpose.msra.mxu1 %v2813_v23  ;;  %13480 = vmatprep.mubr.msk.bf16.mxu1 %vm14713_vm0, %v17669_v1 }
 0x287   :  { %13475 = vmatmul.mubr.msk.bf16.vlgmr.msra.gmra.mxu0 %vm1520_vm2, %v619_v27  ;;  %13490 = vmatprep.subr.bf16.mxu1 %v17669_v1 }
 0x288   :  { %13485 = vmatpush3.bf16.xpose.msra.mxu0 %v2859_v30  ;;  %13486 = vmatprep.mubr.msk.bf16.mxu0 %vm14713_vm0, %v17669_v1 }
 0x289   :  { %13496 = vmatprep.subr.bf16.mxu0 %v17669_v1 }
 0x28d   :  { %13481 = vmatmul.mubr.msk.bf16.vlgmr.msra.gmra.mxu1 %vm1520_vm2, %v620_v40 }
 0x28e   :  { %13491 = vmatpush3.bf16.xpose.msra.mxu1 %v2905_v42  ;;  %13492 = vmatprep.mubr.msk.bf16.mxu1 %vm14713_vm0, %v17669_v1 }
 0x28f   :  { %13487 = vmatmul.mubr.msk.bf16.vlgmr.msra.gmra.mxu0 %vm1520_vm2, %v621_v43  ;;  %13502 = vmatprep.subr.bf16.mxu1 %v17669_v1 }
 0x290   :  { %13497 = vmatpush3.bf16.xpose.msra.mxu0 %v2951_v45  ;;  %13498 = vmatprep.mubr.msk.bf16.mxu0 %vm14713_vm0, %v17669_v1 }
 0x291   :  { %13508 = vmatprep.subr.bf16.mxu0 %v17669_v1 }
 0x295   :  { %13493 = vmatmul.mubr.msk.bf16.vlgmr.msra.gmra.mxu1 %vm1520_vm2, %v622_v47 }
 0x296   :  { %13504 = vmatprep.mubr.msk.bf16.mxu1 %vm14713_vm0, %v17669_v1 }
 0x297   :  { %13499 = vmatmul.mubr.msk.bf16.vlgmr.msra.gmra.mxu0 %vm1520_vm2, %v623_v48 }
 0x298   :  { %13510 = vmatprep.mubr.msk.bf16.mxu0 %vm14713_vm0, %v17669_v1 }
 0x2a2   :  { %v15231_v50 = vpop.f32.mrf.mxu1 }
 0x2a3   :  { %3025 = vrot.lane.b32.xlu0 %v15231_v50, %s14720_s13 }
 0x2a4   :  { %v13314_v51 = vpop.f32.mrf.mxu1  ;;  %v15235_v52 = vpop.f32.mrf.mxu0 }
 0x2a5   :  { %3027 = vrot.lane.b32.xlu1 %v15235_v52, %s14720_s13 }
 0x2a6   :  { %v1564_v54 = vpop.f32.mrf.mxu1  ;;  %v13320_v55 = vpop.f32.mrf.mxu0 }
 0x2a8   :  { %v13315_v56 = vpop.f32.mrf.mxu1  ;;  %v1610_v49 = vpop.f32.mrf.mxu0 }
 0x2aa   :  { %v13321_v58 = vpop.f32.mrf.mxu0  ;;  %v15239_v60 = vpop.f32.mrf.mxu1 }
 0x2ab   :  { %3029 = vrot.lane.b32.xlu0 %v15239_v60, %s14720_s13 }
 0x2ac   :  { %v13326_v61 = vpop.f32.mrf.mxu1  ;;  %v15243_v62 = vpop.f32.mrf.mxu0 }
 0x2ad   :  { %3031 = vrot.lane.b32.xlu1 %v15243_v62, %s14720_s13 }
 0x2ae   :  { %v1656_v0 = vpop.f32.mrf.mxu1  ;;  %v13332_v2 = vpop.f32.mrf.mxu0 }
 0x2b0   :  { %v13327_v3 = vpop.f32.mrf.mxu1  ;;  %v1702_v4 = vpop.f32.mrf.mxu0 }
 0x2b2   :  { %v13333_v6 = vpop.f32.mrf.mxu0  ;;  %v15247_v7 = vpop.f32.mrf.mxu1 }
 0x2b3   :  { %3033 = vrot.lane.b32.xlu0 %v15247_v7, %s14720_s13 }
 0x2b4   :  { %v13338_v9 = vpop.f32.mrf.mxu1  ;;  %v15251_v10 = vpop.f32.mrf.mxu0 }
 0x2b5   :  { %3035 = vrot.lane.b32.xlu1 %v15251_v10, %s14720_s13 }
 0x2b6   :  { %v1748_v11 = vpop.f32.mrf.mxu1  ;;  %v13344_v12 = vpop.f32.mrf.mxu0 }
 0x2b8   :  { %v13339_v13 = vpop.f32.mrf.mxu1  ;;  %v1794_v14 = vpop.f32.mrf.mxu0 }
 0x2ba   :  { %v13345_v15 = vpop.f32.mrf.mxu0  ;;  %v15255_v16 = vpop.f32.mrf.mxu1 }
 0x2bb   :  { %3037 = vrot.lane.b32.xlu0 %v15255_v16, %s14720_s13 }
 0x2bc   :  { %v13350_v17 = vpop.f32.mrf.mxu1  ;;  %v15259_v20 = vpop.f32.mrf.mxu0 }
 0x2bd   :  { %3039 = vrot.lane.b32.xlu1 %v15259_v20, %s14720_s13 }
 0x2be   :  { %v1840_v21 = vpop.f32.mrf.mxu1  ;;  %v13356_v22 = vpop.f32.mrf.mxu0 }
 0x2c0   :  { %v13351_v24 = vpop.f32.mrf.mxu1  ;;  %v1886_v18 = vpop.f32.mrf.mxu0 }
 0x2c2   :  { %v13357_v19 = vpop.f32.mrf.mxu0  ;;  %v15263_v25 = vpop.f32.mrf.mxu1 }
 0x2c3   :  { %3041 = vrot.lane.b32.xlu0 %v15263_v25, %s14720_s13 }
 0x2c4   :  { %v13362_v26 = vpop.f32.mrf.mxu1  ;;  %v15267_v23 = vpop.f32.mrf.mxu0 }
 0x2c5   :  { %3043 = vrot.lane.b32.xlu1 %v15267_v23, %s14720_s13 }
 0x2c6   :  { %v1932_v27 = vpop.f32.mrf.mxu1  ;;  %v13368_v29 = vpop.f32.mrf.mxu0 }
 0x2c8   :  { %v13363_v30 = vpop.f32.mrf.mxu1  ;;  %v1978_v31 = vpop.f32.mrf.mxu0 }
 0x2ca   :  { %v13369_v33 = vpop.f32.mrf.mxu0  ;;  %v15271_v34 = vpop.f32.mrf.mxu1 }
 0x2cb   :  { %3045 = vrot.lane.b32.xlu0 %v15271_v34, %s14720_s13 }
 0x2cc   :  { %v13374_v36 = vpop.f32.mrf.mxu1  ;;  %v15275_v40 = vpop.f32.mrf.mxu0 }
 0x2cd   :  { %3047 = vrot.lane.b32.xlu1 %v15275_v40, %s14720_s13 }
 0x2ce   :  { %v2024_v41 = vpop.f32.mrf.mxu1  ;;  %v13380_v42 = vpop.f32.mrf.mxu0 }
 0x2d0   :  { %v13375_v43 = vpop.f32.mrf.mxu1  ;;  %v2070_v44 = vpop.f32.mrf.mxu0 }
 0x2d2   :  { %v13381_v45 = vpop.f32.mrf.mxu0  ;;  %v15279_v46 = vpop.f32.mrf.mxu1 }
 0x2d3   :  { %3049 = vrot.lane.b32.xlu0 %v15279_v46, %s14720_s13 }
 0x2d4   :  { %v13386_v47 = vpop.f32.mrf.mxu1  ;;  %v15283_v48 = vpop.f32.mrf.mxu0 }
 0x2d5   :  { %3051 = vrot.lane.b32.xlu1 %v15283_v48, %s14720_s13 }
 0x2d6   :  { %v2116_v51 = vpop.f32.mrf.mxu1  ;;  %v13392_v54 = vpop.f32.mrf.mxu0 }
 0x2d8   :  { %v13387_v55 = vpop.f32.mrf.mxu1  ;;  %v2162_v56 = vpop.f32.mrf.mxu0 }
 0x2da   :  { %v13393_v49 = vpop.f32.mrf.mxu0  ;;  %v15287_v58 = vpop.f32.mrf.mxu1 }
 0x2db   :  { %3053 = vrot.lane.b32.xlu0 %v15287_v58, %s14720_s13 }
 0x2dc   :  { %v13398_v61 = vpop.f32.mrf.mxu1  ;;  %v15291_v0 = vpop.f32.mrf.mxu0 }
 0x2dd   :  { %3055 = vrot.lane.b32.xlu1 %v15291_v0, %s14720_s13 }
 0x2de   :  { %v2208_v2 = vpop.f32.mrf.mxu1  ;;  %v13404_v3 = vpop.f32.mrf.mxu0 }
 0x2e0   :  { %v13399_v4 = vpop.f32.mrf.mxu1  ;;  %v2254_v6 = vpop.f32.mrf.mxu0 }
 0x2e2   :  { %v13405_v9 = vpop.f32.mrf.mxu0 }
 0x315   :  { %v3026_v11 = vpop.permute.xlu0 %3025 }
 0x316   :  { %v3121_v12 = vsub.f32 %v15231_v50, %v3026_v11 }
 0x317   :  { %v3028_v13 = vpop.permute.xlu1 %3027 }
 0x318   :  { %v3153_v14 = vsub.f32 0.0, %v3121_v12  ;;  %v3122_v15 = vsub.f32 %v15235_v52, %v3028_v13 }
 0x31a   :  { %v3185_v17 = vmul.f32 1.442695, %v3153_v14  ;;  %v3154_v21 = vsub.f32 0.0, %v3122_v15 }
 0x31c   :  { %14383 = vpow2.f32 %v3185_v17  ;;  %v3187_v24 = vmul.f32 1.442695, %v3154_v21 }
 0x31d   :  { %v15297_v22 = vpop.f32.mrf.mxu1  ;;  %v3030_v18 = vpop.permute.xlu0 %3029 }
 0x31e   :  { %3057 = vrot.lane.b32.xlu0 %v15297_v22, %s14720_s13  ;;  %14385 = vpow2.f32 %v3187_v24  ;;  %v3123_v26 = vsub.f32 %v15239_v60, %v3030_v18 }
 0x31f   :  { %v13410_v19 = vpop.f32.mrf.mxu1  ;;  %v15302_v27 = vpop.f32.mrf.mxu0 }
 0x320   :  { %v3032_v50 = vpop.permute.xlu1 %3031  ;;  %3059 = vrot.lane.b32.xlu1 %v15302_v27, %s14720_s13  ;;  %v3155_v29 = vsub.f32 0.0, %v3123_v26 }
 0x321   :  { %v2300_v52 = vpop.f32.mrf.mxu1  ;;  %v3124_v30 = vsub.f32 %v15243_v62, %v3032_v50  ;;  %v13416_v31 = vpop.f32.mrf.mxu0 }
 0x322   :  { %1072 = vrot.lane.b32.xlu0 %v14832_v32, %s14721_s14  ;;  %v3189_v36 = vmul.f32 1.442695, %v3155_v29 }
 0x323   :  { %v13411_v33 = vpop.f32.mrf.mxu1  ;;  %v3156_v41 = vsub.f32 0.0, %v3124_v30  ;;  %v2346_v42 = vpop.f32.mrf.mxu0 }
 0x324   :  { %1076 = vrot.lane.b32.xlu1 %v14844_v37, %s14721_s14  ;;  %14387 = vpow2.f32 %v3189_v36 }
 0x325   :  { %v15311_v60 = vpop.f32.mrf.mxu1  ;;  %v3191_v43 = vmul.f32 1.442695, %v3156_v41  ;;  %v13417_v44 = vpop.f32.mrf.mxu0 }
 0x326   :  { %3061 = vrot.lane.b32.xlu0 %v15311_v60, %s14720_s13  ;;  %v3034_v62 = vpop.permute.xlu0 %3033 }
 0x327   :  { %v13422_v45 = vpop.f32.mrf.mxu1  ;;  %14389 = vpow2.f32 %v3191_v43  ;;  %v3125_v32 = vsub.f32 %v15247_v7, %v3034_v62  ;;  %v15316_v47 = vpop.f32.mrf.mxu0 }
 0x328   :  { %v3036_v51 = vpop.permute.xlu1 %3035  ;;  %3063 = vrot.lane.b32.xlu1 %v15316_v47, %s14720_s13 }
 0x329   :  { %v2392_v37 = vpop.f32.mrf.mxu1  ;;  %v3157_v54 = vsub.f32 0.0, %v3125_v32  ;;  %v3126_v55 = vsub.f32 %v15251_v10, %v3036_v51  ;;  %v13428_v56 = vpop.f32.mrf.mxu0 }
 0x32a   :  { %1080 = vrot.lane.b32.xlu0 %v14850_v39, %s14721_s14  ;;  %v14384_v49 = vpop.eup %14383 }
 0x32b   :  { %v13423_v61 = vpop.f32.mrf.mxu1  ;;  %v3249_v2 = vadd.f32 1.0, %v14384_v49  ;;  %v3193_v3 = vmul.f32 1.442695, %v3157_v54  ;;  %v3158_v4 = vsub.f32 0.0, %v3126_v55  ;;  %v2438_v7 = vpop.f32.mrf.mxu0 }
 0x32c   :  { %v14386_v6 = vpop.eup %14385  ;;  %1084 = vrot.lane.b32.xlu1 %v14848_v38, %s14721_s14 }
 0x32d   :  { %v15325_v9 = vpop.f32.mrf.mxu1  ;;  %14391 = vrcp.f32 %v3249_v2  ;;  %v3250_v11 = vadd.f32 1.0, %v14386_v6  ;;  %v3195_v12 = vmul.f32 1.442695, %v3158_v4  ;;  %v13429_v10 = vpop.f32.mrf.mxu0 }
 0x32e   :  { %3065 = vrot.lane.b32.xlu0 %v15325_v9, %s14720_s13  ;;  %14393 = vpow2.f32 %v3193_v3  ;;  %v3038_v39 = vpop.permute.xlu0 %3037 }
 0x32f   :  { %v13434_v13 = vpop.f32.mrf.mxu1  ;;  %14395 = vrcp.f32 %v3250_v11  ;;  %v3127_v14 = vsub.f32 %v15255_v16, %v3038_v39  ;;  %v15330_v15 = vpop.f32.mrf.mxu0 }
 0x330   :  { %14397 = vpow2.f32 %v3195_v12  ;;  %v3040_v17 = vpop.permute.xlu1 %3039  ;;  %3067 = vrot.lane.b32.xlu1 %v15330_v15, %s14720_s13 }
 0x331   :  { %v2484_v38 = vpop.f32.mrf.mxu1  ;;  %v3159_v21 = vsub.f32 0.0, %v3127_v14  ;;  %v3128_v24 = vsub.f32 %v15259_v20, %v3040_v17  ;;  %v13440_v18 = vpop.f32.mrf.mxu0 }
 0x332   :  { %v14388_v19 = vpop.eup %14387 }
 0x333   :  { %v13435_v26 = vpop.f32.mrf.mxu1  ;;  %v3251_v50 = vadd.f32 1.0, %v14388_v19  ;;  %v3197_v52 = vmul.f32 1.442695, %v3159_v21  ;;  %v3160_v29 = vsub.f32 0.0, %v3128_v24  ;;  %v2530_v30 = vpop.f32.mrf.mxu0 }
 0x334   :  { %v14390_v31 = vpop.eup %14389 }
 0x335   :  { %v15335_v16 = vpop.f32.mrf.mxu1  ;;  %14399 = vrcp.f32 %v3251_v50  ;;  %v3252_v33 = vadd.f32 1.0, %v14390_v31  ;;  %v3199_v36 = vmul.f32 1.442695, %v3160_v29  ;;  %v13441_v41 = vpop.f32.mrf.mxu0 }
 0x336   :  { %3069 = vrot.lane.b32.xlu0 %v15335_v16, %s14720_s13  ;;  %14401 = vpow2.f32 %v3197_v52  ;;  %v3042_v42 = vpop.permute.xlu0 %3041 }
 0x337   :  { %v13446_v20 = vpop.f32.mrf.mxu1  ;;  %14403 = vrcp.f32 %v3252_v33  ;;  %v3129_v43 = vsub.f32 %v15263_v25, %v3042_v42  ;;  %v15340_v44 = vpop.f32.mrf.mxu0 }
 0x338   :  { %14405 = vpow2.f32 %v3199_v36  ;;  %v3044_v62 = vpop.permute.xlu1 %3043  ;;  %3071 = vrot.lane.b32.xlu1 %v15340_v44, %s14720_s13 }
 0x339   :  { %v2576_v45 = vpop.f32.mrf.mxu1  ;;  %v3161_v32 = vsub.f32 0.0, %v3129_v43  ;;  %v3130_v51 = vsub.f32 %v15267_v23, %v3044_v62  ;;  %v13452_v37 = vpop.f32.mrf.mxu0 }
 0x33a   :  { %v15345_v54 = vpop.eup %14391 }
 0x33b   :  { %v13447_v55 = vpop.f32.mrf.mxu1  ;;  %v14394_v56 = vpop.eup %14393  ;;  %v3201_v49 = vmul.f32 1.442695, %v3161_v32  ;;  %v3162_v61 = vsub.f32 0.0, %v3130_v51  ;;  %v3313_v23 = vsub.f32 1.0, %v15345_v54 }
 0x33c   :  { %v2622_v2 = vpop.f32.mrf.mxu0  ;;  %v15347_v25 = vpop.eup %14395  ;;  %v3253_v3 = vadd.f32 1.0, %v14394_v56 }
 0x33d   :  { %v15349_v4 = vpop.f32.mrf.mxu1  ;;  %v14398_v7 = vpop.eup %14397  ;;  %14407 = vpow2.f32 %v3201_v49  ;;  %v3203_v6 = vmul.f32 1.442695, %v3162_v61  ;;  %v3314_v12 = vsub.f32 1.0, %v15347_v25 }
 0x33e   :  { %v13453_v11 = vpop.f32.mrf.mxu0  ;;  %3073 = vrot.lane.b32.xlu0 %v15349_v4, %s14720_s13  ;;  %14409 = vrcp.f32 %v3253_v3  ;;  %v3254_v10 = vadd.f32 1.0, %v14398_v7  ;;  %v3046_v39 = vpop.permute.xlu0 %3045 }
 0x33f   :  { %v13458_v13 = vpop.f32.mrf.mxu1  ;;  %14411 = vpow2.f32 %v3203_v6  ;;  %v3131_v14 = vsub.f32 %v15271_v34, %v3046_v39  ;;  %v14171_v38 = vpack.i.bf16 %v3314_v12, %v3313_v23  ;;  %v3048_v21 = vpop.permute.xlu1 %3047 }
 0x340   :  { %v15356_v17 = vpop.f32.mrf.mxu0  ;;  %14413 = vrcp.f32 %v3254_v10  ;;  %v3132_v19 = vsub.f32 %v15275_v40, %v3048_v21 }
 0x341   :  { %3075 = vrot.lane.b32.xlu1 %v15356_v17, %s14720_s13  ;;  %v2668_v24 = vpop.f32.mrf.mxu1  ;;  %v3163_v18 = vsub.f32 0.0, %v3131_v14 }
 0x342   :  { %v13464_v26 = vpop.f32.mrf.mxu0  ;;  %14172 = vrot.lane.b32.xlu0 %v14171_v38, %s14722_s15  ;;  %v15362_v50 = vpop.eup %14399  ;;  %v3164_v30 = vsub.f32 0.0, %v3132_v19 }
 0x343   :  { %v13459_v52 = vpop.f32.mrf.mxu1  ;;  %v14402_v34 = vpop.eup %14401  ;;  %v3205_v29 = vmul.f32 1.442695, %v3163_v18  ;;  %v3315_v43 = vsub.f32 1.0, %v15362_v50 }
 0x344   :  { %v2714_v31 = vpop.f32.mrf.mxu0  ;;  %v15364_v33 = vpop.eup %14403  ;;  %v3255_v36 = vadd.f32 1.0, %v14402_v34  ;;  %v3207_v20 = vmul.f32 1.442695, %v3164_v30 }
 0x345   :  { %v15366_v41 = vpop.f32.mrf.mxu1  ;;  %v14406_v42 = vpop.eup %14405  ;;  %14415 = vpow2.f32 %v3205_v29  ;;  %v3316_v62 = vsub.f32 1.0, %v15364_v33 }
 0x346   :  { %v13465_v40 = vpop.f32.mrf.mxu0  ;;  %3077 = vrot.lane.b32.xlu1 %v15366_v41, %s14720_s13  ;;  %14417 = vrcp.f32 %v3255_v36  ;;  %v3256_v45 = vadd.f32 1.0, %v14406_v42  ;;  %v3050_v32 = vpop.permute.xlu0 %3049 }
 0x347   :  { %v13470_v51 = vpop.f32.mrf.mxu1  ;;  %14419 = vpow2.f32 %v3207_v20  ;;  %v3133_v37 = vsub.f32 %v15279_v46, %v3050_v32  ;;  %v14176_v56 = vpack.i.bf16 %v3316_v62, %v3315_v43  ;;  %v3052_v49 = vpop.permute.xlu1 %3051 }
 0x348   :  { %v15373_v55 = vpop.f32.mrf.mxu0  ;;  %14421 = vrcp.f32 %v3256_v45  ;;  %v3134_v3 = vsub.f32 %v15283_v48, %v3052_v49 }
 0x349   :  { %3079 = vrot.lane.b32.xlu0 %v15373_v55, %s14720_s13  ;;  %v2760_v61 = vpop.f32.mrf.mxu1  ;;  %v3165_v2 = vsub.f32 0.0, %v3133_v37 }
 0x34a   :  { %v13476_v7 = vpop.f32.mrf.mxu0  ;;  %14177 = vrot.lane.b32.xlu1 %v14176_v56, %s14722_s15  ;;  %v14408_v6 = vpop.eup %14407  ;;  %v3166_v10 = vsub.f32 0.0, %v3134_v3 }
 0x34b   :  { %v13471_v11 = vpop.f32.mrf.mxu1  ;;  %v15379_v23 = vpop.eup %14409  ;;  %v3257_v46 = vadd.f32 1.0, %v14408_v6  ;;  %v3209_v12 = vmul.f32 1.442695, %v3165_v2 }
 0x34c   :  { %v2806_v39 = vpop.f32.mrf.mxu0  ;;  %v14412_v13 = vpop.eup %14411  ;;  %v3211_v24 = vmul.f32 1.442695, %v3166_v10  ;;  %v3317_v26 = vsub.f32 1.0, %v15379_v23 }
 0x34d   :  { %v15381_v14 = vpop.f32.mrf.mxu1  ;;  %v15383_v38 = vpop.eup %14413  ;;  %14423 = vrcp.f32 %v3257_v46  ;;  %v3258_v21 = vadd.f32 1.0, %v14412_v13 }
 0x34e   :  { %v13477_v48 = vpop.f32.mrf.mxu0  ;;  %3081 = vrot.lane.b32.xlu0 %v15381_v14, %s14720_s13  ;;  %14425 = vpow2.f32 %v3209_v12  ;;  %v3054_v18 = vpop.permute.xlu0 %3053  ;;  %v3318_v52 = vsub.f32 1.0, %v15383_v38 }
 0x34f   :  { %v13482_v19 = vpop.f32.mrf.mxu1  ;;  %14427 = vrcp.f32 %v3258_v21  ;;  %v3135_v34 = vsub.f32 %v15287_v58, %v3054_v18  ;;  %v3056_v30 = vpop.permute.xlu1 %3055 }
 0x350   :  { %v15390_v29 = vpop.f32.mrf.mxu0  ;;  %14429 = vpow2.f32 %v3211_v24  ;;  %v14181_v36 = vpack.i.bf16 %v3318_v52, %v3317_v26  ;;  %v3136_v20 = vsub.f32 %v15291_v0, %v3056_v30 }
 0x351   :  { %3083 = vrot.lane.b32.xlu1 %v15390_v29, %s14720_s13  ;;  %v2852_v31 = vpop.f32.mrf.mxu1  ;;  %v3167_v42 = vsub.f32 0.0, %v3135_v34 }
 0x352   :  { %v13488_v40 = vpop.f32.mrf.mxu0  ;;  %v14416_v43 = vpop.eup %14415  ;;  %14182 = vrot.lane.b32.xlu0 %v14181_v36, %s14722_s15  ;;  %v3168_v51 = vsub.f32 0.0, %v3136_v20 }
 0x353   :  { %v13483_v62 = vpop.f32.mrf.mxu1  ;;  %v15396_v45 = vpop.eup %14417  ;;  %v3259_v58 = vadd.f32 1.0, %v14416_v43  ;;  %v3213_v32 = vmul.f32 1.442695, %v3167_v42 }
 0x354   :  { %v2898_v37 = vpop.f32.mrf.mxu0  ;;  %v14420_v56 = vpop.eup %14419  ;;  %v3215_v3 = vmul.f32 1.442695, %v3168_v51  ;;  %v3319_v6 = vsub.f32 1.0, %v15396_v45 }
 0x355   :  { %v15398_v49 = vpop.f32.mrf.mxu1  ;;  %v15400_v61 = vpop.eup %14421  ;;  %14431 = vrcp.f32 %v3259_v58  ;;  %v3260_v2 = vadd.f32 1.0, %v14420_v56 }
 0x356   :  { %v13489_v0 = vpop.f32.mrf.mxu0  ;;  %3085 = vrot.lane.b32.xlu1 %v15398_v49, %s14720_s13  ;;  %14433 = vpow2.f32 %v3213_v32  ;;  %v3320_v11 = vsub.f32 1.0, %v15400_v61 }
 0x357   :  { %v13494_v7 = vpop.f32.mrf.mxu1  ;;  %14435 = vrcp.f32 %v3260_v2 }
 0x358   :  { %v15406_v46 = vpop.f32.mrf.mxu0  ;;  %14437 = vpow2.f32 %v3215_v3  ;;  %v14186_v10 = vpack.i.bf16 %v3320_v11, %v3319_v6 }
 0x359   :  { %3087 = vrot.lane.b32.xlu0 %v15406_v46, %s14720_s13  ;;  %v2944_v12 = vpop.f32.mrf.mxu1 }
 0x35a   :  { %v13500_v39 = vpop.f32.mrf.mxu0  ;;  %v15410_v13 = vpop.eup %14423  ;;  %14187 = vrot.lane.b32.xlu1 %v14186_v10, %s14722_s15 }
 0x35b   :  { %v13495_v21 = vpop.f32.mrf.mxu1  ;;  %v14426_v24 = vpop.eup %14425  ;;  %v3321_v34 = vsub.f32 1.0, %v15410_v13 }
 0x35c   :  { %v2990_v48 = vpop.f32.mrf.mxu0  ;;  %v15413_v18 = vpop.eup %14427  ;;  %v3261_v19 = vadd.f32 1.0, %v14426_v24 }
 0x35d   :  { %v14430_v26 = vpop.eup %14429  ;;  %v3322_v30 = vsub.f32 1.0, %v15413_v18 }
 0x35e   :  { %v13501_v52 = vpop.f32.mrf.mxu0  ;;  %14439 = vrcp.f32 %v3261_v19  ;;  %v3262_v31 = vadd.f32 1.0, %v14430_v26  ;;  %1078 = vrot.lane.b32.xlu1 %v14877_v59, %s14721_s14 }
 0x35f   :  { %v14191_v36 = vpack.i.bf16 %v3322_v30, %v3321_v34 }
 0x360   :  { %14441 = vrcp.f32 %v3262_v31 }
 0x361   :  { %14192 = vrot.lane.b32.xlu0 %v14191_v36, %s14722_s15 }
 0x362   :  { %v15420_v42 = vpop.eup %14431 }
 0x363   :  { %v14434_v20 = vpop.eup %14433  ;;  %v3323_v58 = vsub.f32 1.0, %v15420_v42 }
 0x364   :  { %v15422_v40 = vpop.eup %14435  ;;  %v3263_v43 = vadd.f32 1.0, %v14434_v20 }
 0x365   :  { %v14438_v62 = vpop.eup %14437  ;;  %1074 = vrot.lane.b32.xlu0 %v14838_v35, %s14721_s14  ;;  %v3324_v32 = vsub.f32 1.0, %v15422_v40 }
 0x366   :  { %14443 = vrcp.f32 %v3263_v43  ;;  %v3264_v59 = vadd.f32 1.0, %v14438_v62 }
 0x367   :  { %v14196_v51 = vpack.i.bf16 %v3324_v32, %v3323_v58 }
 0x368   :  { %14445 = vrcp.f32 %v3264_v59 }
 0x369   :  { %14197 = vrot.lane.b32.xlu1 %v14196_v51, %s14722_s15  ;;  %1082 = vrot.lane.b32.xlu0 %v14875_v57, %s14721_s14 }
 0x36b   :  { %v15431_v37 = vpop.eup %14439 }
 0x36c   :  { %v3325_v35 = vsub.f32 1.0, %v15431_v37 }
 0x36d   :  { %v15433_v56 = vpop.eup %14441  ;;  %1086 = vrot.lane.b32.xlu1 %v14885_v63, %s14721_s14 }
 0x36e   :  { %v3326_v2 = vsub.f32 1.0, %v15433_v56 }
 0x370   :  { %v14201_v3 = vpack.i.bf16 %v3326_v2, %v3325_v35 }
 0x372   :  { %14202 = vrot.lane.b32.xlu0 %v14201_v3, %s14722_s15 }
 0x373   :  { %v15440_v0 = vpop.eup %14443 }
 0x374   :  { %v3327_v57 = vsub.f32 1.0, %v15440_v0 }
 0x375   :  { %v15442_v7 = vpop.eup %14445 }
 0x376   :  { %v3328_v6 = vsub.f32 1.0, %v15442_v7 }
 0x378   :  { %v14206_v11 = vpack.i.bf16 %v3328_v6, %v3327_v57 }
 0x37a   :  { %14207 = vrot.lane.b32.xlu1 %v14206_v11, %s14722_s15 }
 0x390   :  { %v3058_v12 = vpop.permute.xlu0 %3057 }
 0x391   :  { %v3137_v63 = vsub.f32 %v15297_v22, %v3058_v12 }
 0x392   :  { %v3060_v39 = vpop.permute.xlu1 %3059 }
 0x393   :  { %v3169_v10 = vsub.f32 0.0, %v3137_v63  ;;  %v3138_v21 = vsub.f32 %v15302_v27, %v3060_v39 }
 0x394   :  { %v1073_v24 = vpop.permute.xlu0 %1072 }
 0x395   :  { %v3217_v48 = vmul.f32 1.442695, %v3169_v10  ;;  %v3170_v19 = vsub.f32 0.0, %v3138_v21 }
 0x396   :  { %v1077_v26 = vpop.permute.xlu1 %1076 }
 0x397   :  { %14447 = vpow2.f32 %v3217_v48  ;;  %v3219_v52 = vmul.f32 1.442695, %v3170_v19 }
 0x398   :  { %v3062_v34 = vpop.permute.xlu0 %3061 }
 0x399   :  { %v3139_v30 = vsub.f32 %v15311_v60, %v3062_v34  ;;  %14449 = vpow2.f32 %v3219_v52 }
 0x39a   :  { %v3064_v36 = vpop.permute.xlu1 %3063 }
 0x39b   :  { %v3171_v31 = vsub.f32 0.0, %v3139_v30  ;;  %v3140_v20 = vsub.f32 %v15316_v47, %v3064_v36 }
 0x39c   :  { %v1081_v43 = vpop.permute.xlu0 %1080 }
 0x39d   :  { %v3221_v22 = vmul.f32 1.442695, %v3171_v31  ;;  %v3172_v62 = vsub.f32 0.0, %v3140_v20  ;;  %v1096_v58 = vcombine.low %v1073_v24, %v1081_v43  ;;  %v1097_v36 = vcombine.high %v1073_v24, %v1081_v43 }
 0x39e   :  { %v1085_v27 = vpop.permute.xlu1 %1084 }
 0x39f   :  { %14451 = vpow2.f32 %v3221_v22  ;;  %v3223_v32 = vmul.f32 1.442695, %v3172_v62  ;;  %v1112_v59 = vcombine.low %v1077_v26, %v1085_v27  ;;  %v1104_v2 = vrot.slane %v1096_v58, %v14794_v8 }
 0x3a0   :  { %v3066_v51 = vpop.permute.xlu0 %3065 }
 0x3a1   :  { %v3141_v35 = vsub.f32 %v15325_v9, %v3066_v51  ;;  %14453 = vpow2.f32 %v3223_v32  ;;  %v1120_v60 = vrot.slane %v1112_v59, %v14794_v8  ;;  %v1113_v9 = vcombine.high %v1077_v26, %v1085_v27 }
 0x3a2   :  { %v3068_v57 = vpop.permute.xlu1 %3067 }
 0x3a3   :  { %v3173_v3 = vsub.f32 0.0, %v3141_v35  ;;  %v1128_v47 = vcombine.low %v1104_v2, %v1120_v60  ;;  %v1129_v11 = vcombine.high %v1104_v2, %v1120_v60  ;;  %v3142_v10 = vsub.f32 %v15330_v15, %v3068_v57 }
 0x3a4   :  { %v14448_v6 = vpop.eup %14447  ;;  %v15463_v58 = vrot.slane %v1113_v9, %v14794_v8  ;;  %v15470_v35 = vrot.slane %v1097_v36, %v14794_v8 }
 0x3a5   :  { %v3265_v12 = vadd.f32 1.0, %v14448_v6  ;;  %v3225_v63 = vmul.f32 1.442695, %v3173_v3  ;;  %v1136_v39 = vrot.slane %v1128_v47, %v14871_v53  ;;  %v1143_v21 = vrot.slane %v1129_v11, %v14871_v53 }
 0x3a6   :  { %v14450_v48 = vpop.eup %14449  ;;  %v3174_v19 = vsub.f32 0.0, %v3142_v10 }
 0x3a7   :  { %14455 = vrcp.f32 %v3265_v12  ;;  %v3266_v52 = vadd.f32 1.0, %v14450_v48  ;;  %v1231_v34 = vcombine.high %v1136_v39, %v17669_v1  ;;  %v1264_v30 = vcombine.high %v1143_v21, %v17669_v1 }
 0x3a8   :  { %v3070_v31 = vpop.permute.xlu0 %3069  ;;  %14457 = vpow2.f32 %v3225_v63  ;;  %v3227_v20 = vmul.f32 1.442695, %v3174_v19  ;;  %v1230_v15 = vrot.slane %v1136_v39, %v14794_v8  ;;  %v15473_v60 = vrot.slane %v1143_v21, %v14794_v8 }
 0x3a9   :  { %v3143_v22 = vsub.f32 %v15335_v16, %v3070_v31  ;;  %14459 = vrcp.f32 %v3266_v52  ;;  %v1238_v62 = vrot.slane %v1231_v34, %v14794_v8  ;;  %v15466_v32 = vrot.slane %v1264_v30, %v14794_v8 }
 0x3aa   :  { %14461 = vpow2.f32 %v3227_v20  ;;  %v3072_v27 = vpop.permute.xlu1 %3071 }
 0x3ab   :  { %v3175_v26 = vsub.f32 0.0, %v3143_v22  ;;  %v3144_v24 = vsub.f32 %v15340_v44, %v3072_v27  ;;  %v1239_v43 = vcombine.low %v1230_v15, %v1238_v62  ;;  %v1240_v51 = vcombine.high %v1230_v15, %v1238_v62 }
 0x3ac   :  { %v14452_v59 = vpop.eup %14451  ;;  %v1144_v44 = vcombine.low %v15470_v35, %v15463_v58  ;;  %v1272_v11 = vcombine.low %v15473_v60, %v15466_v32  ;;  %v1273_v15 = vcombine.high %v15473_v60, %v15466_v32 }
 0x3ad   :  { %v3267_v16 = vadd.f32 1.0, %v14452_v59  ;;  %v3229_v2 = vmul.f32 1.442695, %v3175_v26  ;;  %v3176_v3 = vsub.f32 0.0, %v3144_v24  ;;  %v1247_v57 = vrot.slane %v1239_v43, %v14871_v53 }
 0x3ae   :  { %v1254_v6 = vrot.slane %v1240_v51, %v14871_v53  ;;  %v14454_v47 = vpop.eup %14453  ;;  %v1152_v36 = vrot.slane %v1144_v44, %v14871_v53  ;;  %v15491_v22 = vrot.slane %v1272_v11, %v14871_v53 }
 0x3af   :  { %14463 = vrcp.f32 %v3267_v16  ;;  %v3268_v12 = vadd.f32 1.0, %v14454_v47  ;;  %v3231_v63 = vmul.f32 1.442695, %v3176_v3  ;;  %v1488_v39 = vpack.c.bf16 %v1247_v57, %v1247_v57 }
 0x3b0   :  { %14465 = vpow2.f32 %v3229_v2  ;;  %v3074_v10 = vpop.permute.xlu0 %3073  ;;  %v1255_v48 = vcombine.high %v1247_v57, %v17669_v1  ;;  %v1256_v19 = vcombine.high %v1254_v6, %v17669_v1  ;;  %v1490_v51 = vpack.c.bf16 %v1254_v6, %v1254_v6 }
 0x3b1   :  { %v3145_v21 = vsub.f32 %v15349_v4, %v3074_v10  ;;  %14467 = vrcp.f32 %v3268_v12  ;;  %v3544_v9 = vsel %vm3542_vm3, %v1488_v39, 0  ;;  %v1288_v39 = vcombine.high %v15491_v22, %v17669_v1 }
 0x3b2   :  { %14469 = vpow2.f32 %v3231_v63  ;;  %13503 = vmatpush3.bf16.msra.mxu1 %v3544_v9  ;;  %v1489_v30 = vpack.c.bf16 %v1255_v48, %v1255_v48  ;;  %v1491_v16 = vpack.c.bf16 %v1256_v19, %v1256_v19  ;;  %v1297_v48 = vcombine.high %v1152_v36, %v17669_v1 }
 0x3b3   :  { %v3177_v52 = vsub.f32 0.0, %v3145_v21  ;;  %v3076_v34 = vpop.permute.xlu1 %3075  ;;  %13514 = vmatprep.subr.bf16.mxu1 %v17669_v1 }
 0x3b4   :  { %v15485_v31 = vpop.eup %14455  ;;  %v3146_v4 = vsub.f32 %v15356_v17, %v3076_v34  ;;  %v14173_v20 = vpop.permute.xlu0 %14172  ;;  %v3590_v59 = vsel %vm3542_vm3, %v1489_v30, 0 }
 0x3b5   :  { %v3233_v62 = vmul.f32 1.442695, %v3177_v52  ;;  %v14175_v26 = vunpack.i.h.bf16 %v14173_v20  ;;  %v14174_v27 = vunpack.i.l.bf16 %v14173_v20  ;;  %v14458_v24 = vpop.eup %14457  ;;  %13509 = vmatpush3.bf16.msra.mxu0 %v3590_v59  ;;  %v3329_v17 = vsub.f32 1.0, %v15485_v31 }
 0x3b6   :  { %v3178_v43 = vsub.f32 0.0, %v3146_v4  ;;  %v15497_v2 = vpop.eup %14459  ;;  %v3269_v3 = vadd.f32 1.0, %v14458_v24  ;;  %13520 = vmatprep.subr.bf16.mxu0 %v17669_v1  ;;  %v1145_v52 = vcombine.high %v15470_v35, %v15463_v58  ;;  %v15522_v4 = vrot.slane %v1152_v36, %v14794_v8 }
 0x3b7   :  { %14471 = vpow2.f32 %v3233_v62  ;;  %v3475_v57 = vsel %vm3473_vm4, %v15347_v25, %v14175_v26  ;;  %v3474_v32 = vsel %vm3473_vm4, %v15345_v54, %v14174_v27  ;;  %v14462_v60 = vpop.eup %14461  ;;  %v3330_v12 = vsub.f32 1.0, %v15497_v2 }
 0x3b8   :  { %v3235_v47 = vmul.f32 1.442695, %v3178_v43  ;;  %v3507_v44 = vpack.c.bf16 %v3475_v57, %v3475_v57  ;;  %v3506_v11 = vpack.c.bf16 %v3474_v32, %v3474_v32  ;;  %v3078_v6 = vpop.permute.xlu1 %3077  ;;  %14473 = vrcp.f32 %v3269_v3 }
 0x3b9   :  { %v3270_v63 = vadd.f32 1.0, %v14462_v60  ;;  %v3147_v10 = vsub.f32 %v15366_v41, %v3078_v6  ;;  %v3636_v54 = vsel %vm3542_vm3, %v1490_v51, 0  ;;  %v3682_v25 = vsel %vm3542_vm3, %v1491_v16, 0 }
 0x3ba   :  { %14475 = vpow2.f32 %v3235_v47  ;;  %13505 = vmatmul.mubr.msk.bf16.vlgmr.msra.gmra.mxu1 %vm3538_vm5, %v3506_v11  ;;  %13511 = vmatmul.mubr.msk.bf16.vlgmr.msra.gmra.mxu0 %vm3538_vm5, %v3507_v44  ;;  %v14211_v21 = vpack.i.bf16 %v3330_v12, %v3329_v17  ;;  %v1492_v36 = vpack.c.bf16 %v15491_v22, %v15491_v22  ;;  %v1493_v59 = vpack.c.bf16 %v1288_v39, %v1288_v39 }
 0x3bb   :  { %14477 = vrcp.f32 %v3270_v63  ;;  %v3179_v9 = vsub.f32 0.0, %v3147_v10  ;;  %13515 = vmatpush3.bf16.msra.mxu1 %v3636_v54  ;;  %13521 = vmatpush3.bf16.msra.mxu0 %v3682_v25  ;;  %v3080_v41 = vpop.permute.xlu0 %3079  ;;  %v1159_v54 = vrot.slane %v1145_v52, %v14871_v53 }
 0x3bc   :  { %v15513_v19 = vpop.eup %14463  ;;  %v3148_v34 = vsub.f32 %v15373_v55, %v3080_v41  ;;  %14212 = vrot.lane.b32.xlu0 %v14211_v21, %s14722_s15  ;;  %v14178_v30 = vpop.permute.xlu1 %14177  ;;  %13516 = vmatprep.mubr.msk.bf16.mxu1 %vm14713_vm0, %v17669_v1  ;;  %v15528_v55 = vrot.slane %v1273_v15, %v14871_v53  ;;  %v15540_v15 = vrot.slane %v1297_v48, %v14794_v8 }
 0x3bd   :  { %v14466_v20 = vpop.eup %14465  ;;  %v3237_v62 = vmul.f32 1.442695, %v3179_v9  ;;  %v14180_v26 = vunpack.i.h.bf16 %v14178_v30  ;;  %v14179_v27 = vunpack.i.l.bf16 %v14178_v30  ;;  %13522 = vmatprep.mubr.msk.bf16.mxu0 %vm14713_vm0, %v17669_v1  ;;  %13526 = vmatprep.subr.bf16.mxu1 %v17669_v1  ;;  %v3331_v22 = vsub.f32 1.0, %v15513_v19 }
 0x3be   :  { %v3271_v58 = vadd.f32 1.0, %v14466_v20  ;;  %v3180_v35 = vsub.f32 0.0, %v3148_v34  ;;  %13532 = vmatprep.subr.bf16.mxu0 %v17669_v1  ;;  %v15533_v24 = vpop.eup %14467  ;;  %v1289_v11 = vcombine.high %v15528_v55, %v17669_v1  ;;  %v1305_v63 = vcombine.low %v15522_v4, %v15540_v15 }
 0x3bf   :  { %14479 = vpow2.f32 %v3237_v62  ;;  %v3477_v43 = vsel %vm3473_vm4, %v15364_v33, %v14180_v26  ;;  %v3476_v51 = vsel %vm3473_vm4, %v15362_v50, %v14179_v27  ;;  %v14470_v16 = vpop.eup %14469  ;;  %v3332_v44 = vsub.f32 1.0, %v15533_v24 }
 0x3c0   :  { %v3239_v17 = vmul.f32 1.442695, %v3180_v35  ;;  %v3509_v3 = vpack.c.bf16 %v3477_v43, %v3477_v43  ;;  %v3508_v57 = vpack.c.bf16 %v3476_v51, %v3476_v51  ;;  %v3082_v32 = vpop.permute.xlu0 %3081  ;;  %14481 = vrcp.f32 %v3271_v58 }
 0x3c1   :  { %v3272_v60 = vadd.f32 1.0, %v14470_v16  ;;  %v3149_v47 = vsub.f32 %v15381_v14, %v3082_v32  ;;  %v3728_v50 = vsel %vm3542_vm3, %v1492_v36, 0  ;;  %v3774_v33 = vsel %vm3542_vm3, %v1493_v59, 0 }
 0x3c2   :  { %14483 = vpow2.f32 %v3239_v17  ;;  %13517 = vmatmul.mubr.msk.bf16.vlgmr.msra.gmra.mxu1 %vm3538_vm5, %v3508_v57  ;;  %13523 = vmatmul.mubr.msk.bf16.vlgmr.msra.gmra.mxu0 %vm3538_vm5, %v3509_v3  ;;  %v14216_v14 = vpack.i.bf16 %v3332_v44, %v3331_v22  ;;  %v1306_v9 = vcombine.high %v15522_v4, %v15540_v15  ;;  %v1495_v20 = vpack.c.bf16 %v1289_v11, %v1289_v11 }
 0x3c3   :  { %14485 = vrcp.f32 %v3272_v60  ;;  %v3181_v6 = vsub.f32 0.0, %v3149_v47  ;;  %13527 = vmatpush3.bf16.msra.mxu1 %v3728_v50  ;;  %13533 = vmatpush3.bf16.msra.mxu0 %v3774_v33  ;;  %v3084_v12 = vpop.permute.xlu1 %3083  ;;  %v1494_v52 = vpack.c.bf16 %v15528_v55, %v15528_v55  ;;  %v15570_v27 = vrot.slane %v1305_v63, %v14871_v53 }
 0x3c4   :  { %v14472_v10 = vpop.eup %14471  ;;  %v3150_v39 = vsub.f32 %v15390_v29, %v3084_v12  ;;  %13528 = vmatprep.mubr.msk.bf16.mxu1 %vm14713_vm0, %v17669_v1  ;;  %13534 = vmatprep.mubr.msk.bf16.mxu0 %vm14713_vm0, %v17669_v1  ;;  %v14183_v48 = vpop.permute.xlu0 %14182  ;;  %v1330_v16 = vcombine.high %v1159_v54, %v17669_v1  ;;  %v3866_v3 = vsel %vm3542_vm3, %v1495_v20, 0  ;;  %v15590_v33 = vrot.slane %v1306_v9, %v14871_v53 }
 0x3c5   :  { %v3273_v25 = vadd.f32 1.0, %v14472_v10  ;;  %v3241_v21 = vmul.f32 1.442695, %v3181_v6  ;;  %14217 = vrot.lane.b32.xlu1 %v14216_v14, %s14722_s15  ;;  %13538 = vmatprep.subr.bf16.mxu1 %v17669_v1  ;;  %v15563_v41 = vpop.eup %14473  ;;  %v14185_v34 = vunpack.i.h.bf16 %v14183_v48  ;;  %v14184_v30 = vunpack.i.l.bf16 %v14183_v48 }
 0x3c6   :  { %v3182_v29 = vsub.f32 0.0, %v3150_v39  ;;  %13544 = vmatprep.subr.bf16.mxu0 %v17669_v1  ;;  %v3333_v26 = vsub.f32 1.0, %v15563_v41  ;;  %v1321_v22 = vcombine.high %v15570_v27, %v17669_v1  ;;  %v15603_v39 = vrot.slane %v1159_v54, %v14794_v8 }
 0x3c7   :  { %v14476_v62 = vpop.eup %14475  ;;  %14487 = vrcp.f32 %v3273_v25  ;;  %v3479_v36 = vsel %vm3473_vm4, %v15383_v38, %v14185_v34  ;;  %v3478_v51 = vsel %vm3473_vm4, %v15379_v23, %v14184_v30  ;;  %v15606_v25 = vrot.slane %v1330_v16, %v14794_v8 }
 0x3c8   :  { %v15572_v58 = vpop.eup %14477  ;;  %v3274_v4 = vadd.f32 1.0, %v14476_v62  ;;  %14489 = vpow2.f32 %v3241_v21  ;;  %v3243_v35 = vmul.f32 1.442695, %v3182_v29  ;;  %v3086_v59 = vpop.permute.xlu1 %3085  ;;  %v3511_v43 = vpack.c.bf16 %v3479_v36, %v3479_v36 }
 0x3c9   :  { %v3151_v55 = vsub.f32 %v15398_v49, %v3086_v59  ;;  %v3334_v15 = vsub.f32 1.0, %v15572_v58  ;;  %v3510_v17 = vpack.c.bf16 %v3478_v51, %v3478_v51  ;;  %v3820_v49 = vsel %vm3542_vm3, %v1494_v52, 0 }
 0x3ca   :  { %14491 = vrcp.f32 %v3274_v4  ;;  %13535 = vmatmul.mubr.msk.bf16.vlgmr.msra.gmra.mxu0 %vm3538_vm5, %v3511_v43  ;;  %v1497_v10 = vpack.c.bf16 %v1321_v22, %v1321_v22  ;;  %v1322_v52 = vcombine.high %v15590_v33, %v17669_v1  ;;  %v1498_v22 = vpack.c.bf16 %v15590_v33, %v15590_v33 }
 0x3cb   :  { %14493 = vpow2.f32 %v3243_v35  ;;  %v3183_v57 = vsub.f32 0.0, %v3151_v55  ;;  %v3088_v38 = vpop.permute.xlu0 %3087  ;;  %v14221_v32 = vpack.i.bf16 %v3334_v15, %v3333_v26  ;;  %13529 = vmatmul.mubr.msk.bf16.vlgmr.msra.gmra.mxu1 %vm3538_vm5, %v3510_v17  ;;  %13545 = vmatpush3.bf16.msra.mxu0 %v3866_v3 }
 0x3cc   :  { %v14480_v23 = vpop.eup %14479  ;;  %v3152_v60 = vsub.f32 %v15406_v46, %v3088_v38  ;;  %13539 = vmatpush3.bf16.msra.mxu1 %v3820_v49  ;;  %v14188_v50 = vpop.permute.xlu1 %14187  ;;  %13540 = vmatprep.mubr.msk.bf16.mxu1 %vm14713_vm0, %v17669_v1  ;;  %v1496_v46 = vpack.c.bf16 %v15570_v27, %v15570_v27  ;;  %v3958_v26 = vsel %vm3542_vm3, %v1497_v10, 0  ;;  %v1499_v55 = vpack.c.bf16 %v1322_v52, %v1322_v52 }
 0x3cd   :  { %v3275_v47 = vadd.f32 1.0, %v14480_v23  ;;  %v3245_v44 = vmul.f32 1.442695, %v3183_v57  ;;  %14222 = vrot.lane.b32.xlu0 %v14221_v32, %s14722_s15  ;;  %v15592_v11 = vpop.eup %14481  ;;  %v14190_v12 = vunpack.i.h.bf16 %v14188_v50  ;;  %v14189_v14 = vunpack.i.l.bf16 %v14188_v50  ;;  %13546 = vmatprep.mubr.msk.bf16.mxu0 %vm14713_vm0, %v17669_v1 }
 0x3ce   :  { %v3184_v6 = vsub.f32 0.0, %v3152_v60  ;;  %13550 = vmatprep.subr.bf16.mxu1 %v17669_v1  ;;  %13556 = vmatprep.subr.bf16.mxu0 %v17669_v1  ;;  %v3335_v20 = vsub.f32 1.0, %v15592_v11 }
 0x3cf   :  { %v14484_v63 = vpop.eup %14483  ;;  %14495 = vrcp.f32 %v3275_v47  ;;  %v3481_v29 = vsel %vm3473_vm4, %v15400_v61, %v14190_v12  ;;  %v3480_v30 = vsel %vm3473_vm4, %v15396_v45, %v14189_v14  ;;  %v1338_v61 = vcombine.low %v15603_v39, %v15606_v25 }
 0x3d0   :  { %v15608_v21 = vpop.eup %14485  ;;  %v3276_v48 = vadd.f32 1.0, %v14484_v63  ;;  %14497 = vpow2.f32 %v3245_v44  ;;  %v3247_v9 = vmul.f32 1.442695, %v3184_v6  ;;  %v3513_v34 = vpack.c.bf16 %v3481_v29, %v3481_v29  ;;  %v15640_v38 = vpop.permute.xlu1 %1078 }
 0x3d1   :  { %v3336_v54 = vsub.f32 1.0, %v15608_v21  ;;  %v3512_v62 = vpack.c.bf16 %v3480_v30, %v3480_v30  ;;  %v3912_v45 = vsel %vm3542_vm3, %v1496_v46, 0  ;;  %v1346_v3 = vrot.slane %v1338_v61, %v14871_v53 }
 0x3d2   :  { %14499 = vrcp.f32 %v3276_v48  ;;  %13547 = vmatmul.mubr.msk.bf16.vlgmr.msra.gmra.mxu0 %vm3538_vm5, %v3513_v34  ;;  %v4050_v44 = vsel %vm3542_vm3, %v1499_v55, 0  ;;  %v4004_v14 = vsel %vm3542_vm3, %v1498_v22, 0  ;;  %v1339_v46 = vcombine.high %v15603_v39, %v15606_v25 }
 0x3d3   :  { %14501 = vpow2.f32 %v3247_v9  ;;  %v14226_v27 = vpack.i.bf16 %v3336_v54, %v3335_v20  ;;  %13541 = vmatmul.mubr.msk.bf16.vlgmr.msra.gmra.mxu1 %vm3538_vm5, %v3512_v62  ;;  %13557 = vmatpush3.bf16.msra.mxu0 %v3958_v26  ;;  %v14193_v35 = vpop.permute.xlu0 %14192  ;;  %v1354_v50 = vcombine.high %v1346_v3, %v17669_v1  ;;  %v1500_v62 = vpack.c.bf16 %v1346_v3, %v1346_v3 }
 0x3d4   :  { %v15622_v4 = vpop.eup %14487  ;;  %13551 = vmatpush3.bf16.msra.mxu1 %v3912_v45  ;;  %v14195_v59 = vunpack.i.h.bf16 %v14193_v35  ;;  %v14194_v43 = vunpack.i.l.bf16 %v14193_v35  ;;  %13552 = vmatprep.mubr.msk.bf16.mxu1 %vm14713_vm0, %v17669_v1 }
 0x3d5   :  { %v14490_v36 = vpop.eup %14489  ;;  %14227 = vrot.lane.b32.xlu1 %v14226_v27, %s14722_s15  ;;  %13558 = vmatprep.mubr.msk.bf16.mxu0 %vm14713_vm0, %v17669_v1  ;;  %v3337_v23 = vsub.f32 1.0, %v15622_v4  ;;  %v1501_v30 = vpack.c.bf16 %v1354_v50, %v1354_v50 }
 0x3d6   :  { %v3277_v51 = vadd.f32 1.0, %v14490_v36  ;;  %v3483_v16 = vsel %vm3473_vm4, %v15413_v18, %v14195_v59  ;;  %v3482_v17 = vsel %vm3473_vm4, %v15410_v13, %v14194_v43  ;;  %13562 = vmatprep.subr.bf16.mxu1 %v17669_v1  ;;  %13568 = vmatprep.subr.bf16.mxu0 %v17669_v1 }
 0x3d7   :  { %v15631_v15 = vpop.eup %14491  ;;  %v15642_v32 = vpop.permute.xlu0 %1074  ;;  %v3515_v13 = vpack.c.bf16 %v3483_v16, %v3483_v16  ;;  %v3514_v60 = vpack.c.bf16 %v3482_v17, %v3482_v17  ;;  %v4142_v43 = vsel %vm3542_vm3, %v1501_v30, 0 }
 0x3d8   :  { %v14494_v57 = vpop.eup %14493  ;;  %v3338_v18 = vsub.f32 1.0, %v15631_v15  ;;  %14503 = vrcp.f32 %v3277_v51  ;;  %v4096_v51 = vsel %vm3542_vm3, %v1500_v62, 0 }
 0x3d9   :  { %v3278_v49 = vadd.f32 1.0, %v14494_v57 }
 0x3da   :  { %v14231_v47 = vpack.i.bf16 %v3338_v18, %v3337_v23  ;;  %13559 = vmatmul.mubr.msk.bf16.vlgmr.msra.gmra.mxu0 %vm3538_vm5, %v3515_v13 }
 0x3db   :  { %14505 = vrcp.f32 %v3278_v49  ;;  %v14198_v12 = vpop.permute.xlu1 %14197  ;;  %v15653_v33 = vpop.permute.xlu0 %1082  ;;  %13553 = vmatmul.mubr.msk.bf16.vlgmr.msra.gmra.mxu1 %vm3538_vm5, %v3514_v60  ;;  %13569 = vmatpush3.bf16.msra.mxu0 %v4050_v44 }
 0x3dc   :  { %v15651_v6 = vpop.eup %14495  ;;  %v14200_v10 = vunpack.i.h.bf16 %v14198_v12  ;;  %v14199_v48 = vunpack.i.l.bf16 %v14198_v12  ;;  %13563 = vmatpush3.bf16.msra.mxu1 %v4004_v14  ;;  %14232 = vrot.lane.b32.xlu0 %v14231_v47, %s14722_s15  ;;  %v1160_v25 = vcombine.low %v15642_v32, %v15653_v33 }
 0x3dd   :  { %v14498_v63 = vpop.eup %14497  ;;  %13564 = vmatprep.mubr.msk.bf16.mxu1 %vm14713_vm0, %v17669_v1  ;;  %13570 = vmatprep.mubr.msk.bf16.mxu0 %vm14713_vm0, %v17669_v1  ;;  %v3339_v52 = vsub.f32 1.0, %v15651_v6 }
 0x3de   :  { %v3279_v9 = vadd.f32 1.0, %v14498_v63  ;;  %v3485_v34 = vsel %vm3473_vm4, %v15422_v40, %v14200_v10  ;;  %v3484_v39 = vsel %vm3473_vm4, %v15420_v42, %v14199_v48  ;;  %13574 = vmatprep.subr.bf16.mxu1 %v17669_v1  ;;  %13580 = vmatprep.subr.bf16.mxu0 %v17669_v1  ;;  %v1353_v40 = vrot.slane %v1339_v46, %v14871_v53 }
 0x3df   :  { %v15664_v29 = vpop.eup %14499  ;;  %v15673_v54 = vpop.permute.xlu1 %1086  ;;  %v3517_v27 = vpack.c.bf16 %v3485_v34, %v3485_v34  ;;  %v3516_v45 = vpack.c.bf16 %v3484_v39, %v3484_v39  ;;  %v15682_v36 = vrot.slane %v1160_v25, %v14794_v8 }
 0x3e0   :  { %v14502_v20 = vpop.eup %14501  ;;  %v3340_v26 = vsub.f32 1.0, %v15664_v29  ;;  %14507 = vrcp.f32 %v3279_v9  ;;  %v1176_v61 = vcombine.low %v15640_v38, %v15673_v54  ;;  %v1355_v55 = vcombine.high %v1353_v40, %v17669_v1 }
 0x3e1   :  { %v3280_v42 = vadd.f32 1.0, %v14502_v20  ;;  %v1502_v49 = vpack.c.bf16 %v1353_v40, %v1353_v40 }
 0x3e2   :  { %v14236_v35 = vpack.i.bf16 %v3340_v26, %v3339_v52  ;;  %v15685_v59 = vrot.slane %v1176_v61, %v14794_v8  ;;  %13571 = vmatmul.mubr.msk.bf16.vlgmr.msra.gmra.mxu0 %vm3538_vm5, %v3517_v27  ;;  %v1503_v44 = vpack.c.bf16 %v1355_v55, %v1355_v55 }
 0x3e3   :  { %14509 = vrcp.f32 %v3280_v42  ;;  %13565 = vmatmul.mubr.msk.bf16.vlgmr.msra.gmra.mxu1 %vm3538_vm5, %v3516_v45  ;;  %13581 = vmatpush3.bf16.msra.mxu0 %v4142_v43 }
 0x3e4   :  { %v1192_v16 = vcombine.low %v15682_v36, %v15685_v59  ;;  %v1193_v17 = vcombine.high %v15682_v36, %v15685_v59  ;;  %v14203_v3 = vpop.permute.xlu0 %14202  ;;  %13575 = vmatpush3.bf16.msra.mxu1 %v4096_v51  ;;  %14237 = vrot.lane.b32.xlu1 %v14236_v35, %s14722_s15  ;;  %v4234_v48 = vsel %vm3542_vm3, %v1503_v44, 0 }
 0x3e5   :  { %v14205_v57 = vunpack.i.h.bf16 %v14203_v3  ;;  %v14204_v22 = vunpack.i.l.bf16 %v14203_v3  ;;  %13576 = vmatprep.mubr.msk.bf16.mxu1 %vm14713_vm0, %v17669_v1  ;;  %v15699_v23 = vpop.eup %14503  ;;  %13582 = vmatprep.mubr.msk.bf16.mxu0 %vm14713_vm0, %v17669_v1 }
 0x3e6   :  { %v1200_v18 = vrot.slane %v1192_v16, %v14871_v53  ;;  %13586 = vmatprep.subr.bf16.mxu1 %v17669_v1  ;;  %13592 = vmatprep.subr.bf16.mxu0 %v17669_v1  ;;  %v3341_v46 = vsub.f32 1.0, %v15699_v23  ;;  %v1207_v16 = vrot.slane %v1193_v17, %v14871_v53 }
 0x3e7   :  { %v3487_v60 = vsel %vm3473_vm4, %v15433_v56, %v14205_v57  ;;  %v3486_v47 = vsel %vm3473_vm4, %v15431_v37, %v14204_v22  ;;  %v4188_v37 = vsel %vm3542_vm3, %v1502_v49, 0  ;;  %v1177_v57 = vcombine.high %v15640_v38, %v15673_v54 }
 0x3e8   :  { %v15704_v13 = vpop.eup %14505  ;;  %v1363_v50 = vcombine.high %v1200_v18, %v17669_v1  ;;  %v3519_v12 = vpack.c.bf16 %v3487_v60, %v3487_v60  ;;  %v3518_v14 = vpack.c.bf16 %v3486_v47, %v3486_v47  ;;  %v1362_v10 = vrot.slane %v1200_v18, %v14794_v8 }
 0x3e9   :  { %v3342_v63 = vsub.f32 1.0, %v15704_v13  ;;  %v1396_v22 = vcombine.high %v1207_v16, %v17669_v1  ;;  %v1161_v18 = vcombine.high %v15642_v32, %v15653_v33  ;;  %v15762_v60 = vrot.slane %v1177_v57, %v14794_v8 }
 0x3ea   :  { %v1370_v56 = vrot.slane %v1363_v50, %v14794_v8  ;;  %13583 = vmatmul.mubr.msk.bf16.vlgmr.msra.gmra.mxu0 %vm3538_vm5, %v3519_v12  ;;  %v1395_v36 = vrot.slane %v1207_v16, %v14794_v8 }
 0x3eb   :  { %13577 = vmatmul.mubr.msk.bf16.vlgmr.msra.gmra.mxu1 %vm3538_vm5, %v3518_v14  ;;  %v14241_v9 = vpack.i.bf16 %v3342_v63, %v3341_v46  ;;  %13593 = vmatpush3.bf16.msra.mxu0 %v4234_v48  ;;  %v1403_v47 = vrot.slane %v1396_v22, %v14794_v8  ;;  %v1175_v44 = vrot.slane %v1161_v18, %v14794_v8 }
 0x3ec   :  { %v14208_v34 = vpop.permute.xlu1 %14207  ;;  %13587 = vmatpush3.bf16.msra.mxu1 %v4188_v37  ;;  %v1371_v39 = vcombine.low %v1362_v10, %v1370_v56  ;;  %13588 = vmatprep.mubr.msk.bf16.mxu1 %vm14713_vm0, %v17669_v1  ;;  %v1372_v3 = vcombine.high %v1362_v10, %v1370_v56 }
 0x3ed   :  { %v15721_v25 = vpop.eup %14507  ;;  %v14210_v30 = vunpack.i.h.bf16 %v14208_v34  ;;  %v14209_v20 = vunpack.i.l.bf16 %v14208_v34  ;;  %14242 = vrot.lane.b32.xlu0 %v14241_v9, %s14722_s15  ;;  %13594 = vmatprep.mubr.msk.bf16.mxu0 %vm14713_vm0, %v17669_v1  ;;  %v1208_v38 = vcombine.low %v1175_v44, %v15762_v60  ;;  %v1404_v54 = vcombine.low %v1395_v36, %v1403_v47 }
 0x3ee   :  { %13598 = vmatprep.subr.bf16.mxu1 %v17669_v1  ;;  %v1379_v62 = vrot.slane %v1371_v39, %v14871_v53  ;;  %13604 = vmatprep.subr.bf16.mxu0 %v17669_v1  ;;  %v3343_v27 = vsub.f32 1.0, %v15721_v25  ;;  %v1386_v49 = vrot.slane %v1372_v3, %v14871_v53  ;;  %v1405_v39 = vcombine.high %v1395_v36, %v1403_v47 }
 0x3ef   :  { %v3489_v26 = vsel %vm3473_vm4, %v15442_v7, %v14210_v30  ;;  %v3488_v40 = vsel %vm3473_vm4, %v15440_v0, %v14209_v20  ;;  %v1216_v14 = vrot.slane %v1208_v38, %v14871_v53  ;;  %v1412_v10 = vrot.slane %v1404_v54, %v14871_v53 }
 0x3f0   :  { %v15730_v52 = vpop.eup %14509  ;;  %v1504_v42 = vpack.c.bf16 %v1379_v62, %v1379_v62  ;;  %v3521_v45 = vpack.c.bf16 %v3489_v26, %v3489_v26  ;;  %v3520_v35 = vpack.c.bf16 %v3488_v40, %v3488_v40  ;;  %v1387_v43 = vcombine.high %v1379_v62, %v17669_v1 }
 0x3f1   :  { %v3344_v61 = vsub.f32 1.0, %v15730_v52  ;;  %v1388_v59 = vcombine.high %v1386_v49, %v17669_v1  ;;  %v1506_v32 = vpack.c.bf16 %v1386_v49, %v1386_v49  ;;  %v1429_v34 = vcombine.high %v1216_v14, %v17669_v1 }
 0x3f2   :  { %v4280_v51 = vsel %vm3542_vm3, %v1504_v42, 0  ;;  %13595 = vmatmul.mubr.msk.bf16.vlgmr.msra.gmra.mxu0 %vm3538_vm5, %v3521_v45  ;;  %v1505_v7 = vpack.c.bf16 %v1387_v43, %v1387_v43  ;;  %v1508_v62 = vpack.c.bf16 %v1412_v10, %v1412_v10  ;;  %v1419_v40 = vrot.slane %v1405_v39, %v14871_v53 }
 0x3f3   :  { %v14246_v55 = vpack.i.bf16 %v3344_v61, %v3343_v27  ;;  %13589 = vmatmul.mubr.msk.bf16.vlgmr.msra.gmra.mxu1 %vm3538_vm5, %v3520_v35  ;;  %13606 = vmatprep.mubr.msk.bf16.mxu0 %vm14713_vm0, %v17669_v1  ;;  %v1507_v33 = vpack.c.bf16 %v1388_v59, %v1388_v59  ;;  %v4372_v48 = vsel %vm3542_vm3, %v1506_v32, 0  ;;  %v1436_v42 = vrot.slane %v1429_v34, %v14794_v8 }
 0x3f4   :  { %13599 = vmatpush3.bf16.msra.mxu1 %v4280_v51  ;;  %v4326_v0 = vsel %vm3542_vm3, %v1505_v7, 0  ;;  %13600 = vmatprep.mubr.msk.bf16.mxu1 %vm14713_vm0, %v17669_v1  ;;  %v1428_v43 = vrot.slane %v1216_v14, %v14794_v8  ;;  %v4464_v51 = vsel %vm3542_vm3, %v1508_v62, 0  ;;  %v1421_v7 = vcombine.high %v1419_v40, %v17669_v1 }
 0x3f5   :  { %14247 = vrot.lane.b32.xlu1 %v14246_v55, %s14722_s15  ;;  %13605 = vmatpush3.bf16.msra.mxu0 %v4326_v0  ;;  %v4418_v9 = vsel %vm3542_vm3, %v1507_v33, 0  ;;  %v1510_v57 = vpack.c.bf16 %v1419_v40, %v1419_v40 }
 0x3f6   :  { %13610 = vmatprep.subr.bf16.mxu1 %v17669_v1  ;;  %13616 = vmatprep.subr.bf16.mxu0 %v17669_v1  ;;  %v1437_v0 = vcombine.low %v1428_v43, %v1436_v42  ;;  %v1511_v22 = vpack.c.bf16 %v1421_v7, %v1421_v7 }
 0x3f7   :  { %v4556_v59 = vsel %vm3542_vm3, %v1510_v57, 0 }
 0x3f8   :  { %v1445_v18 = vrot.slane %v1437_v0, %v14871_v53  ;;  %v4602_v38 = vsel %vm3542_vm3, %v1511_v22, 0 }
 0x3fa   :  { %v1453_v54 = vcombine.high %v1445_v18, %v17669_v1  ;;  %v1512_v32 = vpack.c.bf16 %v1445_v18, %v1445_v18 }
 0x3fc   :  { %v1513_v33 = vpack.c.bf16 %v1453_v54, %v1453_v54 }
 0x3fe   :  { %v4694_v34 = vsel %vm3542_vm3, %v1513_v33, 0 }
 0x42e   :  { %v14213_v17 = vpop.permute.xlu0 %14212 }
 0x42f   :  { %v14215_v50 = vunpack.i.h.bf16 %v14213_v17  ;;  %v14214_v12 = vunpack.i.l.bf16 %v14213_v17  ;;  %v1438_v17 = vcombine.high %v1428_v43, %v1436_v42 }
 0x431   :  { %v3491_v46 = vsel %vm3473_vm4, %v15497_v2, %v14215_v50  ;;  %v3490_v63 = vsel %vm3473_vm4, %v15485_v31, %v14214_v12  ;;  %v1420_v2 = vcombine.high %v1412_v10, %v17669_v1  ;;  %v1452_v14 = vrot.slane %v1438_v17, %v14871_v53 }
 0x432   :  { %v3523_v56 = vpack.c.bf16 %v3491_v46, %v3491_v46  ;;  %v3522_v37 = vpack.c.bf16 %v3490_v63, %v3490_v63 }
 0x433   :  { %v1509_v26 = vpack.c.bf16 %v1420_v2, %v1420_v2  ;;  %v1454_v2 = vcombine.high %v1452_v14, %v17669_v1 }
 0x434   :  { %13601 = vmatmul.mubr.msk.bf16.vlgmr.msra.gmra.mxu1 %vm3538_vm5, %v3522_v37  ;;  %13607 = vmatmul.mubr.msk.bf16.vlgmr.msra.gmra.mxu0 %vm3538_vm5, %v3523_v56 }
 0x435   :  { %13611 = vmatpush3.bf16.msra.mxu1 %v4372_v48  ;;  %13617 = vmatpush3.bf16.msra.mxu0 %v4418_v9  ;;  %v4510_v55 = vsel %vm3542_vm3, %v1509_v26, 0  ;;  %v4648_v9 = vsel %vm3542_vm3, %v1512_v32, 0 }
 0x436   :  { %13612 = vmatprep.mubr.msk.bf16.mxu1 %vm14713_vm0, %v17669_v1  ;;  %13618 = vmatprep.mubr.msk.bf16.mxu0 %vm14713_vm0, %v17669_v1 }
 0x437   :  { %v14218_v31 = vpop.permute.xlu1 %14217  ;;  %13622 = vmatprep.subr.bf16.mxu1 %v17669_v1  ;;  %13628 = vmatprep.subr.bf16.mxu0 %v17669_v1 }
 0x438   :  { %v14220_v30 = vunpack.i.h.bf16 %v14218_v31  ;;  %v14219_v20 = vunpack.i.l.bf16 %v14218_v31 }
 0x43a   :  { %v3493_v27 = vsel %vm3473_vm4, %v15533_v24, %v14220_v30  ;;  %v3492_v61 = vsel %vm3473_vm4, %v15513_v19, %v14219_v20  ;;  %v1209_v24 = vcombine.high %v1175_v44, %v15762_v60  ;;  %v1514_v30 = vpack.c.bf16 %v1452_v14, %v1452_v14 }
 0x43b   :  { %v3525_v45 = vpack.c.bf16 %v3493_v27, %v3493_v27  ;;  %v3524_v35 = vpack.c.bf16 %v3492_v61, %v3492_v61  ;;  %v1515_v20 = vpack.c.bf16 %v1454_v2, %v1454_v2 }
 0x43c   :  { %v1223_v49 = vrot.slane %v1209_v24, %v14871_v53  ;;  %v4740_v61 = vsel %vm3542_vm3, %v1514_v30, 0 }
 0x43d   :  { %13613 = vmatmul.mubr.msk.bf16.vlgmr.msra.gmra.mxu1 %vm3538_vm5, %v3524_v35  ;;  %13619 = vmatmul.mubr.msk.bf16.vlgmr.msra.gmra.mxu0 %vm3538_vm5, %v3525_v45  ;;  %v4786_v45 = vsel %vm3542_vm3, %v1515_v20, 0 }
 0x43e   :  { %13623 = vmatpush3.bf16.msra.mxu1 %v4464_v51  ;;  %13629 = vmatpush3.bf16.msra.mxu0 %v4510_v55  ;;  %v1462_v50 = vcombine.high %v1223_v49, %v17669_v1  ;;  %v1461_v48 = vrot.slane %v1223_v49, %v14794_v8 }
 0x43f   :  { %v14223_v19 = vpop.permute.xlu0 %14222  ;;  %13624 = vmatprep.mubr.msk.bf16.mxu1 %vm14713_vm0, %v17669_v1  ;;  %13630 = vmatprep.mubr.msk.bf16.mxu0 %vm14713_vm0, %v17669_v1 }
 0x440   :  { %v14225_v16 = vunpack.i.h.bf16 %v14223_v19  ;;  %v14224_v3 = vunpack.i.l.bf16 %v14223_v19  ;;  %13634 = vmatprep.subr.bf16.mxu1 %v17669_v1  ;;  %13640 = vmatprep.subr.bf16.mxu0 %v17669_v1  ;;  %v1469_v10 = vrot.slane %v1462_v50, %v14794_v8 }
 0x442   :  { %v3495_v60 = vsel %vm3473_vm4, %v15572_v58, %v14225_v16  ;;  %v3494_v47 = vsel %vm3473_vm4, %v15563_v41, %v14224_v3 }
 0x443   :  { %v3527_v44 = vpack.c.bf16 %v3495_v60, %v3495_v60  ;;  %v3526_v36 = vpack.c.bf16 %v3494_v47, %v3494_v47 }
 0x445   :  { %13625 = vmatmul.mubr.msk.bf16.vlgmr.msra.gmra.mxu1 %vm3538_vm5, %v3526_v36  ;;  %13631 = vmatmul.mubr.msk.bf16.vlgmr.msra.gmra.mxu0 %vm3538_vm5, %v3527_v44 }
 0x446   :  { %13635 = vmatpush3.bf16.msra.mxu1 %v4556_v59  ;;  %13641 = vmatpush3.bf16.msra.mxu0 %v4602_v38 }
 0x447   :  { %v14228_v58 = vpop.permute.xlu1 %14227  ;;  %13636 = vmatprep.mubr.msk.bf16.mxu1 %vm14713_vm0, %v17669_v1  ;;  %13642 = vmatprep.mubr.msk.bf16.mxu0 %vm14713_vm0, %v17669_v1 }
 0x448   :  { %v14230_v41 = vunpack.i.h.bf16 %v14228_v58  ;;  %v14229_v12 = vunpack.i.l.bf16 %v14228_v58  ;;  %13646 = vmatprep.subr.bf16.mxu1 %v17669_v1  ;;  %13652 = vmatprep.subr.bf16.mxu0 %v17669_v1 }
 0x44a   :  { %v3497_v46 = vsel %vm3473_vm4, %v15608_v21, %v14230_v41  ;;  %v3496_v63 = vsel %vm3473_vm4, %v15592_v11, %v14229_v12  ;;  %v1470_v21 = vcombine.low %v1461_v48, %v1469_v10 }
 0x44b   :  { %v3529_v56 = vpack.c.bf16 %v3497_v46, %v3497_v46  ;;  %v3528_v37 = vpack.c.bf16 %v3496_v63, %v3496_v63 }
 0x44c   :  { %v1478_v40 = vrot.slane %v1470_v21, %v14871_v53 }
 0x44d   :  { %13637 = vmatmul.mubr.msk.bf16.vlgmr.msra.gmra.mxu1 %vm3538_vm5, %v3528_v37  ;;  %13643 = vmatmul.mubr.msk.bf16.vlgmr.msra.gmra.mxu0 %vm3538_vm5, %v3529_v56 }
 0x44e   :  { %13647 = vmatpush3.bf16.msra.mxu1 %v4648_v9  ;;  %13653 = vmatpush3.bf16.msra.mxu0 %v4694_v34  ;;  %v14233_v11 = vpop.permute.xlu0 %14232  ;;  %v1486_v35 = vcombine.high %v1478_v40, %v17669_v1  ;;  %v1516_v55 = vpack.c.bf16 %v1478_v40, %v1478_v40 }
 0x44f   :  { %13648 = vmatprep.mubr.msk.bf16.mxu1 %vm14713_vm0, %v17669_v1  ;;  %13654 = vmatprep.mubr.msk.bf16.mxu0 %vm14713_vm0, %v17669_v1  ;;  %v14235_v39 = vunpack.i.h.bf16 %v14233_v11  ;;  %v14234_v31 = vunpack.i.l.bf16 %v14233_v11 }
 0x450   :  { %13658 = vmatprep.subr.bf16.mxu1 %v17669_v1  ;;  %13664 = vmatprep.subr.bf16.mxu0 %v17669_v1  ;;  %v1517_v7 = vpack.c.bf16 %v1486_v35, %v1486_v35  ;;  %v4832_v57 = vsel %vm3542_vm3, %v1516_v55, 0 }
 0x451   :  { %v3499_v62 = vsel %vm3473_vm4, %v15631_v15, %v14235_v39  ;;  %v3498_v26 = vsel %vm3473_vm4, %v15622_v4, %v14234_v31  ;;  %v1471_v15 = vcombine.high %v1461_v48, %v1469_v10 }
 0x452   :  { %v3531_v42 = vpack.c.bf16 %v3499_v62, %v3499_v62  ;;  %v3530_v27 = vpack.c.bf16 %v3498_v26, %v3498_v26  ;;  %v4878_v22 = vsel %vm3542_vm3, %v1517_v7, 0 }
 0x453   :  { %v1485_v0 = vrot.slane %v1471_v15, %v14871_v53 }
 0x455   :  { %13649 = vmatmul.mubr.msk.bf16.vlgmr.msra.gmra.mxu1 %vm3538_vm5, %v3530_v27  ;;  %13655 = vmatmul.mubr.msk.bf16.vlgmr.msra.gmra.mxu0 %vm3538_vm5, %v3531_v42  ;;  %v1487_v18 = vcombine.high %v1485_v0, %v17669_v1  ;;  %v1518_v60 = vpack.c.bf16 %v1485_v0, %v1485_v0 }
 0x456   :  { %13659 = vmatpush3.bf16.msra.mxu1 %v4740_v61  ;;  %13665 = vmatpush3.bf16.msra.mxu0 %v4786_v45  ;;  %v14238_v4 = vpop.permute.xlu1 %14237 }
 0x457   :  { %13660 = vmatprep.mubr.msk.bf16.mxu1 %vm14713_vm0, %v17669_v1  ;;  %13666 = vmatprep.mubr.msk.bf16.mxu0 %vm14713_vm0, %v17669_v1  ;;  %v14240_v43 = vunpack.i.h.bf16 %v14238_v4  ;;  %v14239_v51 = vunpack.i.l.bf16 %v14238_v4  ;;  %v1519_v47 = vpack.c.bf16 %v1487_v18, %v1487_v18  ;;  %v4924_v54 = vsel %vm3542_vm3, %v1518_v60, 0 }
 0x458   :  { %13670 = vmatprep.subr.bf16.mxu1 %v17669_v1  ;;  %13676 = vmatprep.subr.bf16.mxu0 %v17669_v1 }
 0x459   :  { %v3501_v24 = vsel %vm3473_vm4, %v15664_v29, %v14240_v43  ;;  %v3500_v19 = vsel %vm3473_vm4, %v15651_v6, %v14239_v51  ;;  %v4970_v17 = vsel %vm3542_vm3, %v1519_v47, 0 }
 0x45a   :  { %v3533_v16 = vpack.c.bf16 %v3501_v24, %v3501_v24  ;;  %v3532_v3 = vpack.c.bf16 %v3500_v19, %v3500_v19 }
 0x45d   :  { %13661 = vmatmul.mubr.msk.bf16.vlgmr.msra.gmra.mxu1 %vm3538_vm5, %v3532_v3  ;;  %13667 = vmatmul.mubr.msk.bf16.vlgmr.msra.gmra.mxu0 %vm3538_vm5, %v3533_v16 }
 0x45e   :  { %13671 = vmatpush3.bf16.msra.mxu1 %v4832_v57  ;;  %13677 = vmatpush3.bf16.msra.mxu0 %v4878_v22 }
 0x45f   :  { %v14243_v49 = vpop.permute.xlu0 %14242  ;;  %13672 = vmatprep.mubr.msk.bf16.mxu1 %vm14713_vm0, %v17669_v1  ;;  %13678 = vmatprep.mubr.msk.bf16.mxu0 %vm14713_vm0, %v17669_v1 }
 0x460   :  { %v14245_v6 = vunpack.i.h.bf16 %v14243_v49  ;;  %v14244_v29 = vunpack.i.l.bf16 %v14243_v49  ;;  %13682 = vmatprep.subr.bf16.mxu1 %v17669_v1  ;;  %13688 = vmatprep.subr.bf16.mxu0 %v17669_v1 }
 0x462   :  { %v3503_v44 = vsel %vm3473_vm4, %v15704_v13, %v14245_v6  ;;  %v3502_v36 = vsel %vm3473_vm4, %v15699_v23, %v14244_v29 }
 0x463   :  { %v3535_v59 = vpack.c.bf16 %v3503_v44, %v3503_v44  ;;  %v3534_v38 = vpack.c.bf16 %v3502_v36, %v3502_v36 }
 0x465   :  { %13673 = vmatmul.mubr.msk.bf16.vlgmr.msra.gmra.mxu1 %vm3538_vm5, %v3534_v38  ;;  %13679 = vmatmul.mubr.msk.bf16.vlgmr.msra.gmra.mxu0 %vm3538_vm5, %v3535_v59 }
 0x466   :  { %13683 = vmatpush3.bf16.msra.mxu1 %v4924_v54  ;;  %13689 = vmatpush3.bf16.msra.mxu0 %v4970_v17 }
 0x467   :  { %v14248_v50 = vpop.permute.xlu1 %14247  ;;  %13684 = vmatprep.mubr.msk.bf16.mxu1 %vm14713_vm0, %v17669_v1  ;;  %13690 = vmatprep.mubr.msk.bf16.mxu0 %vm14713_vm0, %v17669_v1 }
 0x468   :  { %v14250_v58 = vunpack.i.h.bf16 %v14248_v50  ;;  %v14249_v41 = vunpack.i.l.bf16 %v14248_v50  ;;  %13694 = vmatprep.subr.bf16.mxu1 %v17669_v1  ;;  %13702 = vmatprep.subr.bf16.mxu0 %v17669_v1 }
 0x46a   :  { %v3505_v23 = vsel %vm3473_vm4, %v15730_v52, %v14250_v58  ;;  %v3504_v13 = vsel %vm3473_vm4, %v15721_v25, %v14249_v41 }
 0x46b   :  { %v3537_v12 = vpack.c.bf16 %v3505_v23, %v3505_v23  ;;  %v3536_v32 = vpack.c.bf16 %v3504_v13, %v3504_v13 }
 0x46d   :  { %13685 = vmatmul.mubr.msk.bf16.vlgmr.msra.gmra.mxu1 %vm3538_vm5, %v3536_v32  ;;  %13691 = vmatmul.mubr.msk.bf16.vlgmr.msra.gmra.mxu0 %vm3538_vm5, %v3537_v12 }
 0x46e   :  { %13698 = vmatprep.mubr.msk.bf16.mxu1 %vm14713_vm0, %v17669_v1  ;;  %13706 = vmatprep.mubr.msk.bf16.mxu0 %vm14713_vm0, %v17669_v1 }
 0x47a   :  { %v3580_v33 = vpop.f32.mrf.mxu1  ;;  %v3626_v14 = vpop.f32.mrf.mxu0 }
 0x47c   :  { %v13506_v46 = vpop.f32.mrf.mxu1  ;;  %v13512_v63 = vpop.f32.mrf.mxu0 }
 0x47e   :  { %v3583_v52 = vpop.f32.mrf.mxu1  ;;  %v3629_v10 = vpop.f32.mrf.mxu0 }
 0x480   :  { %v13507_v56 = vpop.f32.mrf.mxu1  ;;  %v13513_v25 = vpop.f32.mrf.mxu0 }
 0x482   :  { %v3672_v37 = vpop.f32.mrf.mxu1  ;;  %v3718_v48 = vpop.f32.mrf.mxu0 }
 0x483   :  { %v5012_v9 = vcombine.low %v3580_v33, %v3672_v37  ;;  %v5020_v34 = vcombine.low %v3626_v14, %v3718_v48 }
 0x484   :  { %v13518_v2 = vpop.f32.mrf.mxu1  ;;  %v13524_v21 = vpop.f32.mrf.mxu0 }
 0x485   :  { %v5019_v11 = vrot.slane %v5012_v9, %v14794_v8  ;;  %v5027_v39 = vrot.slane %v5020_v34, %v14794_v8 }
 0x486   :  { %v3675_v31 = vpop.f32.mrf.mxu1  ;;  %v3721_v30 = vpop.f32.mrf.mxu0 }
 0x487   :  { %v5028_v20 = vcombine.low %v5019_v11, %v5027_v39 }
 0x488   :  { %v13519_v62 = vpop.f32.mrf.mxu1  ;;  %v13525_v26 = vpop.f32.mrf.mxu0 }
 0x489   :  { %v5035_v6 = vrot.slane %v5028_v20, %v14871_v53 }
 0x48a   :  { %v3810_v40 = vpop.f32.mrf.mxu0 }
 0x48b   :  { %v3764_v42 = vpop.f32.mrf.mxu1 }
 0x48c   :  { %v13536_v27 = vpop.f32.mrf.mxu0 }
 0x48d   :  { %v13530_v61 = vpop.f32.mrf.mxu1 }
 0x48e   :  { %v3813_v45 = vpop.f32.mrf.mxu0 }
 0x48f   :  { %v3767_v35 = vpop.f32.mrf.mxu1 }
 0x490   :  { %v13537_v15 = vpop.f32.mrf.mxu0 }
 0x491   :  { %v13531_v4 = vpop.f32.mrf.mxu1 }
 0x492   :  { %v3902_v43 = vpop.f32.mrf.mxu0 }
 0x493   :  { %v3856_v51 = vpop.f32.mrf.mxu1  ;;  %v5045_v55 = vcombine.low %v3810_v40, %v3902_v43 }
 0x494   :  { %v5037_v7 = vcombine.low %v3764_v42, %v3856_v51  ;;  %v13548_v0 = vpop.f32.mrf.mxu0 }
 0x495   :  { %v5052_v24 = vrot.slane %v5045_v55, %v14794_v8  ;;  %v13542_v19 = vpop.f32.mrf.mxu1 }
 0x496   :  { %v5044_v16 = vrot.slane %v5037_v7, %v14794_v8  ;;  %v3905_v3 = vpop.f32.mrf.mxu0 }
 0x497   :  { %v3859_v57 = vpop.f32.mrf.mxu1 }
 0x498   :  { %v5053_v22 = vcombine.low %v5044_v16, %v5052_v24  ;;  %v13549_v18 = vpop.f32.mrf.mxu0 }
 0x499   :  { %v13543_v49 = vpop.f32.mrf.mxu1 }
 0x49a   :  { %v5060_v29 = vrot.slane %v5053_v22, %v14871_v53  ;;  %v3994_v60 = vpop.f32.mrf.mxu0 }
 0x49b   :  { %v3948_v47 = vpop.f32.mrf.mxu1 }
 0x49c   :  { %v5212_v44 = vcombine.low %v5035_v6, %v5060_v29  ;;  %v12894_v36 = vcombine.high %v5035_v6, %v5060_v29  ;;  %v13560_v59 = vpop.f32.mrf.mxu0 }
 0x49d   :  { %v13554_v38 = vpop.f32.mrf.mxu1 }
 0x49e   :  { %v5219_v54 = vrot.slane %v5212_v44, %v14794_v8  ;;  %v5227_v17 = vrot.slane %v12894_v36, %v14794_v8  ;;  %v3997_v50 = vpop.f32.mrf.mxu0 }
 0x49f   :  { %v3951_v58 = vpop.f32.mrf.mxu1 }
 0x4a0   :  { %v13561_v41 = vpop.f32.mrf.mxu0  ;;  %v5245_v23 = vcombine.high %v5219_v54, %v5227_v17  ;;  %v5244_v13 = vcombine.low %v5219_v54, %v5227_v17 }
 0x4a1   :  { %v13555_v12 = vpop.f32.mrf.mxu1 }
 0x4a2   :  { %v4086_v32 = vpop.f32.mrf.mxu0  ;;  %v15915_v49 = vrot.slane %v5245_v23, %v14871_v53  ;;  %v15921_v29 = vrot.slane %v5244_v13, %v14871_v53 }
 0x4a3   :  { %v4040_v33 = vpop.f32.mrf.mxu1  ;;  %v5070_v14 = vcombine.low %v3994_v60, %v4086_v32 }
 0x4a4   :  { %v5062_v46 = vcombine.low %v3948_v47, %v4040_v33  ;;  %v13572_v63 = vpop.f32.mrf.mxu0 }
 0x4a5   :  { %v5077_v52 = vrot.slane %v5070_v14, %v14794_v8  ;;  %v13566_v10 = vpop.f32.mrf.mxu1 }
 0x4a6   :  { %v5069_v56 = vrot.slane %v5062_v46, %v14794_v8  ;;  %v4089_v25 = vpop.f32.mrf.mxu0 }
 0x4a7   :  { %v4043_v37 = vpop.f32.mrf.mxu1 }
 0x4a8   :  { %v5078_v48 = vcombine.low %v5069_v56, %v5077_v52  ;;  %v13573_v9 = vpop.f32.mrf.mxu0 }
 0x4a9   :  { %v13567_v34 = vpop.f32.mrf.mxu1 }
 0x4aa   :  { %v4178_v21 = vpop.f32.mrf.mxu0  ;;  %v5085_v0 = vrot.slane %v5078_v48, %v14871_v53 }
 0x4ab   :  { %v4132_v2 = vpop.f32.mrf.mxu1 }
 0x4ac   :  { %v13584_v39 = vpop.f32.mrf.mxu0 }
 0x4ad   :  { %v13578_v11 = vpop.f32.mrf.mxu1 }
 0x4ae   :  { %v4181_v30 = vpop.f32.mrf.mxu0 }
 0x4af   :  { %v4135_v31 = vpop.f32.mrf.mxu1 }
 0x4b0   :  { %v13585_v62 = vpop.f32.mrf.mxu0 }
 0x4b1   :  { %v13579_v20 = vpop.f32.mrf.mxu1 }
 0x4b2   :  { %v4270_v40 = vpop.f32.mrf.mxu0 }
 0x4b3   :  { %v4224_v26 = vpop.f32.mrf.mxu1  ;;  %v5095_v27 = vcombine.low %v4178_v21, %v4270_v40 }
 0x4b4   :  { %v5087_v42 = vcombine.low %v4132_v2, %v4224_v26  ;;  %v13596_v45 = vpop.f32.mrf.mxu0 }
 0x4b5   :  { %v13590_v61 = vpop.f32.mrf.mxu1  ;;  %v5102_v15 = vrot.slane %v5095_v27, %v14794_v8 }
 0x4b6   :  { %v5094_v35 = vrot.slane %v5087_v42, %v14794_v8  ;;  %v4273_v43 = vpop.f32.mrf.mxu0 }
 0x4b7   :  { %v4227_v4 = vpop.f32.mrf.mxu1 }
 0x4b8   :  { %v5103_v51 = vcombine.low %v5094_v35, %v5102_v15  ;;  %v13597_v7 = vpop.f32.mrf.mxu0 }
 0x4b9   :  { %v13591_v55 = vpop.f32.mrf.mxu1 }
 0x4ba   :  { %v5110_v24 = vrot.slane %v5103_v51, %v14871_v53 }
 0x4bc   :  { %v5228_v19 = vcombine.low %v5085_v0, %v5110_v24  ;;  %v12895_v16 = vcombine.high %v5085_v0, %v5110_v24 }
 0x4be   :  { %v5235_v3 = vrot.slane %v5228_v19, %v14794_v8  ;;  %v5243_v57 = vrot.slane %v12895_v16, %v14794_v8 }
 0x4c0   :  { %v5261_v22 = vcombine.high %v5235_v3, %v5243_v57  ;;  %v5260_v18 = vcombine.low %v5235_v3, %v5243_v57 }
 0x4c2   :  { %v15918_v6 = vrot.slane %v5261_v22, %v14871_v53  ;;  %v15924_v60 = vrot.slane %v5260_v18, %v14871_v53 }
 0x4c4   :  { %v5278_v47 = vcombine.low %v15915_v49, %v15918_v6  ;;  %v5276_v44 = vcombine.low %v15921_v29, %v15924_v60  ;;  %v5277_v36 = vcombine.high %v15921_v29, %v15924_v60  ;;  %v5279_v59 = vcombine.high %v15915_v49, %v15918_v6  ;;  %v15987_v60 = vld [vmem:[#allocation2] sm:$0xff] }
 0x4c5   :  { %v17668_v29 = vsub.s32 1, %v14785_v5 }
 0x4f4   :  { %v4316_v38 = vpop.f32.mrf.mxu1  ;;  %v4362_v54 = vpop.f32.mrf.mxu0 }
 0x4f6   :  { %v13602_v17 = vpop.f32.mrf.mxu1  ;;  %v13608_v50 = vpop.f32.mrf.mxu0 }
 0x4f8   :  { %v4319_v58 = vpop.f32.mrf.mxu1  ;;  %v4365_v41 = vpop.f32.mrf.mxu0 }
 0x4fa   :  { %v13603_v23 = vpop.f32.mrf.mxu1  ;;  %v13609_v13 = vpop.f32.mrf.mxu0 }
 0x4fd   :  { %v4408_v12 = vpop.f32.mrf.mxu1  ;;  %v4454_v32 = vpop.f32.mrf.mxu0 }
 0x4fe   :  { %v5112_v16 = vcombine.low %v4316_v38, %v4408_v12  ;;  %v5120_v3 = vcombine.low %v4362_v54, %v4454_v32 }
 0x4ff   :  { %v13614_v33 = vpop.f32.mrf.mxu1  ;;  %v13620_v14 = vpop.f32.mrf.mxu0 }
 0x500   :  { %v5119_v41 = vrot.slane %v5112_v16, %v14794_v8  ;;  %v5127_v23 = vrot.slane %v5120_v3, %v14794_v8 }
 0x501   :  { %v4411_v46 = vpop.f32.mrf.mxu1  ;;  %v4457_v63 = vpop.f32.mrf.mxu0 }
 0x502   :  { %v5128_v54 = vcombine.low %v5119_v41, %v5127_v23  ;;  %v14364_v41 = vld [vmem:[%s17655_s2] sm:$0xff]  }
 0x503   :  { %v13615_v52 = vpop.f32.mrf.mxu1  ;;  %v13621_v10 = vpop.f32.mrf.mxu0 }
 0x505   :  { %v4500_v56 = vpop.f32.mrf.mxu1  ;;  %v4546_v25 = vpop.f32.mrf.mxu0 }
 0x507   :  { %v13626_v37 = vpop.f32.mrf.mxu1  ;;  %v13632_v48 = vpop.f32.mrf.mxu0 }
 0x509   :  { %v4503_v9 = vpop.f32.mrf.mxu1  ;;  %v4549_v34 = vpop.f32.mrf.mxu0 }
 0x50a   :  { %v5135_v9 = vrot.slane %v5128_v54, %v14871_v53 }
 0x50b   :  { %v13627_v2 = vpop.f32.mrf.mxu1  ;;  %v13633_v21 = vpop.f32.mrf.mxu0 }
 0x50d   :  { %v4592_v11 = vpop.f32.mrf.mxu1  ;;  %v4638_v39 = vpop.f32.mrf.mxu0 }
 0x50e   :  { %v5137_v7 = vcombine.low %v4500_v56, %v4592_v11  ;;  %v5145_v0 = vcombine.low %v4546_v25, %v4638_v39 }
 0x50f   :  { %v13638_v31 = vpop.f32.mrf.mxu1  ;;  %v13644_v30 = vpop.f32.mrf.mxu0 }
 0x510   :  { %v5144_v18 = vrot.slane %v5137_v7, %v14794_v8  ;;  %v5152_v17 = vrot.slane %v5145_v0, %v14794_v8  ;;  %v14363_v0 = vld [vmem:[%s17655_s2 + $0x8] sm:$0xff]  }
 0x511   :  { %v4595_v20 = vpop.f32.mrf.mxu1  ;;  %v4641_v62 = vpop.f32.mrf.mxu0  ;;  %13695 = vmatpush3.bf16.msra.mxu1 %v14363_v0 }
 0x512   :  { %v5153_v14 = vcombine.low %v5144_v18, %v5152_v17  ;;  %13696 = vmatprep.subr.bf16.mxu1 %v17669_v1 }
 0x513   :  { %v13639_v26 = vpop.f32.mrf.mxu1  ;;  %v13645_v40 = vpop.f32.mrf.mxu0 }
 0x514   :  { %v5160_v10 = vrot.slane %v5153_v14, %v14871_v53 }
 0x515   :  { %v4684_v42 = vpop.f32.mrf.mxu1  ;;  %v4730_v27 = vpop.f32.mrf.mxu0  ;;  %13697 = vmatpush3.bf16.msra.mxu1 %v14364_v41 }
 0x516   :  { %v5280_v39 = vcombine.low %v5135_v9, %v5160_v10  ;;  %v12896_v20 = vcombine.high %v5135_v9, %v5160_v10  ;;  %13710 = vmatprep.subr.bf16.mxu1 %v17669_v1 }
 0x517   :  { %v13650_v61 = vpop.f32.mrf.mxu1  ;;  %v13656_v45 = vpop.f32.mrf.mxu0 }
 0x519   :  { %v4687_v35 = vpop.f32.mrf.mxu1  ;;  %v4733_v15 = vpop.f32.mrf.mxu0 }
 0x51a   :  { %v5287_v15 = vrot.slane %v5280_v39, %v14794_v8 }
 0x51b   :  { %v13651_v4 = vpop.f32.mrf.mxu1  ;;  %v13657_v43 = vpop.f32.mrf.mxu0 }
 0x51c   :  { %v5295_v4 = vrot.slane %v12896_v20, %v14794_v8 }
 0x51d   :  { %v4776_v51 = vpop.f32.mrf.mxu1  ;;  %v4822_v55 = vpop.f32.mrf.mxu0 }
 0x51e   :  { %v5162_v52 = vcombine.low %v4684_v42, %v4776_v51  ;;  %v5170_v38 = vcombine.low %v4730_v27, %v4822_v55  ;;  %v5313_v16 = vcombine.high %v5287_v15, %v5295_v4  ;;  %v5312_v3 = vcombine.low %v5287_v15, %v5295_v4 }
 0x51f   :  { %v13662_v24 = vpop.f32.mrf.mxu1  ;;  %v13668_v19 = vpop.f32.mrf.mxu0 }
 0x520   :  { %v5169_v37 = vrot.slane %v5162_v52, %v14794_v8  ;;  %v5177_v48 = vrot.slane %v5170_v38, %v14794_v8  ;;  %v5327_v18 = vrot.slane %v5313_v16, %v14871_v53 }
 0x521   :  { %v4779_v57 = vpop.f32.mrf.mxu1  ;;  %v4825_v22 = vpop.f32.mrf.mxu0 }
 0x522   :  { %v5178_v62 = vcombine.low %v5169_v37, %v5177_v48 }
 0x523   :  { %v13663_v50 = vpop.f32.mrf.mxu1  ;;  %v13669_v58 = vpop.f32.mrf.mxu0 }
 0x524   :  { %v5185_v43 = vrot.slane %v5178_v62, %v14871_v53  ;;  %v5320_v50 = vrot.slane %v5312_v3, %v14871_v53 }
 0x525   :  { %v4868_v13 = vpop.f32.mrf.mxu1  ;;  %v4914_v33 = vpop.f32.mrf.mxu0 }
 0x527   :  { %v13674_v46 = vpop.f32.mrf.mxu1  ;;  %v13680_v63 = vpop.f32.mrf.mxu0 }
 0x529   :  { %v4871_v12 = vpop.f32.mrf.mxu1  ;;  %v4917_v32 = vpop.f32.mrf.mxu0 }
 0x52b   :  { %v13675_v56 = vpop.f32.mrf.mxu1  ;;  %v13681_v25 = vpop.f32.mrf.mxu0 }
 0x52d   :  { %v4960_v34 = vpop.f32.mrf.mxu1  ;;  %v5006_v2 = vpop.f32.mrf.mxu0 }
 0x52e   :  { %v5187_v21 = vcombine.low %v4868_v13, %v4960_v34  ;;  %v5195_v11 = vcombine.low %v4914_v33, %v5006_v2 }
 0x52f   :  { %v13686_v31 = vpop.f32.mrf.mxu1  ;;  %v13692_v30 = vpop.f32.mrf.mxu0 }
 0x530   :  { %v5194_v26 = vrot.slane %v5187_v21, %v14794_v8  ;;  %v5202_v40 = vrot.slane %v5195_v11, %v14794_v8 }
 0x531   :  { %v4963_v42 = vpop.f32.mrf.mxu1  ;;  %v5009_v27 = vpop.f32.mrf.mxu0 }
 0x532   :  { %v5203_v61 = vcombine.low %v5194_v26, %v5202_v40  ;;  %v14656_v27 = vld [vmem:[%s17653_s0] sm:$0x3] }
 0x533   :  { %v13687_v45 = vpop.f32.mrf.mxu1  ;;  %v13693_v35 = vpop.f32.mrf.mxu0 }
 0x534   :  { %v5210_v51 = vrot.slane %v5203_v61, %v14871_v53  ;;  %v14657_v45 = vld [vmem:[%s17653_s0 + $0x2] sm:$0x3] }
 0x536   :  { %v5296_v55 = vcombine.low %v5185_v43, %v5210_v51  ;;  %v12897_v7 = vcombine.high %v5185_v43, %v5210_v51  ;;  %v14658_v43 = vld [vmem:[%s17653_s0 + $0x4] sm:$0x3] }
 0x538   :  { %v5303_v24 = vrot.slane %v5296_v55, %v14794_v8  ;;  %v5311_v19 = vrot.slane %v12897_v7, %v14794_v8  ;;  %v14659_v7 = vld [vmem:[%s17653_s0 + $0x6] sm:$0x3] }
 0x53a   :  { %v5329_v57 = vcombine.high %v5303_v24, %v5311_v19  ;;  %v5328_v22 = vcombine.low %v5303_v24, %v5311_v19 }
 0x53c   :  { %v5343_v17 = vrot.slane %v5329_v57, %v14871_v53  ;;  %v5336_v58 = vrot.slane %v5328_v22, %v14871_v53  ;;  %v14660_v57 = vld [vmem:[%s17653_s0 + $0x8] sm:$0x3] }
 0x53e   :  { %v5346_v23 = vcombine.low %v5327_v18, %v5343_v17  ;;  %v5345_v13 = vcombine.high %v5320_v50, %v5336_v58  ;;  %v5344_v33 = vcombine.low %v5320_v50, %v5336_v58  ;;  %v5347_v63 = vcombine.high %v5327_v18, %v5343_v17  ;;  %v14661_v18 = vld [vmem:[%s17653_s0 + $0xa] sm:$0x3]  ;;  %v14662_v50 = vld [vmem:[%s17653_s0 + $0xc] sm:$0x3] }
 0x540   :  { %v14256_v14 = vpack.i.bf16 %v5346_v23, %v5278_v47  ;;  %v14251_v46 = vpack.i.bf16 %v5345_v13, %v5277_v36  ;;  %v14261_v52 = vpack.i.bf16 %v5347_v63, %v5279_v59  ;;  %v14663_v13 = vld [vmem:[%s17653_s0 + $0xe] sm:$0x3] }
 0x542   :  { %14257 = vrot.lane.b32.xlu1 %v14256_v14, %s14723_s20  ;;  %14252 = vrot.lane.b32.xlu0 %v14251_v46, %s14711_s9 }
 0x546   :  { %14262 = vrot.lane.b32.xlu0 %v14261_v52, %s14724_s21 }
 0x5b4   :  { %v14258_v38 = vpop.permute.xlu1 %14257  ;;  %v14253_v54 = vpop.permute.xlu0 %14252 }
 0x5b5   :  { %v14255_v47 = vunpack.i.h.bf16 %v14253_v54  ;;  %v14254_v12 = vunpack.i.l.bf16 %v14253_v54  ;;  %v14260_v32 = vunpack.i.h.bf16 %v14258_v38  ;;  %v14259_v10 = vunpack.i.l.bf16 %v14258_v38 }
 0x5b7   :  { %v5372_v36 = vsel %vm1520_vm2, %v5276_v44, %v14254_v12  ;;  %v5373_v56 = vsel %vm1520_vm2, %v5344_v33, %v14255_v47  ;;  %v5384_v44 = vrot.slane %v15987_v60, %v17668_v29 }
 0x5b8   :  { %v14263_v49 = vpop.permute.xlu0 %14262  ;;  %v5375_v25 = vsel %vm5374_vm6, %v5372_v36, %v14259_v10  ;;  %v5376_v37 = vsel %vm5374_vm6, %v5373_v56, %v14260_v32  ;;  %v14725_v32 = vmov 269488144   ;;  %v14726_v36 = vmov 842150450  }
 0x5b9   :  { %v14265_v6 = vunpack.i.h.bf16 %v14263_v49  ;;  %v14264_v59 = vunpack.i.l.bf16 %v14263_v49  ;;  %v5549_v10 = vunpack.c.l.s4 %v14725_v32  ;;  %v5556_v56 = vunpack.c.l.s4 %v14726_v36  ;;  %v14366_v32 = vld [vmem:[%s17656_s3] sm:$0xff]  }
 0x5ba   :  { %v14727_v49 = vmov 1414812756  }
 0x5bb   :  { %v5378_v48 = vsel %vm5377_vm7, %v5375_v25, %v14264_v59  ;;  %v5379_v9 = vsel %vm5377_vm7, %v5376_v37, %v14265_v6  ;;  %v5563_v6 = vunpack.c.l.s4 %v14727_v49  ;;  %v14728_v59 = vmov 1987475062  }
 0x5bc   :  { %v5380_v34 = vpack.c.bf16 %v5379_v9, %v5378_v48  ;;  %v5570_v25 = vunpack.c.l.s4 %v14728_v59  ;;  %v5550_v37 = vunpack.c.0.s8 %v5549_v10  ;;  %v5557_v48 = vunpack.c.0.s8 %v5556_v56  ;;  %v14367_v10 = vld [vmem:[%s17657_s4 + $0x18] sm:$0xff]  }
 0x5bd   :  { %v5564_v9 = vunpack.c.0.s8 %v5563_v6  ;;  %v17667_v49 = vsub.s32 2, %v14785_v5 }
 0x5be   :  { %13699 = vmatmul.mubr.msk.bf16.vlgmr.msra.gmra.mxu1 %vm135_vm1, %v5380_v34  ;;  %v5571_v34 = vunpack.c.0.s8 %v5570_v25 }
 0x5bf   :  { %13718 = vmatprep.mubr.msk.bf16.mxu1 %vm14713_vm0, %v17669_v1  ;;  %13711 = vmatpush3.bf16.msra.mxu1 %v14367_v10 }
 0x5c0   :  { %13712 = vmatprep.subr.bf16.mxu1 %v17669_v1 }
 0x67e   :  { %v5434_v2 = vpop.f32.mrf.mxu1 }
 0x67f   :  { %v5435_v21 = vadd.f32 %v5434_v2, %v5384_v44  ;;  %v16030_v2 = vsub.s32 %v5557_v48, %v14785_v5 }
 0x680   :  { %v13700_v11 = vpop.f32.mrf.mxu1 }
 0x681   :  { %v5443_v39 = vcombine.high %v5435_v21, %v5435_v21  ;;  %v5450_v31 = vrot.slane %v5435_v21, %v14794_v8  ;;  %v16033_v21 = vsub.s32 %v5564_v9, %v14785_v5  ;;  %v16036_v11 = vsub.s32 %v5571_v34, %v14785_v5 }
 0x682   :  { %v5437_v30 = vpop.f32.mrf.mxu1  ;;  %v5761_v9 = vrot.slane %v15987_v60, %v17667_v49 }
 0x683   :  { %v5457_v20 = vrot.slane %v5443_v39, %v14794_v8  ;;  %v5458_v62 = vcombine.high %v5450_v31, %v5450_v31  ;;  %v5438_v26 = vadd.f32 %v5437_v30, %v5384_v44  ;;  %v5485_v61 = vadd.f32 %v14656_v27, %v5450_v31  ;;  %17675 = vst [vmem:[#allocation8_spill] sm:$0xff] %v16033_v21 }
 0x684   :  { %v13701_v40 = vpop.f32.mrf.mxu1  ;;  %v16027_v44 = vsub.s32 %v5550_v37, %v14785_v5  ;;  %17676 = vst [vmem:[#allocation9_spill] sm:$0xff] %v16036_v11  ;;  %v17666_v37 = vsub.s32 3, %v14785_v5 }
 0x685   :  { %v5459_v42 = vcombine.high %v5457_v20, %v5457_v20  ;;  %v5486_v35 = vadd.f32 %v14657_v45, %v5458_v62  ;;  %v5460_v15 = vcombine.high %v5438_v26, %v5438_v26  ;;  %v5467_v4 = vrot.slane %v5438_v26, %v14794_v8 }
 0x686   :  { %v5487_v51 = vadd.f32 %v14658_v43, %v5457_v20  ;;  %v5795_v34 = vrot.slane %v15987_v60, %v17666_v37 }
 0x687   :  { %v5474_v55 = vrot.slane %v5460_v15, %v14794_v8  ;;  %v5488_v0 = vadd.f32 %v14659_v7, %v5459_v42  ;;  %v5501_v24 = vcombine.low %v5485_v61, %v5486_v35  ;;  %v5475_v19 = vcombine.high %v5467_v4, %v5467_v4 }
 0x688   :  { %v5489_v22 = vadd.f32 %v14660_v57, %v5467_v4 }
 0x689   :  { %v5476_v16 = vcombine.high %v5474_v55, %v5474_v55  ;;  %v5502_v3 = vcombine.low %v5487_v51, %v5488_v0  ;;  %v5490_v17 = vadd.f32 %v14661_v18, %v5475_v19  ;;  %v5491_v58 = vadd.f32 %v14662_v50, %v5474_v55 }
 0x68a   :  { %v5509_v41 = vrot.slane %v5501_v24, %v14794_v8 }
 0x68b   :  { %v5516_v23 = vrot.slane %v5502_v3, %v14794_v8  ;;  %v5492_v33 = vadd.f32 %v14663_v13, %v5476_v16  ;;  %v5518_v14 = vcombine.low %v5489_v22, %v5490_v17 }
 0x68d   :  { %v5517_v46 = vcombine.low %v5509_v41, %v5516_v23  ;;  %v5519_v63 = vcombine.low %v5491_v58, %v5492_v33  ;;  %v5526_v38 = vrot.slane %v5518_v14, %v14794_v8 }
 0x68f   :  { %v5537_v52 = vsel %vm135_vm1, %v5517_v46, 0.0  ;;  %v5533_v54 = vrot.slane %v5519_v63, %v14794_v8 }
 0x690   :  { %5538 = vadd.xlane.f32.xlu1 %v5537_v52 }
 0x691   :  { %v5534_v47 = vcombine.low %v5526_v38, %v5533_v54 }
 0x693   :  { %v5540_v12 = vsel %vm135_vm1, %v5534_v47, 0.0 }
 0x694   :  { %5541 = vadd.xlane.f32.xlu0 %v5540_v12  ;;  %v14365_v12 = vld [vmem:[%s17656_s3 + $0x8] sm:$0xff]  }
 0x695   :  { %13703 = vmatpush3.bf16.msra.mxu0 %v14365_v12 }
 0x696   :  { %13704 = vmatprep.subr.bf16.mxu0 %v17669_v1 }
 0x699   :  { %13705 = vmatpush3.bf16.msra.mxu0 %v14366_v32 }
 0x69a   :  { %13722 = vmatprep.subr.bf16.mxu0 %v17669_v1 }
 0x719   :  { %v5539_v39 = vpop.xlane.xlu1 %5538 }
 0x71a   :  { %v5544_v31 = vmul.f32 0.03125, %v5539_v39  ;;  %v5763_v39 = vcombine.high %v5761_v9, %v5761_v9 }
 0x71c   :  { %v5554_v30 = vrot.slane %v5544_v31, %v16027_v44  ;;  %v5561_v20 = vrot.slane %v5544_v31, %v16030_v2  ;;  %v5568_v62 = vrot.slane %v5544_v31, %v16033_v21  ;;  %v5575_v26 = vrot.slane %v5544_v31, %v16036_v11 }
 0x71d   :  { %v5542_v40 = vpop.xlane.xlu0 %5541  ;;  %v5797_v31 = vcombine.high %v5795_v34, %v5795_v34 }
 0x71e   :  { %v5545_v42 = vmul.f32 0.03125, %v5542_v40  ;;  %v16042_v27 = vsub.f32 %v5485_v61, %v5554_v30  ;;  %v16044_v45 = vsub.f32 %v5486_v35, %v5561_v20  ;;  %v16046_v15 = vsub.f32 %v5487_v51, %v5568_v62 }
 0x71f   :  { %v16048_v4 = vsub.f32 %v5488_v0, %v5575_v26  ;;  %v5770_v30 = vrot.slane %v5761_v9, %v14794_v8  ;;  %v5777_v20 = vrot.slane %v5763_v39, %v14794_v8  ;;  %v5804_v62 = vrot.slane %v5795_v34, %v14794_v8 }
 0x720   :  { %v5582_v43 = vrot.slane %v5545_v42, %v16027_v44  ;;  %v5589_v55 = vrot.slane %v5545_v42, %v16030_v2  ;;  %v5596_v7 = vrot.slane %v5545_v42, %v16033_v21  ;;  %v5603_v24 = vrot.slane %v5545_v42, %v16036_v11 }
 0x721   :  { %v5620_v19 = vmul.f32 %v16042_v27, %v16042_v27  ;;  %v5621_v61 = vmul.f32 %v16044_v45, %v16044_v45  ;;  %v5622_v35 = vmul.f32 %v16046_v15, %v16046_v15  ;;  %v5623_v51 = vmul.f32 %v16048_v4, %v16048_v4 }
 0x722   :  { %v16062_v0 = vsub.f32 %v5489_v22, %v5582_v43  ;;  %v16064_v16 = vsub.f32 %v5490_v17, %v5589_v55  ;;  %v16066_v3 = vsub.f32 %v5491_v58, %v5596_v7  ;;  %v16068_v57 = vsub.f32 %v5492_v33, %v5603_v24 }
 0x723   :  { %v5636_v18 = vcombine.low %v5620_v19, %v5621_v61  ;;  %v5637_v50 = vcombine.low %v5622_v35, %v5623_v51  ;;  %v5811_v26 = vrot.slane %v5797_v31, %v14794_v8  ;;  %v5778_v42 = vcombine.high %v5770_v30, %v5770_v30 }
 0x724   :  { %v5624_v41 = vmul.f32 %v16062_v0, %v16062_v0  ;;  %v5625_v23 = vmul.f32 %v16064_v16, %v16064_v16  ;;  %v5626_v13 = vmul.f32 %v16066_v3, %v16066_v3  ;;  %v5627_v22 = vmul.f32 %v16068_v57, %v16068_v57 }
 0x725   :  { %v5644_v17 = vrot.slane %v5636_v18, %v14794_v8  ;;  %v5651_v58 = vrot.slane %v5637_v50, %v14794_v8  ;;  %v5779_v43 = vcombine.high %v5777_v20, %v5777_v20  ;;  %v5812_v61 = vcombine.high %v5804_v62, %v5804_v62 }
 0x726   :  { %v5653_v33 = vcombine.low %v5624_v41, %v5625_v23  ;;  %v5654_v14 = vcombine.low %v5626_v13, %v5627_v22  ;;  %v5813_v35 = vcombine.high %v5811_v26, %v5811_v26 }
 0x727   :  { %v5652_v46 = vcombine.low %v5644_v17, %v5651_v58 }
 0x728   :  { %v5661_v63 = vrot.slane %v5653_v33, %v14794_v8  ;;  %v5668_v52 = vrot.slane %v5654_v14, %v14794_v8 }
 0x729   :  { %v5672_v38 = vsel %vm135_vm1, %v5652_v46, 0.0 }
 0x72a   :  { %5673 = vadd.xlane.f32.xlu0 %v5672_v38  ;;  %v5669_v54 = vcombine.low %v5661_v63, %v5668_v52 }
 0x72c   :  { %v5675_v47 = vsel %vm135_vm1, %v5669_v54, 0.0 }
 0x72d   :  { %5676 = vadd.xlane.f32.xlu1 %v5675_v47 }
 0x7b3   :  { %v5674_v36 = vpop.xlane.xlu0 %5673 }
 0x7b4   :  { %v5678_v56 = vmul.f32 0.03125, %v5674_v36 }
 0x7b6   :  { %v5680_v6 = vadd.f32 1e-05, %v5678_v56  ;;  %v5677_v59 = vpop.xlane.xlu1 %5676 }
 0x7b7   :  { %v5679_v25 = vmul.f32 0.03125, %v5677_v59 }
 0x7b8   :  { %14511 = vrsqrt.f32 %v5680_v6 }
 0x7b9   :  { %v5681_v48 = vadd.f32 1e-05, %v5679_v25 }
 0x7bb   :  { %14513 = vrsqrt.f32 %v5681_v48 }
 0x7c5   :  { %v14512_v40 = vpop.eup %14511 }
 0x7c6   :  { %v5692_v55 = vrot.slane %v14512_v40, %v16027_v44  ;;  %v5699_v7 = vrot.slane %v14512_v40, %v16030_v2  ;;  %v5706_v24 = vrot.slane %v14512_v40, %v16033_v21  ;;  %v5713_v19 = vrot.slane %v14512_v40, %v16036_v11  ;;  %v14370_v40 = vld [vmem:[%s17657_s4] sm:$0xff]  }
 0x7c8   :  { %v14514_v51 = vpop.eup %14513  ;;  %v5750_v18 = vmul.f32 %v5692_v55, %v16042_v27  ;;  %v5751_v50 = vmul.f32 %v5699_v7, %v16044_v45  ;;  %v5752_v41 = vmul.f32 %v5706_v24, %v16046_v15  ;;  %v5753_v23 = vmul.f32 %v5713_v19, %v16048_v4 }
 0x7c9   :  { %v5720_v13 = vrot.slane %v14514_v51, %v16027_v44  ;;  %v5727_v22 = vrot.slane %v14514_v51, %v16030_v2  ;;  %v5734_v17 = vrot.slane %v14514_v51, %v16033_v21  ;;  %v5741_v58 = vrot.slane %v14514_v51, %v16036_v11 }
 0x7ca   :  { %v5784_v33 = vmul.f32 %v5770_v30, %v5750_v18  ;;  %v5785_v14 = vmul.f32 %v5778_v42, %v5751_v50  ;;  %v5786_v46 = vmul.f32 %v5777_v20, %v5752_v41  ;;  %v5787_v63 = vmul.f32 %v5779_v43, %v5753_v23 }
 0x7cb   :  { %v5754_v27 = vmul.f32 %v5720_v13, %v16062_v0  ;;  %v5755_v45 = vmul.f32 %v5727_v22, %v16064_v16  ;;  %v5756_v15 = vmul.f32 %v5734_v17, %v16066_v3  ;;  %v5757_v4 = vmul.f32 %v5741_v58, %v16068_v57 }
 0x7cc   :  { %v5818_v52 = vadd.f32 %v5804_v62, %v5784_v33  ;;  %v5819_v38 = vadd.f32 %v5812_v61, %v5785_v14  ;;  %v16124_v54 = vadd.f32 %v5811_v26, %v5786_v46  ;;  %v16126_v47 = vadd.f32 %v5813_v35, %v5787_v63 }
 0x7cd   :  { %v5788_v12 = vmul.f32 %v5770_v30, %v5754_v27  ;;  %v5789_v32 = vmul.f32 %v5778_v42, %v5755_v45  ;;  %v5790_v10 = vmul.f32 %v5777_v20, %v5756_v15  ;;  %v5791_v36 = vmul.f32 %v5779_v43, %v5757_v4 }
 0x7ce   :  { %v5834_v56 = vcombine.low %v5818_v52, %v5819_v38  ;;  %v5835_v0 = vcombine.low %v16124_v54, %v16126_v47  ;;  %v17665_v42 = vsub.s32 4, %v14785_v5  ;;  %v17664_v41 = vsub.s32 5, %v14785_v5 }
 0x7cf   :  { %v5822_v6 = vadd.f32 %v5804_v62, %v5788_v12  ;;  %v5823_v16 = vadd.f32 %v5812_v61, %v5789_v32  ;;  %v5824_v59 = vadd.f32 %v5811_v26, %v5790_v10  ;;  %v16130_v3 = vadd.f32 %v5813_v35, %v5791_v36  ;;  %v14368_v62 = vld [vmem:[%s17657_s4 + $0x10] sm:$0xff]   ;;  %v14369_v26 = vld [vmem:[%s17657_s4 + $0x8] sm:$0xff]  }
 0x7d0   :  { %v5842_v57 = vrot.slane %v5834_v56, %v14794_v8  ;;  %v5849_v25 = vrot.slane %v5835_v0, %v14794_v8  ;;  %13713 = vmatpush3.bf16.msra.mxu1 %v14368_v62  ;;  %v5874_v43 = vrot.slane %v15987_v60, %v17665_v42  ;;  %v5937_v23 = vrot.slane %v15987_v60, %v17664_v41 }
 0x7d1   :  { %v5851_v48 = vcombine.low %v5822_v6, %v5823_v16  ;;  %v5852_v9 = vcombine.low %v5824_v59, %v16130_v3  ;;  %13714 = vmatprep.subr.bf16.mxu1 %v17669_v1 }
 0x7d2   :  { %v5850_v31 = vcombine.low %v5842_v57, %v5849_v25 }
 0x7d3   :  { %v5859_v34 = vrot.slane %v5851_v48, %v14794_v8  ;;  %v5866_v39 = vrot.slane %v5852_v9, %v14794_v8 }
 0x7d4   :  { %13715 = vmatpush3.bf16.msra.mxu1 %v14369_v26 }
 0x7d5   :  { %v5867_v30 = vcombine.low %v5859_v34, %v5866_v39  ;;  %13716 = vmatprep.subr.bf16.mxu1 %v17669_v1 }
 0x7d7   :  { %v5870_v20 = vpack.c.bf16 %v5867_v30, %v5850_v31 }
 0x7d8   :  { %13717 = vmatpush3.bf16.msra.mxu1 %v14370_v40 }
 0x7d9   :  { %13707 = vmatmul.mubr.msk.bf16.vlgmr.msra.gmra.mxu0 %vm135_vm1, %v5870_v20  ;;  %13736 = vmatprep.subr.bf16.mxu1 %v17669_v1 }
 0x7da   :  { %13726 = vmatprep.mubr.msk.bf16.mxu0 %vm14713_vm0, %v17669_v1 }
 0x899   :  { %v5924_v55 = vpop.f32.mrf.mxu0 }
 0x89a   :  { %v5925_v24 = vadd.f32 %v5924_v55, %v5874_v43 }
 0x89b   :  { %v13708_v7 = vpop.f32.mrf.mxu0 }
 0x89c   :  { %v5931_v51 = vmax.f32 %v5925_v24, 0.0 }
 0x89d   :  { %v5927_v19 = vpop.f32.mrf.mxu0 }
 0x89e   :  { %v5928_v61 = vadd.f32 %v5927_v19, %v5874_v43 }
 0x89f   :  { %v13709_v35 = vpop.f32.mrf.mxu0 }
 0x8a0   :  { %v5932_v18 = vmax.f32 %v5928_v61, 0.0 }
 0x8a2   :  { %v5933_v50 = vpack.c.bf16 %v5932_v18, %v5931_v51 }
 0x8a4   :  { %13719 = vmatmul.mubr.msk.bf16.vlgmr.msra.gmra.mxu1 %vm5962_vm8, %v5933_v50 }
 0x8a5   :  { %13738 = vmatprep.mubr.msk.bf16.mxu1 %vm14713_vm0, %v17669_v1 }
 0x964   :  { %v6000_v13 = vpop.f32.mrf.mxu1 }
 0x965   :  { %v6001_v22 = vadd.f32 %v6000_v13, %v5937_v23 }
 0x966   :  { %v13720_v17 = vpop.f32.mrf.mxu1 }
 0x967   :  { %v6009_v58 = vcombine.high %v6001_v22, %v6001_v22  ;;  %v6016_v33 = vrot.slane %v6001_v22, %v14794_v8 }
 0x968   :  { %v6003_v14 = vpop.f32.mrf.mxu1 }
 0x969   :  { %v6023_v46 = vrot.slane %v6009_v58, %v14794_v8  ;;  %v6024_v63 = vcombine.high %v6016_v33, %v6016_v33  ;;  %v6004_v27 = vadd.f32 %v6003_v14, %v5937_v23  ;;  %v6051_v4 = vadd.f32 %v6016_v33, %v5818_v52 }
 0x96a   :  { %v13721_v45 = vpop.f32.mrf.mxu1 }
 0x96b   :  { %v6025_v15 = vcombine.high %v6023_v46, %v6023_v46  ;;  %v6052_v12 = vadd.f32 %v6024_v63, %v5819_v38  ;;  %v6026_v32 = vcombine.high %v6004_v27, %v6004_v27  ;;  %v6033_v10 = vrot.slane %v6004_v27, %v14794_v8 }
 0x96c   :  { %v6053_v36 = vadd.f32 %v6023_v46, %v16124_v54 }
 0x96d   :  { %v6040_v56 = vrot.slane %v6026_v32, %v14794_v8  ;;  %v6054_v0 = vadd.f32 %v6025_v15, %v16126_v47  ;;  %v6067_v57 = vcombine.low %v6051_v4, %v6052_v12  ;;  %v6041_v25 = vcombine.high %v6033_v10, %v6033_v10 }
 0x96e   :  { %v6055_v34 = vadd.f32 %v6033_v10, %v5822_v6 }
 0x96f   :  { %v6042_v48 = vcombine.high %v6040_v56, %v6040_v56  ;;  %v6068_v9 = vcombine.low %v6053_v36, %v6054_v0  ;;  %v6056_v39 = vadd.f32 %v6041_v25, %v5823_v16  ;;  %v6057_v31 = vadd.f32 %v6040_v56, %v5824_v59 }
 0x970   :  { %v6075_v30 = vrot.slane %v6067_v57, %v14794_v8 }
 0x971   :  { %v6082_v52 = vrot.slane %v6068_v9, %v14794_v8  ;;  %v6058_v38 = vadd.f32 %v6042_v48, %v16130_v3  ;;  %v6084_v20 = vcombine.low %v6055_v34, %v6056_v39 }
 0x973   :  { %v6083_v62 = vcombine.low %v6075_v30, %v6082_v52  ;;  %v6085_v54 = vcombine.low %v6057_v31, %v6058_v38  ;;  %v6092_v47 = vrot.slane %v6084_v20, %v14794_v8  ;;  %v14372_v20 = vld [vmem:[%s17654_s1 + $0x10] sm:$0xff]  }
 0x975   :  { %v6103_v26 = vsel %vm135_vm1, %v6083_v62, 0.0  ;;  %v6099_v40 = vrot.slane %v6085_v54, %v14794_v8 }
 0x976   :  { %6104 = vadd.xlane.f32.xlu0 %v6103_v26  ;;  %v17663_v26 = vsub.s32 6, %v14785_v5 }
 0x977   :  { %v6100_v43 = vcombine.low %v6092_v47, %v6099_v40 }
 0x979   :  { %v6106_v6 = vsel %vm135_vm1, %v6100_v43, 0.0 }
 0x97a   :  { %6107 = vadd.xlane.f32.xlu1 %v6106_v6  ;;  %v17662_v6 = vsub.s32 7, %v14785_v5 }
 0x9ff   :  { %v6105_v16 = vpop.xlane.xlu0 %6104 }
 0xa00   :  { %v6109_v59 = vmul.f32 0.03125, %v6105_v16 }
 0xa02   :  { %v6119_v55 = vrot.slane %v6109_v59, %v16027_v44  ;;  %v6126_v3 = vrot.slane %v6109_v59, %v16030_v2  ;;  %v6133_v7 = vrot.slane %v6109_v59, %v16033_v21  ;;  %v6140_v24 = vrot.slane %v6109_v59, %v16036_v11 }
 0xa03   :  { %v6108_v19 = vpop.xlane.xlu1 %6107  ;;  %v6326_v59 = vrot.slane %v15987_v60, %v17663_v26 }
 0xa04   :  { %v6110_v61 = vmul.f32 0.03125, %v6108_v19  ;;  %v16180_v35 = vsub.f32 %v6051_v4, %v6119_v55  ;;  %v16182_v51 = vsub.f32 %v6052_v12, %v6126_v3  ;;  %v16184_v18 = vsub.f32 %v6053_v36, %v6133_v7 }
 0xa05   :  { %v16186_v50 = vsub.f32 %v6054_v0, %v6140_v24  ;;  %v6360_v55 = vrot.slane %v15987_v60, %v17662_v6  ;;  %v6328_v3 = vcombine.high %v6326_v59, %v6326_v59  ;;  %v6335_v24 = vrot.slane %v6326_v59, %v14794_v8 }
 0xa06   :  { %v6147_v23 = vrot.slane %v6110_v61, %v16027_v44  ;;  %v6154_v13 = vrot.slane %v6110_v61, %v16030_v2  ;;  %v6161_v22 = vrot.slane %v6110_v61, %v16033_v21  ;;  %v6168_v17 = vrot.slane %v6110_v61, %v16036_v11 }
 0xa07   :  { %v6185_v58 = vmul.f32 %v16180_v35, %v16180_v35  ;;  %v6186_v33 = vmul.f32 %v16182_v51, %v16182_v51  ;;  %v6187_v14 = vmul.f32 %v16184_v18, %v16184_v18  ;;  %v6188_v46 = vmul.f32 %v16186_v50, %v16186_v50 }
 0xa08   :  { %v16200_v63 = vsub.f32 %v6055_v34, %v6147_v23  ;;  %v16202_v27 = vsub.f32 %v6056_v39, %v6154_v13  ;;  %v16204_v45 = vsub.f32 %v6057_v31, %v6161_v22  ;;  %v16206_v15 = vsub.f32 %v6058_v38, %v6168_v17  ;;  %v14371_v38 = vld [vmem:[%s17654_s1 + $0x18] sm:$0xff]  }
 0xa09   :  { %v6201_v4 = vcombine.low %v6185_v58, %v6186_v33  ;;  %v6202_v12 = vcombine.low %v6187_v14, %v6188_v46  ;;  %13723 = vmatpush3.bf16.msra.mxu0 %v14371_v38  ;;  %v6362_v7 = vcombine.high %v6360_v55, %v6360_v55  ;;  %v6342_v19 = vrot.slane %v6328_v3, %v14794_v8 }
 0xa0a   :  { %v6189_v32 = vmul.f32 %v16200_v63, %v16200_v63  ;;  %v6190_v10 = vmul.f32 %v16202_v27, %v16202_v27  ;;  %v6191_v36 = vmul.f32 %v16204_v45, %v16204_v45  ;;  %v6192_v56 = vmul.f32 %v16206_v15, %v16206_v15  ;;  %13724 = vmatprep.subr.bf16.mxu0 %v17669_v1 }
 0xa0b   :  { %v6209_v0 = vrot.slane %v6201_v4, %v14794_v8  ;;  %v6216_v57 = vrot.slane %v6202_v12, %v14794_v8  ;;  %v6369_v61 = vrot.slane %v6360_v55, %v14794_v8  ;;  %v6376_v23 = vrot.slane %v6362_v7, %v14794_v8 }
 0xa0c   :  { %v6218_v25 = vcombine.low %v6189_v32, %v6190_v10  ;;  %v6219_v48 = vcombine.low %v6191_v36, %v6192_v56  ;;  %v6343_v22 = vcombine.high %v6335_v24, %v6335_v24  ;;  %v6344_v17 = vcombine.high %v6342_v19, %v6342_v19 }
 0xa0d   :  { %v6217_v9 = vcombine.low %v6209_v0, %v6216_v57  ;;  %13725 = vmatpush3.bf16.msra.mxu0 %v14372_v20  ;;  %v6377_v46 = vcombine.high %v6369_v61, %v6369_v61  ;;  %v6378_v4 = vcombine.high %v6376_v23, %v6376_v23 }
 0xa0e   :  { %v6226_v34 = vrot.slane %v6218_v25, %v14794_v8  ;;  %v6233_v39 = vrot.slane %v6219_v48, %v14794_v8  ;;  %13730 = vmatprep.subr.bf16.mxu0 %v17669_v1 }
 0xa0f   :  { %v6237_v31 = vsel %vm135_vm1, %v6217_v9, 0.0 }
 0xa10   :  { %6238 = vadd.xlane.f32.xlu0 %v6237_v31  ;;  %v6234_v30 = vcombine.low %v6226_v34, %v6233_v39 }
 0xa12   :  { %v6240_v52 = vsel %vm135_vm1, %v6234_v30, 0.0 }
 0xa13   :  { %6241 = vadd.xlane.f32.xlu1 %v6240_v52 }
 0xa99   :  { %v6239_v62 = vpop.xlane.xlu0 %6238 }
 0xa9a   :  { %v6243_v54 = vmul.f32 0.03125, %v6239_v62 }
 0xa9c   :  { %v6245_v47 = vadd.f32 1e-05, %v6243_v54  ;;  %v6242_v40 = vpop.xlane.xlu1 %6241 }
 0xa9d   :  { %v6244_v43 = vmul.f32 0.03125, %v6242_v40 }
 0xa9e   :  { %14515 = vrsqrt.f32 %v6245_v47 }
 0xa9f   :  { %v6246_v16 = vadd.f32 1e-05, %v6244_v43 }
 0xaa1   :  { %14517 = vrsqrt.f32 %v6246_v16 }
 0xaab   :  { %v14516_v13 = vpop.eup %14515 }
 0xaac   :  { %v6257_v58 = vrot.slane %v14516_v13, %v16027_v44  ;;  %v6264_v33 = vrot.slane %v14516_v13, %v16030_v2  ;;  %v6271_v14 = vrot.slane %v14516_v13, %v16033_v21  ;;  %v6278_v60 = vrot.slane %v14516_v13, %v16036_v11 }
 0xaae   :  { %v14518_v12 = vpop.eup %14517  ;;  %v6315_v32 = vmul.f32 %v6257_v58, %v16180_v35  ;;  %v6316_v10 = vmul.f32 %v6264_v33, %v16182_v51  ;;  %v6317_v36 = vmul.f32 %v6271_v14, %v16184_v18  ;;  %v6318_v56 = vmul.f32 %v6278_v60, %v16186_v50 }
 0xaaf   :  { %v6285_v0 = vrot.slane %v14518_v12, %v16027_v44  ;;  %v6292_v57 = vrot.slane %v14518_v12, %v16030_v2  ;;  %v6299_v25 = vrot.slane %v14518_v12, %v16033_v21  ;;  %v6306_v48 = vrot.slane %v14518_v12, %v16036_v11 }
 0xab0   :  { %v6349_v9 = vmul.f32 %v6335_v24, %v6315_v32  ;;  %v6350_v34 = vmul.f32 %v6343_v22, %v6316_v10  ;;  %v6351_v39 = vmul.f32 %v6342_v19, %v6317_v36  ;;  %v6352_v31 = vmul.f32 %v6344_v17, %v6318_v56 }
 0xab1   :  { %v6319_v35 = vmul.f32 %v6285_v0, %v16200_v63  ;;  %v6320_v51 = vmul.f32 %v6292_v57, %v16202_v27  ;;  %v6321_v18 = vmul.f32 %v6299_v25, %v16204_v45  ;;  %v6322_v50 = vmul.f32 %v6306_v48, %v16206_v15 }
 0xab2   :  { %v16258_v30 = vadd.f32 %v6369_v61, %v6349_v9  ;;  %v16260_v52 = vadd.f32 %v6377_v46, %v6350_v34  ;;  %v16262_v38 = vadd.f32 %v6376_v23, %v6351_v39  ;;  %v16264_v20 = vadd.f32 %v6378_v4, %v6352_v31 }
 0xab3   :  { %v6353_v62 = vmul.f32 %v6335_v24, %v6319_v35  ;;  %v6354_v54 = vmul.f32 %v6343_v22, %v6320_v51  ;;  %v6355_v47 = vmul.f32 %v6342_v19, %v6321_v18  ;;  %v6356_v40 = vmul.f32 %v6344_v17, %v6322_v50  ;;  %v6392_v22 = vld [vmem:[#allocation2 + $0x8] sm:$0xff] }
 0xab4   :  { %v6425_v63 = vcombine.low %v16258_v30, %v16260_v52  ;;  %v6426_v27 = vcombine.low %v16262_v38, %v16264_v20  ;;  %v6465_v17 = vrot.slane %v6392_v22, %v121_v28 }
 0xab5   :  { %v16270_v45 = vadd.f32 %v6369_v61, %v6353_v62  ;;  %v16272_v15 = vadd.f32 %v6377_v46, %v6354_v54  ;;  %v16274_v43 = vadd.f32 %v6376_v23, %v6355_v47  ;;  %v16276_v16 = vadd.f32 %v6378_v4, %v6356_v40 }
 0xab6   :  { %v6433_v59 = vrot.slane %v6425_v63, %v14794_v8  ;;  %v6440_v55 = vrot.slane %v6426_v27, %v14794_v8 }
 0xab7   :  { %v6442_v3 = vcombine.low %v16270_v45, %v16272_v15  ;;  %v6443_v7 = vcombine.low %v16274_v43, %v16276_v16 }
 0xab8   :  { %v6441_v61 = vcombine.low %v6433_v59, %v6440_v55 }
 0xab9   :  { %v6450_v24 = vrot.slane %v6442_v3, %v14794_v8  ;;  %v6457_v19 = vrot.slane %v6443_v7, %v14794_v8 }
 0xabb   :  { %v6458_v13 = vcombine.low %v6450_v24, %v6457_v19 }
 0xabd   :  { %v6461_v23 = vpack.c.bf16 %v6458_v13, %v6441_v61 }
 0xabf   :  { %13727 = vmatmul.mubr.msk.bf16.vlgmr.msra.gmra.mxu0 %vm135_vm1, %v6461_v23 }
 0xac0   :  { %13732 = vmatprep.mubr.msk.bf16.mxu0 %vm14713_vm0, %v17669_v1 }
 0xb7f   :  { %v6515_v58 = vpop.f32.mrf.mxu0 }
 0xb80   :  { %v16291_v33 = vadd.f32 %v6515_v58, %v6465_v17 }
 0xb81   :  { %v13728_v14 = vpop.f32.mrf.mxu0 }
 0xb82   :  { %6530 = vrot.lane.b32.xlu1 %v16291_v33, %s14718_s12  ;;  %6524 = vrot.lane.b32.xlu0 %v16291_v33, %s14716_s11 }
 0xb83   :  { %v6518_v60 = vpop.f32.mrf.mxu0 }
 0xb84   :  { %v16297_v46 = vadd.f32 %v6518_v60, %v6465_v17 }
 0xb85   :  { %v13729_v4 = vpop.f32.mrf.mxu0 }
 0xb86   :  { %6536 = vrot.lane.b32.xlu1 %v16291_v33, %s14715_s10  ;;  %6966 = vrot.lane.b32.xlu0 %v16291_v33, %s14717_s5 }
 0xbf4   :  { %v16303_v28 = vpop.permute.xlu1 %6530  ;;  %v16305_v12 = vpop.permute.xlu0 %6524 }
 0xbf5   :  { %6974 = vrot.lane.b32.xlu0 %v16303_v28, %s14717_s5  ;;  %6970 = vrot.lane.b32.xlu1 %v16305_v12, %s14717_s5  ;;  %v6542_v57 = vcombine.low %v16291_v33, %v16303_v28 }
 0xbf7   :  { %v6550_v31 = vrot.slane %v6542_v57, %v14794_v8 }
 0xbf8   :  { %v16311_v32 = vpop.permute.xlu1 %6536  ;;  %v6967_v10 = vpop.permute.xlu0 %6966 }
 0xbf9   :  { %6978 = vrot.lane.b32.xlu1 %v16311_v32, %s14717_s5  ;;  %6526 = vrot.lane.b32.xlu0 %v16297_v46, %s14716_s11  ;;  %v6558_v36 = vcombine.low %v16305_v12, %v16311_v32 }
 0xbfb   :  { %v6566_v48 = vrot.slane %v6558_v36, %v14794_v8 }
 0xbfd   :  { %6532 = vrot.lane.b32.xlu1 %v16297_v46, %s14718_s12  ;;  %6538 = vrot.lane.b32.xlu0 %v16297_v46, %s14715_s10  ;;  %v6574_v18 = vcombine.low %v6550_v31, %v6566_v48  ;;  %v6575_v58 = vcombine.high %v6550_v31, %v6566_v48 }
 0xbff   :  { %v6582_v40 = vrot.slane %v6574_v18, %v14871_v53 }
 0xc01   :  { %6968 = vrot.lane.b32.xlu1 %v16297_v46, %s14717_s5  ;;  %v6677_v59 = vcombine.high %v6582_v40, %v17669_v1  ;;  %v6676_v61 = vrot.slane %v6582_v40, %v14794_v8 }
 0xc03   :  { %v6684_v19 = vrot.slane %v6677_v59, %v14794_v8 }
 0xc05   :  { %v6685_v14 = vcombine.low %v6676_v61, %v6684_v19  ;;  %v6686_v40 = vcombine.high %v6676_v61, %v6684_v19 }
 0xc07   :  { %v6700_v19 = vrot.slane %v6686_v40, %v14871_v53 }
 0xc67   :  { %v6971_v56 = vpop.permute.xlu1 %6970  ;;  %v6975_v0 = vpop.permute.xlu0 %6974 }
 0xc68   :  { %v6990_v25 = vcombine.low %v6967_v10, %v6975_v0  ;;  %v6991_v60 = vcombine.high %v6967_v10, %v6975_v0 }
 0xc6a   :  { %v6998_v35 = vrot.slane %v6990_v25, %v14794_v8 }
 0xc6b   :  { %v6979_v9 = vpop.permute.xlu1 %6978  ;;  %v16328_v34 = vpop.permute.xlu0 %6526 }
 0xc6c   :  { %v7006_v39 = vcombine.low %v6971_v56, %v6979_v9  ;;  %6972 = vrot.lane.b32.xlu0 %v16328_v34, %s14717_s5  ;;  %v7007_v13 = vcombine.high %v6971_v56, %v6979_v9  ;;  %v6589_v56 = vrot.slane %v6575_v58, %v14871_v53  ;;  %v6693_v9 = vrot.slane %v6685_v14, %v14871_v53 }
 0xc6e   :  { %v7014_v51 = vrot.slane %v7006_v39, %v14794_v8  ;;  %v16355_v4 = vrot.slane %v7007_v13, %v14794_v8  ;;  %v6701_v59 = vcombine.high %v6693_v9, %v17669_v1  ;;  %v6709_v14 = vrot.slane %v6589_v56, %v14794_v8 }
 0xc6f   :  { %v16335_v50 = vpop.permute.xlu1 %6532  ;;  %v16337_v54 = vpop.permute.xlu0 %6538 }
 0xc70   :  { %v7022_v62 = vcombine.low %v6998_v35, %v7014_v51  ;;  %6976 = vrot.lane.b32.xlu1 %v16335_v50, %s14717_s5  ;;  %6980 = vrot.lane.b32.xlu0 %v16337_v54, %s14717_s5  ;;  %v7023_v27 = vcombine.high %v6998_v35, %v7014_v51  ;;  %v16363_v35 = vrot.slane %v6991_v60, %v14794_v8 }
 0xc72   :  { %v7030_v47 = vrot.slane %v7022_v62, %v14871_v53  ;;  %v7037_v7 = vrot.slane %v7023_v27, %v14871_v53  ;;  %v7038_v31 = vcombine.low %v16363_v35, %v16355_v4 }
 0xc74   :  { %v7125_v63 = vcombine.high %v7030_v47, %v17669_v1  ;;  %v7124_v3 = vrot.slane %v7030_v47, %v14794_v8  ;;  %v7158_v23 = vcombine.high %v7037_v7, %v17669_v1  ;;  %v7157_v48 = vrot.slane %v7037_v7, %v14794_v8 }
 0xc75   :  { %v6559_v47 = vcombine.high %v16305_v12, %v16311_v32  ;;  %v6934_v7 = vpack.c.bf16 %v6693_v9, %v6693_v9 }
 0xc76   :  { %v7132_v55 = vrot.slane %v7125_v63, %v14794_v8  ;;  %v7165_v39 = vrot.slane %v7158_v23, %v14794_v8  ;;  %v6710_v63 = vcombine.high %v6589_v56, %v17669_v1 }
 0xc77   :  { %v16382_v23 = vrot.slane %v6559_v47, %v14794_v8 }
 0xc78   :  { %v7133_v24 = vcombine.low %v7124_v3, %v7132_v55  ;;  %v7134_v17 = vcombine.high %v7124_v3, %v7132_v55  ;;  %v7166_v62 = vcombine.low %v7157_v48, %v7165_v39  ;;  %v6543_v55 = vcombine.high %v16291_v33, %v16303_v28 }
 0xc79   :  { %v7046_v3 = vrot.slane %v7038_v31, %v14871_v53  ;;  %v6717_v61 = vrot.slane %v6710_v63, %v14794_v8  ;;  %v6936_v31 = vpack.c.bf16 %v6700_v19, %v6700_v19 }
 0xc7a   :  { %v7141_v22 = vrot.slane %v7133_v24, %v14871_v53  ;;  %v7148_v25 = vrot.slane %v7134_v17, %v14871_v53  ;;  %v7174_v13 = vrot.slane %v7166_v62, %v14871_v53  ;;  %v6935_v17 = vpack.c.bf16 %v6701_v59, %v6701_v59 }
 0xc7b   :  { %v16389_v58 = vrot.slane %v6543_v55, %v14794_v8  ;;  %v7191_v60 = vcombine.high %v7046_v3, %v17669_v1  ;;  %v6718_v56 = vcombine.low %v6709_v14, %v6717_v61  ;;  %v7190_v47 = vrot.slane %v7046_v3, %v14794_v8 }
 0xc7c   :  { %v7382_v36 = vpack.c.bf16 %v7141_v22, %v7141_v22  ;;  %v7149_v57 = vcombine.high %v7141_v22, %v17669_v1  ;;  %v7150_v18 = vcombine.high %v7148_v25, %v17669_v1  ;;  %v7384_v27 = vpack.c.bf16 %v7148_v25, %v7148_v25 }
 0xc7d   :  { %v7167_v25 = vcombine.high %v7157_v48, %v7165_v39  ;;  %v6590_v9 = vcombine.low %v16389_v58, %v16382_v23  ;;  %v7198_v62 = vrot.slane %v7191_v60, %v14794_v8  ;;  %v6726_v48 = vrot.slane %v6718_v56, %v14871_v53 }
 0xc7e   :  { %v7866_v10 = vsel %vm1520_vm2, %v7382_v36, 0  ;;  %v7383_v0 = vpack.c.bf16 %v7149_v57, %v7149_v57  ;;  %v7385_v24 = vpack.c.bf16 %v7150_v18, %v7150_v18  ;;  %v7958_v22 = vsel %vm1520_vm2, %v7384_v27, 0 }
 0xc7f   :  { %13731 = vmatpush3.bf16.xpose.msra.mxu0 %v7866_v10  ;;  %v7182_v57 = vcombine.high %v7174_v13, %v17669_v1  ;;  %v7386_v10 = vpack.c.bf16 %v7174_v13, %v7174_v13  ;;  %v7181_v18 = vrot.slane %v7167_v25, %v14871_v53  ;;  %v6598_v39 = vrot.slane %v6590_v9, %v14871_v53 }
 0xc80   :  { %v7912_v51 = vsel %vm1520_vm2, %v7383_v0, 0  ;;  %13742 = vmatprep.subr.bf16.mxu0 %v17669_v1  ;;  %v8004_v36 = vsel %vm1520_vm2, %v7385_v24, 0  ;;  %v6702_v0 = vcombine.high %v6700_v19, %v17669_v1  ;;  %v7039_v27 = vcombine.high %v16363_v35, %v16355_v4 }
 0xc81   :  { %13737 = vmatpush3.bf16.xpose.msra.mxu1 %v7912_v51  ;;  %v7387_v51 = vpack.c.bf16 %v7182_v57, %v7182_v57  ;;  %v8050_v40 = vsel %vm1520_vm2, %v7386_v10, 0  ;;  %v7183_v55 = vcombine.high %v7181_v18, %v17669_v1  ;;  %v7199_v3 = vcombine.low %v7190_v47, %v7198_v62 }
 0xc82   :  { %13748 = vmatprep.subr.bf16.mxu1 %v17669_v1  ;;  %v6937_v63 = vpack.c.bf16 %v6702_v0, %v6702_v0  ;;  %v6743_v24 = vcombine.high %v6598_v39, %v17669_v1  ;;  %v7388_v13 = vpack.c.bf16 %v7181_v18, %v7181_v18  ;;  %v6734_v19 = vcombine.high %v6726_v48, %v17669_v1 }
 0xc83   :  { %v8096_v59 = vsel %vm1520_vm2, %v7387_v51, 0  ;;  %v7053_v4 = vrot.slane %v7039_v27, %v14871_v53  ;;  %v6938_v35 = vpack.c.bf16 %v6726_v48, %v6726_v48  ;;  %v6742_v57 = vrot.slane %v6598_v39, %v14794_v8 }
 0xc84   :  { %v7200_v10 = vcombine.high %v7190_v47, %v7198_v62  ;;  %v6591_v0 = vcombine.high %v16389_v58, %v16382_v23 }
 0xc85   :  { %v7224_v25 = vcombine.high %v7053_v4, %v17669_v1  ;;  %v7223_v58 = vrot.slane %v7053_v4, %v14794_v8 }
 0xc86   :  { %13733 = vmatmul.mubr.msk.bf16.vlgmr.msra.gmra.mxu0 %vm1520_vm2, %v6934_v7  ;;  %v6719_v7 = vcombine.high %v6709_v14, %v6717_v61  ;;  %v8142_v61 = vsel %vm1520_vm2, %v7388_v13, 0  ;;  %v6939_v14 = vpack.c.bf16 %v6734_v19, %v6734_v19  ;;  %v6605_v62 = vrot.slane %v6591_v0, %v14871_v53 }
 0xc87   :  { %13743 = vmatpush3.bf16.xpose.msra.mxu0 %v7958_v22  ;;  %13744 = vmatprep.mubr.msk.bf16.mxu0 %vm14713_vm0, %v17669_v1  ;;  %v7389_v22 = vpack.c.bf16 %v7183_v55, %v7183_v55 }
 0xc88   :  { %13739 = vmatmul.mubr.msk.bf16.vlgmr.msra.gmra.mxu1 %vm1520_vm2, %v6935_v17  ;;  %13754 = vmatprep.subr.bf16.mxu0 %v17669_v1  ;;  %v7207_v17 = vrot.slane %v7199_v3, %v14871_v53  ;;  %v6733_v60 = vrot.slane %v6719_v7, %v14871_v53 }
 0xc89   :  { %13749 = vmatpush3.bf16.xpose.msra.mxu1 %v8004_v36  ;;  %13750 = vmatprep.mubr.msk.bf16.mxu1 %vm14713_vm0, %v17669_v1  ;;  %v6750_v36 = vrot.slane %v6743_v24, %v14794_v8  ;;  %v8188_v9 = vsel %vm1520_vm2, %v7389_v22, 0  ;;  %v6776_v24 = vcombine.high %v6605_v62, %v17669_v1 }
 0xc8a   :  { %13760 = vmatprep.subr.bf16.mxu1 %v17669_v1  ;;  %v7215_v56 = vcombine.high %v7207_v17, %v17669_v1  ;;  %v7390_v51 = vpack.c.bf16 %v7207_v17, %v7207_v17  ;;  %v6735_v18 = vcombine.high %v6733_v60, %v17669_v1  ;;  %v6940_v39 = vpack.c.bf16 %v6733_v60, %v6733_v60 }
 0xc8b   :  { %v6752_v7 = vcombine.high %v6742_v57, %v6750_v36  ;;  %v6783_v60 = vrot.slane %v6776_v24, %v14794_v8 }
 0xc8c   :  { %v7391_v48 = vpack.c.bf16 %v7215_v56, %v7215_v56  ;;  %v8234_v47 = vsel %vm1520_vm2, %v7390_v51, 0  ;;  %v6941_v27 = vpack.c.bf16 %v6735_v18, %v6735_v18 }
 0xc8d   :  { %v6766_v17 = vrot.slane %v6752_v7, %v14871_v53 }
 0xc8e   :  { %13745 = vmatmul.mubr.msk.bf16.vlgmr.msra.gmra.mxu0 %vm1520_vm2, %v6936_v31  ;;  %v6751_v31 = vcombine.low %v6742_v57, %v6750_v36 }
 0xc8f   :  { %13755 = vmatpush3.bf16.xpose.msra.mxu0 %v8050_v40  ;;  %13756 = vmatprep.mubr.msk.bf16.mxu0 %vm14713_vm0, %v17669_v1  ;;  %v7214_v40 = vrot.slane %v7200_v10, %v14871_v53  ;;  %v6768_v0 = vcombine.high %v6766_v17, %v17669_v1 }
 0xc90   :  { %13751 = vmatmul.mubr.msk.bf16.vlgmr.msra.gmra.mxu1 %vm1520_vm2, %v6937_v63  ;;  %13766 = vmatprep.subr.bf16.mxu0 %v17669_v1  ;;  %v7231_v63 = vrot.slane %v7224_v25, %v14794_v8  ;;  %v6759_v23 = vrot.slane %v6751_v31, %v14871_v53  ;;  %v6944_v31 = vpack.c.bf16 %v6766_v17, %v6766_v17 }
 0xc91   :  { %13761 = vmatpush3.bf16.xpose.msra.mxu1 %v8096_v59  ;;  %13762 = vmatprep.mubr.msk.bf16.mxu1 %vm14713_vm0, %v17669_v1  ;;  %v8280_v59 = vsel %vm1520_vm2, %v7391_v48, 0  ;;  %v7216_v55 = vcombine.high %v7214_v40, %v17669_v1  ;;  %v7392_v13 = vpack.c.bf16 %v7214_v40, %v7214_v40  ;;  %v6945_v40 = vpack.c.bf16 %v6768_v0, %v6768_v0 }
 0xc92   :  { %13772 = vmatprep.subr.bf16.mxu1 %v17669_v1  ;;  %v7232_v3 = vcombine.low %v7223_v58, %v7231_v63  ;;  %v6767_v19 = vcombine.high %v6759_v23, %v17669_v1  ;;  %v6942_v4 = vpack.c.bf16 %v6759_v23, %v6759_v23 }
 0xc94   :  { %v7240_v22 = vrot.slane %v7232_v3, %v14871_v53  ;;  %v6943_v36 = vpack.c.bf16 %v6767_v19, %v6767_v19 }
 0xc96   :  { %13757 = vmatmul.mubr.msk.bf16.vlgmr.msra.gmra.mxu0 %vm1520_vm2, %v6938_v35  ;;  %v7393_v35 = vpack.c.bf16 %v7216_v55, %v7216_v55  ;;  %v7248_v25 = vcombine.high %v7240_v22, %v17669_v1  ;;  %v7394_v10 = vpack.c.bf16 %v7240_v22, %v7240_v22  ;;  %v6622_v22 = vcombine.low %v16328_v34, %v16337_v54 }
 0xc97   :  { %13767 = vmatpush3.bf16.xpose.msra.mxu0 %v8142_v61  ;;  %13768 = vmatprep.mubr.msk.bf16.mxu0 %vm14713_vm0, %v17669_v1  ;;  %v8326_v61 = vsel %vm1520_vm2, %v7392_v13, 0 }
 0xc98   :  { %13763 = vmatmul.mubr.msk.bf16.vlgmr.msra.gmra.mxu1 %vm1520_vm2, %v6939_v14  ;;  %13778 = vmatprep.subr.bf16.mxu0 %v17669_v1  ;;  %v6775_v14 = vrot.slane %v6605_v62, %v14794_v8  ;;  %v8372_v57 = vsel %vm1520_vm2, %v7393_v35, 0  ;;  %v7395_v51 = vpack.c.bf16 %v7248_v25, %v7248_v25  ;;  %v8418_v48 = vsel %vm1520_vm2, %v7394_v10, 0 }
 0xc99   :  { %13773 = vmatpush3.bf16.xpose.msra.mxu1 %v8188_v9  ;;  %13774 = vmatprep.mubr.msk.bf16.mxu1 %vm14713_vm0, %v17669_v1  ;;  %v7233_v9 = vcombine.high %v7223_v58, %v7231_v63  ;;  %v6606_v35 = vcombine.low %v16297_v46, %v16335_v50 }
 0xc9a   :  { %13784 = vmatprep.subr.bf16.mxu1 %v17669_v1  ;;  %v6784_v56 = vcombine.low %v6775_v14, %v6783_v60  ;;  %v8464_v63 = vsel %vm1520_vm2, %v7395_v51, 0  ;;  %v6785_v23 = vcombine.high %v6775_v14, %v6783_v60  ;;  %v6630_v60 = vrot.slane %v6622_v22, %v14794_v8 }
 0xc9b   :  { %v7247_v18 = vrot.slane %v7233_v9, %v14871_v53  ;;  %v6614_v17 = vrot.slane %v6606_v35, %v14794_v8 }
 0xc9c   :  { %v6799_v55 = vrot.slane %v6785_v23, %v14871_v53 }
 0xc9d   :  { %v7249_v62 = vcombine.high %v7247_v18, %v17669_v1  ;;  %v7396_v58 = vpack.c.bf16 %v7247_v18, %v7247_v18  ;;  %v6638_v14 = vcombine.low %v6614_v17, %v6630_v60 }
 0xc9e   :  { %13769 = vmatmul.mubr.msk.bf16.vlgmr.msra.gmra.mxu0 %vm1520_vm2, %v6940_v39  ;;  %v6792_v39 = vrot.slane %v6784_v56, %v14871_v53  ;;  %v6801_v13 = vcombine.high %v6799_v55, %v17669_v1  ;;  %v6948_v19 = vpack.c.bf16 %v6799_v55, %v6799_v55 }
 0xc9f   :  { %13779 = vmatpush3.bf16.xpose.msra.mxu0 %v8234_v47  ;;  %13780 = vmatprep.mubr.msk.bf16.mxu0 %vm14713_vm0, %v17669_v1  ;;  %v8510_v3 = vsel %vm1520_vm2, %v7396_v58, 0  ;;  %v6646_v0 = vrot.slane %v6638_v14, %v14871_v53 }
 0xca0   :  { %13775 = vmatmul.mubr.msk.bf16.vlgmr.msra.gmra.mxu1 %vm1520_vm2, %v6941_v27  ;;  %13790 = vmatprep.subr.bf16.mxu0 %v17669_v1  ;;  %v6800_v47 = vcombine.high %v6792_v39, %v17669_v1  ;;  %v6946_v27 = vpack.c.bf16 %v6792_v39, %v6792_v39 }
 0xca1   :  { %13785 = vmatpush3.bf16.xpose.msra.mxu1 %v8280_v59  ;;  %13786 = vmatprep.mubr.msk.bf16.mxu1 %vm14713_vm0, %v17669_v1  ;;  %v7397_v59 = vpack.c.bf16 %v7249_v62, %v7249_v62  ;;  %v6809_v39 = vcombine.high %v6646_v0, %v17669_v1 }
 0xca2   :  { %13796 = vmatprep.subr.bf16.mxu1 %v17669_v1  ;;  %v6947_v7 = vpack.c.bf16 %v6800_v47, %v6800_v47 }
 0xca3   :  { %v8556_v24 = vsel %vm1520_vm2, %v7397_v59, 0  ;;  %v6816_v62 = vrot.slane %v6809_v39, %v14794_v8  ;;  %v6808_v59 = vrot.slane %v6646_v0, %v14794_v8 }
 0xca5   :  { %v6818_v39 = vcombine.high %v6808_v59, %v6816_v62 }
 0xca6   :  { %13781 = vmatmul.mubr.msk.bf16.vlgmr.msra.gmra.mxu0 %vm1520_vm2, %v6942_v4  ;;  %v6949_v4 = vpack.c.bf16 %v6801_v13, %v6801_v13  ;;  %v6817_v13 = vcombine.low %v6808_v59, %v6816_v62 }
 0xca7   :  { %13791 = vmatpush3.bf16.xpose.msra.mxu0 %v8326_v61  ;;  %13792 = vmatprep.mubr.msk.bf16.mxu0 %vm14713_vm0, %v17669_v1  ;;  %v6969_v61 = vpop.permute.xlu1 %6968  ;;  %v6832_v62 = vrot.slane %v6818_v39, %v14871_v53 }
 0xca8   :  { %13787 = vmatmul.mubr.msk.bf16.vlgmr.msra.gmra.mxu1 %vm1520_vm2, %v6943_v36  ;;  %13802 = vmatprep.subr.bf16.mxu0 %v17669_v1 }
 0xca9   :  { %13797 = vmatpush3.bf16.xpose.msra.mxu1 %v8372_v57  ;;  %13798 = vmatprep.mubr.msk.bf16.mxu1 %vm14713_vm0, %v17669_v1 }
 0xcaa   :  { %13808 = vmatprep.subr.bf16.mxu1 %v17669_v1 }
 0xcae   :  { %13793 = vmatmul.mubr.msk.bf16.vlgmr.msra.gmra.mxu0 %vm1520_vm2, %v6944_v31 }
 0xcaf   :  { %13803 = vmatpush3.bf16.xpose.msra.mxu0 %v8418_v48  ;;  %13804 = vmatprep.mubr.msk.bf16.mxu0 %vm14713_vm0, %v17669_v1 }
 0xcb0   :  { %13799 = vmatmul.mubr.msk.bf16.vlgmr.msra.gmra.mxu1 %vm1520_vm2, %v6945_v40  ;;  %13814 = vmatprep.subr.bf16.mxu0 %v17669_v1 }
 0xcb1   :  { %13809 = vmatpush3.bf16.xpose.msra.mxu1 %v8464_v63  ;;  %13810 = vmatprep.mubr.msk.bf16.mxu1 %vm14713_vm0, %v17669_v1 }
 0xcb2   :  { %13820 = vmatprep.subr.bf16.mxu1 %v17669_v1 }
 0xcb6   :  { %13805 = vmatmul.mubr.msk.bf16.vlgmr.msra.gmra.mxu0 %vm1520_vm2, %v6946_v27 }
 0xcb7   :  { %13815 = vmatpush3.bf16.xpose.msra.mxu0 %v8510_v3  ;;  %13816 = vmatprep.mubr.msk.bf16.mxu0 %vm14713_vm0, %v17669_v1 }
 0xcb8   :  { %13811 = vmatmul.mubr.msk.bf16.vlgmr.msra.gmra.mxu1 %vm1520_vm2, %v6947_v7  ;;  %13826 = vmatprep.subr.bf16.mxu0 %v17669_v1 }
 0xcb9   :  { %13821 = vmatpush3.bf16.xpose.msra.mxu1 %v8556_v24  ;;  %13822 = vmatprep.mubr.msk.bf16.mxu1 %vm14713_vm0, %v17669_v1  ;;  %v6639_v24 = vcombine.high %v6614_v17, %v6630_v60  ;;  %v6825_v17 = vrot.slane %v6817_v13, %v14871_v53 }
 0xcba   :  { %13832 = vmatprep.subr.bf16.mxu1 %v17669_v1 }
 0xcbe   :  { %13817 = vmatmul.mubr.msk.bf16.vlgmr.msra.gmra.mxu0 %vm1520_vm2, %v6948_v19 }
 0xcbf   :  { %13828 = vmatprep.mubr.msk.bf16.mxu0 %vm14713_vm0, %v17669_v1 }
 0xcc0   :  { %13823 = vmatmul.mubr.msk.bf16.vlgmr.msra.gmra.mxu1 %vm1520_vm2, %v6949_v4 }
 0xcc1   :  { %13834 = vmatprep.mubr.msk.bf16.mxu1 %vm14713_vm0, %v17669_v1 }
 0xcde   :  { %v6973_v36 = vpop.permute.xlu0 %6972 }
 0xce2   :  { %v6977_v57 = vpop.permute.xlu1 %6976  ;;  %v6981_v9 = vpop.permute.xlu0 %6980 }
 0xce3   :  { %v7054_v25 = vcombine.low %v6969_v61, %v6977_v57  ;;  %v7070_v56 = vcombine.low %v6973_v36, %v6981_v9  ;;  %v7055_v47 = vcombine.high %v6969_v61, %v6977_v57  ;;  %v7071_v27 = vcombine.high %v6973_v36, %v6981_v9 }
 0xce4   :  { %v6653_v57 = vrot.slane %v6639_v24, %v14871_v53 }
 0xce5   :  { %v7062_v10 = vrot.slane %v7054_v25, %v14794_v8  ;;  %v7078_v31 = vrot.slane %v7070_v56, %v14794_v8  ;;  %v16531_v4 = vrot.slane %v7055_v47, %v14794_v8  ;;  %v16534_v35 = vrot.slane %v7071_v27, %v14794_v8 }
 0xce6   :  { %v6841_v13 = vrot.slane %v6653_v57, %v14794_v8 }
 0xce7   :  { %v7086_v51 = vcombine.low %v7062_v10, %v7078_v31  ;;  %v7087_v18 = vcombine.high %v7062_v10, %v7078_v31  ;;  %v7102_v56 = vcombine.low %v16531_v4, %v16534_v35 }
 0xce9   :  { %v7094_v48 = vrot.slane %v7086_v51, %v14871_v53  ;;  %v7101_v40 = vrot.slane %v7087_v18, %v14871_v53  ;;  %v6607_v51 = vcombine.high %v16297_v46, %v16335_v50  ;;  %v6623_v18 = vcombine.high %v16328_v34, %v16337_v54 }
 0xceb   :  { %v7257_v63 = vcombine.high %v7094_v48, %v17669_v1  ;;  %v7256_v23 = vrot.slane %v7094_v48, %v14794_v8  ;;  %v7290_v55 = vcombine.high %v7101_v40, %v17669_v1  ;;  %v7289_v60 = vrot.slane %v7101_v40, %v14794_v8 }
 0xcec   :  { %v6842_v48 = vcombine.high %v6653_v57, %v17669_v1 }
 0xced   :  { %v7264_v58 = vrot.slane %v7257_v63, %v14794_v8  ;;  %v7297_v14 = vrot.slane %v7290_v55, %v14794_v8  ;;  %v6833_v63 = vcombine.high %v6825_v17, %v17669_v1  ;;  %v16558_v55 = vrot.slane %v6607_v51, %v14794_v8 }
 0xcee   :  { %v6849_v59 = vrot.slane %v6842_v48, %v14794_v8  ;;  %v7103_v48 = vcombine.high %v16531_v4, %v16534_v35 }
 0xcef   :  { %v7265_v3 = vcombine.low %v7256_v23, %v7264_v58  ;;  %v7266_v7 = vcombine.high %v7256_v23, %v7264_v58  ;;  %v7298_v31 = vcombine.low %v7289_v60, %v7297_v14  ;;  %v7110_v23 = vrot.slane %v7102_v56, %v14871_v53 }
 0xcf0   :  { %v6950_v58 = vpack.c.bf16 %v6825_v17, %v6825_v17  ;;  %v6951_v24 = vpack.c.bf16 %v6833_v63, %v6833_v63  ;;  %v6850_v57 = vcombine.low %v6841_v13, %v6849_v59  ;;  %v6952_v56 = vpack.c.bf16 %v6832_v62, %v6832_v62 }
 0xcf1   :  { %v7273_v19 = vrot.slane %v7265_v3, %v14871_v53  ;;  %v7280_v36 = vrot.slane %v7266_v7, %v14871_v53  ;;  %v7306_v27 = vrot.slane %v7298_v31, %v14871_v53  ;;  %v16561_v3 = vrot.slane %v6623_v18, %v14794_v8 }
 0xcf2   :  { %v7322_v51 = vrot.slane %v7110_v23, %v14794_v8  ;;  %v7117_v4 = vrot.slane %v7103_v48, %v14871_v53 }
 0xcf3   :  { %v7398_v22 = vpack.c.bf16 %v7273_v19, %v7273_v19  ;;  %v7281_v61 = vcombine.high %v7273_v19, %v17669_v1  ;;  %v7282_v0 = vcombine.high %v7280_v36, %v17669_v1  ;;  %v7400_v40 = vpack.c.bf16 %v7280_v36, %v7280_v36 }
 0xcf4   :  { %v7323_v19 = vcombine.high %v7110_v23, %v17669_v1  ;;  %v7299_v36 = vcombine.high %v7289_v60, %v7297_v14  ;;  %v6654_v17 = vcombine.low %v16558_v55, %v16561_v3  ;;  %v6858_v60 = vrot.slane %v6850_v57, %v14871_v53 }
 0xcf5   :  { %v8602_v25 = vsel %vm1520_vm2, %v7398_v22, 0  ;;  %v7399_v9 = vpack.c.bf16 %v7281_v61, %v7281_v61  ;;  %v7401_v47 = vpack.c.bf16 %v7282_v0, %v7282_v0  ;;  %v8694_v7 = vsel %vm1520_vm2, %v7400_v40, 0 }
 0xcf6   :  { %13827 = vmatpush3.bf16.xpose.msra.mxu0 %v8602_v25  ;;  %v7314_v61 = vcombine.high %v7306_v27, %v17669_v1  ;;  %v7402_v25 = vpack.c.bf16 %v7306_v27, %v7306_v27  ;;  %v7313_v0 = vrot.slane %v7299_v36, %v14871_v53  ;;  %v7330_v31 = vrot.slane %v7323_v19, %v14794_v8 }
 0xcf7   :  { %v8648_v10 = vsel %vm1520_vm2, %v7399_v9, 0  ;;  %13838 = vmatprep.subr.bf16.mxu0 %v17669_v1  ;;  %v8740_v22 = vsel %vm1520_vm2, %v7401_v47, 0  ;;  %v6834_v9 = vcombine.high %v6832_v62, %v17669_v1  ;;  %v6662_v14 = vrot.slane %v6654_v17, %v14871_v53 }
 0xcf8   :  { %13833 = vmatpush3.bf16.xpose.msra.mxu1 %v8648_v10  ;;  %v7403_v10 = vpack.c.bf16 %v7314_v61, %v7314_v61  ;;  %v8786_v18 = vsel %vm1520_vm2, %v7402_v25, 0  ;;  %v7315_v63 = vcombine.high %v7313_v0, %v17669_v1  ;;  %v7331_v23 = vcombine.low %v7322_v51, %v7330_v31 }
 0xcf9   :  { %13844 = vmatprep.subr.bf16.mxu1 %v17669_v1  ;;  %v6953_v39 = vpack.c.bf16 %v6834_v9, %v6834_v9  ;;  %v6875_v47 = vcombine.high %v6662_v14, %v17669_v1  ;;  %v7404_v27 = vpack.c.bf16 %v7313_v0, %v7313_v0  ;;  %v6866_v62 = vcombine.high %v6858_v60, %v17669_v1 }
 0xcfa   :  { %v8832_v40 = vsel %vm1520_vm2, %v7403_v10, 0  ;;  %v6954_v35 = vpack.c.bf16 %v6858_v60, %v6858_v60  ;;  %v6874_v61 = vrot.slane %v6662_v14, %v14794_v8  ;;  %v7356_v36 = vcombine.high %v7117_v4, %v17669_v1 }
 0xcfb   :  { %v7332_v25 = vcombine.high %v7322_v51, %v7330_v31  ;;  %v6655_v9 = vcombine.high %v16558_v55, %v16561_v3  ;;  %v7355_v3 = vrot.slane %v7117_v4, %v14794_v8 }
 0xcfd   :  { %13829 = vmatmul.mubr.msk.bf16.vlgmr.msra.gmra.mxu0 %vm1520_vm2, %v6950_v58  ;;  %v6851_v58 = vcombine.high %v6841_v13, %v6849_v59  ;;  %v8878_v59 = vsel %vm1520_vm2, %v7404_v27, 0  ;;  %v6955_v13 = vpack.c.bf16 %v6866_v62, %v6866_v62  ;;  %v6669_v31 = vrot.slane %v6655_v9, %v14871_v53 }
 0xcfe   :  { %13839 = vmatpush3.bf16.xpose.msra.mxu0 %v8694_v7  ;;  %13840 = vmatprep.mubr.msk.bf16.mxu0 %vm14713_vm0, %v17669_v1  ;;  %v7405_v7 = vpack.c.bf16 %v7315_v63, %v7315_v63 }
 0xcff   :  { %13835 = vmatmul.mubr.msk.bf16.vlgmr.msra.gmra.mxu1 %vm1520_vm2, %v6951_v24  ;;  %13850 = vmatprep.subr.bf16.mxu0 %v17669_v1  ;;  %v7339_v24 = vrot.slane %v7331_v23, %v14871_v53  ;;  %v6865_v19 = vrot.slane %v6851_v58, %v14871_v53 }
 0xd00   :  { %13845 = vmatpush3.bf16.xpose.msra.mxu1 %v8740_v22  ;;  %13846 = vmatprep.mubr.msk.bf16.mxu1 %vm14713_vm0, %v17669_v1  ;;  %v6882_v22 = vrot.slane %v6875_v47, %v14794_v8  ;;  %v8924_v17 = vsel %vm1520_vm2, %v7405_v7, 0  ;;  %v6908_v47 = vcombine.high %v6669_v31, %v17669_v1 }
 0xd01   :  { %13856 = vmatprep.subr.bf16.mxu1 %v17669_v1  ;;  %v7347_v57 = vcombine.high %v7339_v24, %v17669_v1  ;;  %v7406_v10 = vpack.c.bf16 %v7339_v24, %v7339_v24  ;;  %v6867_v0 = vcombine.high %v6865_v19, %v17669_v1  ;;  %v6956_v14 = vpack.c.bf16 %v6865_v19, %v6865_v19 }
 0xd02   :  { %v6884_v58 = vcombine.high %v6874_v61, %v6882_v22  ;;  %v6915_v19 = vrot.slane %v6908_v47, %v14794_v8 }
 0xd03   :  { %v7407_v60 = vpack.c.bf16 %v7347_v57, %v7347_v57  ;;  %v8970_v51 = vsel %vm1520_vm2, %v7406_v10, 0  ;;  %v6957_v48 = vpack.c.bf16 %v6867_v0, %v6867_v0 }
 0xd04   :  { %v6898_v24 = vrot.slane %v6884_v58, %v14871_v53 }
 0xd05   :  { %13841 = vmatmul.mubr.msk.bf16.vlgmr.msra.gmra.mxu0 %vm1520_vm2, %v6952_v56  ;;  %v6883_v56 = vcombine.low %v6874_v61, %v6882_v22 }
 0xd06   :  { %13851 = vmatpush3.bf16.xpose.msra.mxu0 %v8786_v18  ;;  %13852 = vmatprep.mubr.msk.bf16.mxu0 %vm14713_vm0, %v17669_v1  ;;  %v7346_v18 = vrot.slane %v7332_v25, %v14871_v53  ;;  %v6900_v9 = vcombine.high %v6898_v24, %v17669_v1 }
 0xd07   :  { %13847 = vmatmul.mubr.msk.bf16.vlgmr.msra.gmra.mxu1 %vm1520_vm2, %v6953_v39  ;;  %13862 = vmatprep.subr.bf16.mxu0 %v17669_v1  ;;  %v7363_v39 = vrot.slane %v7356_v36, %v14794_v8  ;;  %v6891_v55 = vrot.slane %v6883_v56, %v14871_v53  ;;  %v6960_v56 = vpack.c.bf16 %v6898_v24, %v6898_v24 }
 0xd08   :  { %13857 = vmatpush3.bf16.xpose.msra.mxu1 %v8832_v40  ;;  %13858 = vmatprep.mubr.msk.bf16.mxu1 %vm14713_vm0, %v17669_v1  ;;  %v9016_v40 = vsel %vm1520_vm2, %v7407_v60, 0  ;;  %v7348_v63 = vcombine.high %v7346_v18, %v17669_v1  ;;  %v7408_v27 = vpack.c.bf16 %v7346_v18, %v7346_v18  ;;  %v6961_v18 = vpack.c.bf16 %v6900_v9, %v6900_v9 }
 0xd09   :  { %13868 = vmatprep.subr.bf16.mxu1 %v17669_v1  ;;  %v7364_v23 = vcombine.low %v7355_v3, %v7363_v39  ;;  %v6899_v62 = vcombine.high %v6891_v55, %v17669_v1  ;;  %v6958_v4 = vpack.c.bf16 %v6891_v55, %v6891_v55 }
 0xd0b   :  { %v7372_v7 = vrot.slane %v7364_v23, %v14871_v53  ;;  %v6959_v22 = vpack.c.bf16 %v6899_v62, %v6899_v62 }
 0xd0d   :  { %13853 = vmatmul.mubr.msk.bf16.vlgmr.msra.gmra.mxu0 %vm1520_vm2, %v6954_v35  ;;  %v7409_v35 = vpack.c.bf16 %v7348_v63, %v7348_v63  ;;  %v7380_v36 = vcombine.high %v7372_v7, %v17669_v1  ;;  %v7410_v25 = vpack.c.bf16 %v7372_v7, %v7372_v7 }
 0xd0e   :  { %13863 = vmatpush3.bf16.xpose.msra.mxu0 %v8878_v59  ;;  %13864 = vmatprep.mubr.msk.bf16.mxu0 %vm14713_vm0, %v17669_v1  ;;  %v9062_v59 = vsel %vm1520_vm2, %v7408_v27, 0 }
 0xd0f   :  { %13859 = vmatmul.mubr.msk.bf16.vlgmr.msra.gmra.mxu1 %vm1520_vm2, %v6955_v13  ;;  %13874 = vmatprep.subr.bf16.mxu0 %v17669_v1  ;;  %v6907_v13 = vrot.slane %v6669_v31, %v14794_v8  ;;  %v9108_v61 = vsel %vm1520_vm2, %v7409_v35, 0  ;;  %v7411_v10 = vpack.c.bf16 %v7380_v36, %v7380_v36  ;;  %v9154_v60 = vsel %vm1520_vm2, %v7410_v25, 0 }
 0xd10   :  { %13869 = vmatpush3.bf16.xpose.msra.mxu1 %v8924_v17  ;;  %13870 = vmatprep.mubr.msk.bf16.mxu1 %vm14713_vm0, %v17669_v1  ;;  %v7365_v17 = vcombine.high %v7355_v3, %v7363_v39 }
 0xd11   :  { %13880 = vmatprep.subr.bf16.mxu1 %v17669_v1  ;;  %v6916_v57 = vcombine.low %v6907_v13, %v6915_v19  ;;  %v9200_v39 = vsel %vm1520_vm2, %v7411_v10, 0  ;;  %v6917_v55 = vcombine.high %v6907_v13, %v6915_v19 }
 0xd12   :  { %v7379_v0 = vrot.slane %v7365_v17, %v14871_v53 }
 0xd13   :  { %v6931_v63 = vrot.slane %v6917_v55, %v14871_v53 }
 0xd14   :  { %v7381_v31 = vcombine.high %v7379_v0, %v17669_v1  ;;  %v7412_v3 = vpack.c.bf16 %v7379_v0, %v7379_v0 }
 0xd15   :  { %13865 = vmatmul.mubr.msk.bf16.vlgmr.msra.gmra.mxu0 %vm1520_vm2, %v6956_v14  ;;  %v6924_v14 = vrot.slane %v6916_v57, %v14871_v53  ;;  %v6933_v27 = vcombine.high %v6931_v63, %v17669_v1  ;;  %v6964_v62 = vpack.c.bf16 %v6931_v63, %v6931_v63 }
 0xd16   :  { %13875 = vmatpush3.bf16.xpose.msra.mxu0 %v8970_v51  ;;  %13876 = vmatprep.mubr.msk.bf16.mxu0 %vm14713_vm0, %v17669_v1  ;;  %v9246_v23 = vsel %vm1520_vm2, %v7412_v3, 0 }
 0xd17   :  { %13871 = vmatmul.mubr.msk.bf16.vlgmr.msra.gmra.mxu1 %vm1520_vm2, %v6957_v48  ;;  %13886 = vmatprep.subr.bf16.mxu0 %v17669_v1  ;;  %v6932_v51 = vcombine.high %v6924_v14, %v17669_v1  ;;  %v6962_v48 = vpack.c.bf16 %v6924_v14, %v6924_v14 }
 0xd18   :  { %13881 = vmatpush3.bf16.xpose.msra.mxu1 %v9016_v40  ;;  %13882 = vmatprep.mubr.msk.bf16.mxu1 %vm14713_vm0, %v17669_v1  ;;  %v7413_v40 = vpack.c.bf16 %v7381_v31, %v7381_v31 }
 0xd19   :  { %13892 = vmatprep.subr.bf16.mxu1 %v17669_v1  ;;  %v6963_v58 = vpack.c.bf16 %v6932_v51, %v6932_v51 }
 0xd1a   :  { %v9292_v47 = vsel %vm1520_vm2, %v7413_v40, 0 }
 0xd1d   :  { %13877 = vmatmul.mubr.msk.bf16.vlgmr.msra.gmra.mxu0 %vm1520_vm2, %v6958_v4  ;;  %v6965_v4 = vpack.c.bf16 %v6933_v27, %v6933_v27 }
 0xd1e   :  { %13887 = vmatpush3.bf16.xpose.msra.mxu0 %v9062_v59  ;;  %13888 = vmatprep.mubr.msk.bf16.mxu0 %vm14713_vm0, %v17669_v1 }
 0xd1f   :  { %13883 = vmatmul.mubr.msk.bf16.vlgmr.msra.gmra.mxu1 %vm1520_vm2, %v6959_v22  ;;  %13898 = vmatprep.subr.bf16.mxu0 %v17669_v1 }
 0xd20   :  { %13893 = vmatpush3.bf16.xpose.msra.mxu1 %v9108_v61  ;;  %13894 = vmatprep.mubr.msk.bf16.mxu1 %vm14713_vm0, %v17669_v1 }
 0xd21   :  { %13904 = vmatprep.subr.bf16.mxu1 %v17669_v1 }
 0xd25   :  { %13889 = vmatmul.mubr.msk.bf16.vlgmr.msra.gmra.mxu0 %vm1520_vm2, %v6960_v56 }
 0xd26   :  { %13899 = vmatpush3.bf16.xpose.msra.mxu0 %v9154_v60  ;;  %13900 = vmatprep.mubr.msk.bf16.mxu0 %vm14713_vm0, %v17669_v1 }
 0xd27   :  { %13895 = vmatmul.mubr.msk.bf16.vlgmr.msra.gmra.mxu1 %vm1520_vm2, %v6961_v18  ;;  %13910 = vmatprep.subr.bf16.mxu0 %v17669_v1 }
 0xd28   :  { %13905 = vmatpush3.bf16.xpose.msra.mxu1 %v9200_v39  ;;  %13906 = vmatprep.mubr.msk.bf16.mxu1 %vm14713_vm0, %v17669_v1 }
 0xd29   :  { %13916 = vmatprep.subr.bf16.mxu1 %v17669_v1 }
 0xd2d   :  { %13901 = vmatmul.mubr.msk.bf16.vlgmr.msra.gmra.mxu0 %vm1520_vm2, %v6962_v48 }
 0xd2e   :  { %13911 = vmatpush3.bf16.xpose.msra.mxu0 %v9246_v23  ;;  %13912 = vmatprep.mubr.msk.bf16.mxu0 %vm14713_vm0, %v17669_v1 }
 0xd2f   :  { %13907 = vmatmul.mubr.msk.bf16.vlgmr.msra.gmra.mxu1 %vm1520_vm2, %v6963_v58  ;;  %13922 = vmatprep.subr.bf16.mxu0 %v17669_v1 }
 0xd30   :  { %13917 = vmatpush3.bf16.xpose.msra.mxu1 %v9292_v47  ;;  %13918 = vmatprep.mubr.msk.bf16.mxu1 %vm14713_vm0, %v17669_v1 }
 0xd31   :  { %13928 = vmatprep.subr.bf16.mxu1 %v17669_v1 }
 0xd35   :  { %13913 = vmatmul.mubr.msk.bf16.vlgmr.msra.gmra.mxu0 %vm1520_vm2, %v6964_v62 }
 0xd36   :  { %13924 = vmatprep.mubr.msk.bf16.mxu0 %vm14713_vm0, %v17669_v1 }
 0xd37   :  { %13919 = vmatmul.mubr.msk.bf16.vlgmr.msra.gmra.mxu1 %vm1520_vm2, %v6965_v4 }
 0xd38   :  { %13930 = vmatprep.mubr.msk.bf16.mxu1 %vm14713_vm0, %v17669_v1 }
 0xd46   :  { %v16687_v35 = vpop.f32.mrf.mxu0 }
 0xd47   :  { %9366 = vrot.lane.b32.xlu1 %v16687_v35, %s14720_s13 }
 0xd48   :  { %v13734_v7 = vpop.f32.mrf.mxu0  ;;  %v16691_v24 = vpop.f32.mrf.mxu1 }
 0xd49   :  { %9368 = vrot.lane.b32.xlu0 %v16691_v24, %s14720_s13 }
 0xd4a   :  { %v7905_v19 = vpop.f32.mrf.mxu0  ;;  %v13740_v59 = vpop.f32.mrf.mxu1 }
 0xd4c   :  { %v13735_v22 = vpop.f32.mrf.mxu0  ;;  %v7951_v13 = vpop.f32.mrf.mxu1 }
 0xd4e   :  { %v13741_v61 = vpop.f32.mrf.mxu1  ;;  %v16695_v36 = vpop.f32.mrf.mxu0 }
 0xd4f   :  { %9370 = vrot.lane.b32.xlu1 %v16695_v36, %s14720_s13 }
 0xd50   :  { %v13746_v17 = vpop.f32.mrf.mxu0  ;;  %v16699_v57 = vpop.f32.mrf.mxu1 }
 0xd51   :  { %9372 = vrot.lane.b32.xlu0 %v16699_v57, %s14720_s13 }
 0xd52   :  { %v7997_v25 = vpop.f32.mrf.mxu0  ;;  %v13752_v9 = vpop.f32.mrf.mxu1 }
 0xd54   :  { %v13747_v56 = vpop.f32.mrf.mxu0  ;;  %v8043_v10 = vpop.f32.mrf.mxu1 }
 0xd56   :  { %v13753_v0 = vpop.f32.mrf.mxu1  ;;  %v16703_v14 = vpop.f32.mrf.mxu0 }
 0xd57   :  { %9374 = vrot.lane.b32.xlu1 %v16703_v14, %s14720_s13 }
 0xd58   :  { %v13758_v60 = vpop.f32.mrf.mxu0  ;;  %v16707_v18 = vpop.f32.mrf.mxu1 }
 0xd59   :  { %9376 = vrot.lane.b32.xlu0 %v16707_v18, %s14720_s13 }
 0xd5a   :  { %v8089_v39 = vpop.f32.mrf.mxu0  ;;  %v13764_v31 = vpop.f32.mrf.mxu1 }
 0xd5c   :  { %v13759_v55 = vpop.f32.mrf.mxu0  ;;  %v8135_v3 = vpop.f32.mrf.mxu1 }
 0xd5e   :  { %v13765_v51 = vpop.f32.mrf.mxu1  ;;  %v16711_v48 = vpop.f32.mrf.mxu0 }
 0xd5f   :  { %9378 = vrot.lane.b32.xlu1 %v16711_v48, %s14720_s13 }
 0xd60   :  { %v13770_v40 = vpop.f32.mrf.mxu0  ;;  %v16715_v63 = vpop.f32.mrf.mxu1 }
 0xd61   :  { %9380 = vrot.lane.b32.xlu0 %v16715_v63, %s14720_s13 }
 0xd62   :  { %v8181_v23 = vpop.f32.mrf.mxu0  ;;  %v13776_v58 = vpop.f32.mrf.mxu1 }
 0xd64   :  { %v13771_v47 = vpop.f32.mrf.mxu0  ;;  %v8227_v27 = vpop.f32.mrf.mxu1 }
 0xd66   :  { %v13777_v62 = vpop.f32.mrf.mxu1  ;;  %v16719_v4 = vpop.f32.mrf.mxu0 }
 0xd67   :  { %9382 = vrot.lane.b32.xlu1 %v16719_v4, %s14720_s13 }
 0xd68   :  { %v13782_v7 = vpop.f32.mrf.mxu0  ;;  %v16723_v19 = vpop.f32.mrf.mxu1 }
 0xd69   :  { %9384 = vrot.lane.b32.xlu0 %v16723_v19, %s14720_s13 }
 0xd6a   :  { %v8273_v59 = vpop.f32.mrf.mxu0  ;;  %v13788_v22 = vpop.f32.mrf.mxu1 }
 0xd6c   :  { %v13783_v13 = vpop.f32.mrf.mxu0  ;;  %v8319_v61 = vpop.f32.mrf.mxu1 }
 0xd6e   :  { %v13789_v17 = vpop.f32.mrf.mxu1  ;;  %v16727_v25 = vpop.f32.mrf.mxu0 }
 0xd6f   :  { %9386 = vrot.lane.b32.xlu1 %v16727_v25, %s14720_s13 }
 0xd70   :  { %v13794_v9 = vpop.f32.mrf.mxu0  ;;  %v16731_v56 = vpop.f32.mrf.mxu1 }
 0xd71   :  { %9388 = vrot.lane.b32.xlu0 %v16731_v56, %s14720_s13 }
 0xd72   :  { %v8365_v10 = vpop.f32.mrf.mxu0  ;;  %v13800_v0 = vpop.f32.mrf.mxu1 }
 0xd74   :  { %v13795_v60 = vpop.f32.mrf.mxu0  ;;  %v8411_v39 = vpop.f32.mrf.mxu1 }
 0xd76   :  { %v13801_v31 = vpop.f32.mrf.mxu1  ;;  %v16735_v55 = vpop.f32.mrf.mxu0 }
 0xd77   :  { %9390 = vrot.lane.b32.xlu1 %v16735_v55, %s14720_s13 }
 0xd78   :  { %v13806_v3 = vpop.f32.mrf.mxu0  ;;  %v16739_v51 = vpop.f32.mrf.mxu1 }
 0xd79   :  { %9392 = vrot.lane.b32.xlu0 %v16739_v51, %s14720_s13 }
 0xd7a   :  { %v8457_v40 = vpop.f32.mrf.mxu0  ;;  %v13812_v23 = vpop.f32.mrf.mxu1 }
 0xd7c   :  { %v13807_v58 = vpop.f32.mrf.mxu0  ;;  %v8503_v47 = vpop.f32.mrf.mxu1 }
 0xd7e   :  { %v13813_v27 = vpop.f32.mrf.mxu1  ;;  %v16743_v62 = vpop.f32.mrf.mxu0 }
 0xd7f   :  { %9394 = vrot.lane.b32.xlu1 %v16743_v62, %s14720_s13 }
 0xd80   :  { %v13818_v7 = vpop.f32.mrf.mxu0  ;;  %v16747_v59 = vpop.f32.mrf.mxu1 }
 0xd81   :  { %9396 = vrot.lane.b32.xlu0 %v16747_v59, %s14720_s13 }
 0xd82   :  { %v8549_v22 = vpop.f32.mrf.mxu0  ;;  %v13824_v13 = vpop.f32.mrf.mxu1 }
 0xd84   :  { %v13819_v61 = vpop.f32.mrf.mxu0  ;;  %v8595_v17 = vpop.f32.mrf.mxu1 }
 0xd86   :  { %v13825_v9 = vpop.f32.mrf.mxu1 }
 0xdb9   :  { %v9367_v0 = vpop.permute.xlu1 %9366 }
 0xdba   :  { %v9462_v60 = vsub.f32 %v16687_v35, %v9367_v0 }
 0xdbb   :  { %v9369_v3 = vpop.permute.xlu0 %9368 }
 0xdbc   :  { %v9494_v40 = vsub.f32 0.0, %v9462_v60  ;;  %v9463_v23 = vsub.f32 %v16691_v24, %v9369_v3 }
 0xdbd   :  { %v16751_v10 = vpop.f32.mrf.mxu0 }
 0xdbe   :  { %9398 = vrot.lane.b32.xlu1 %v16751_v10, %s14720_s13  ;;  %v9526_v27 = vmul.f32 1.442695, %v9494_v40  ;;  %v9495_v7 = vsub.f32 0.0, %v9463_v23 }
 0xdbf   :  { %v13830_v39 = vpop.f32.mrf.mxu0  ;;  %v16756_v31 = vpop.f32.mrf.mxu1 }
 0xdc0   :  { %9400 = vrot.lane.b32.xlu0 %v16756_v31, %s14720_s13  ;;  %14519 = vpow2.f32 %v9526_v27  ;;  %v9528_v35 = vmul.f32 1.442695, %v9495_v7 }
 0xdc1   :  { %v13836_v58 = vpop.f32.mrf.mxu1  ;;  %v8641_v47 = vpop.f32.mrf.mxu0 }
 0xdc2   :  { %7414 = vrot.lane.b32.xlu1 %v16291_v33, %s14721_s14  ;;  %v9371_v9 = vpop.permute.xlu1 %9370  ;;  %14521 = vpow2.f32 %v9528_v35 }
 0xdc3   :  { %v8687_v22 = vpop.f32.mrf.mxu1  ;;  %v13831_v13 = vpop.f32.mrf.mxu0  ;;  %v9464_v24 = vsub.f32 %v16695_v36, %v9371_v9 }
 0xdc4   :  { %7418 = vrot.lane.b32.xlu0 %v16305_v12, %s14721_s14  ;;  %v9373_v60 = vpop.permute.xlu0 %9372 }
 0xdc5   :  { %v13837_v61 = vpop.f32.mrf.mxu1  ;;  %v16765_v17 = vpop.f32.mrf.mxu0  ;;  %v9496_v12 = vsub.f32 0.0, %v9464_v24  ;;  %v9465_v39 = vsub.f32 %v16699_v57, %v9373_v60 }
 0xdc6   :  { %9402 = vrot.lane.b32.xlu1 %v16765_v17, %s14720_s13 }
 0xdc7   :  { %v13842_v33 = vpop.f32.mrf.mxu0  ;;  %v16770_v0 = vpop.f32.mrf.mxu1  ;;  %v9530_v23 = vmul.f32 1.442695, %v9496_v12  ;;  %v9497_v58 = vsub.f32 0.0, %v9465_v39 }
 0xdc8   :  { %9404 = vrot.lane.b32.xlu0 %v16770_v0, %s14720_s13 }
 0xdc9   :  { %v13848_v3 = vpop.f32.mrf.mxu1  ;;  %v8733_v40 = vpop.f32.mrf.mxu0  ;;  %14523 = vpow2.f32 %v9530_v23  ;;  %v9532_v36 = vmul.f32 1.442695, %v9497_v58 }
 0xdca   :  { %7422 = vrot.lane.b32.xlu1 %v16303_v28, %s14721_s14  ;;  %v9375_v13 = vpop.permute.xlu1 %9374 }
 0xdcb   :  { %v8779_v47 = vpop.f32.mrf.mxu1  ;;  %v13843_v27 = vpop.f32.mrf.mxu0  ;;  %14525 = vpow2.f32 %v9532_v36  ;;  %v9466_v57 = vsub.f32 %v16703_v14, %v9375_v13 }
 0xdcc   :  { %7426 = vrot.lane.b32.xlu0 %v16311_v32, %s14721_s14  ;;  %v9377_v61 = vpop.permute.xlu0 %9376 }
 0xdcd   :  { %v13849_v7 = vpop.f32.mrf.mxu1  ;;  %v16779_v22 = vpop.f32.mrf.mxu0  ;;  %v9498_v32 = vsub.f32 0.0, %v9466_v57  ;;  %v9467_v9 = vsub.f32 %v16707_v18, %v9377_v61 }
 0xdce   :  { %9406 = vrot.lane.b32.xlu1 %v16779_v22, %s14720_s13  ;;  %v14520_v60 = vpop.eup %14519 }
 0xdcf   :  { %v13854_v28 = vpop.f32.mrf.mxu0  ;;  %v16784_v35 = vpop.f32.mrf.mxu1  ;;  %v9590_v12 = vadd.f32 1.0, %v14520_v60  ;;  %v9534_v39 = vmul.f32 1.442695, %v9498_v32  ;;  %v9499_v3 = vsub.f32 0.0, %v9467_v9 }
 0xdd0   :  { %9408 = vrot.lane.b32.xlu0 %v16784_v35, %s14720_s13  ;;  %v14522_v58 = vpop.eup %14521 }
 0xdd1   :  { %v13860_v24 = vpop.f32.mrf.mxu1  ;;  %v8825_v33 = vpop.f32.mrf.mxu0  ;;  %14527 = vrcp.f32 %v9590_v12  ;;  %v9591_v14 = vadd.f32 1.0, %v14522_v58  ;;  %v9536_v47 = vmul.f32 1.442695, %v9499_v3 }
 0xdd2   :  { %14529 = vpow2.f32 %v9534_v39  ;;  %v9379_v7 = vpop.permute.xlu1 %9378 }
 0xdd3   :  { %v8871_v40 = vpop.f32.mrf.mxu1  ;;  %v13855_v23 = vpop.f32.mrf.mxu0  ;;  %14531 = vrcp.f32 %v9591_v14  ;;  %v9468_v18 = vsub.f32 %v16711_v48, %v9379_v7 }
 0xdd4   :  { %14533 = vpow2.f32 %v9536_v47  ;;  %v9381_v28 = vpop.permute.xlu0 %9380 }
 0xdd5   :  { %v13861_v27 = vpop.f32.mrf.mxu1  ;;  %v16789_v36 = vpop.f32.mrf.mxu0  ;;  %v9500_v61 = vsub.f32 0.0, %v9468_v18  ;;  %v9469_v32 = vsub.f32 %v16715_v63, %v9381_v28 }
 0xdd6   :  { %9410 = vrot.lane.b32.xlu1 %v16789_v36, %s14720_s13  ;;  %v14524_v33 = vpop.eup %14523 }
 0xdd7   :  { %v13866_v13 = vpop.f32.mrf.mxu0  ;;  %v16794_v57 = vpop.f32.mrf.mxu1  ;;  %v9592_v60 = vadd.f32 1.0, %v14524_v33  ;;  %v9538_v12 = vmul.f32 1.442695, %v9500_v61  ;;  %v9501_v39 = vsub.f32 0.0, %v9469_v32 }
 0xdd8   :  { %9412 = vrot.lane.b32.xlu0 %v16794_v57, %s14720_s13  ;;  %v14526_v48 = vpop.eup %14525 }
 0xdd9   :  { %v13872_v9 = vpop.f32.mrf.mxu1  ;;  %v8917_v24 = vpop.f32.mrf.mxu0  ;;  %14535 = vrcp.f32 %v9592_v60  ;;  %v9593_v23 = vadd.f32 1.0, %v14526_v48  ;;  %v9540_v58 = vmul.f32 1.442695, %v9501_v39 }
 0xdda   :  { %14537 = vpow2.f32 %v9538_v12  ;;  %v9383_v27 = vpop.permute.xlu1 %9382 }
 0xddb   :  { %v8963_v3 = vpop.f32.mrf.mxu1  ;;  %v13867_v40 = vpop.f32.mrf.mxu0  ;;  %14539 = vrcp.f32 %v9593_v23  ;;  %v9470_v63 = vsub.f32 %v16719_v4, %v9383_v27 }
 0xddc   :  { %14541 = vpow2.f32 %v9540_v58  ;;  %v9385_v13 = vpop.permute.xlu0 %9384 }
 0xddd   :  { %v13873_v14 = vpop.f32.mrf.mxu1  ;;  %v16799_v47 = vpop.f32.mrf.mxu0  ;;  %v9502_v28 = vsub.f32 0.0, %v9470_v63  ;;  %v9471_v61 = vsub.f32 %v16723_v19, %v9385_v13 }
 0xdde   :  { %9414 = vrot.lane.b32.xlu1 %v16799_v47, %s14720_s13  ;;  %v16809_v24 = vpop.eup %14527 }
 0xddf   :  { %v13878_v7 = vpop.f32.mrf.mxu0  ;;  %v16804_v18 = vpop.f32.mrf.mxu1  ;;  %v9542_v60 = vmul.f32 1.442695, %v9502_v28  ;;  %v9503_v12 = vsub.f32 0.0, %v9471_v61  ;;  %v9654_v58 = vsub.f32 1.0, %v16809_v24 }
 0xde0   :  { %9416 = vrot.lane.b32.xlu0 %v16804_v18, %s14720_s13  ;;  %v14530_v33 = vpop.eup %14529 }
 0xde1   :  { %v13884_v32 = vpop.f32.mrf.mxu1  ;;  %v9009_v9 = vpop.f32.mrf.mxu0  ;;  %v9594_v40 = vadd.f32 1.0, %v14530_v33  ;;  %14543 = vpow2.f32 %v9542_v60  ;;  %v9544_v23 = vmul.f32 1.442695, %v9503_v12 }
 0xde2   :  { %v16811_v3 = vpop.eup %14531  ;;  %v9387_v7 = vpop.permute.xlu1 %9386 }
 0xde3   :  { %v9055_v39 = vpop.f32.mrf.mxu1  ;;  %v13879_v4 = vpop.f32.mrf.mxu0  ;;  %v9655_v14 = vsub.f32 1.0, %v16811_v3  ;;  %14545 = vrcp.f32 %v9594_v40  ;;  %v9472_v13 = vsub.f32 %v16727_v25, %v9387_v7 }
 0xde4   :  { %v14534_v48 = vpop.eup %14533  ;;  %14547 = vpow2.f32 %v9544_v23  ;;  %v9389_v9 = vpop.permute.xlu0 %9388 }
 0xde5   :  { %v13885_v19 = vpop.f32.mrf.mxu1  ;;  %v16815_v27 = vpop.f32.mrf.mxu0  ;;  %v9595_v63 = vadd.f32 1.0, %v14534_v48  ;;  %v14266_v28 = vpack.i.bf16 %v9655_v14, %v9654_v58  ;;  %v9504_v33 = vsub.f32 0.0, %v9472_v13  ;;  %v9473_v60 = vsub.f32 %v16731_v56, %v9389_v9 }
 0xde6   :  { %9418 = vrot.lane.b32.xlu0 %v16815_v27, %s14720_s13  ;;  %v16824_v4 = vpop.eup %14535 }
 0xde7   :  { %v13890_v61 = vpop.f32.mrf.mxu0  ;;  %v16820_v32 = vpop.f32.mrf.mxu1  ;;  %14549 = vrcp.f32 %v9595_v63  ;;  %14267 = vrot.lane.b32.xlu1 %v14266_v28, %s14722_s15  ;;  %v9546_v48 = vmul.f32 1.442695, %v9504_v33  ;;  %v9505_v23 = vsub.f32 0.0, %v9473_v60  ;;  %v9656_v56 = vsub.f32 1.0, %v16824_v4 }
 0xde8   :  { %v14538_v40 = vpop.eup %14537 }
 0xde9   :  { %v13896_v12 = vpop.f32.mrf.mxu1  ;;  %v9101_v39 = vpop.f32.mrf.mxu0  ;;  %v9596_v14 = vadd.f32 1.0, %v14538_v40  ;;  %14551 = vpow2.f32 %v9546_v48  ;;  %v9548_v63 = vmul.f32 1.442695, %v9505_v23 }
 0xdea   :  { %v16826_v58 = vpop.eup %14539  ;;  %v9391_v33 = vpop.permute.xlu1 %9390 }
 0xdeb   :  { %v9147_v19 = vpop.f32.mrf.mxu1  ;;  %v13891_v25 = vpop.f32.mrf.mxu0  ;;  %9420 = vrot.lane.b32.xlu1 %v16820_v32, %s14720_s13  ;;  %v9657_v13 = vsub.f32 1.0, %v16826_v58  ;;  %14553 = vrcp.f32 %v9596_v14  ;;  %v9474_v60 = vsub.f32 %v16735_v55, %v9391_v33 }
 0xdec   :  { %v14542_v7 = vpop.eup %14541  ;;  %14555 = vpow2.f32 %v9548_v63  ;;  %v9393_v48 = vpop.permute.xlu0 %9392 }
 0xded   :  { %v13897_v28 = vpop.f32.mrf.mxu1  ;;  %v16832_v61 = vpop.f32.mrf.mxu0  ;;  %v9597_v9 = vadd.f32 1.0, %v14542_v7  ;;  %v14271_v12 = vpack.i.bf16 %v9657_v13, %v9656_v56  ;;  %v9506_v23 = vsub.f32 0.0, %v9474_v60  ;;  %v9475_v19 = vsub.f32 %v16739_v51, %v9393_v48 }
 0xdee   :  { %v14544_v7 = vpop.eup %14543 }
 0xdef   :  { %v13902_v39 = vpop.f32.mrf.mxu0  ;;  %v16835_v40 = vpop.f32.mrf.mxu1  ;;  %14557 = vrcp.f32 %v9597_v9  ;;  %14272 = vrot.lane.b32.xlu0 %v14271_v12, %s14722_s15  ;;  %9422 = vrot.lane.b32.xlu1 %v16832_v61, %s14720_s13  ;;  %v9598_v55 = vadd.f32 1.0, %v14544_v7  ;;  %v9550_v56 = vmul.f32 1.442695, %v9506_v23  ;;  %v9507_v13 = vsub.f32 0.0, %v9475_v19 }
 0xdf0   :  { %v16841_v63 = vpop.eup %14545 }
 0xdf1   :  { %v13908_v25 = vpop.f32.mrf.mxu1  ;;  %v9193_v14 = vpop.f32.mrf.mxu0  ;;  %14559 = vrcp.f32 %v9598_v55  ;;  %v9552_v60 = vmul.f32 1.442695, %v9507_v13 }
 0xdf2   :  { %v14548_v9 = vpop.eup %14547  ;;  %14561 = vpow2.f32 %v9550_v56  ;;  %v9395_v25 = vpop.permute.xlu1 %9394  ;;  %v9658_v14 = vsub.f32 1.0, %v16841_v63 }
 0xdf3   :  { %v9239_v28 = vpop.f32.mrf.mxu1  ;;  %v13903_v33 = vpop.f32.mrf.mxu0  ;;  %v9599_v51 = vadd.f32 1.0, %v14548_v9  ;;  %9424 = vrot.lane.b32.xlu0 %v16835_v40, %s14720_s13  ;;  %v9476_v19 = vsub.f32 %v16743_v62, %v9395_v25 }
 0xdf4   :  { %v16843_v39 = vpop.eup %14549  ;;  %v9397_v55 = vpop.permute.xlu0 %9396 }
 0xdf5   :  { %v13909_v12 = vpop.f32.mrf.mxu1  ;;  %v16847_v48 = vpop.f32.mrf.mxu0  ;;  %v9659_v23 = vsub.f32 1.0, %v16843_v39  ;;  %14563 = vrcp.f32 %v9599_v51  ;;  %v9508_v33 = vsub.f32 0.0, %v9476_v19  ;;  %v9477_v9 = vsub.f32 %v16747_v59, %v9397_v55 }
 0xdf6   :  { %14565 = vpow2.f32 %v9552_v60  ;;  %v14552_v6 = vpop.eup %14551 }
 0xdf7   :  { %v13914_v7 = vpop.f32.mrf.mxu0  ;;  %v16852_v28 = vpop.f32.mrf.mxu1  ;;  %v14276_v13 = vpack.i.bf16 %v9659_v23, %v9658_v14  ;;  %9426 = vrot.lane.b32.xlu0 %v16847_v48, %s14720_s13  ;;  %v9600_v62 = vadd.f32 1.0, %v14552_v6  ;;  %v9554_v25 = vmul.f32 1.442695, %v9508_v33 }
 0xdf8   :  { %v16858_v51 = vpop.eup %14553  ;;  %v9509_v7 = vsub.f32 0.0, %v9477_v9 }
 0xdf9   :  { %v9285_v56 = vpop.f32.mrf.mxu0  ;;  %v13920_v12 = vpop.f32.mrf.mxu1  ;;  %14277 = vrot.lane.b32.xlu1 %v14276_v13, %s14722_s15  ;;  %14567 = vrcp.f32 %v9600_v62  ;;  %v9660_v55 = vsub.f32 1.0, %v16858_v51 }
 0xdfa   :  { %v14556_v41 = vpop.eup %14555  ;;  %v9556_v23 = vmul.f32 1.442695, %v9509_v7  ;;  %14569 = vpow2.f32 %v9554_v25 }
 0xdfb   :  { %v13915_v26 = vpop.f32.mrf.mxu0  ;;  %v9331_v60 = vpop.f32.mrf.mxu1  ;;  %v9601_v59 = vadd.f32 1.0, %v14556_v41 }
 0xdfc   :  { %v16860_v14 = vpop.eup %14557 }
 0xdfd   :  { %v13921_v19 = vpop.f32.mrf.mxu1  ;;  %9428 = vrot.lane.b32.xlu1 %v16852_v28, %s14720_s13  ;;  %v9661_v13 = vsub.f32 1.0, %v16860_v14  ;;  %14571 = vrcp.f32 %v9601_v59 }
 0xdfe   :  { %14573 = vpow2.f32 %v9556_v23  ;;  %v16866_v26 = vpop.eup %14559 }
 0xdff   :  { %v14281_v6 = vpack.i.bf16 %v9661_v13, %v9660_v55  ;;  %v14562_v33 = vpop.eup %14561  ;;  %v9662_v12 = vsub.f32 1.0, %v16866_v26 }
 0xe00   :  { %v9602_v41 = vadd.f32 1.0, %v14562_v33 }
 0xe01   :  { %14282 = vrot.lane.b32.xlu0 %v14281_v6, %s14722_s15 }
 0xe02   :  { %v16869_v9 = vpop.eup %14563  ;;  %14575 = vrcp.f32 %v9602_v41 }
 0xe03   :  { %v14566_v56 = vpop.eup %14565  ;;  %v9663_v62 = vsub.f32 1.0, %v16869_v9 }
 0xe04   :  { %v9603_v25 = vadd.f32 1.0, %v14566_v56 }
 0xe05   :  { %7420 = vrot.lane.b32.xlu0 %v16328_v34, %s14721_s14  ;;  %v14286_v7 = vpack.i.bf16 %v9663_v62, %v9662_v12 }
 0xe06   :  { %14577 = vrcp.f32 %v9603_v25  ;;  %v16876_v60 = vpop.eup %14567 }
 0xe07   :  { %14287 = vrot.lane.b32.xlu1 %v14286_v7, %s14722_s15  ;;  %v14570_v59 = vpop.eup %14569  ;;  %v9664_v13 = vsub.f32 1.0, %v16876_v60 }
 0xe08   :  { %v9604_v19 = vadd.f32 1.0, %v14570_v59 }
 0xe0a   :  { %v16878_v23 = vpop.eup %14571  ;;  %14579 = vrcp.f32 %v9604_v19 }
 0xe0b   :  { %v14574_v55 = vpop.eup %14573  ;;  %7416 = vrot.lane.b32.xlu1 %v16297_v46, %s14721_s14  ;;  %v9665_v6 = vsub.f32 1.0, %v16878_v23 }
 0xe0c   :  { %v9605_v34 = vadd.f32 1.0, %v14574_v55 }
 0xe0d   :  { %v14291_v33 = vpack.i.bf16 %v9665_v6, %v9664_v13 }
 0xe0e   :  { %14581 = vrcp.f32 %v9605_v34 }
 0xe0f   :  { %7424 = vrot.lane.b32.xlu1 %v16335_v50, %s14721_s14  ;;  %14292 = vrot.lane.b32.xlu0 %v14291_v33, %s14722_s15  ;;  %v16887_v41 = vpop.eup %14575 }
 0xe10   :  { %v9666_v46 = vsub.f32 1.0, %v16887_v41 }
 0xe13   :  { %v16889_v56 = vpop.eup %14577  ;;  %7428 = vrot.lane.b32.xlu0 %v16337_v54, %s14721_s14 }
 0xe14   :  { %v9667_v12 = vsub.f32 1.0, %v16889_v56 }
 0xe16   :  { %v14296_v62 = vpack.i.bf16 %v9667_v12, %v9666_v46 }
 0xe17   :  { %v16896_v25 = vpop.eup %14579 }
 0xe18   :  { %14297 = vrot.lane.b32.xlu1 %v14296_v62, %s14722_s15  ;;  %v9668_v50 = vsub.f32 1.0, %v16896_v25 }
 0xe1b   :  { %v16898_v7 = vpop.eup %14581 }
 0xe1c   :  { %v9669_v59 = vsub.f32 1.0, %v16898_v7 }
 0xe1e   :  { %v14301_v19 = vpack.i.bf16 %v9669_v59, %v9668_v50 }
 0xe20   :  { %14302 = vrot.lane.b32.xlu0 %v14301_v19, %s14722_s15 }
 0xe30   :  { %v9399_v55 = vpop.permute.xlu1 %9398 }
 0xe31   :  { %v9478_v54 = vsub.f32 %v16751_v10, %v9399_v55 }
 0xe32   :  { %v9401_v13 = vpop.permute.xlu0 %9400 }
 0xe33   :  { %v9510_v6 = vsub.f32 0.0, %v9478_v54  ;;  %v9479_v34 = vsub.f32 %v16756_v31, %v9401_v13 }
 0xe34   :  { %v16905_v33 = vpop.permute.xlu1 %7414 }
 0xe35   :  { %v9558_v46 = vmul.f32 1.442695, %v9510_v6  ;;  %v9511_v12 = vsub.f32 0.0, %v9479_v34 }
 0xe36   :  { %v7419_v62 = vpop.permute.xlu0 %7418 }
 0xe37   :  { %14583 = vpow2.f32 %v9558_v46  ;;  %v9560_v42 = vmul.f32 1.442695, %v9511_v12 }
 0xe38   :  { %v9403_v37 = vpop.permute.xlu1 %9402 }
 0xe39   :  { %14585 = vpow2.f32 %v9560_v42  ;;  %v9480_v50 = vsub.f32 %v16765_v17, %v9403_v37 }
 0xe3a   :  { %v9405_v59 = vpop.permute.xlu0 %9404 }
 0xe3b   :  { %v9512_v19 = vsub.f32 0.0, %v9480_v50  ;;  %v9481_v49 = vsub.f32 %v16770_v0, %v9405_v59 }
 0xe3c   :  { %v7423_v10 = vpop.permute.xlu1 %7422 }
 0xe3d   :  { %v9562_v55 = vmul.f32 1.442695, %v9512_v19  ;;  %v9513_v54 = vsub.f32 0.0, %v9481_v49  ;;  %v7438_v31 = vcombine.low %v16905_v33, %v7423_v10 }
 0xe3e   :  { %v7427_v13 = vpop.permute.xlu0 %7426 }
 0xe3f   :  { %14587 = vpow2.f32 %v9562_v55  ;;  %v9564_v6 = vmul.f32 1.442695, %v9513_v54  ;;  %v7454_v34 = vcombine.low %v7419_v62, %v7427_v13  ;;  %v7446_v42 = vrot.slane %v7438_v31, %v14794_v8 }
 0xe40   :  { %v9407_v29 = vpop.permute.xlu1 %9406 }
 0xe41   :  { %14589 = vpow2.f32 %v9564_v6  ;;  %v9482_v46 = vsub.f32 %v16779_v22, %v9407_v29  ;;  %v7462_v37 = vrot.slane %v7454_v34, %v14794_v8  ;;  %v17677_v22 = vmov 0.0  }
 0xe42   :  { %v9409_v17 = vpop.permute.xlu0 %9408  ;;  %v7455_v34 = vcombine.high %v7419_v62, %v7427_v13  ;;  %v7439_v62 = vcombine.high %v16905_v33, %v7423_v10 }
 0xe43   :  { %v9514_v12 = vsub.f32 0.0, %v9482_v46  ;;  %v9483_v0 = vsub.f32 %v16784_v35, %v9409_v17  ;;  %v7470_v49 = vcombine.low %v7446_v42, %v7462_v37  ;;  %v7471_v11 = vcombine.high %v7446_v42, %v7462_v37 }
 0xe44   :  { %v14584_v50 = vpop.eup %14583  ;;  %v16923_v13 = vrot.slane %v7455_v34, %v14794_v8  ;;  %v16930_v10 = vrot.slane %v7439_v62, %v14794_v8 }
 0xe45   :  { %v9606_v59 = vadd.f32 1.0, %v14584_v50  ;;  %v9515_v19 = vsub.f32 0.0, %v9483_v0  ;;  %v7478_v55 = vrot.slane %v7470_v49, %v14871_v53  ;;  %v9566_v54 = vmul.f32 1.442695, %v9514_v12 }
 0xe46   :  { %v14586_v1 = vpop.eup %14585  ;;  %v7485_v50 = vrot.slane %v7471_v11, %v14871_v53 }
 0xe47   :  { %14591 = vrcp.f32 %v9606_v59  ;;  %v9607_v6 = vadd.f32 1.0, %v14586_v1  ;;  %v9568_v29 = vmul.f32 1.442695, %v9515_v19  ;;  %v7573_v31 = vcombine.high %v7478_v55, %v17677_v22 }
 0xe48   :  { %v9411_v21 = vpop.permute.xlu1 %9410  ;;  %v7572_v46 = vrot.slane %v7478_v55, %v14794_v8  ;;  %v7606_v11 = vcombine.high %v7485_v50, %v17677_v22 }
 0xe49   :  { %14593 = vrcp.f32 %v9607_v6  ;;  %v9484_v35 = vsub.f32 %v16789_v36, %v9411_v21  ;;  %v7580_v0 = vrot.slane %v7573_v31, %v14794_v8 }
 0xe4a   :  { %14595 = vpow2.f32 %v9566_v54  ;;  %v9413_v17 = vpop.permute.xlu0 %9412 }
 0xe4b   :  { %14597 = vpow2.f32 %v9568_v29  ;;  %v9485_v1 = vsub.f32 %v16794_v57, %v9413_v17  ;;  %v9516_v37 = vsub.f32 0.0, %v9484_v35  ;;  %v7581_v12 = vcombine.low %v7572_v46, %v7580_v0 }
 0xe4c   :  { %v14588_v42 = vpop.eup %14587  ;;  %v7582_v31 = vcombine.high %v7572_v46, %v7580_v0  ;;  %v7486_v46 = vcombine.low %v16930_v10, %v16923_v13 }
 0xe4d   :  { %v9608_v49 = vadd.f32 1.0, %v14588_v42  ;;  %v9517_v59 = vsub.f32 0.0, %v9485_v1  ;;  %v9570_v21 = vmul.f32 1.442695, %v9516_v37  ;;  %v7589_v36 = vrot.slane %v7581_v12, %v14871_v53 }
 0xe4e   :  { %v14590_v19 = vpop.eup %14589  ;;  %v16942_v12 = vrot.slane %v7606_v11, %v14794_v8  ;;  %v7494_v11 = vrot.slane %v7486_v46, %v14871_v53 }
 0xe4f   :  { %14599 = vrcp.f32 %v9608_v49  ;;  %v9609_v55 = vadd.f32 1.0, %v14590_v19  ;;  %v9572_v54 = vmul.f32 1.442695, %v9517_v59  ;;  %v7830_v6 = vpack.c.bf16 %v7589_v36, %v7589_v36 }
 0xe50   :  { %14601 = vpow2.f32 %v9570_v21  ;;  %v9415_v57 = vpop.permute.xlu1 %9414  ;;  %v7597_v29 = vcombine.high %v7589_v36, %v17677_v22 }
 0xe51   :  { %14603 = vrcp.f32 %v9609_v55  ;;  %v9486_v33 = vsub.f32 %v16799_v47, %v9415_v57  ;;  %v9882_v35 = vsel %vm3542_vm3, %v7830_v6, 0  ;;  %v7596_v47 = vrot.slane %v7582_v31, %v14871_v53 }
 0xe52   :  { %14605 = vpow2.f32 %v9572_v54  ;;  %v9417_v34 = vpop.permute.xlu0 %9416  ;;  %v7831_v17 = vpack.c.bf16 %v7597_v29, %v7597_v29  ;;  %13923 = vmatpush3.bf16.msra.mxu0 %v9882_v35 }
 0xe53   :  { %v9518_v1 = vsub.f32 0.0, %v9486_v33  ;;  %v9487_v42 = vsub.f32 %v16804_v18, %v9417_v34  ;;  %13934 = vmatprep.subr.bf16.mxu0 %v17677_v22  ;;  %v16947_v18 = vrot.slane %v7485_v50, %v14794_v8  ;;  %v7598_v29 = vcombine.high %v7596_v47, %v17677_v22 }
 0xe54   :  { %v16934_v37 = vpop.eup %14591  ;;  %v9928_v0 = vsel %vm3542_vm3, %v7831_v17, 0 }
 0xe55   :  { %v9574_v49 = vmul.f32 1.442695, %v9518_v1  ;;  %v9519_v59 = vsub.f32 0.0, %v9487_v42  ;;  %13929 = vmatpush3.bf16.msra.mxu1 %v9928_v0  ;;  %v9670_v36 = vsub.f32 1.0, %v16934_v37  ;;  %v7614_v50 = vcombine.low %v16947_v18, %v16942_v12 }
 0xe56   :  { %v16944_v19 = vpop.eup %14593  ;;  %13940 = vmatprep.subr.bf16.mxu1 %v17677_v22  ;;  %v7639_v42 = vcombine.high %v7494_v11, %v17677_v22 }
 0xe57   :  { %v14596_v62 = vpop.eup %14595  ;;  %14607 = vpow2.f32 %v9574_v49  ;;  %v9576_v21 = vmul.f32 1.442695, %v9519_v59  ;;  %v9671_v55 = vsub.f32 1.0, %v16944_v19 }
 0xe58   :  { %v14598_v54 = vpop.eup %14597  ;;  %v9610_v57 = vadd.f32 1.0, %v14596_v62  ;;  %v9419_v6 = vpop.permute.xlu0 %9418  ;;  %v7832_v62 = vpack.c.bf16 %v7596_v47, %v7596_v47 }
 0xe59   :  { %v9611_v31 = vadd.f32 1.0, %v14598_v54  ;;  %14609 = vpow2.f32 %v9576_v21  ;;  %v9488_v33 = vsub.f32 %v16815_v27, %v9419_v6  ;;  %v14306_v34 = vpack.i.bf16 %v9671_v55, %v9670_v36  ;;  %v14268_v35 = vpop.permute.xlu1 %14267 }
 0xe5a   :  { %14611 = vrcp.f32 %v9610_v57  ;;  %v14270_v46 = vunpack.i.h.bf16 %v14268_v35  ;;  %v14269_v0 = vunpack.i.l.bf16 %v14268_v35  ;;  %v7833_v54 = vpack.c.bf16 %v7598_v29, %v7598_v29 }
 0xe5b   :  { %14613 = vrcp.f32 %v9611_v31  ;;  %v9520_v17 = vsub.f32 0.0, %v9488_v33  ;;  %14307 = vrot.lane.b32.xlu1 %v14306_v34, %s14722_s15  ;;  %v7622_v21 = vrot.slane %v7614_v50, %v14871_v53 }
 0xe5c   :  { %v16958_v1 = vpop.eup %14599  ;;  %v9815_v55 = vsel %vm3473_vm4, %v16811_v3, %v14270_v46  ;;  %v9814_v57 = vsel %vm3473_vm4, %v16809_v24, %v14269_v0  ;;  %v9974_v24 = vsel %vm3542_vm3, %v7832_v62, 0  ;;  %v10020_v3 = vsel %vm3542_vm3, %v7833_v54, 0 }
 0xe5d   :  { %v14602_v49 = vpop.eup %14601  ;;  %v9578_v59 = vmul.f32 1.442695, %v9520_v17  ;;  %v9672_v6 = vsub.f32 1.0, %v16958_v1  ;;  %v9847_v33 = vpack.c.bf16 %v9815_v55, %v9815_v55  ;;  %v9846_v34 = vpack.c.bf16 %v9814_v57, %v9814_v57  ;;  %v9421_v35 = vpop.permute.xlu1 %9420 }
 0xe5e   :  { %v16962_v27 = vpop.eup %14603  ;;  %v9612_v36 = vadd.f32 1.0, %v14602_v49  ;;  %v9489_v50 = vsub.f32 %v16820_v32, %v9421_v35  ;;  %v7615_v17 = vcombine.high %v16947_v18, %v16942_v12  ;;  %v7630_v0 = vcombine.high %v7622_v21, %v17677_v22 }
 0xe5f   :  { %v14606_v31 = vpop.eup %14605  ;;  %14615 = vpow2.f32 %v9578_v59  ;;  %v9673_v47 = vsub.f32 1.0, %v16962_v27  ;;  %13925 = vmatmul.mubr.msk.bf16.vlgmr.msra.gmra.mxu0 %vm3538_vm5, %v9846_v34  ;;  %13931 = vmatmul.mubr.msk.bf16.vlgmr.msra.gmra.mxu1 %vm3538_vm5, %v9847_v33  ;;  %v7487_v32 = vcombine.high %v16930_v10, %v16923_v13  ;;  %v7834_v18 = vpack.c.bf16 %v7622_v21, %v7622_v21 }
 0xe60   :  { %14617 = vrcp.f32 %v9612_v36  ;;  %v9613_v29 = vadd.f32 1.0, %v14606_v31  ;;  %v9521_v49 = vsub.f32 0.0, %v9489_v50  ;;  %13935 = vmatpush3.bf16.msra.mxu0 %v9974_v24  ;;  %13941 = vmatpush3.bf16.msra.mxu1 %v10020_v3  ;;  %v16985_v62 = vrot.slane %v7639_v42, %v14794_v8 }
 0xe61   :  { %v14311_v46 = vpack.i.bf16 %v9673_v47, %v9672_v6  ;;  %v14273_v59 = vpop.permute.xlu0 %14272  ;;  %v9423_v12 = vpop.permute.xlu1 %9422  ;;  %13936 = vmatprep.mubr.msk.bf16.mxu0 %vm14713_vm0, %v17677_v22  ;;  %13942 = vmatprep.mubr.msk.bf16.mxu1 %vm14713_vm0, %v17677_v22  ;;  %v16991_v13 = vrot.slane %v7494_v11, %v14794_v8  ;;  %v7835_v21 = vpack.c.bf16 %v7630_v0, %v7630_v0 }
 0xe62   :  { %14619 = vrcp.f32 %v9613_v29  ;;  %v9580_v36 = vmul.f32 1.442695, %v9521_v49  ;;  %v14275_v55 = vunpack.i.h.bf16 %v14273_v59  ;;  %v14274_v57 = vunpack.i.l.bf16 %v14273_v59  ;;  %13946 = vmatprep.subr.bf16.mxu0 %v17677_v22  ;;  %13952 = vmatprep.subr.bf16.mxu1 %v17677_v22 }
 0xe63   :  { %v9490_v6 = vsub.f32 %v16832_v61, %v9423_v12  ;;  %14312 = vrot.lane.b32.xlu0 %v14311_v46, %s14722_s15  ;;  %v7629_v42 = vrot.slane %v7615_v17, %v14871_v53  ;;  %v10066_v46 = vsel %vm3542_vm3, %v7834_v18, 0  ;;  %v7501_v59 = vrot.slane %v7487_v32, %v14871_v53 }
 0xe64   :  { %v14608_v54 = vpop.eup %14607  ;;  %14621 = vpow2.f32 %v9580_v36  ;;  %v9817_v33 = vsel %vm3473_vm4, %v16826_v58, %v14275_v55  ;;  %v9816_v61 = vsel %vm3473_vm4, %v16824_v4, %v14274_v57  ;;  %v7647_v58 = vcombine.low %v16991_v13, %v16985_v62 }
 0xe65   :  { %v9614_v10 = vadd.f32 1.0, %v14608_v54  ;;  %v9522_v34 = vsub.f32 0.0, %v9490_v6  ;;  %v9849_v47 = vpack.c.bf16 %v9817_v33, %v9817_v33  ;;  %v9848_v29 = vpack.c.bf16 %v9816_v61, %v9816_v61  ;;  %v9425_v50 = vpop.permute.xlu0 %9424 }
 0xe66   :  { %v14610_v31 = vpop.eup %14609  ;;  %v9491_v17 = vsub.f32 %v16835_v40, %v9425_v50  ;;  %v10112_v4 = vsel %vm3542_vm3, %v7835_v21, 0  ;;  %v7631_v12 = vcombine.high %v7629_v42, %v17677_v22  ;;  %v7655_v33 = vrot.slane %v7647_v58, %v14871_v53 }
 0xe67   :  { %v16999_v35 = vpop.eup %14611  ;;  %14623 = vrcp.f32 %v9614_v10  ;;  %v9615_v11 = vadd.f32 1.0, %v14610_v31  ;;  %v9582_v3 = vmul.f32 1.442695, %v9522_v34  ;;  %13937 = vmatmul.mubr.msk.bf16.vlgmr.msra.gmra.mxu0 %vm3538_vm5, %v9848_v29  ;;  %13943 = vmatmul.mubr.msk.bf16.vlgmr.msra.gmra.mxu1 %vm3538_vm5, %v9849_v47  ;;  %v7836_v31 = vpack.c.bf16 %v7629_v42, %v7629_v42 }
 0xe68   :  { %v17001_v24 = vpop.eup %14613  ;;  %v9674_v0 = vsub.f32 1.0, %v16999_v35  ;;  %v9523_v40 = vsub.f32 0.0, %v9491_v17  ;;  %13947 = vmatpush3.bf16.msra.mxu0 %v10066_v46  ;;  %13953 = vmatpush3.bf16.msra.mxu1 %v10112_v4  ;;  %v7672_v61 = vcombine.high %v7501_v59, %v17677_v22 }
 0xe69   :  { %14625 = vrcp.f32 %v9615_v11  ;;  %v9675_v49 = vsub.f32 1.0, %v17001_v24  ;;  %v9427_v18 = vpop.permute.xlu0 %9426  ;;  %13948 = vmatprep.mubr.msk.bf16.mxu0 %vm14713_vm0, %v17677_v22  ;;  %13954 = vmatprep.mubr.msk.bf16.mxu1 %vm14713_vm0, %v17677_v22  ;;  %v7837_v11 = vpack.c.bf16 %v7631_v12, %v7631_v12  ;;  %v7648_v12 = vcombine.high %v16991_v13, %v16985_v62 }
 0xe6a   :  { %14627 = vpow2.f32 %v9582_v3  ;;  %v9584_v55 = vmul.f32 1.442695, %v9523_v40  ;;  %v9492_v6 = vsub.f32 %v16847_v48, %v9427_v18  ;;  %13958 = vmatprep.subr.bf16.mxu0 %v17677_v22  ;;  %13964 = vmatprep.subr.bf16.mxu1 %v17677_v22  ;;  %v7663_v40 = vcombine.high %v7655_v33, %v17677_v22 }
 0xe6b   :  { %v14316_v54 = vpack.i.bf16 %v9675_v49, %v9674_v0  ;;  %v14278_v57 = vpop.permute.xlu1 %14277  ;;  %v10158_v49 = vsel %vm3542_vm3, %v7836_v31, 0  ;;  %v17052_v62 = vrot.slane %v7672_v61, %v14794_v8 }
 0xe6c   :  { %v14616_v36 = vpop.eup %14615  ;;  %v14280_v10 = vunpack.i.h.bf16 %v14278_v57  ;;  %v14279_v21 = vunpack.i.l.bf16 %v14278_v57  ;;  %14629 = vpow2.f32 %v9584_v55  ;;  %v9524_v34 = vsub.f32 0.0, %v9492_v6 }
 0xe6d   :  { %v17021_v32 = vpop.eup %14617  ;;  %14317 = vrot.lane.b32.xlu1 %v14316_v54, %s14722_s15  ;;  %v9616_v48 = vadd.f32 1.0, %v14616_v36  ;;  %v17045_v36 = vrot.slane %v7501_v59, %v14794_v8  ;;  %v7838_v59 = vpack.c.bf16 %v7655_v33, %v7655_v33  ;;  %v7839_v31 = vpack.c.bf16 %v7663_v40, %v7663_v40 }
 0xe6e   :  { %v9819_v29 = vsel %vm3473_vm4, %v16843_v39, %v14280_v10  ;;  %v9818_v50 = vsel %vm3473_vm4, %v16841_v63, %v14279_v21  ;;  %v9676_v3 = vsub.f32 1.0, %v17021_v32  ;;  %v9586_v46 = vmul.f32 1.442695, %v9524_v34 }
 0xe6f   :  { %v17026_v47 = vpop.eup %14619  ;;  %v9851_v17 = vpack.c.bf16 %v9819_v29, %v9819_v29  ;;  %v9850_v42 = vpack.c.bf16 %v9818_v50, %v9818_v50  ;;  %v9429_v58 = vpop.permute.xlu1 %9428  ;;  %v10204_v63 = vsel %vm3542_vm3, %v7837_v11, 0  ;;  %v7662_v11 = vrot.slane %v7648_v12, %v14871_v53 }
 0xe70   :  { %v9677_v4 = vsub.f32 1.0, %v17026_v47  ;;  %v9493_v0 = vsub.f32 %v16852_v28, %v9429_v58  ;;  %14631 = vpow2.f32 %v9586_v46  ;;  %v7680_v46 = vcombine.low %v17045_v36, %v17052_v62 }
 0xe71   :  { %13949 = vmatmul.mubr.msk.bf16.vlgmr.msra.gmra.mxu0 %vm3538_vm5, %v9850_v42  ;;  %13955 = vmatmul.mubr.msk.bf16.vlgmr.msra.gmra.mxu1 %vm3538_vm5, %v9851_v17  ;;  %v14622_v18 = vpop.eup %14621  ;;  %14633 = vrcp.f32 %v9616_v48  ;;  %v10250_v58 = vsel %vm3542_vm3, %v7838_v59, 0 }
 0xe72   :  { %v14321_v39 = vpack.i.bf16 %v9677_v4, %v9676_v3  ;;  %v9525_v54 = vsub.f32 0.0, %v9493_v0  ;;  %13959 = vmatpush3.bf16.msra.mxu0 %v10158_v49  ;;  %13965 = vmatpush3.bf16.msra.mxu1 %v10204_v63  ;;  %v9617_v55 = vadd.f32 1.0, %v14622_v18  ;;  %v7664_v4 = vcombine.high %v7662_v11, %v17677_v22 }
 0xe73   :  { %v14283_v57 = vpop.permute.xlu0 %14282  ;;  %13960 = vmatprep.mubr.msk.bf16.mxu0 %vm14713_vm0, %v17677_v22  ;;  %13966 = vmatprep.mubr.msk.bf16.mxu1 %vm14713_vm0, %v17677_v22  ;;  %v7688_v12 = vrot.slane %v7680_v46, %v14871_v53 }
 0xe74   :  { %v17042_v28 = vpop.eup %14623  ;;  %v9588_v13 = vmul.f32 1.442695, %v9525_v54  ;;  %v14285_v6 = vunpack.i.h.bf16 %v14283_v57  ;;  %v14284_v10 = vunpack.i.l.bf16 %v14283_v57  ;;  %13970 = vmatprep.subr.bf16.mxu0 %v17677_v22  ;;  %13976 = vmatprep.subr.bf16.mxu1 %v17677_v22  ;;  %14635 = vrcp.f32 %v9617_v55 }
 0xe75   :  { %14322 = vrot.lane.b32.xlu0 %v14321_v39, %s14722_s15  ;;  %v9678_v34 = vsub.f32 1.0, %v17042_v28  ;;  %v7840_v39 = vpack.c.bf16 %v7662_v11, %v7662_v11  ;;  %v7841_v55 = vpack.c.bf16 %v7664_v4, %v7664_v4 }
 0xe76   :  { %v17056_v21 = vpop.eup %14625  ;;  %14637 = vpow2.f32 %v9588_v13  ;;  %v9821_v48 = vsel %vm3473_vm4, %v16860_v14, %v14285_v6  ;;  %v9820_v29 = vsel %vm3473_vm4, %v16858_v51, %v14284_v10  ;;  %v10296_v14 = vsel %vm3542_vm3, %v7839_v31, 0 }
 0xe77   :  { %v14628_v61 = vpop.eup %14627  ;;  %v9679_v33 = vsub.f32 1.0, %v17056_v21  ;;  %v9853_v50 = vpack.c.bf16 %v9821_v48, %v9821_v48  ;;  %v9852_v3 = vpack.c.bf16 %v9820_v29, %v9820_v29  ;;  %v7421_v13 = vpop.permute.xlu0 %7420  ;;  %v10388_v11 = vsel %vm3542_vm3, %v7841_v55, 0 }
 0xe78   :  { %v9618_v17 = vadd.f32 1.0, %v14628_v61  ;;  %v7681_v61 = vcombine.high %v17045_v36, %v17052_v62 }
 0xe79   :  { %v14326_v42 = vpack.i.bf16 %v9679_v33, %v9678_v34  ;;  %13961 = vmatmul.mubr.msk.bf16.vlgmr.msra.gmra.mxu0 %vm3538_vm5, %v9852_v3  ;;  %13967 = vmatmul.mubr.msk.bf16.vlgmr.msra.gmra.mxu1 %vm3538_vm5, %v9853_v50  ;;  %v14630_v51 = vpop.eup %14629  ;;  %v14288_v0 = vpop.permute.xlu1 %14287  ;;  %v7842_v50 = vpack.c.bf16 %v7688_v12, %v7688_v12 }
 0xe7a   :  { %13971 = vmatpush3.bf16.msra.mxu0 %v10250_v58  ;;  %13977 = vmatpush3.bf16.msra.mxu1 %v10296_v14  ;;  %v9619_v49 = vadd.f32 1.0, %v14630_v51  ;;  %v14290_v40 = vunpack.i.h.bf16 %v14288_v0  ;;  %v14289_v63 = vunpack.i.l.bf16 %v14288_v0  ;;  %14639 = vrcp.f32 %v9618_v17 }
 0xe7b   :  { %14327 = vrot.lane.b32.xlu1 %v14326_v42, %s14722_s15  ;;  %13972 = vmatprep.mubr.msk.bf16.mxu0 %vm14713_vm0, %v17677_v22 }
 0xe7c   :  { %13978 = vmatprep.mubr.msk.bf16.mxu1 %vm14713_vm0, %v17677_v22  ;;  %13982 = vmatprep.subr.bf16.mxu0 %v17677_v22  ;;  %14641 = vrcp.f32 %v9619_v49  ;;  %v9823_v18 = vsel %vm3473_vm4, %v16869_v9, %v14290_v40  ;;  %v9822_v54 = vsel %vm3473_vm4, %v16866_v26, %v14289_v63  ;;  %v10342_v9 = vsel %vm3542_vm3, %v7840_v39, 0 }
 0xe7d   :  { %13988 = vmatprep.subr.bf16.mxu1 %v17677_v22  ;;  %v14632_v57 = vpop.eup %14631  ;;  %v9855_v6 = vpack.c.bf16 %v9823_v18, %v9823_v18  ;;  %v9854_v10 = vpack.c.bf16 %v9822_v54, %v9822_v54  ;;  %v7417_v59 = vpop.permute.xlu1 %7416  ;;  %v7696_v26 = vcombine.high %v7688_v12, %v17677_v22  ;;  %v7695_v49 = vrot.slane %v7681_v61, %v14871_v53 }
 0xe7e   :  { %v17085_v31 = vpop.eup %14633  ;;  %v9620_v34 = vadd.f32 1.0, %v14632_v57 }
 0xe7f   :  { %v9680_v58 = vsub.f32 1.0, %v17085_v31  ;;  %v7843_v0 = vpack.c.bf16 %v7696_v26, %v7696_v26 }
 0xe80   :  { %14643 = vrcp.f32 %v9620_v34  ;;  %v7697_v34 = vcombine.high %v7695_v49, %v17677_v22 }
 0xe81   :  { %13973 = vmatmul.mubr.msk.bf16.vlgmr.msra.gmra.mxu0 %vm3538_vm5, %v9854_v10  ;;  %13979 = vmatmul.mubr.msk.bf16.vlgmr.msra.gmra.mxu1 %vm3538_vm5, %v9855_v6  ;;  %v17094_v48 = vpop.eup %14635  ;;  %v7425_v29 = vpop.permute.xlu1 %7424 }
 0xe82   :  { %13983 = vmatpush3.bf16.msra.mxu0 %v10342_v9  ;;  %13989 = vmatpush3.bf16.msra.mxu1 %v10388_v11  ;;  %v14293_v33 = vpop.permute.xlu0 %14292  ;;  %v7503_v17 = vcombine.high %v7417_v59, %v7425_v29  ;;  %v7502_v62 = vcombine.low %v7417_v59, %v7425_v29  ;;  %v9681_v14 = vsub.f32 1.0, %v17094_v48 }
 0xe83   :  { %v14638_v3 = vpop.eup %14637  ;;  %v14295_v42 = vunpack.i.h.bf16 %v14293_v33  ;;  %v14294_v46 = vunpack.i.l.bf16 %v14293_v33  ;;  %13984 = vmatprep.mubr.msk.bf16.mxu0 %vm14713_vm0, %v17677_v22  ;;  %13990 = vmatprep.mubr.msk.bf16.mxu1 %vm14713_vm0, %v17677_v22 }
 0xe84   :  { %v9621_v36 = vadd.f32 1.0, %v14638_v3  ;;  %13994 = vmatprep.subr.bf16.mxu0 %v17677_v22  ;;  %14000 = vmatprep.subr.bf16.mxu1 %v17677_v22  ;;  %v14331_v12 = vpack.i.bf16 %v9681_v14, %v9680_v58  ;;  %v17110_v55 = vrot.slane %v7502_v62, %v14794_v8  ;;  %v7844_v14 = vpack.c.bf16 %v7695_v49, %v7695_v49 }
 0xe85   :  { %v9825_v4 = vsel %vm3473_vm4, %v16878_v23, %v14295_v42  ;;  %v9824_v51 = vsel %vm3473_vm4, %v16876_v60, %v14294_v46  ;;  %v10434_v23 = vsel %vm3542_vm3, %v7842_v50, 0  ;;  %v17117_v60 = vrot.slane %v7503_v17, %v14794_v8 }
 0xe86   :  { %14645 = vrcp.f32 %v9621_v36  ;;  %v9857_v40 = vpack.c.bf16 %v9825_v4, %v9825_v4  ;;  %v9856_v63 = vpack.c.bf16 %v9824_v51, %v9824_v51  ;;  %v7429_v39 = vpop.permute.xlu0 %7428  ;;  %14332 = vrot.lane.b32.xlu0 %v14331_v12, %s14722_s15  ;;  %v7845_v4 = vpack.c.bf16 %v7697_v34, %v7697_v34 }
 0xe87   :  { %v7518_v18 = vcombine.low %v7421_v13, %v7429_v39  ;;  %v7519_v54 = vcombine.high %v7421_v13, %v7429_v39  ;;  %v17114_v57 = vpop.eup %14639  ;;  %v10480_v13 = vsel %vm3542_vm3, %v7843_v0, 0 }
 0xe88   :  { %v9682_v3 = vsub.f32 1.0, %v17114_v57 }
 0xe89   :  { %v17120_v6 = vrot.slane %v7518_v18, %v14794_v8  ;;  %v17123_v10 = vrot.slane %v7519_v54, %v14794_v8  ;;  %13985 = vmatmul.mubr.msk.bf16.vlgmr.msra.gmra.mxu0 %vm3538_vm5, %v9856_v63  ;;  %13991 = vmatmul.mubr.msk.bf16.vlgmr.msra.gmra.mxu1 %vm3538_vm5, %v9857_v40  ;;  %v17128_v59 = vpop.eup %14641 }
 0xe8a   :  { %13995 = vmatpush3.bf16.msra.mxu0 %v10434_v23  ;;  %14001 = vmatpush3.bf16.msra.mxu1 %v10480_v13  ;;  %v14298_v29 = vpop.permute.xlu1 %14297  ;;  %v9683_v17 = vsub.f32 1.0, %v17128_v59 }
 0xe8b   :  { %v7534_v9 = vcombine.low %v17110_v55, %v17120_v6  ;;  %v7535_v11 = vcombine.high %v17110_v55, %v17120_v6  ;;  %v7550_v26 = vcombine.low %v17117_v60, %v17123_v10  ;;  %v7551_v61 = vcombine.high %v17117_v60, %v17123_v10  ;;  %13996 = vmatprep.mubr.msk.bf16.mxu0 %vm14713_vm0, %v17677_v22 }
 0xe8c   :  { %v14300_v33 = vunpack.i.h.bf16 %v14298_v29  ;;  %v14299_v50 = vunpack.i.l.bf16 %v14298_v29  ;;  %14002 = vmatprep.mubr.msk.bf16.mxu1 %vm14713_vm0, %v17677_v22  ;;  %14006 = vmatprep.subr.bf16.mxu0 %v17677_v22  ;;  %v14336_v36 = vpack.i.bf16 %v9683_v17, %v9682_v3 }
 0xe8d   :  { %v7542_v42 = vrot.slane %v7534_v9, %v14871_v53  ;;  %14012 = vmatprep.subr.bf16.mxu1 %v17677_v22  ;;  %v17154_v51 = vpop.eup %14643 }
 0xe8e   :  { %v9827_v46 = vsel %vm3473_vm4, %v16889_v56, %v14300_v33  ;;  %v9826_v58 = vsel %vm3473_vm4, %v16887_v41, %v14299_v50  ;;  %14337 = vrot.lane.b32.xlu1 %v14336_v36, %s14722_s15  ;;  %v10526_v41 = vsel %vm3542_vm3, %v7844_v14, 0  ;;  %v10572_v56 = vsel %vm3542_vm3, %v7845_v4, 0 }
 0xe8f   :  { %v7705_v62 = vcombine.high %v7542_v42, %v17677_v22  ;;  %v7704_v0 = vrot.slane %v7542_v42, %v14794_v8  ;;  %v9859_v40 = vpack.c.bf16 %v9827_v46, %v9827_v46  ;;  %v9858_v63 = vpack.c.bf16 %v9826_v58, %v9826_v58 }
 0xe90   :  { %v9684_v23 = vsub.f32 1.0, %v17154_v51 }
 0xe91   :  { %v7712_v39 = vrot.slane %v7705_v62, %v14794_v8  ;;  %13997 = vmatmul.mubr.msk.bf16.vlgmr.msra.gmra.mxu0 %vm3538_vm5, %v9858_v63  ;;  %14003 = vmatmul.mubr.msk.bf16.vlgmr.msra.gmra.mxu1 %vm3538_vm5, %v9859_v40 }
 0xe92   :  { %v14303_v49 = vpop.permute.xlu0 %14302  ;;  %14007 = vmatpush3.bf16.msra.mxu0 %v10526_v41  ;;  %14013 = vmatpush3.bf16.msra.mxu1 %v10572_v56 }
 0xe93   :  { %v17158_v12 = vpop.eup %14645  ;;  %v7713_v18 = vcombine.low %v7704_v0, %v7712_v39  ;;  %v14305_v54 = vunpack.i.h.bf16 %v14303_v49  ;;  %v14304_v55 = vunpack.i.l.bf16 %v14303_v49  ;;  %14008 = vmatprep.mubr.msk.bf16.mxu0 %vm14713_vm0, %v17677_v22  ;;  %14014 = vmatprep.mubr.msk.bf16.mxu1 %vm14713_vm0, %v17677_v22  ;;  %v7714_v58 = vcombine.high %v7704_v0, %v7712_v39 }
 0xe94   :  { %v9685_v6 = vsub.f32 1.0, %v17158_v12  ;;  %14018 = vmatprep.subr.bf16.mxu0 %v17677_v22  ;;  %14024 = vmatprep.subr.bf16.mxu1 %v17677_v22 }
 0xe95   :  { %v7721_v13 = vrot.slane %v7713_v18, %v14871_v53  ;;  %v9829_v34 = vsel %vm3473_vm4, %v16898_v7, %v14305_v54  ;;  %v9828_v9 = vsel %vm3473_vm4, %v16896_v25, %v14304_v55  ;;  %v7549_v7 = vrot.slane %v7535_v11, %v14871_v53 }
 0xe96   :  { %v14341_v29 = vpack.i.bf16 %v9685_v6, %v9684_v23  ;;  %v9861_v33 = vpack.c.bf16 %v9829_v34, %v9829_v34  ;;  %v9860_v50 = vpack.c.bf16 %v9828_v9, %v9828_v9  ;;  %v7728_v62 = vrot.slane %v7714_v58, %v14871_v53 }
 0xe97   :  { %v7846_v3 = vpack.c.bf16 %v7721_v13, %v7721_v13  ;;  %v7729_v17 = vcombine.high %v7721_v13, %v17677_v22  ;;  %v7738_v36 = vcombine.high %v7549_v7, %v17677_v22  ;;  %v7737_v4 = vrot.slane %v7549_v7, %v14794_v8 }
 0xe98   :  { %14342 = vrot.lane.b32.xlu0 %v14341_v29, %s14722_s15  ;;  %v7730_v40 = vcombine.high %v7728_v62, %v17677_v22  ;;  %v7848_v18 = vpack.c.bf16 %v7728_v62, %v7728_v62  ;;  %v7558_v6 = vrot.slane %v7550_v26, %v14871_v53 }
 0xe99   :  { %v10618_v42 = vsel %vm3542_vm3, %v7846_v3, 0  ;;  %v7847_v46 = vpack.c.bf16 %v7729_v17, %v7729_v17  ;;  %14009 = vmatmul.mubr.msk.bf16.vlgmr.msra.gmra.mxu0 %vm3538_vm5, %v9860_v50  ;;  %14015 = vmatmul.mubr.msk.bf16.vlgmr.msra.gmra.mxu1 %vm3538_vm5, %v9861_v33  ;;  %v7745_v14 = vrot.slane %v7738_v36, %v14794_v8 }
 0xe9a   :  { %14019 = vmatpush3.bf16.msra.mxu0 %v10618_v42  ;;  %14020 = vmatprep.mubr.msk.bf16.mxu0 %vm14713_vm0, %v17677_v22  ;;  %v7849_v54 = vpack.c.bf16 %v7730_v40, %v7730_v40  ;;  %v10710_v13 = vsel %vm3542_vm3, %v7848_v18, 0  ;;  %v7771_v26 = vcombine.high %v7558_v6, %v17677_v22  ;;  %v7770_v36 = vrot.slane %v7558_v6, %v14794_v8 }
 0xe9b   :  { %v10664_v25 = vsel %vm3542_vm3, %v7847_v46, 0  ;;  %14026 = vmatprep.mubr.msk.bf16.mxu1 %vm14713_vm0, %v17677_v22  ;;  %14030 = vmatprep.subr.bf16.mxu0 %v17677_v22  ;;  %v7746_v41 = vcombine.low %v7737_v4, %v7745_v14  ;;  %v7747_v34 = vcombine.high %v7737_v4, %v7745_v14 }
 0xe9c   :  { %14025 = vmatpush3.bf16.msra.mxu1 %v10664_v25  ;;  %v7778_v25 = vrot.slane %v7771_v26, %v14794_v8 }
 0xe9d   :  { %14036 = vmatprep.subr.bf16.mxu1 %v17677_v22  ;;  %v7754_v23 = vrot.slane %v7746_v41, %v14871_v53  ;;  %v7761_v17 = vrot.slane %v7747_v34, %v14871_v53 }
 0xe9f   :  { %v7850_v50 = vpack.c.bf16 %v7754_v23, %v7754_v23  ;;  %v7763_v4 = vcombine.high %v7761_v17, %v17677_v22  ;;  %v7852_v41 = vpack.c.bf16 %v7761_v17, %v7761_v17 }
 0xea1   :  { %v10802_v62 = vsel %vm3542_vm3, %v7850_v50, 0 }
 0xecd   :  { %v14308_v63 = vpop.permute.xlu1 %14307 }
 0xece   :  { %v14310_v56 = vunpack.i.h.bf16 %v14308_v63  ;;  %v14309_v49 = vunpack.i.l.bf16 %v14308_v63 }
 0xed0   :  { %v9831_v11 = vsel %vm3473_vm4, %v16944_v19, %v14310_v56  ;;  %v9830_v0 = vsel %vm3473_vm4, %v16934_v37, %v14309_v49  ;;  %v10756_v19 = vsel %vm3542_vm3, %v7849_v54, 0  ;;  %v7762_v37 = vcombine.high %v7754_v23, %v17677_v22 }
 0xed1   :  { %v9863_v39 = vpack.c.bf16 %v9831_v11, %v9831_v11  ;;  %v9862_v55 = vpack.c.bf16 %v9830_v0, %v9830_v0  ;;  %v7853_v56 = vpack.c.bf16 %v7763_v4, %v7763_v4  ;;  %v7780_v23 = vcombine.high %v7770_v36, %v7778_v25 }
 0xed2   :  { %v7851_v3 = vpack.c.bf16 %v7762_v37, %v7762_v37 }
 0xed3   :  { %14021 = vmatmul.mubr.msk.bf16.vlgmr.msra.gmra.mxu0 %vm3538_vm5, %v9862_v55  ;;  %14027 = vmatmul.mubr.msk.bf16.vlgmr.msra.gmra.mxu1 %vm3538_vm5, %v9863_v39  ;;  %v7565_v39 = vrot.slane %v7551_v61, %v14871_v53  ;;  %v10894_v55 = vsel %vm3542_vm3, %v7852_v41, 0  ;;  %v7794_v37 = vrot.slane %v7780_v23, %v14871_v53 }
 0xed4   :  { %14031 = vmatpush3.bf16.msra.mxu0 %v10710_v13  ;;  %14037 = vmatpush3.bf16.msra.mxu1 %v10756_v19  ;;  %v10848_v14 = vsel %vm3542_vm3, %v7851_v3, 0 }
 0xed5   :  { %14032 = vmatprep.mubr.msk.bf16.mxu0 %vm14713_vm0, %v17677_v22  ;;  %14038 = vmatprep.mubr.msk.bf16.mxu1 %vm14713_vm0, %v17677_v22  ;;  %v14313_v9 = vpop.permute.xlu0 %14312  ;;  %v7804_v10 = vcombine.high %v7565_v39, %v17677_v22 }
 0xed6   :  { %14042 = vmatprep.subr.bf16.mxu0 %v17677_v22  ;;  %14048 = vmatprep.subr.bf16.mxu1 %v17677_v22  ;;  %v14315_v29 = vunpack.i.h.bf16 %v14313_v9  ;;  %v14314_v33 = vunpack.i.l.bf16 %v14313_v9 }
 0xed8   :  { %v9833_v42 = vsel %vm3473_vm4, %v16962_v27, %v14315_v29  ;;  %v9832_v46 = vsel %vm3473_vm4, %v16958_v1, %v14314_v33  ;;  %v7779_v27 = vcombine.low %v7770_v36, %v7778_v25  ;;  %v7811_v33 = vrot.slane %v7804_v10, %v14794_v8 }
 0xed9   :  { %v9865_v7 = vpack.c.bf16 %v9833_v42, %v9833_v42  ;;  %v9864_v58 = vpack.c.bf16 %v9832_v46, %v9832_v46  ;;  %v7796_v42 = vcombine.high %v7794_v37, %v17677_v22 }
 0xeda   :  { %v7787_v54 = vrot.slane %v7779_v27, %v14871_v53 }
 0xedb   :  { %14033 = vmatmul.mubr.msk.bf16.vlgmr.msra.gmra.mxu0 %vm3538_vm5, %v9864_v58  ;;  %14039 = vmatmul.mubr.msk.bf16.vlgmr.msra.gmra.mxu1 %vm3538_vm5, %v9865_v7  ;;  %v7857_v4 = vpack.c.bf16 %v7796_v42, %v7796_v42 }
 0xedc   :  { %14043 = vmatpush3.bf16.msra.mxu0 %v10802_v62  ;;  %14049 = vmatpush3.bf16.msra.mxu1 %v10848_v14  ;;  %v7854_v13 = vpack.c.bf16 %v7787_v54, %v7787_v54  ;;  %v7856_v14 = vpack.c.bf16 %v7794_v37, %v7794_v37 }
 0xedd   :  { %14044 = vmatprep.mubr.msk.bf16.mxu0 %vm14713_vm0, %v17677_v22  ;;  %14050 = vmatprep.mubr.msk.bf16.mxu1 %vm14713_vm0, %v17677_v22 }
 0xede   :  { %14054 = vmatprep.subr.bf16.mxu0 %v17677_v22  ;;  %14060 = vmatprep.subr.bf16.mxu1 %v17677_v22  ;;  %v10986_v50 = vsel %vm3542_vm3, %v7854_v13, 0 }
 0xedf   :  { %v14318_v1 = vpop.permute.xlu1 %14317 }
 0xee0   :  { %v14320_v40 = vunpack.i.h.bf16 %v14318_v1  ;;  %v14319_v63 = vunpack.i.l.bf16 %v14318_v1  ;;  %v11124_v1 = vsel %vm3542_vm3, %v7857_v4, 0 }
 0xee2   :  { %v9835_v49 = vsel %vm3473_vm4, %v17001_v24, %v14320_v40  ;;  %v9834_v18 = vsel %vm3473_vm4, %v16999_v35, %v14319_v63  ;;  %v10940_v24 = vsel %vm3542_vm3, %v7853_v56, 0  ;;  %v7795_v35 = vcombine.high %v7787_v54, %v17677_v22 }
 0xee3   :  { %v9867_v11 = vpack.c.bf16 %v9835_v49, %v9835_v49  ;;  %v9866_v0 = vpack.c.bf16 %v9834_v18, %v9834_v18 }
 0xee4   :  { %v7855_v19 = vpack.c.bf16 %v7795_v35, %v7795_v35 }
 0xee5   :  { %14045 = vmatmul.mubr.msk.bf16.vlgmr.msra.gmra.mxu0 %vm3538_vm5, %v9866_v0  ;;  %14051 = vmatmul.mubr.msk.bf16.vlgmr.msra.gmra.mxu1 %vm3538_vm5, %v9867_v11 }
 0xee6   :  { %14055 = vmatpush3.bf16.msra.mxu0 %v10894_v55  ;;  %14061 = vmatpush3.bf16.msra.mxu1 %v10940_v24  ;;  %v11032_v3 = vsel %vm3542_vm3, %v7855_v19, 0 }
 0xee7   :  { %14056 = vmatprep.mubr.msk.bf16.mxu0 %vm14713_vm0, %v17677_v22  ;;  %14062 = vmatprep.mubr.msk.bf16.mxu1 %vm14713_vm0, %v17677_v22  ;;  %v14323_v60 = vpop.permute.xlu0 %14322 }
 0xee8   :  { %14066 = vmatprep.subr.bf16.mxu0 %v17677_v22  ;;  %14072 = vmatprep.subr.bf16.mxu1 %v17677_v22  ;;  %v14325_v61 = vunpack.i.h.bf16 %v14323_v60  ;;  %v14324_v6 = vunpack.i.l.bf16 %v14323_v60 }
 0xeea   :  { %v9837_v34 = vsel %vm3473_vm4, %v17026_v47, %v14325_v61  ;;  %v9836_v26 = vsel %vm3473_vm4, %v17021_v32, %v14324_v6  ;;  %v7803_v47 = vrot.slane %v7565_v39, %v14794_v8 }
 0xeeb   :  { %v9869_v9 = vpack.c.bf16 %v9837_v34, %v9837_v34  ;;  %v9868_v29 = vpack.c.bf16 %v9836_v26, %v9836_v26 }
 0xeec   :  { %v7812_v58 = vcombine.low %v7803_v47, %v7811_v33  ;;  %v7813_v40 = vcombine.high %v7803_v47, %v7811_v33 }
 0xeed   :  { %14057 = vmatmul.mubr.msk.bf16.vlgmr.msra.gmra.mxu0 %vm3538_vm5, %v9868_v29  ;;  %14063 = vmatmul.mubr.msk.bf16.vlgmr.msra.gmra.mxu1 %vm3538_vm5, %v9869_v9  ;;  %v14328_v17 = vpop.permute.xlu1 %14327 }
 0xeee   :  { %14067 = vmatpush3.bf16.msra.mxu0 %v10986_v50  ;;  %14073 = vmatpush3.bf16.msra.mxu1 %v11032_v3  ;;  %v14330_v32 = vunpack.i.h.bf16 %v14328_v17  ;;  %v14329_v46 = vunpack.i.l.bf16 %v14328_v17  ;;  %v7820_v27 = vrot.slane %v7812_v58, %v14871_v53  ;;  %v7827_v54 = vrot.slane %v7813_v40, %v14871_v53 }
 0xeef   :  { %14068 = vmatprep.mubr.msk.bf16.mxu0 %vm14713_vm0, %v17677_v22  ;;  %14074 = vmatprep.mubr.msk.bf16.mxu1 %vm14713_vm0, %v17677_v22 }
 0xef0   :  { %v9839_v25 = vsel %vm3473_vm4, %v17056_v21, %v14330_v32  ;;  %v9838_v7 = vsel %vm3473_vm4, %v17042_v28, %v14329_v46  ;;  %14078 = vmatprep.subr.bf16.mxu0 %v17677_v22  ;;  %14084 = vmatprep.subr.bf16.mxu1 %v17677_v22  ;;  %v11078_v21 = vsel %vm3542_vm3, %v7856_v14, 0  ;;  %v7828_v28 = vcombine.high %v7820_v27, %v17677_v22 }
 0xef1   :  { %v9871_v36 = vpack.c.bf16 %v9839_v25, %v9839_v25  ;;  %v9870_v62 = vpack.c.bf16 %v9838_v7, %v9838_v7  ;;  %v7858_v49 = vpack.c.bf16 %v7820_v27, %v7820_v27  ;;  %v7829_v23 = vcombine.high %v7827_v54, %v17677_v22 }
 0xef2   :  { %v7859_v18 = vpack.c.bf16 %v7828_v28, %v7828_v28  ;;  %v7860_v10 = vpack.c.bf16 %v7827_v54, %v7827_v54 }
 0xef3   :  { %v11170_v24 = vsel %vm3542_vm3, %v7858_v49, 0  ;;  %v7861_v61 = vpack.c.bf16 %v7829_v23, %v7829_v23 }
 0xef4   :  { %v11216_v35 = vsel %vm3542_vm3, %v7859_v18, 0  ;;  %v11262_v34 = vsel %vm3542_vm3, %v7860_v10, 0 }
 0xef5   :  { %14069 = vmatmul.mubr.msk.bf16.vlgmr.msra.gmra.mxu0 %vm3538_vm5, %v9870_v62  ;;  %14075 = vmatmul.mubr.msk.bf16.vlgmr.msra.gmra.mxu1 %vm3538_vm5, %v9871_v36  ;;  %v11308_v26 = vsel %vm3542_vm3, %v7861_v61, 0 }
 0xef6   :  { %14079 = vmatpush3.bf16.msra.mxu0 %v11078_v21  ;;  %14085 = vmatpush3.bf16.msra.mxu1 %v11124_v1 }
 0xef7   :  { %14080 = vmatprep.mubr.msk.bf16.mxu0 %vm14713_vm0, %v17677_v22  ;;  %14086 = vmatprep.mubr.msk.bf16.mxu1 %vm14713_vm0, %v17677_v22 }
 0xef8   :  { %14090 = vmatprep.subr.bf16.mxu0 %v17677_v22  ;;  %14096 = vmatprep.subr.bf16.mxu1 %v17677_v22  ;;  %v14333_v63 = vpop.permute.xlu0 %14332 }
 0xef9   :  { %v14335_v41 = vunpack.i.h.bf16 %v14333_v63  ;;  %v14334_v56 = vunpack.i.l.bf16 %v14333_v63 }
 0xefb   :  { %v9841_v11 = vsel %vm3473_vm4, %v17094_v48, %v14335_v41  ;;  %v9840_v0 = vsel %vm3473_vm4, %v17085_v31, %v14334_v56 }
 0xefc   :  { %v9873_v39 = vpack.c.bf16 %v9841_v11, %v9841_v11  ;;  %v9872_v55 = vpack.c.bf16 %v9840_v0, %v9840_v0 }
 0xefe   :  { %14081 = vmatmul.mubr.msk.bf16.vlgmr.msra.gmra.mxu0 %vm3538_vm5, %v9872_v55  ;;  %14087 = vmatmul.mubr.msk.bf16.vlgmr.msra.gmra.mxu1 %vm3538_vm5, %v9873_v39 }
 0xeff   :  { %14091 = vmatpush3.bf16.msra.mxu0 %v11170_v24  ;;  %14097 = vmatpush3.bf16.msra.mxu1 %v11216_v35 }
 0xf00   :  { %v14338_v60 = vpop.permute.xlu1 %14337  ;;  %14092 = vmatprep.mubr.msk.bf16.mxu0 %vm14713_vm0, %v17677_v22  ;;  %14098 = vmatprep.mubr.msk.bf16.mxu1 %vm14713_vm0, %v17677_v22 }
 0xf01   :  { %v14340_v31 = vunpack.i.h.bf16 %v14338_v60  ;;  %v14339_v48 = vunpack.i.l.bf16 %v14338_v60  ;;  %14102 = vmatprep.subr.bf16.mxu0 %v17677_v22  ;;  %14108 = vmatprep.subr.bf16.mxu1 %v17677_v22 }
 0xf03   :  { %v9843_v6 = vsel %vm3473_vm4, %v17128_v59, %v14340_v31  ;;  %v9842_v13 = vsel %vm3473_vm4, %v17114_v57, %v14339_v48 }
 0xf04   :  { %v9875_v19 = vpack.c.bf16 %v9843_v6, %v9843_v6  ;;  %v9874_v37 = vpack.c.bf16 %v9842_v13, %v9842_v13 }
 0xf06   :  { %14093 = vmatmul.mubr.msk.bf16.vlgmr.msra.gmra.mxu0 %vm3538_vm5, %v9874_v37  ;;  %14099 = vmatmul.mubr.msk.bf16.vlgmr.msra.gmra.mxu1 %vm3538_vm5, %v9875_v19 }
 0xf07   :  { %14103 = vmatpush3.bf16.msra.mxu0 %v11262_v34  ;;  %14109 = vmatpush3.bf16.msra.mxu1 %v11308_v26 }
 0xf08   :  { %14104 = vmatprep.mubr.msk.bf16.mxu0 %vm14713_vm0, %v17677_v22  ;;  %14110 = vmatprep.mubr.msk.bf16.mxu1 %vm14713_vm0, %v17677_v22 }
 0xf09   :  { %14114 = vmatprep.subr.bf16.mxu0 %v17677_v22  ;;  %14122 = vmatprep.subr.bf16.mxu1 %v17677_v22 }
 0xf0a   :  { %v14343_v9 = vpop.permute.xlu0 %14342 }
 0xf0b   :  { %v14345_v57 = vunpack.i.h.bf16 %v14343_v9  ;;  %v14344_v59 = vunpack.i.l.bf16 %v14343_v9 }
 0xf0d   :  { %v9845_v29 = vsel %vm3473_vm4, %v17158_v12, %v14345_v57  ;;  %v9844_v33 = vsel %vm3473_vm4, %v17154_v51, %v14344_v59 }
 0xf0e   :  { %v9877_v50 = vpack.c.bf16 %v9845_v29, %v9845_v29  ;;  %v9876_v3 = vpack.c.bf16 %v9844_v33, %v9844_v33 }
 0xf10   :  { %14105 = vmatmul.mubr.msk.bf16.vlgmr.msra.gmra.mxu0 %vm3538_vm5, %v9876_v3  ;;  %14111 = vmatmul.mubr.msk.bf16.vlgmr.msra.gmra.mxu1 %vm3538_vm5, %v9877_v50 }
 0xf11   :  { %14118 = vmatprep.mubr.msk.bf16.mxu0 %vm14713_vm0, %v17677_v22  ;;  %14126 = vmatprep.mubr.msk.bf16.mxu1 %vm14713_vm0, %v17677_v22 }
 0xf1f   :  { %v9918_v17 = vpop.f32.mrf.mxu0  ;;  %v9964_v42 = vpop.f32.mrf.mxu1 }
 0xf21   :  { %v13926_v47 = vpop.f32.mrf.mxu0  ;;  %v13932_v32 = vpop.f32.mrf.mxu1 }
 0xf23   :  { %v9921_v12 = vpop.f32.mrf.mxu0  ;;  %v9967_v46 = vpop.f32.mrf.mxu1 }
 0xf25   :  { %v13927_v25 = vpop.f32.mrf.mxu0  ;;  %v13933_v51 = vpop.f32.mrf.mxu1 }
 0xf27   :  { %v10010_v7 = vpop.f32.mrf.mxu0  ;;  %v10056_v58 = vpop.f32.mrf.mxu1 }
 0xf28   :  { %v11350_v36 = vcombine.low %v9918_v17, %v10010_v7  ;;  %v11358_v62 = vcombine.low %v9964_v42, %v10056_v58 }
 0xf29   :  { %v13938_v14 = vpop.f32.mrf.mxu0  ;;  %v13944_v4 = vpop.f32.mrf.mxu1 }
 0xf2a   :  { %v11357_v27 = vrot.slane %v11350_v36, %v14794_v8  ;;  %v11365_v21 = vrot.slane %v11358_v62, %v14794_v8 }
 0xf2b   :  { %v10013_v1 = vpop.f32.mrf.mxu0  ;;  %v10059_v28 = vpop.f32.mrf.mxu1 }
 0xf2c   :  { %v11366_v40 = vcombine.low %v11357_v27, %v11365_v21 }
 0xf2d   :  { %v13939_v63 = vpop.f32.mrf.mxu0  ;;  %v13945_v41 = vpop.f32.mrf.mxu1 }
 0xf2e   :  { %v11373_v26 = vrot.slane %v11366_v40, %v14871_v53 }
 0xf31   :  { %v10102_v56 = vpop.f32.mrf.mxu0  ;;  %v10148_v49 = vpop.f32.mrf.mxu1 }
 0xf33   :  { %v13950_v18 = vpop.f32.mrf.mxu0  ;;  %v13956_v54 = vpop.f32.mrf.mxu1 }
 0xf35   :  { %v10105_v11 = vpop.f32.mrf.mxu0  ;;  %v10151_v0 = vpop.f32.mrf.mxu1 }
 0xf37   :  { %v13951_v39 = vpop.f32.mrf.mxu0  ;;  %v13957_v55 = vpop.f32.mrf.mxu1 }
 0xf39   :  { %v10194_v24 = vpop.f32.mrf.mxu0  ;;  %v10240_v35 = vpop.f32.mrf.mxu1 }
 0xf3a   :  { %v11375_v23 = vcombine.low %v10102_v56, %v10194_v24  ;;  %v11383_v60 = vcombine.low %v10148_v49, %v10240_v35 }
 0xf3b   :  { %v13962_v31 = vpop.f32.mrf.mxu0  ;;  %v13968_v48 = vpop.f32.mrf.mxu1 }
 0xf3c   :  { %v11382_v10 = vrot.slane %v11375_v23, %v14794_v8  ;;  %v11390_v61 = vrot.slane %v11383_v60, %v14794_v8 }
 0xf3d   :  { %v10197_v6 = vpop.f32.mrf.mxu0  ;;  %v10243_v13 = vpop.f32.mrf.mxu1 }
 0xf3e   :  { %v11391_v19 = vcombine.low %v11382_v10, %v11390_v61 }
 0xf3f   :  { %v13963_v37 = vpop.f32.mrf.mxu0  ;;  %v13969_v34 = vpop.f32.mrf.mxu1 }
 0xf40   :  { %v11398_v9 = vrot.slane %v11391_v19, %v14871_v53 }
 0xf41   :  { %v10286_v57 = vpop.f32.mrf.mxu0  ;;  %v10332_v59 = vpop.f32.mrf.mxu1 }
 0xf42   :  { %v11550_v29 = vcombine.low %v11373_v26, %v11398_v9  ;;  %v12996_v33 = vcombine.high %v11373_v26, %v11398_v9 }
 0xf43   :  { %v13974_v50 = vpop.f32.mrf.mxu0  ;;  %v13980_v3 = vpop.f32.mrf.mxu1 }
 0xf44   :  { %v11557_v17 = vrot.slane %v11550_v29, %v14794_v8  ;;  %v11565_v42 = vrot.slane %v12996_v33, %v14794_v8 }
 0xf45   :  { %v10289_v47 = vpop.f32.mrf.mxu0  ;;  %v10335_v32 = vpop.f32.mrf.mxu1 }
 0xf46   :  { %v11583_v12 = vcombine.high %v11557_v17, %v11565_v42  ;;  %v11582_v46 = vcombine.low %v11557_v17, %v11565_v42 }
 0xf47   :  { %v13975_v25 = vpop.f32.mrf.mxu0  ;;  %v13981_v51 = vpop.f32.mrf.mxu1 }
 0xf48   :  { %v17346_v17 = vrot.slane %v11583_v12, %v14871_v53  ;;  %v17352_v47 = vrot.slane %v11582_v46, %v14871_v53 }
 0xf49   :  { %v10378_v7 = vpop.f32.mrf.mxu0  ;;  %v10424_v58 = vpop.f32.mrf.mxu1 }
 0xf4a   :  { %v11400_v36 = vcombine.low %v10286_v57, %v10378_v7  ;;  %v11408_v62 = vcombine.low %v10332_v59, %v10424_v58 }
 0xf4b   :  { %v13986_v14 = vpop.f32.mrf.mxu0  ;;  %v13992_v4 = vpop.f32.mrf.mxu1 }
 0xf4c   :  { %v11407_v27 = vrot.slane %v11400_v36, %v14794_v8  ;;  %v11415_v21 = vrot.slane %v11408_v62, %v14794_v8 }
 0xf4d   :  { %v10381_v1 = vpop.f32.mrf.mxu0  ;;  %v10427_v28 = vpop.f32.mrf.mxu1 }
 0xf4e   :  { %v11416_v40 = vcombine.low %v11407_v27, %v11415_v21 }
 0xf4f   :  { %v13987_v63 = vpop.f32.mrf.mxu0  ;;  %v13993_v41 = vpop.f32.mrf.mxu1 }
 0xf50   :  { %v11423_v26 = vrot.slane %v11416_v40, %v14871_v53 }
 0xf51   :  { %v10470_v56 = vpop.f32.mrf.mxu0  ;;  %v10516_v49 = vpop.f32.mrf.mxu1 }
 0xf53   :  { %v13998_v18 = vpop.f32.mrf.mxu0  ;;  %v14004_v54 = vpop.f32.mrf.mxu1 }
 0xf55   :  { %v10473_v11 = vpop.f32.mrf.mxu0  ;;  %v10519_v0 = vpop.f32.mrf.mxu1 }
 0xf57   :  { %v13999_v39 = vpop.f32.mrf.mxu0  ;;  %v14005_v55 = vpop.f32.mrf.mxu1 }
 0xf59   :  { %v10562_v24 = vpop.f32.mrf.mxu0  ;;  %v10608_v35 = vpop.f32.mrf.mxu1 }
 0xf5a   :  { %v11425_v23 = vcombine.low %v10470_v56, %v10562_v24  ;;  %v11433_v60 = vcombine.low %v10516_v49, %v10608_v35 }
 0xf5b   :  { %v14010_v31 = vpop.f32.mrf.mxu0  ;;  %v14016_v48 = vpop.f32.mrf.mxu1 }
 0xf5c   :  { %v11432_v10 = vrot.slane %v11425_v23, %v14794_v8  ;;  %v11440_v61 = vrot.slane %v11433_v60, %v14794_v8 }
 0xf5d   :  { %v10565_v6 = vpop.f32.mrf.mxu0  ;;  %v10611_v13 = vpop.f32.mrf.mxu1 }
 0xf5e   :  { %v11441_v19 = vcombine.low %v11432_v10, %v11440_v61 }
 0xf5f   :  { %v14011_v37 = vpop.f32.mrf.mxu0  ;;  %v14017_v34 = vpop.f32.mrf.mxu1 }
 0xf60   :  { %v11448_v9 = vrot.slane %v11441_v19, %v14871_v53 }
 0xf62   :  { %v11566_v57 = vcombine.low %v11423_v26, %v11448_v9  ;;  %v12997_v59 = vcombine.high %v11423_v26, %v11448_v9 }
 0xf64   :  { %v11573_v29 = vrot.slane %v11566_v57, %v14794_v8  ;;  %v11581_v33 = vrot.slane %v12997_v59, %v14794_v8 }
 0xf66   :  { %v11599_v50 = vcombine.high %v11573_v29, %v11581_v33  ;;  %v11598_v3 = vcombine.low %v11573_v29, %v11581_v33 }
 0xf68   :  { %v17349_v42 = vrot.slane %v11599_v50, %v14871_v53  ;;  %v17355_v32 = vrot.slane %v11598_v3, %v14871_v53 }
 0xf6a   :  { %v11616_v25 = vcombine.low %v17346_v17, %v17349_v42  ;;  %v11614_v51 = vcombine.low %v17352_v47, %v17355_v32  ;;  %v11615_v7 = vcombine.high %v17352_v47, %v17355_v32  ;;  %v11617_v12 = vcombine.high %v17346_v17, %v17349_v42  ;;  %v17417_v47 = vld [vmem:[#allocation2 + $0x8] sm:$0xff] }
 0xf6b   :  { %v17678_v32 = vsub.s32 1, %v14785_v5 }
 0xf93   :  { %v10654_v58 = vpop.f32.mrf.mxu0  ;;  %v10700_v36 = vpop.f32.mrf.mxu1 }
 0xf95   :  { %v14022_v62 = vpop.f32.mrf.mxu0  ;;  %v14028_v46 = vpop.f32.mrf.mxu1 }
 0xf97   :  { %v10657_v14 = vpop.f32.mrf.mxu0  ;;  %v10703_v4 = vpop.f32.mrf.mxu1 }
 0xf99   :  { %v14023_v27 = vpop.f32.mrf.mxu0  ;;  %v14029_v21 = vpop.f32.mrf.mxu1 }
 0xf9b   :  { %v10746_v1 = vpop.f32.mrf.mxu0  ;;  %v10792_v28 = vpop.f32.mrf.mxu1 }
 0xf9c   :  { %v11450_v27 = vcombine.low %v10654_v58, %v10746_v1  ;;  %v11458_v21 = vcombine.low %v10700_v36, %v10792_v28 }
 0xf9d   :  { %v14034_v40 = vpop.f32.mrf.mxu0  ;;  %v14040_v63 = vpop.f32.mrf.mxu1 }
 0xf9f   :  { %v10749_v41 = vpop.f32.mrf.mxu0  ;;  %v10795_v56 = vpop.f32.mrf.mxu1 }
 0xfa1   :  { %v14035_v49 = vpop.f32.mrf.mxu0  ;;  %v14041_v18 = vpop.f32.mrf.mxu1 }
 0xfa5   :  { %v10838_v54 = vpop.f32.mrf.mxu0  ;;  %v10884_v11 = vpop.f32.mrf.mxu1 }
 0xfa7   :  { %v14046_v0 = vpop.f32.mrf.mxu0  ;;  %v14052_v39 = vpop.f32.mrf.mxu1 }
 0xfa8   :  { %v11457_v0 = vrot.slane %v11450_v27, %v14794_v8  ;;  %v11465_v39 = vrot.slane %v11458_v21, %v14794_v8 }
 0xfa9   :  { %v10841_v55 = vpop.f32.mrf.mxu0  ;;  %v10887_v24 = vpop.f32.mrf.mxu1 }
 0xfaa   :  { %v11466_v36 = vcombine.low %v11457_v0, %v11465_v39 }
 0xfab   :  { %v14047_v35 = vpop.f32.mrf.mxu0  ;;  %v14053_v23 = vpop.f32.mrf.mxu1 }
 0xfad   :  { %v10930_v60 = vpop.f32.mrf.mxu0  ;;  %v10976_v31 = vpop.f32.mrf.mxu1 }
 0xfae   :  { %v11475_v62 = vcombine.low %v10838_v54, %v10930_v60  ;;  %v11483_v46 = vcombine.low %v10884_v11, %v10976_v31 }
 0xfaf   :  { %v14058_v48 = vpop.f32.mrf.mxu0  ;;  %v14064_v10 = vpop.f32.mrf.mxu1 }
 0xfb0   :  { %v11482_v41 = vrot.slane %v11475_v62, %v14794_v8  ;;  %v11490_v56 = vrot.slane %v11483_v46, %v14794_v8 }
 0xfb1   :  { %v10933_v61 = vpop.f32.mrf.mxu0  ;;  %v10979_v6 = vpop.f32.mrf.mxu1 }
 0xfb2   :  { %v11491_v54 = vcombine.low %v11482_v41, %v11490_v56  ;;  %v11473_v6 = vrot.slane %v11466_v36, %v14871_v53  ;;  %v14374_v36 = vld [vmem:[%s17655_s2 + $0x10] sm:$0xff]  }
 0xfb3   :  { %v14059_v13 = vpop.f32.mrf.mxu0  ;;  %v14065_v19 = vpop.f32.mrf.mxu1 }
 0xfb4   :  { %v11498_v60 = vrot.slane %v11491_v54, %v14871_v53 }
 0xfb5   :  { %v11022_v37 = vpop.f32.mrf.mxu0  ;;  %v11068_v34 = vpop.f32.mrf.mxu1 }
 0xfb7   :  { %v14070_v26 = vpop.f32.mrf.mxu0  ;;  %v14076_v9 = vpop.f32.mrf.mxu1 }
 0xfb9   :  { %v11025_v57 = vpop.f32.mrf.mxu0  ;;  %v11071_v59 = vpop.f32.mrf.mxu1 }
 0xfba   :  { %v11618_v57 = vcombine.low %v11473_v6, %v11498_v60  ;;  %v12998_v59 = vcombine.high %v11473_v6, %v11498_v60 }
 0xfbb   :  { %v14071_v29 = vpop.f32.mrf.mxu0  ;;  %v14077_v33 = vpop.f32.mrf.mxu1 }
 0xfbc   :  { %v11625_v27 = vrot.slane %v11618_v57, %v14794_v8  ;;  %v11633_v21 = vrot.slane %v12998_v59, %v14794_v8 }
 0xfbe   :  { %v11114_v50 = vpop.f32.mrf.mxu0  ;;  %v11160_v3 = vpop.f32.mrf.mxu1 }
 0xfbf   :  { %v11500_v23 = vcombine.low %v11022_v37, %v11114_v50  ;;  %v11508_v58 = vcombine.low %v11068_v34, %v11160_v3 }
 0xfc0   :  { %v14082_v14 = vpop.f32.mrf.mxu0  ;;  %v14088_v4 = vpop.f32.mrf.mxu1 }
 0xfc1   :  { %v11507_v10 = vrot.slane %v11500_v23, %v14794_v8  ;;  %v11515_v61 = vrot.slane %v11508_v58, %v14794_v8 }
 0xfc2   :  { %v11117_v40 = vpop.f32.mrf.mxu0  ;;  %v11163_v63 = vpop.f32.mrf.mxu1 }
 0xfc3   :  { %v11516_v29 = vcombine.low %v11507_v10, %v11515_v61 }
 0xfc4   :  { %v14083_v49 = vpop.f32.mrf.mxu0  ;;  %v14089_v18 = vpop.f32.mrf.mxu1 }
 0xfc5   :  { %v11523_v40 = vrot.slane %v11516_v29, %v14871_v53  ;;  %v14373_v49 = vld [vmem:[%s17655_s2 + $0x18] sm:$0xff]   ;;  %v11651_v18 = vcombine.high %v11625_v27, %v11633_v21 }
 0xfc6   :  { %v11206_v55 = vpop.f32.mrf.mxu0  ;;  %v11252_v24 = vpop.f32.mrf.mxu1  ;;  %14115 = vmatpush3.bf16.msra.mxu0 %v14373_v49 }
 0xfc7   :  { %14116 = vmatprep.subr.bf16.mxu0 %v17677_v22 }
 0xfc8   :  { %v14094_v11 = vpop.f32.mrf.mxu0  ;;  %v14100_v35 = vpop.f32.mrf.mxu1 }
 0xfc9   :  { %v11665_v11 = vrot.slane %v11651_v18, %v14871_v53 }
 0xfca   :  { %v11209_v1 = vpop.f32.mrf.mxu0  ;;  %v11255_v28 = vpop.f32.mrf.mxu1  ;;  %14117 = vmatpush3.bf16.msra.mxu0 %v14374_v36 }
 0xfcb   :  { %14130 = vmatprep.subr.bf16.mxu0 %v17677_v22 }
 0xfcc   :  { %v14095_v31 = vpop.f32.mrf.mxu0  ;;  %v14101_v48 = vpop.f32.mrf.mxu1 }
 0xfd0   :  { %v11298_v13 = vpop.f32.mrf.mxu0  ;;  %v11344_v19 = vpop.f32.mrf.mxu1 }
 0xfd1   :  { %v11525_v26 = vcombine.low %v11206_v55, %v11298_v13  ;;  %v11533_v9 = vcombine.low %v11252_v24, %v11344_v19  ;;  %v11650_v55 = vcombine.low %v11625_v27, %v11633_v21 }
 0xfd2   :  { %v14106_v37 = vpop.f32.mrf.mxu0  ;;  %v14112_v34 = vpop.f32.mrf.mxu1 }
 0xfd3   :  { %v11532_v33 = vrot.slane %v11525_v26, %v14794_v8  ;;  %v11540_v50 = vrot.slane %v11533_v9, %v14794_v8  ;;  %v11658_v23 = vrot.slane %v11650_v55, %v14871_v53 }
 0xfd4   :  { %v11301_v3 = vpop.f32.mrf.mxu0  ;;  %v11347_v62 = vpop.f32.mrf.mxu1 }
 0xfd5   :  { %v11541_v46 = vcombine.low %v11532_v33, %v11540_v50 }
 0xfd6   :  { %v14107_v14 = vpop.f32.mrf.mxu0  ;;  %v14113_v4 = vpop.f32.mrf.mxu1 }
 0xfd7   :  { %v11548_v63 = vrot.slane %v11541_v46, %v14871_v53 }
 0xfd9   :  { %v11634_v41 = vcombine.low %v11523_v40, %v11548_v63  ;;  %v12999_v56 = vcombine.high %v11523_v40, %v11548_v63 }
 0xfdb   :  { %v11641_v0 = vrot.slane %v11634_v41, %v14794_v8  ;;  %v11649_v39 = vrot.slane %v12999_v56, %v14794_v8 }
 0xfdd   :  { %v11667_v24 = vcombine.high %v11641_v0, %v11649_v39  ;;  %v11666_v54 = vcombine.low %v11641_v0, %v11649_v39 }
 0xfdf   :  { %v11681_v35 = vrot.slane %v11667_v24, %v14871_v53  ;;  %v11674_v58 = vrot.slane %v11666_v54, %v14871_v53 }
 0xfe1   :  { %v11684_v1 = vcombine.low %v11665_v11, %v11681_v35  ;;  %v11683_v28 = vcombine.high %v11658_v23, %v11674_v58  ;;  %v11682_v60 = vcombine.low %v11658_v23, %v11674_v58  ;;  %v11685_v10 = vcombine.high %v11665_v11, %v11681_v35 }
 0xfe3   :  { %v14351_v31 = vpack.i.bf16 %v11684_v1, %v11616_v25  ;;  %v14346_v48 = vpack.i.bf16 %v11683_v28, %v11615_v7  ;;  %v14356_v53 = vpack.i.bf16 %v11685_v10, %v11617_v12 }
 0xfe5   :  { %14352 = vrot.lane.b32.xlu0 %v14351_v31, %s14723_s20  ;;  %14347 = vrot.lane.b32.xlu1 %v14346_v48, %s14711_s9 }
 0xfe9   :  { %14357 = vrot.lane.b32.xlu1 %v14356_v53, %s14724_s21 }
0x1057   :  { %v14353_v61 = vpop.permute.xlu0 %14352  ;;  %v14348_v6 = vpop.permute.xlu1 %14347 }
0x1058   :  { %v14350_v13 = vunpack.i.h.bf16 %v14348_v6  ;;  %v14349_v19 = vunpack.i.l.bf16 %v14348_v6  ;;  %v14355_v25 = vunpack.i.h.bf16 %v14353_v61  ;;  %v14354_v26 = vunpack.i.l.bf16 %v14353_v61  ;;  %v17679_v61 = vld [vmem:[#allocation8_spill] sm:$0xff] }
0x105a   :  { %v11710_v7 = vsel %vm1520_vm2, %v11614_v51, %v14349_v19  ;;  %v11711_v9 = vsel %vm1520_vm2, %v11682_v60, %v14350_v13  ;;  %v11720_v51 = vrot.slane %v17417_v47, %v17678_v32  ;;  %v17680_v13 = vld [vmem:[#allocation9_spill] sm:$0xff] }
0x105b   :  { %v14358_v57 = vpop.permute.xlu1 %14357  ;;  %v11712_v17 = vsel %vm5374_vm6, %v11710_v7, %v14354_v26  ;;  %v11713_v42 = vsel %vm5374_vm6, %v11711_v9, %v14355_v25 }
0x105c   :  { %v14360_v37 = vunpack.i.h.bf16 %v14358_v57  ;;  %v14359_v34 = vunpack.i.l.bf16 %v14358_v57 }
0x105e   :  { %v11714_v12 = vsel %vm5377_vm7, %v11712_v17, %v14359_v34  ;;  %v11715_v59 = vsel %vm5377_vm7, %v11713_v42, %v14360_v37 }
0x105f   :  { %v11716_v29 = vpack.c.bf16 %v11715_v59, %v11714_v12 }
0x1061   :  { %14119 = vmatmul.mubr.msk.bf16.vlgmr.msra.gmra.mxu0 %vm135_vm1, %v11716_v29 }
0x1062   :  { %14138 = vmatprep.mubr.msk.bf16.mxu0 %vm14713_vm0, %v17677_v22 }
0x1121   :  { %v11770_v33 = vpop.f32.mrf.mxu0 }
0x1122   :  { %v11771_v50 = vadd.f32 %v11770_v33, %v11720_v51 }
0x1123   :  { %v14120_v3 = vpop.f32.mrf.mxu0 }
0x1124   :  { %v11779_v62 = vcombine.high %v11771_v50, %v11771_v50  ;;  %v11786_v46 = vrot.slane %v11771_v50, %v14794_v8 }
0x1125   :  { %v11773_v14 = vpop.f32.mrf.mxu0 }
0x1126   :  { %v11793_v4 = vrot.slane %v11779_v62, %v14794_v8  ;;  %v11794_v27 = vcombine.high %v11786_v46, %v11786_v46  ;;  %v11774_v21 = vadd.f32 %v11773_v14, %v11720_v51  ;;  %v11821_v41 = vadd.f32 %v11786_v46, %v16258_v30 }
0x1127   :  { %v14121_v40 = vpop.f32.mrf.mxu0 }
0x1128   :  { %v11795_v63 = vcombine.high %v11793_v4, %v11793_v4  ;;  %v11822_v56 = vadd.f32 %v11794_v27, %v16260_v52  ;;  %v11796_v49 = vcombine.high %v11774_v21, %v11774_v21  ;;  %v11803_v18 = vrot.slane %v11774_v21, %v14794_v8 }
0x1129   :  { %v11823_v0 = vadd.f32 %v11793_v4, %v16262_v38 }
0x112a   :  { %v11824_v39 = vadd.f32 %v11795_v63, %v16264_v20  ;;  %v11837_v55 = vcombine.low %v11821_v41, %v11822_v56  ;;  %v11810_v24 = vrot.slane %v11796_v49, %v14794_v8  ;;  %v11811_v54 = vcombine.high %v11803_v18, %v11803_v18 }
0x112b   :  { %v11825_v23 = vadd.f32 %v11803_v18, %v16270_v45 }
0x112c   :  { %v11812_v11 = vcombine.high %v11810_v24, %v11810_v24  ;;  %v11838_v35 = vcombine.low %v11823_v0, %v11824_v39  ;;  %v11826_v58 = vadd.f32 %v11811_v54, %v16272_v15  ;;  %v11827_v30 = vadd.f32 %v11810_v24, %v16274_v43 }
0x112d   :  { %v11845_v36 = vrot.slane %v11837_v55, %v14794_v8 }
0x112e   :  { %v11828_v52 = vadd.f32 %v11812_v11, %v16276_v16  ;;  %v11852_v38 = vrot.slane %v11838_v35, %v14794_v8  ;;  %v11854_v1 = vcombine.low %v11825_v23, %v11826_v58  ;;  %v14375_v11 = vld [vmem:[%s17656_s3 + $0x18] sm:$0xff]   ;;  %v14376_v35 = vld [vmem:[%s17656_s3 + $0x10] sm:$0xff]  }
0x112f   :  { %14123 = vmatpush3.bf16.msra.mxu1 %v14375_v11 }
0x1130   :  { %v11853_v20 = vcombine.low %v11845_v36, %v11852_v38  ;;  %v11855_v28 = vcombine.low %v11827_v30, %v11828_v52  ;;  %v11862_v31 = vrot.slane %v11854_v1, %v14794_v8  ;;  %14124 = vmatprep.subr.bf16.mxu1 %v17677_v22  ;;  %v17681_v1 = vsub.s32 2, %v14785_v5 }
0x1132   :  { %v11873_v60 = vsel %vm135_vm1, %v11853_v20, 0.0  ;;  %v11869_v48 = vrot.slane %v11855_v28, %v14794_v8  ;;  %v12096_v20 = vrot.slane %v17417_v47, %v17681_v1 }
0x1133   :  { %11874 = vadd.xlane.f32.xlu0 %v11873_v60  ;;  %14125 = vmatpush3.bf16.msra.mxu1 %v14376_v35  ;;  %v17682_v60 = vsub.s32 3, %v14785_v5 }
0x1134   :  { %v11870_v45 = vcombine.low %v11862_v31, %v11869_v48  ;;  %14142 = vmatprep.subr.bf16.mxu1 %v17677_v22  ;;  %v12098_v48 = vcombine.high %v12096_v20, %v12096_v20 }
0x1135   :  { %v12130_v31 = vrot.slane %v17417_v47, %v17682_v60 }
0x1136   :  { %v11876_v15 = vsel %vm135_vm1, %v11870_v45, 0.0 }
0x1137   :  { %11877 = vadd.xlane.f32.xlu1 %v11876_v15  ;;  %v12132_v45 = vcombine.high %v12130_v31, %v12130_v31  ;;  %v12105_v15 = vrot.slane %v12096_v20, %v14794_v8 }
0x11bc   :  { %v11875_v43 = vpop.xlane.xlu0 %11874 }
0x11bd   :  { %v11879_v16 = vmul.f32 0.03125, %v11875_v43  ;;  %v12112_v43 = vrot.slane %v12098_v48, %v14794_v8  ;;  %v14379_v48 = vld [vmem:[%s17657_s4 + $0x28] sm:$0xff]  }
0x11bf   :  { %v11889_v10 = vrot.slane %v11879_v16, %v16027_v44  ;;  %v11896_v53 = vrot.slane %v11879_v16, %v16030_v2  ;;  %v11903_v6 = vrot.slane %v11879_v16, %v17679_v61  ;;  %v11910_v19 = vrot.slane %v11879_v16, %v17680_v13 }
0x11c0   :  { %v11878_v25 = vpop.xlane.xlu1 %11877  ;;  %v12139_v16 = vrot.slane %v12130_v31, %v14794_v8  ;;  %v14378_v31 = vld [vmem:[%s17657_s4 + $0x30] sm:$0xff]  }
0x11c1   :  { %v17444_v26 = vsub.f32 %v11821_v41, %v11889_v10  ;;  %v17446_v7 = vsub.f32 %v11822_v56, %v11896_v53  ;;  %v17448_v9 = vsub.f32 %v11823_v0, %v11903_v6  ;;  %v17450_v57 = vsub.f32 %v11824_v39, %v11910_v19 }
0x11c2   :  { %v11880_v37 = vmul.f32 0.03125, %v11878_v25  ;;  %v12146_v10 = vrot.slane %v12132_v45, %v14794_v8  ;;  %v12113_v6 = vcombine.high %v12105_v15, %v12105_v15  ;;  %v12114_v19 = vcombine.high %v12112_v43, %v12112_v43  ;;  %v14380_v45 = vld [vmem:[%s17657_s4 + $0x20] sm:$0xff]  }
0x11c3   :  { %v11955_v34 = vmul.f32 %v17444_v26, %v17444_v26  ;;  %v11956_v17 = vmul.f32 %v17446_v7, %v17446_v7  ;;  %v11957_v42 = vmul.f32 %v17448_v9, %v17448_v9  ;;  %v11958_v12 = vmul.f32 %v17450_v57, %v17450_v57 }
0x11c4   :  { %v11917_v59 = vrot.slane %v11880_v37, %v16027_v44  ;;  %v11924_v29 = vrot.slane %v11880_v37, %v16030_v2  ;;  %v11931_v32 = vrot.slane %v11880_v37, %v17679_v61  ;;  %v11938_v51 = vrot.slane %v11880_v37, %v17680_v13 }
0x11c5   :  { %v11971_v33 = vcombine.low %v11955_v34, %v11956_v17  ;;  %v11972_v50 = vcombine.low %v11957_v42, %v11958_v12  ;;  %v12147_v42 = vcombine.high %v12139_v16, %v12139_v16  ;;  %v12148_v12 = vcombine.high %v12146_v10, %v12146_v10 }
0x11c6   :  { %v17464_v3 = vsub.f32 %v11825_v23, %v11917_v59  ;;  %v17466_v62 = vsub.f32 %v11826_v58, %v11924_v29  ;;  %v17468_v46 = vsub.f32 %v11827_v30, %v11931_v32  ;;  %v17470_v14 = vsub.f32 %v11828_v52, %v11938_v51  ;;  %v14377_v23 = vld [vmem:[%s17657_s4 + $0x38] sm:$0xff]  }
0x11c7   :  { %v11979_v4 = vrot.slane %v11971_v33, %v14794_v8  ;;  %v11986_v27 = vrot.slane %v11972_v50, %v14794_v8  ;;  %14131 = vmatpush3.bf16.msra.mxu0 %v14377_v23 }
0x11c8   :  { %v11959_v21 = vmul.f32 %v17464_v3, %v17464_v3  ;;  %v11960_v40 = vmul.f32 %v17466_v62, %v17466_v62  ;;  %v11961_v63 = vmul.f32 %v17468_v46, %v17468_v46  ;;  %v11962_v41 = vmul.f32 %v17470_v14, %v17470_v14  ;;  %14132 = vmatprep.subr.bf16.mxu0 %v17677_v22 }
0x11c9   :  { %v11987_v56 = vcombine.low %v11979_v4, %v11986_v27 }
0x11ca   :  { %v11988_v49 = vcombine.low %v11959_v21, %v11960_v40  ;;  %v11989_v18 = vcombine.low %v11961_v63, %v11962_v41 }
0x11cb   :  { %v12007_v0 = vsel %vm135_vm1, %v11987_v56, 0.0  ;;  %14133 = vmatpush3.bf16.msra.mxu0 %v14378_v31 }
0x11cc   :  { %12008 = vadd.xlane.f32.xlu0 %v12007_v0  ;;  %v11996_v39 = vrot.slane %v11988_v49, %v14794_v8  ;;  %v12003_v55 = vrot.slane %v11989_v18, %v14794_v8  ;;  %14134 = vmatprep.subr.bf16.mxu0 %v17677_v22 }
0x11ce   :  { %v12004_v24 = vcombine.low %v11996_v39, %v12003_v55 }
0x11cf   :  { %14135 = vmatpush3.bf16.msra.mxu0 %v14379_v48 }
0x11d0   :  { %v12010_v54 = vsel %vm135_vm1, %v12004_v24, 0.0  ;;  %14136 = vmatprep.subr.bf16.mxu0 %v17677_v22 }
0x11d1   :  { %12011 = vadd.xlane.f32.xlu0 %v12010_v54 }
0x11d3   :  { %14137 = vmatpush3.bf16.msra.mxu0 %v14380_v45 }
0x1255   :  { %v12009_v58 = vpop.xlane.xlu0 %12008 }
0x1256   :  { %v12013_v30 = vmul.f32 0.03125, %v12009_v58 }
0x1258   :  { %v12015_v52 = vadd.f32 1e-05, %v12013_v30 }
0x125a   :  { %14647 = vrsqrt.f32 %v12015_v52  ;;  %v12012_v36 = vpop.xlane.xlu0 %12011 }
0x125b   :  { %v12014_v38 = vmul.f32 0.03125, %v12012_v36 }
0x125d   :  { %v12016_v28 = vadd.f32 1e-05, %v12014_v38 }
0x125f   :  { %14649 = vrsqrt.f32 %v12016_v28 }
0x1267   :  { %v14648_v53 = vpop.eup %14647 }
0x1268   :  { %v12027_v25 = vrot.slane %v14648_v53, %v16027_v44  ;;  %v12034_v37 = vrot.slane %v14648_v53, %v16030_v2  ;;  %v12041_v34 = vrot.slane %v14648_v53, %v17679_v61  ;;  %v12048_v17 = vrot.slane %v14648_v53, %v17680_v13 }
0x126a   :  { %v12085_v59 = vmul.f32 %v12027_v25, %v17444_v26  ;;  %v12086_v29 = vmul.f32 %v12034_v37, %v17446_v7  ;;  %v12087_v32 = vmul.f32 %v12041_v34, %v17448_v9  ;;  %v12088_v51 = vmul.f32 %v12048_v17, %v17450_v57 }
0x126c   :  { %v14650_v33 = vpop.eup %14649  ;;  %v12119_v50 = vmul.f32 %v12105_v15, %v12085_v59  ;;  %v12120_v4 = vmul.f32 %v12113_v6, %v12086_v29  ;;  %v12121_v27 = vmul.f32 %v12112_v43, %v12087_v32  ;;  %v12122_v21 = vmul.f32 %v12114_v19, %v12088_v51 }
0x126d   :  { %v12055_v40 = vrot.slane %v14650_v33, %v16027_v44  ;;  %v12062_v63 = vrot.slane %v14650_v33, %v16030_v2  ;;  %v12069_v41 = vrot.slane %v14650_v33, %v17679_v61  ;;  %v12076_v56 = vrot.slane %v14650_v33, %v17680_v13 }
0x126e   :  { %v12153_v26 = vadd.f32 %v12139_v16, %v12119_v50  ;;  %v12154_v49 = vadd.f32 %v12147_v42, %v12120_v4  ;;  %v12155_v7 = vadd.f32 %v12146_v10, %v12121_v27  ;;  %v12156_v18 = vadd.f32 %v12148_v12, %v12122_v21 }
0x126f   :  { %v12089_v9 = vmul.f32 %v12055_v40, %v17464_v3  ;;  %v12090_v57 = vmul.f32 %v12062_v63, %v17466_v62  ;;  %v12091_v0 = vmul.f32 %v12069_v41, %v17468_v46  ;;  %v12092_v39 = vmul.f32 %v12076_v56, %v17470_v14 }
0x1270   :  { %v12169_v55 = vcombine.low %v12153_v26, %v12154_v49  ;;  %v12170_v24 = vcombine.low %v12155_v7, %v12156_v18 }
0x1271   :  { %v12123_v54 = vmul.f32 %v12105_v15, %v12089_v9  ;;  %v12124_v11 = vmul.f32 %v12113_v6, %v12090_v57  ;;  %v12125_v35 = vmul.f32 %v12112_v43, %v12091_v0  ;;  %v12126_v23 = vmul.f32 %v12114_v19, %v12092_v39 }
0x1272   :  { %v12177_v38 = vrot.slane %v12169_v55, %v14794_v8  ;;  %v12184_v3 = vrot.slane %v12170_v24, %v14794_v8  ;;  %v17683_v15 = vsub.s32 4, %v14785_v5 }
0x1273   :  { %v12157_v58 = vadd.f32 %v12139_v16, %v12123_v54  ;;  %v12158_v30 = vadd.f32 %v12147_v42, %v12124_v11  ;;  %v12159_v52 = vadd.f32 %v12146_v10, %v12125_v35  ;;  %v12160_v36 = vadd.f32 %v12148_v12, %v12126_v23 }
0x1274   :  { %v12185_v20 = vcombine.low %v12177_v38, %v12184_v3  ;;  %v12209_v43 = vrot.slane %v17417_v47, %v17683_v15  ;;  %v17684_v42 = vsub.s32 5, %v14785_v5 }
0x1275   :  { %v12186_v1 = vcombine.low %v12157_v58, %v12158_v30  ;;  %v12187_v62 = vcombine.low %v12159_v52, %v12160_v36 }
0x1276   :  { %v12272_v12 = vrot.slane %v17417_v47, %v17684_v42 }
0x1277   :  { %v12194_v46 = vrot.slane %v12186_v1, %v14794_v8  ;;  %v12201_v14 = vrot.slane %v12187_v62, %v14794_v8 }
0x1279   :  { %v12202_v28 = vcombine.low %v12194_v46, %v12201_v14 }
0x127b   :  { %v12205_v60 = vpack.c.bf16 %v12202_v28, %v12185_v20 }
0x127d   :  { %14127 = vmatmul.mubr.msk.bf16.vlgmr.msra.gmra.mxu1 %vm135_vm1, %v12205_v60 }
0x127e   :  { %14146 = vmatprep.mubr.msk.bf16.mxu1 %vm14713_vm0, %v17677_v22 }
0x133d   :  { %v12259_v16 = vpop.f32.mrf.mxu1 }
0x133e   :  { %v12260_v53 = vadd.f32 %v12259_v16, %v12209_v43 }
0x133f   :  { %v14128_v10 = vpop.f32.mrf.mxu1 }
0x1340   :  { %v12266_v37 = vmax.f32 %v12260_v53, 0.0 }
0x1341   :  { %v12262_v6 = vpop.f32.mrf.mxu1 }
0x1342   :  { %v12263_v19 = vadd.f32 %v12262_v6, %v12209_v43 }
0x1343   :  { %v14129_v25 = vpop.f32.mrf.mxu1 }
0x1344   :  { %v12267_v34 = vmax.f32 %v12263_v19, 0.0 }
0x1346   :  { %v12268_v17 = vpack.c.bf16 %v12267_v34, %v12266_v37 }
0x1348   :  { %14139 = vmatmul.mubr.msk.bf16.vlgmr.msra.gmra.mxu0 %vm5962_vm8, %v12268_v17 }
0x1408   :  { %v12334_v59 = vpop.f32.mrf.mxu0 }
0x1409   :  { %v12335_v29 = vadd.f32 %v12334_v59, %v12272_v12 }
0x140a   :  { %v14140_v32 = vpop.f32.mrf.mxu0 }
0x140b   :  { %v12343_v51 = vcombine.high %v12335_v29, %v12335_v29  ;;  %v12350_v33 = vrot.slane %v12335_v29, %v14794_v8 }
0x140c   :  { %v12337_v50 = vpop.f32.mrf.mxu0 }
0x140d   :  { %v12357_v4 = vrot.slane %v12343_v51, %v14794_v8  ;;  %v12358_v27 = vcombine.high %v12350_v33, %v12350_v33  ;;  %v12338_v21 = vadd.f32 %v12337_v50, %v12272_v12  ;;  %v12385_v41 = vadd.f32 %v12350_v33, %v12153_v26 }
0x140e   :  { %v14141_v40 = vpop.f32.mrf.mxu0 }
0x140f   :  { %v12359_v63 = vcombine.high %v12357_v4, %v12357_v4  ;;  %v12386_v56 = vadd.f32 %v12358_v27, %v12154_v49  ;;  %v12360_v9 = vcombine.high %v12338_v21, %v12338_v21  ;;  %v12367_v57 = vrot.slane %v12338_v21, %v14794_v8 }
0x1410   :  { %v12387_v0 = vadd.f32 %v12357_v4, %v12155_v7 }
0x1411   :  { %v12388_v39 = vadd.f32 %v12359_v63, %v12156_v18  ;;  %v12401_v55 = vcombine.low %v12385_v41, %v12386_v56  ;;  %v12374_v24 = vrot.slane %v12360_v9, %v14794_v8  ;;  %v12375_v54 = vcombine.high %v12367_v57, %v12367_v57 }
0x1412   :  { %v12389_v23 = vadd.f32 %v12367_v57, %v12157_v58 }
0x1413   :  { %v12376_v11 = vcombine.high %v12374_v24, %v12374_v24  ;;  %v12402_v35 = vcombine.low %v12387_v0, %v12388_v39  ;;  %v12390_v38 = vadd.f32 %v12375_v54, %v12158_v30  ;;  %v12391_v3 = vadd.f32 %v12374_v24, %v12159_v52 }
0x1414   :  { %v12409_v62 = vrot.slane %v12401_v55, %v14794_v8 }
0x1415   :  { %v12392_v1 = vadd.f32 %v12376_v11, %v12160_v36  ;;  %v12416_v26 = vrot.slane %v12402_v35, %v14794_v8  ;;  %v12418_v49 = vcombine.low %v12389_v23, %v12390_v38  ;;  %v14381_v11 = vld [vmem:[%s17659_s6 + $0x8] sm:$0xff]   ;;  %v14382_v35 = vld [vmem:[%s17659_s6] sm:$0xff]  }
0x1416   :  { %14143 = vmatpush3.bf16.msra.mxu1 %v14381_v11 }
0x1417   :  { %v12417_v46 = vcombine.low %v12409_v62, %v12416_v26  ;;  %v12419_v14 = vcombine.low %v12391_v3, %v12392_v1  ;;  %v12426_v18 = vrot.slane %v12418_v49, %v14794_v8  ;;  %14144 = vmatprep.subr.bf16.mxu1 %v17677_v22  ;;  %v17685_v26 = vsub.s32 6, %v14785_v5 }
0x1419   :  { %v12437_v7 = vsel %vm135_vm1, %v12417_v46, 0.0  ;;  %v12433_v20 = vrot.slane %v12419_v14, %v14794_v8  ;;  %v12660_v49 = vrot.slane %v17417_v47, %v17685_v26 }
0x141a   :  { %12438 = vadd.xlane.f32.xlu1 %v12437_v7  ;;  %14145 = vmatpush3.bf16.msra.mxu1 %v14382_v35  ;;  %v17686_v7 = vsub.s32 7, %v14785_v5 }
0x141b   :  { %v12434_v28 = vcombine.low %v12426_v18, %v12433_v20  ;;  %v12662_v14 = vcombine.high %v12660_v49, %v12660_v49  ;;  %v12669_v22 = vrot.slane %v12660_v49, %v14794_v8 }
0x141c   :  { %v12694_v18 = vrot.slane %v17417_v47, %v17686_v7 }
0x141d   :  { %v12440_v58 = vsel %vm135_vm1, %v12434_v28, 0.0  ;;  %v12676_v20 = vrot.slane %v12662_v14, %v14794_v8 }
0x141e   :  { %12441 = vadd.xlane.f32.xlu0 %v12440_v58  ;;  %v12696_v28 = vcombine.high %v12694_v18, %v12694_v18  ;;  %v12703_v58 = vrot.slane %v12694_v18, %v14794_v8 }
0x14a3   :  { %v12439_v30 = vpop.xlane.xlu1 %12438 }
0x14a4   :  { %v12443_v52 = vmul.f32 0.03125, %v12439_v30 }
0x14a6   :  { %v12453_v36 = vrot.slane %v12443_v52, %v16027_v44  ;;  %v12460_v60 = vrot.slane %v12443_v52, %v16030_v2  ;;  %v12467_v31 = vrot.slane %v12443_v52, %v17679_v61  ;;  %v12474_v48 = vrot.slane %v12443_v52, %v17680_v13 }
0x14a7   :  { %v12442_v45 = vpop.xlane.xlu0 %12441  ;;  %v12677_v52 = vcombine.high %v12669_v22, %v12669_v22 }
0x14a8   :  { %v17563_v15 = vsub.f32 %v12385_v41, %v12453_v36  ;;  %v17565_v43 = vsub.f32 %v12386_v56, %v12460_v60  ;;  %v17567_v16 = vsub.f32 %v12387_v0, %v12467_v31  ;;  %v17569_v10 = vsub.f32 %v12388_v39, %v12474_v48 }
0x14a9   :  { %v12444_v53 = vmul.f32 0.03125, %v12442_v45  ;;  %v12678_v36 = vcombine.high %v12676_v20, %v12676_v20  ;;  %v12710_v60 = vrot.slane %v12696_v28, %v14794_v8  ;;  %v12711_v45 = vcombine.high %v12703_v58, %v12703_v58 }
0x14aa   :  { %v12519_v6 = vmul.f32 %v17563_v15, %v17563_v15  ;;  %v12520_v19 = vmul.f32 %v17565_v43, %v17565_v43  ;;  %v12521_v25 = vmul.f32 %v17567_v16, %v17567_v16  ;;  %v12522_v37 = vmul.f32 %v17569_v10, %v17569_v10 }
0x14ab   :  { %v12481_v34 = vrot.slane %v12444_v53, %v16027_v44  ;;  %v12488_v17 = vrot.slane %v12444_v53, %v16030_v2  ;;  %v12495_v42 = vrot.slane %v12444_v53, %v17679_v61  ;;  %v12502_v12 = vrot.slane %v12444_v53, %v17680_v13 }
0x14ac   :  { %v12535_v59 = vcombine.low %v12519_v6, %v12520_v19  ;;  %v12536_v29 = vcombine.low %v12521_v25, %v12522_v37  ;;  %v12712_v37 = vcombine.high %v12710_v60, %v12710_v60 }
0x14ad   :  { %v17583_v32 = vsub.f32 %v12389_v23, %v12481_v34  ;;  %v17585_v51 = vsub.f32 %v12390_v38, %v12488_v17  ;;  %v17587_v33 = vsub.f32 %v12391_v3, %v12495_v42  ;;  %v17589_v50 = vsub.f32 %v12392_v1, %v12502_v12 }
0x14ae   :  { %v12543_v4 = vrot.slane %v12535_v59, %v14794_v8  ;;  %v12550_v27 = vrot.slane %v12536_v29, %v14794_v8 }
0x14af   :  { %v12523_v21 = vmul.f32 %v17583_v32, %v17583_v32  ;;  %v12524_v40 = vmul.f32 %v17585_v51, %v17585_v51  ;;  %v12525_v63 = vmul.f32 %v17587_v33, %v17587_v33  ;;  %v12526_v41 = vmul.f32 %v17589_v50, %v17589_v50 }
0x14b0   :  { %v12551_v56 = vcombine.low %v12543_v4, %v12550_v27 }
0x14b1   :  { %v12552_v9 = vcombine.low %v12523_v21, %v12524_v40  ;;  %v12553_v57 = vcombine.low %v12525_v63, %v12526_v41 }
0x14b2   :  { %v12571_v0 = vsel %vm135_vm1, %v12551_v56, 0.0 }
0x14b3   :  { %12572 = vadd.xlane.f32.xlu1 %v12571_v0  ;;  %v12560_v39 = vrot.slane %v12552_v9, %v14794_v8  ;;  %v12567_v55 = vrot.slane %v12553_v57, %v14794_v8 }
0x14b5   :  { %v12568_v24 = vcombine.low %v12560_v39, %v12567_v55 }
0x14b7   :  { %v12574_v54 = vsel %vm135_vm1, %v12568_v24, 0.0 }
0x14b8   :  { %12575 = vadd.xlane.f32.xlu0 %v12574_v54 }
0x153c   :  { %v12573_v23 = vpop.xlane.xlu1 %12572 }
0x153d   :  { %v12577_v38 = vmul.f32 0.03125, %v12573_v23 }
0x153f   :  { %v12579_v3 = vadd.f32 1e-05, %v12577_v38 }
0x1541   :  { %14651 = vrsqrt.f32 %v12579_v3  ;;  %v12576_v1 = vpop.xlane.xlu0 %12575 }
0x1542   :  { %v12578_v62 = vmul.f32 0.03125, %v12576_v1 }
0x1544   :  { %v12580_v46 = vadd.f32 1e-05, %v12578_v62 }
0x1546   :  { %14653 = vrsqrt.f32 %v12580_v46  ;;  %v13011_v46 = vld [vmem:[%s17660_s7] ss:$0 sm:$0xff] }
0x154e   :  { %v14652_v30 = vpop.eup %14651 }
0x154f   :  { %v12591_v31 = vrot.slane %v14652_v30, %v16027_v44  ;;  %v12598_v48 = vrot.slane %v14652_v30, %v16030_v2  ;;  %v12605_v5 = vrot.slane %v14652_v30, %v17679_v61  ;;  %v12612_v47 = vrot.slane %v14652_v30, %v17680_v13 }
0x1551   :  { %v12649_v53 = vmul.f32 %v12591_v31, %v17563_v15  ;;  %v12650_v6 = vmul.f32 %v12598_v48, %v17565_v43  ;;  %v12651_v19 = vmul.f32 %v12605_v5, %v17567_v16  ;;  %v12652_v25 = vmul.f32 %v12612_v47, %v17569_v10 }
0x1553   :  { %v14654_v8 = vpop.eup %14653  ;;  %v12683_v34 = vmul.f32 %v12669_v22, %v12649_v53  ;;  %v12684_v17 = vmul.f32 %v12677_v52, %v12650_v6  ;;  %v12685_v42 = vmul.f32 %v12676_v20, %v12651_v19  ;;  %v12686_v12 = vmul.f32 %v12678_v36, %v12652_v25 }
0x1554   :  { %v12619_v59 = vrot.slane %v14654_v8, %v16027_v44  ;;  %v12626_v29 = vrot.slane %v14654_v8, %v16030_v2  ;;  %v12633_v4 = vrot.slane %v14654_v8, %v17679_v61  ;;  %v12640_v15 = vrot.slane %v14654_v8, %v17680_v13 }
0x1555   :  { %v12717_v43 = vadd.f32 %v12703_v58, %v12683_v34  ;;  %v12718_v27 = vadd.f32 %v12711_v45, %v12684_v17  ;;  %v12719_v40 = vadd.f32 %v12710_v60, %v12685_v42  ;;  %v12720_v61 = vadd.f32 %v12712_v37, %v12686_v12 }
0x1556   :  { %v12653_v16 = vmul.f32 %v12619_v59, %v17583_v32  ;;  %v12654_v10 = vmul.f32 %v12626_v29, %v17585_v51  ;;  %v12655_v21 = vmul.f32 %v12633_v4, %v17587_v33  ;;  %v12656_v44 = vmul.f32 %v12640_v15, %v17589_v50 }
0x1557   :  { %v12726_v63 = vsel %vm12725_vm9, %v12717_v43, 0.0  ;;  %v12727_v41 = vsel %vm12725_vm9, %v12718_v27, 0.0  ;;  %v12729_v0 = vsel %vm12725_vm9, %v12719_v40, 0.0  ;;  %v12731_v33 = vsel %vm12725_vm9, %v12720_v61, 0.0 }
0x1558   :  { %v12687_v2 = vmul.f32 %v12669_v22, %v12653_v16  ;;  %v12688_v56 = vmul.f32 %v12677_v52, %v12654_v10  ;;  %v12728_v9 = vadd.f32 %v12727_v41, %v12726_v63  ;;  %v12689_v13 = vmul.f32 %v12676_v20, %v12655_v21 }
0x1559   :  { %v12690_v39 = vmul.f32 %v12678_v36, %v12656_v44 }
0x155a   :  { %v12721_v57 = vadd.f32 %v12703_v58, %v12687_v2  ;;  %v12730_v32 = vadd.f32 %v12729_v0, %v12728_v9  ;;  %v12722_v51 = vadd.f32 %v12711_v45, %v12688_v56  ;;  %v12723_v24 = vadd.f32 %v12710_v60, %v12689_v13 }
0x155b   :  { %v12724_v35 = vadd.f32 %v12712_v37, %v12690_v39 }
0x155c   :  { %v12732_v55 = vadd.f32 %v12731_v33, %v12730_v32  ;;  %v12733_v54 = vsel %vm12725_vm9, %v12721_v57, 0.0  ;;  %v12735_v50 = vsel %vm12725_vm9, %v12722_v51, 0.0  ;;  %v12737_v38 = vsel %vm12725_vm9, %v12723_v24, 0.0 }
0x155d   :  { %v12739_v1 = vsel %vm12725_vm9, %v12724_v35, 0.0 }
0x155e   :  { %v12734_v11 = vadd.f32 %v12733_v54, %v12732_v55 }
0x1560   :  { %v12736_v23 = vadd.f32 %v12735_v50, %v12734_v11 }
0x1562   :  { %v12738_v3 = vadd.f32 %v12737_v38, %v12736_v23 }
0x1564   :  { %v12740_v62 = vadd.f32 %v12739_v1, %v12738_v3 }
0x1566   :  { %v12742_v26 = vmul.f32 0.125, %v12740_v62 }
0x1568   :  { %v12743_v49 = vpack.c.bf16 %v12742_v26, %v12742_v26 }
0x156a   :  { %14147 = vmatmul.mubr.msk.bf16.vlgmr.msra.gmra.mxu1 %vm135_vm1, %v12743_v49 }
0x162a   :  { %v12804_v14 = vpop.f32.mrf.mxu1 }
0x162b   :  { %v12805_v7 = vadd.f32 %v13011_v46, %v12804_v14 }
0x162c   :  { %v14148_v18 = vpop.f32.mrf.mxu1 }
0x162d   :  { %12811 = vst.msk [vmem:[#allocation5] sm:$0x3] %vm12810_vm10, %v12805_v7 }
0x162e   :  { %v12807_v22 = vpop.f32.mrf.mxu1 }
0x162f   :  { %14696 = shalt.err (!%p14693_p9)
}
0x1630   :  { %12821 = dma.vmem_to_hbm [thread:$0]  %s12819_s19, 32, %s17661_s8, [#allocation4]   ;;  %v14149_v20 = vpop.f32.mrf.mxu1 }
0x1631   :  { %14707 = dma.done.wait [#allocation4], 32  }
0x1632   :  { %14708 = vsyncadd [#allocation4], 4294967264 }
0x1633   :  { %12825 = vsyncpa [#allocation3], 1 }
0x1634   :  { %12826 = vsyncpa [#allocation4], 1 }

</bundles_post_ra>
